<compile_context>
chip_gen: v7x
topology: tpu7x:2x2x1
jax: 0.10.0
libtpu: 0.0.40
codegen_flags: <defaults>
</compile_context>

<pallas_src>
import jax
import jax.numpy as jnp
from jax.experimental import pallas as pl
from jax.experimental.pallas import tpu as pltpu

LN_EPS = 1e-5      # nn.LayerNorm default eps
L2_EPS = 1e-12     # F.normalize default eps


def mixvpr_kernel(x_ref, gamma_ref, beta_ref, w1_ref, b1_ref, w2_ref, b2_ref,
                  wrp_ref, wcpt_ref, bfold_ref, o_ref):
    """One batch block (B elements) per grid step; features kept transposed.

    x_ref   : (B, HW, C)    features, C on the lane axis (lane-dense)
    gamma/beta/b1/b2 : (L, HW, 1)   per-HW params as column vectors
    w1/w2   : (L, HW, HW)   mixer weights in torch (out, in) layout (used as W @ x^T)
    wrp     : (R, HW)       row_proj weight (torch layout, used directly)
    wcpt    : (C, C_out)    channel_proj weight transposed
    bfold   : (R, C_out)    rowsum_HW(wrp) ⊗ bcp + brp   (folded projection bias)
    o_ref   : (B, R, C_out) L2-normalized descriptors (lane-dense stores)
    """
    B = x_ref.shape[0]
    L = gamma_ref.shape[0]

    for b in range(B):                                    # static unroll over batch block
        xt = x_ref[b]                                     # (HW, C) f32

        # ---- FeatureMixerLayer stack (LayerNorm over HW = sublane axis) ----------
        for l in range(L):
            mu = jnp.mean(xt, axis=0, keepdims=True)
            xc = xt - mu
            var = jnp.mean(xc * xc, axis=0, keepdims=True)
            xn = xc * jax.lax.rsqrt(var + LN_EPS)
            xn = xn * gamma_ref[l] + beta_ref[l]          # affine, (HW,1) lane-broadcast
            h = jnp.dot(w1_ref[l], xn, preferred_element_type=jnp.float32) + b1_ref[l]
            h = jnp.maximum(h, 0.0)                       # ReLU
            yt = jnp.dot(w2_ref[l], h, preferred_element_type=jnp.float32) + b2_ref[l]
            # TODO(synk): nn.Dropout(p=0.5) is identity in eval mode; training-mode
            # stochastic dropout (pltpu.prng_*) is intentionally not emulated here.
            xt = xt + yt                                  # residual

        # ---- Reassociated projection head: (wrp @ x^T) @ wcp^T + folded bias ------
        t = jnp.dot(wrp_ref[...], xt, preferred_element_type=jnp.float32)       # (R, C)
        zt = jnp.dot(t, wcpt_ref[...], preferred_element_type=jnp.float32) + bfold_ref[...]

        # ---- L2 normalize over the whole descriptor (order-invariant) -------------
        ss = jnp.sum(zt * zt)
        inv = jax.lax.rsqrt(jnp.maximum(ss, L2_EPS * L2_EPS))   # == 1/max(||z||2, eps)
        o_ref[b] = zt * inv                               # (R, C_out) lane-dense store


def mixvpr_forward(x_nchw, params, *, batch_block=8):
    """x_nchw: (N, C, H, W) f32; params: dict of MixVPR weights -> (N, C_out*R) f32."""
    N, C, H, W = x_nchw.shape
    HW = H * W
    L = params["ln_gamma"].shape[0]
    C_out = params["wcp"].shape[0]
    R = params["wrp"].shape[0]

    B = min(batch_block, N)
    n_blocks = pl.cdiv(N, B)
    N_pad = n_blocks * B

    # flatten(2) + one small HBM transpose so C=512 sits on lanes in the kernel.
    x = jnp.transpose(x_nchw.reshape(N, C, HW), (0, 2, 1)).astype(jnp.float32)  # (N,HW,C)
    if N_pad != N:
        x = jnp.pad(x, ((0, N_pad - N), (0, 0), (0, 0)))

    # One-time tiny layout plumbing on the (small) weights.
    f32 = jnp.float32
    gamma3 = params["ln_gamma"].reshape(L, HW, 1).astype(f32)
    beta3 = params["ln_beta"].reshape(L, HW, 1).astype(f32)
    w1 = params["w1"].astype(f32)                                   # (L, HW, HW) torch (out,in)
    b13 = params["b1"].reshape(L, HW, 1).astype(f32)
    w2 = params["w2"].astype(f32)
    b23 = params["b2"].reshape(L, HW, 1).astype(f32)
    wrp = params["wrp"].astype(f32)                                 # (R, HW)
    wcpt = jnp.transpose(params["wcp"], (1, 0)).astype(f32)         # (C, C_out)
    # channel_proj bias folded through row_proj:  rowsum_HW(wrp) ⊗ bcp + brp  (f32)
    bfold = (jnp.sum(wrp, axis=-1)[:, None] * params["bcp"].astype(f32)[None, :]
             + params["brp"].astype(f32)[:, None])                  # (R, C_out)

    grid_spec = pltpu.PrefetchScalarGridSpec(
        num_scalar_prefetch=0,
        grid=(n_blocks,),
        in_specs=[
            pl.BlockSpec((B, HW, C), lambda n: (n, 0, 0)),    # batch-block feature tile
            pl.BlockSpec((L, HW, 1), lambda n: (0, 0, 0)),    # ln gamma (resident)
            pl.BlockSpec((L, HW, 1), lambda n: (0, 0, 0)),    # ln beta
            pl.BlockSpec((L, HW, HW), lambda n: (0, 0, 0)),   # w1
            pl.BlockSpec((L, HW, 1), lambda n: (0, 0, 0)),    # b1
            pl.BlockSpec((L, HW, HW), lambda n: (0, 0, 0)),   # w2
            pl.BlockSpec((L, HW, 1), lambda n: (0, 0, 0)),    # b2
            pl.BlockSpec((R, HW), lambda n: (0, 0)),          # row_proj W
            pl.BlockSpec((C, C_out), lambda n: (0, 0)),       # channel_proj W^T
            pl.BlockSpec((R, C_out), lambda n: (0, 0)),       # folded projection bias
        ],
        out_specs=pl.BlockSpec((B, R, C_out), lambda n: (n, 0, 0)),
    )

    flops = int(N_pad * (L * 4 * HW * HW * C            # mixer MLP matmuls
                         + 2 * R * HW * C               # wrp @ x^T
                         + 2 * R * C * C_out            # (.) @ wcp^T
                         + L * 10 * HW * C))            # LN / ReLU / residual elementwise
    transcendentals = int(N_pad * (L * C + 1))          # rsqrt per LN column + final norm
    bytes_accessed = int(4 * (N_pad * HW * C
                              + 2 * L * HW * HW + 4 * L * HW
                              + R * HW + C * C_out + R * C_out
                              + N_pad * R * C_out))

    out = pl.pallas_call(
        mixvpr_kernel,
        out_shape=jax.ShapeDtypeStruct((N_pad, R, C_out), jnp.float32),
        grid_spec=grid_spec,
        compiler_params=pltpu.CompilerParams(
            dimension_semantics=("parallel",)),
        cost_estimate=pl.CostEstimate(flops=flops,
                                      transcendentals=transcendentals,
                                      bytes_accessed=bytes_accessed),
    )(x, gamma3, beta3, w1, b13, w2, b23, wrp, wcpt, bfold)

    # Reorder the lane-dense (R, C_out) per-element output back to torch's
    # flatten(1) order (index = c_out * R + r); tiny (N, 4, 512) op in the wrapper.
    return jnp.transpose(out[:N], (0, 2, 1)).reshape(N, C_out * R)


def mixvpr_ref(x_nchw, params):
    """Pure-JAX reference mirroring the PyTorch forward (eval mode)."""
    N, C, H, W = x_nchw.shape
    HW = H * W
    L = params["ln_gamma"].shape[0]
    with jax.default_matmul_precision("highest"):
        x = x_nchw.reshape(N, C, HW).astype(jnp.float32)
        for l in range(L):
            g, b = params["ln_gamma"][l], params["ln_beta"][l]
            w1, b1 = params["w1"][l], params["b1"][l]
            w2, b2 = params["w2"][l], params["b2"][l]
            mu = jnp.mean(x, axis=-1, keepdims=True)
            var = jnp.mean((x - mu) ** 2, axis=-1, keepdims=True)
            xn = (x - mu) / jnp.sqrt(var + LN_EPS) * g + b
            h = jax.nn.relu(jnp.einsum("nch,oh->nco", xn, w1) + b1)
            y = jnp.einsum("nch,oh->nco", h, w2) + b2
            x = x + y                                          # dropout identity (eval)
        x = jnp.transpose(x, (0, 2, 1))                        # (N, HW, C)
        x = jnp.einsum("nhc,oc->nho", x, params["wcp"]) + params["bcp"]
        x = jnp.transpose(x, (0, 2, 1))                        # (N, C_out, HW)
        x = jnp.einsum("nch,rh->ncr", x, params["wrp"]) + params["brp"]
        flat = x.reshape(N, -1)
        nrm = jnp.sqrt(jnp.sum(flat * flat, axis=-1, keepdims=True))
        return flat / jnp.maximum(nrm, L2_EPS)


if __name__ == "__main__":
    # MixVPR defaults: in_channels=512, in_h=in_w=7, out_channels=512,
    # mix_depth=4, mlp_ratio=1, out_rows=4.  Batch kept small (N=2).
    N, C, H, W = 2, 512, 7, 7
    C_OUT, R, L = 512, 4, 4
    HW = H * W

    key = jax.random.PRNGKey(0)
    ks = jax.random.split(key, 10)
    x = jax.random.normal(ks[0], (N, C, H, W), dtype=jnp.float32)

    params = {
        # LayerNorm affine (non-trivial to exercise the full path)
        "ln_gamma": 1.0 + 0.05 * jax.random.normal(ks[1], (L, HW), jnp.float32),
        "ln_beta": 0.05 * jax.random.normal(ks[2], (L, HW), jnp.float32),
        # Mixer MLP weights (trunc_normal std=0.02 in torch init; normal is fine here)
        "w1": 0.02 * jax.random.normal(ks[3], (L, HW, HW), jnp.float32),
        "b1": jnp.zeros((L, HW), jnp.float32),
        "w2": 0.02 * jax.random.normal(ks[4], (L, HW, HW), jnp.float32),
        "b2": jnp.zeros((L, HW), jnp.float32),
        # Projections (torch default init is kaiming-uniform; exact scheme irrelevant)
        "wcp": 0.02 * jax.random.normal(ks[5], (C_OUT, C), jnp.float32),
        "bcp": 0.01 * jax.random.normal(ks[6], (C_OUT,), jnp.float32),
        "wrp": 0.1 * jax.random.normal(ks[7], (R, HW), jnp.float32),
        "brp": 0.01 * jax.random.normal(ks[8], (R,), jnp.float32),
    }

    out = mixvpr_forward(x, params)
    out = jax.block_until_ready(out)

    ref = mixvpr_ref(x, params)
    assert out.shape == (N, C_OUT * R)
    err = float(jnp.max(jnp.abs(out - ref)))
    assert jnp.allclose(out, ref, atol=2e-4, rtol=2e-3), f"max abs err = {err}"

    print("KERNEL_OK")
</pallas_src>

<mosaic_0001>
module attributes {stable_mosaic.version = 11 : i64} {
  func.func @mixvpr_kernel(%arg0: i32, %arg1: memref<2x49x512xf32, #tpu.memory_space<vmem>>, %arg2: memref<4x49x1xf32, #tpu.memory_space<vmem>>, %arg3: memref<4x49x1xf32, #tpu.memory_space<vmem>>, %arg4: memref<4x49x49xf32, #tpu.memory_space<vmem>>, %arg5: memref<4x49x1xf32, #tpu.memory_space<vmem>>, %arg6: memref<4x49x49xf32, #tpu.memory_space<vmem>>, %arg7: memref<4x49x1xf32, #tpu.memory_space<vmem>>, %arg8: memref<4x49xf32, #tpu.memory_space<vmem>>, %arg9: memref<512x512xf32, #tpu.memory_space<vmem>>, %arg10: memref<4x512xf32, #tpu.memory_space<vmem>>, %arg11: memref<2x4x512xf32, #tpu.memory_space<vmem>>) attributes {dimension_semantics = [#tpu.dimension_semantics<parallel>], iteration_bounds = array<i64: 1>, scalar_prefetch = 0 : i64, scratch_operands = 0 : i64, tpu.core_type = #tpu.core_type<tc>, window_params = [{transform_indices = @transform_0, window_bounds = array<i64: 2, 49, 512>}, {pipeline_mode = #tpu.pipeline_mode<synchronous>, transform_indices = @transform_1, window_bounds = array<i64: 4, 49, 1>}, {pipeline_mode = #tpu.pipeline_mode<synchronous>, transform_indices = @transform_2, window_bounds = array<i64: 4, 49, 1>}, {pipeline_mode = #tpu.pipeline_mode<synchronous>, transform_indices = @transform_3, window_bounds = array<i64: 4, 49, 49>}, {pipeline_mode = #tpu.pipeline_mode<synchronous>, transform_indices = @transform_4, window_bounds = array<i64: 4, 49, 1>}, {pipeline_mode = #tpu.pipeline_mode<synchronous>, transform_indices = @transform_5, window_bounds = array<i64: 4, 49, 49>}, {pipeline_mode = #tpu.pipeline_mode<synchronous>, transform_indices = @transform_6, window_bounds = array<i64: 4, 49, 1>}, {pipeline_mode = #tpu.pipeline_mode<synchronous>, transform_indices = @transform_7, window_bounds = array<i64: 4, 49>}, {pipeline_mode = #tpu.pipeline_mode<synchronous>, transform_indices = @transform_8, window_bounds = array<i64: 512, 512>}, {pipeline_mode = #tpu.pipeline_mode<synchronous>, transform_indices = @transform_9, window_bounds = array<i64: 4, 512>}, {transform_indices = @transform_10, window_bounds = array<i64: 2, 4, 512>}]} {
    %c0 = arith.constant 0 : index
    %c0_0 = arith.constant 0 : index
    %c0_1 = arith.constant 0 : index
    %0 = vector.load %arg1[%c0, %c0_0, %c0_1] : memref<2x49x512xf32, #tpu.memory_space<vmem>>, vector<1x49x512xf32>
    %1 = vector.shape_cast %0 : vector<1x49x512xf32> to vector<49x512xf32>
    %cst = arith.constant dense<0.000000e+00> : vector<512xf32>
    %2 = vector.multi_reduction <add>, %1, %cst [0] : vector<49x512xf32> to vector<512xf32>
    %3 = vector.shape_cast %2 : vector<512xf32> to vector<1x512xf32>
    %cst_2 = arith.constant 4.900000e+01 : f32
    %4 = vector.broadcast %cst_2 : f32 to vector<1x512xf32>
    %5 = arith.divf %3, %4 : vector<1x512xf32>
    %6 = vector.broadcast %5 : vector<1x512xf32> to vector<49x512xf32>
    %7 = arith.subf %1, %6 : vector<49x512xf32>
    %8 = arith.mulf %7, %7 : vector<49x512xf32>
    %cst_3 = arith.constant dense<0.000000e+00> : vector<512xf32>
    %9 = vector.multi_reduction <add>, %8, %cst_3 [0] : vector<49x512xf32> to vector<512xf32>
    %10 = vector.shape_cast %9 : vector<512xf32> to vector<1x512xf32>
    %cst_4 = arith.constant 4.900000e+01 : f32
    %11 = vector.broadcast %cst_4 : f32 to vector<1x512xf32>
    %12 = arith.divf %10, %11 : vector<1x512xf32>
    %cst_5 = arith.constant 9.99999974E-6 : f32
    %13 = vector.broadcast %cst_5 : f32 to vector<1x512xf32>
    %14 = arith.addf %12, %13 : vector<1x512xf32>
    %15 = math.rsqrt %14 : vector<1x512xf32>
    %16 = vector.broadcast %15 : vector<1x512xf32> to vector<49x512xf32>
    %17 = arith.mulf %7, %16 : vector<49x512xf32>
    %c0_6 = arith.constant 0 : index
    %c0_7 = arith.constant 0 : index
    %c0_8 = arith.constant 0 : index
    %18 = vector.load %arg2[%c0_6, %c0_7, %c0_8] : memref<4x49x1xf32, #tpu.memory_space<vmem>>, vector<1x49x1xf32>
    %19 = vector.shape_cast %18 : vector<1x49x1xf32> to vector<49x1xf32>
    %20 = vector.broadcast %19 : vector<49x1xf32> to vector<49x512xf32>
    %21 = arith.mulf %17, %20 : vector<49x512xf32>
    %c0_9 = arith.constant 0 : index
    %c0_10 = arith.constant 0 : index
    %c0_11 = arith.constant 0 : index
    %22 = vector.load %arg3[%c0_9, %c0_10, %c0_11] : memref<4x49x1xf32, #tpu.memory_space<vmem>>, vector<1x49x1xf32>
    %23 = vector.shape_cast %22 : vector<1x49x1xf32> to vector<49x1xf32>
    %24 = vector.broadcast %23 : vector<49x1xf32> to vector<49x512xf32>
    %25 = arith.addf %21, %24 : vector<49x512xf32>
    %c0_12 = arith.constant 0 : index
    %c0_13 = arith.constant 0 : index
    %c0_14 = arith.constant 0 : index
    %26 = vector.load %arg4[%c0_12, %c0_13, %c0_14] : memref<4x49x49xf32, #tpu.memory_space<vmem>>, vector<1x49x49xf32>
    %27 = vector.shape_cast %26 : vector<1x49x49xf32> to vector<49x49xf32>
    %cst_15 = arith.constant dense<0.000000e+00> : vector<49x512xf32>
    %28 = tpu.matmul %27, %25, %cst_15 {dimension_numbers = #tpu.dot_dimension_numbers<[1], [0], [0], [1], [0, 0, 1, 1], [], []>} : vector<49x49xf32>, vector<49x512xf32>, vector<49x512xf32> -> vector<49x512xf32>
    %c0_16 = arith.constant 0 : index
    %c0_17 = arith.constant 0 : index
    %c0_18 = arith.constant 0 : index
    %29 = vector.load %arg5[%c0_16, %c0_17, %c0_18] : memref<4x49x1xf32, #tpu.memory_space<vmem>>, vector<1x49x1xf32>
    %30 = vector.shape_cast %29 : vector<1x49x1xf32> to vector<49x1xf32>
    %31 = vector.broadcast %30 : vector<49x1xf32> to vector<49x512xf32>
    %32 = arith.addf %28, %31 : vector<49x512xf32>
    %cst_19 = arith.constant 0.000000e+00 : f32
    %33 = vector.broadcast %cst_19 : f32 to vector<49x512xf32>
    %34 = arith.maximumf %32, %33 : vector<49x512xf32>
    %c0_20 = arith.constant 0 : index
    %c0_21 = arith.constant 0 : index
    %c0_22 = arith.constant 0 : index
    %35 = vector.load %arg6[%c0_20, %c0_21, %c0_22] : memref<4x49x49xf32, #tpu.memory_space<vmem>>, vector<1x49x49xf32>
    %36 = vector.shape_cast %35 : vector<1x49x49xf32> to vector<49x49xf32>
    %cst_23 = arith.constant dense<0.000000e+00> : vector<49x512xf32>
    %37 = tpu.matmul %36, %34, %cst_23 {dimension_numbers = #tpu.dot_dimension_numbers<[1], [0], [0], [1], [0, 0, 1, 1], [], []>} : vector<49x49xf32>, vector<49x512xf32>, vector<49x512xf32> -> vector<49x512xf32>
    %c0_24 = arith.constant 0 : index
    %c0_25 = arith.constant 0 : index
    %c0_26 = arith.constant 0 : index
    %38 = vector.load %arg7[%c0_24, %c0_25, %c0_26] : memref<4x49x1xf32, #tpu.memory_space<vmem>>, vector<1x49x1xf32>
    %39 = vector.shape_cast %38 : vector<1x49x1xf32> to vector<49x1xf32>
    %40 = vector.broadcast %39 : vector<49x1xf32> to vector<49x512xf32>
    %41 = arith.addf %37, %40 : vector<49x512xf32>
    %42 = arith.addf %1, %41 : vector<49x512xf32>
    %cst_27 = arith.constant dense<0.000000e+00> : vector<512xf32>
    %43 = vector.multi_reduction <add>, %42, %cst_27 [0] : vector<49x512xf32> to vector<512xf32>
    %44 = vector.shape_cast %43 : vector<512xf32> to vector<1x512xf32>
    %cst_28 = arith.constant 4.900000e+01 : f32
    %45 = vector.broadcast %cst_28 : f32 to vector<1x512xf32>
    %46 = arith.divf %44, %45 : vector<1x512xf32>
    %47 = vector.broadcast %46 : vector<1x512xf32> to vector<49x512xf32>
    %48 = arith.subf %42, %47 : vector<49x512xf32>
    %49 = arith.mulf %48, %48 : vector<49x512xf32>
    %cst_29 = arith.constant dense<0.000000e+00> : vector<512xf32>
    %50 = vector.multi_reduction <add>, %49, %cst_29 [0] : vector<49x512xf32> to vector<512xf32>
    %51 = vector.shape_cast %50 : vector<512xf32> to vector<1x512xf32>
    %cst_30 = arith.constant 4.900000e+01 : f32
    %52 = vector.broadcast %cst_30 : f32 to vector<1x512xf32>
    %53 = arith.divf %51, %52 : vector<1x512xf32>
    %cst_31 = arith.constant 9.99999974E-6 : f32
    %54 = vector.broadcast %cst_31 : f32 to vector<1x512xf32>
    %55 = arith.addf %53, %54 : vector<1x512xf32>
    %56 = math.rsqrt %55 : vector<1x512xf32>
    %57 = vector.broadcast %56 : vector<1x512xf32> to vector<49x512xf32>
    %58 = arith.mulf %48, %57 : vector<49x512xf32>
    %c1 = arith.constant 1 : index
    %c0_32 = arith.constant 0 : index
    %c0_33 = arith.constant 0 : index
    %59 = vector.load %arg2[%c1, %c0_32, %c0_33] : memref<4x49x1xf32, #tpu.memory_space<vmem>>, vector<1x49x1xf32>
    %60 = vector.shape_cast %59 : vector<1x49x1xf32> to vector<49x1xf32>
    %61 = vector.broadcast %60 : vector<49x1xf32> to vector<49x512xf32>
    %62 = arith.mulf %58, %61 : vector<49x512xf32>
    %c1_34 = arith.constant 1 : index
    %c0_35 = arith.constant 0 : index
    %c0_36 = arith.constant 0 : index
    %63 = vector.load %arg3[%c1_34, %c0_35, %c0_36] : memref<4x49x1xf32, #tpu.memory_space<vmem>>, vector<1x49x1xf32>
    %64 = vector.shape_cast %63 : vector<1x49x1xf32> to vector<49x1xf32>
    %65 = vector.broadcast %64 : vector<49x1xf32> to vector<49x512xf32>
    %66 = arith.addf %62, %65 : vector<49x512xf32>
    %c1_37 = arith.constant 1 : index
    %c0_38 = arith.constant 0 : index
    %c0_39 = arith.constant 0 : index
    %67 = vector.load %arg4[%c1_37, %c0_38, %c0_39] : memref<4x49x49xf32, #tpu.memory_space<vmem>>, vector<1x49x49xf32>
    %68 = vector.shape_cast %67 : vector<1x49x49xf32> to vector<49x49xf32>
    %cst_40 = arith.constant dense<0.000000e+00> : vector<49x512xf32>
    %69 = tpu.matmul %68, %66, %cst_40 {dimension_numbers = #tpu.dot_dimension_numbers<[1], [0], [0], [1], [0, 0, 1, 1], [], []>} : vector<49x49xf32>, vector<49x512xf32>, vector<49x512xf32> -> vector<49x512xf32>
    %c1_41 = arith.constant 1 : index
    %c0_42 = arith.constant 0 : index
    %c0_43 = arith.constant 0 : index
    %70 = vector.load %arg5[%c1_41, %c0_42, %c0_43] : memref<4x49x1xf32, #tpu.memory_space<vmem>>, vector<1x49x1xf32>
    %71 = vector.shape_cast %70 : vector<1x49x1xf32> to vector<49x1xf32>
    %72 = vector.broadcast %71 : vector<49x1xf32> to vector<49x512xf32>
    %73 = arith.addf %69, %72 : vector<49x512xf32>
    %cst_44 = arith.constant 0.000000e+00 : f32
    %74 = vector.broadcast %cst_44 : f32 to vector<49x512xf32>
    %75 = arith.maximumf %73, %74 : vector<49x512xf32>
    %c1_45 = arith.constant 1 : index
    %c0_46 = arith.constant 0 : index
    %c0_47 = arith.constant 0 : index
    %76 = vector.load %arg6[%c1_45, %c0_46, %c0_47] : memref<4x49x49xf32, #tpu.memory_space<vmem>>, vector<1x49x49xf32>
    %77 = vector.shape_cast %76 : vector<1x49x49xf32> to vector<49x49xf32>
    %cst_48 = arith.constant dense<0.000000e+00> : vector<49x512xf32>
    %78 = tpu.matmul %77, %75, %cst_48 {dimension_numbers = #tpu.dot_dimension_numbers<[1], [0], [0], [1], [0, 0, 1, 1], [], []>} : vector<49x49xf32>, vector<49x512xf32>, vector<49x512xf32> -> vector<49x512xf32>
    %c1_49 = arith.constant 1 : index
    %c0_50 = arith.constant 0 : index
    %c0_51 = arith.constant 0 : index
    %79 = vector.load %arg7[%c1_49, %c0_50, %c0_51] : memref<4x49x1xf32, #tpu.memory_space<vmem>>, vector<1x49x1xf32>
    %80 = vector.shape_cast %79 : vector<1x49x1xf32> to vector<49x1xf32>
    %81 = vector.broadcast %80 : vector<49x1xf32> to vector<49x512xf32>
    %82 = arith.addf %78, %81 : vector<49x512xf32>
    %83 = arith.addf %42, %82 : vector<49x512xf32>
    %cst_52 = arith.constant dense<0.000000e+00> : vector<512xf32>
    %84 = vector.multi_reduction <add>, %83, %cst_52 [0] : vector<49x512xf32> to vector<512xf32>
    %85 = vector.shape_cast %84 : vector<512xf32> to vector<1x512xf32>
    %cst_53 = arith.constant 4.900000e+01 : f32
    %86 = vector.broadcast %cst_53 : f32 to vector<1x512xf32>
    %87 = arith.divf %85, %86 : vector<1x512xf32>
    %88 = vector.broadcast %87 : vector<1x512xf32> to vector<49x512xf32>
    %89 = arith.subf %83, %88 : vector<49x512xf32>
    %90 = arith.mulf %89, %89 : vector<49x512xf32>
    %cst_54 = arith.constant dense<0.000000e+00> : vector<512xf32>
    %91 = vector.multi_reduction <add>, %90, %cst_54 [0] : vector<49x512xf32> to vector<512xf32>
    %92 = vector.shape_cast %91 : vector<512xf32> to vector<1x512xf32>
    %cst_55 = arith.constant 4.900000e+01 : f32
    %93 = vector.broadcast %cst_55 : f32 to vector<1x512xf32>
    %94 = arith.divf %92, %93 : vector<1x512xf32>
    %cst_56 = arith.constant 9.99999974E-6 : f32
    %95 = vector.broadcast %cst_56 : f32 to vector<1x512xf32>
    %96 = arith.addf %94, %95 : vector<1x512xf32>
    %97 = math.rsqrt %96 : vector<1x512xf32>
    %98 = vector.broadcast %97 : vector<1x512xf32> to vector<49x512xf32>
    %99 = arith.mulf %89, %98 : vector<49x512xf32>
    %c2 = arith.constant 2 : index
    %c0_57 = arith.constant 0 : index
    %c0_58 = arith.constant 0 : index
    %100 = vector.load %arg2[%c2, %c0_57, %c0_58] : memref<4x49x1xf32, #tpu.memory_space<vmem>>, vector<1x49x1xf32>
    %101 = vector.shape_cast %100 : vector<1x49x1xf32> to vector<49x1xf32>
    %102 = vector.broadcast %101 : vector<49x1xf32> to vector<49x512xf32>
    %103 = arith.mulf %99, %102 : vector<49x512xf32>
    %c2_59 = arith.constant 2 : index
    %c0_60 = arith.constant 0 : index
    %c0_61 = arith.constant 0 : index
    %104 = vector.load %arg3[%c2_59, %c0_60, %c0_61] : memref<4x49x1xf32, #tpu.memory_space<vmem>>, vector<1x49x1xf32>
    %105 = vector.shape_cast %104 : vector<1x49x1xf32> to vector<49x1xf32>
    %106 = vector.broadcast %105 : vector<49x1xf32> to vector<49x512xf32>
    %107 = arith.addf %103, %106 : vector<49x512xf32>
    %c2_62 = arith.constant 2 : index
    %c0_63 = arith.constant 0 : index
    %c0_64 = arith.constant 0 : index
    %108 = vector.load %arg4[%c2_62, %c0_63, %c0_64] : memref<4x49x49xf32, #tpu.memory_space<vmem>>, vector<1x49x49xf32>
    %109 = vector.shape_cast %108 : vector<1x49x49xf32> to vector<49x49xf32>
    %cst_65 = arith.constant dense<0.000000e+00> : vector<49x512xf32>
    %110 = tpu.matmul %109, %107, %cst_65 {dimension_numbers = #tpu.dot_dimension_numbers<[1], [0], [0], [1], [0, 0, 1, 1], [], []>} : vector<49x49xf32>, vector<49x512xf32>, vector<49x512xf32> -> vector<49x512xf32>
    %c2_66 = arith.constant 2 : index
    %c0_67 = arith.constant 0 : index
    %c0_68 = arith.constant 0 : index
    %111 = vector.load %arg5[%c2_66, %c0_67, %c0_68] : memref<4x49x1xf32, #tpu.memory_space<vmem>>, vector<1x49x1xf32>
    %112 = vector.shape_cast %111 : vector<1x49x1xf32> to vector<49x1xf32>
    %113 = vector.broadcast %112 : vector<49x1xf32> to vector<49x512xf32>
    %114 = arith.addf %110, %113 : vector<49x512xf32>
    %cst_69 = arith.constant 0.000000e+00 : f32
    %115 = vector.broadcast %cst_69 : f32 to vector<49x512xf32>
    %116 = arith.maximumf %114, %115 : vector<49x512xf32>
    %c2_70 = arith.constant 2 : index
    %c0_71 = arith.constant 0 : index
    %c0_72 = arith.constant 0 : index
    %117 = vector.load %arg6[%c2_70, %c0_71, %c0_72] : memref<4x49x49xf32, #tpu.memory_space<vmem>>, vector<1x49x49xf32>
    %118 = vector.shape_cast %117 : vector<1x49x49xf32> to vector<49x49xf32>
    %cst_73 = arith.constant dense<0.000000e+00> : vector<49x512xf32>
    %119 = tpu.matmul %118, %116, %cst_73 {dimension_numbers = #tpu.dot_dimension_numbers<[1], [0], [0], [1], [0, 0, 1, 1], [], []>} : vector<49x49xf32>, vector<49x512xf32>, vector<49x512xf32> -> vector<49x512xf32>
    %c2_74 = arith.constant 2 : index
    %c0_75 = arith.constant 0 : index
    %c0_76 = arith.constant 0 : index
    %120 = vector.load %arg7[%c2_74, %c0_75, %c0_76] : memref<4x49x1xf32, #tpu.memory_space<vmem>>, vector<1x49x1xf32>
    %121 = vector.shape_cast %120 : vector<1x49x1xf32> to vector<49x1xf32>
    %122 = vector.broadcast %121 : vector<49x1xf32> to vector<49x512xf32>
    %123 = arith.addf %119, %122 : vector<49x512xf32>
    %124 = arith.addf %83, %123 : vector<49x512xf32>
    %cst_77 = arith.constant dense<0.000000e+00> : vector<512xf32>
    %125 = vector.multi_reduction <add>, %124, %cst_77 [0] : vector<49x512xf32> to vector<512xf32>
    %126 = vector.shape_cast %125 : vector<512xf32> to vector<1x512xf32>
    %cst_78 = arith.constant 4.900000e+01 : f32
    %127 = vector.broadcast %cst_78 : f32 to vector<1x512xf32>
    %128 = arith.divf %126, %127 : vector<1x512xf32>
    %129 = vector.broadcast %128 : vector<1x512xf32> to vector<49x512xf32>
    %130 = arith.subf %124, %129 : vector<49x512xf32>
    %131 = arith.mulf %130, %130 : vector<49x512xf32>
    %cst_79 = arith.constant dense<0.000000e+00> : vector<512xf32>
    %132 = vector.multi_reduction <add>, %131, %cst_79 [0] : vector<49x512xf32> to vector<512xf32>
    %133 = vector.shape_cast %132 : vector<512xf32> to vector<1x512xf32>
    %cst_80 = arith.constant 4.900000e+01 : f32
    %134 = vector.broadcast %cst_80 : f32 to vector<1x512xf32>
    %135 = arith.divf %133, %134 : vector<1x512xf32>
    %cst_81 = arith.constant 9.99999974E-6 : f32
    %136 = vector.broadcast %cst_81 : f32 to vector<1x512xf32>
    %137 = arith.addf %135, %136 : vector<1x512xf32>
    %138 = math.rsqrt %137 : vector<1x512xf32>
    %139 = vector.broadcast %138 : vector<1x512xf32> to vector<49x512xf32>
    %140 = arith.mulf %130, %139 : vector<49x512xf32>
    %c3 = arith.constant 3 : index
    %c0_82 = arith.constant 0 : index
    %c0_83 = arith.constant 0 : index
    %141 = vector.load %arg2[%c3, %c0_82, %c0_83] : memref<4x49x1xf32, #tpu.memory_space<vmem>>, vector<1x49x1xf32>
    %142 = vector.shape_cast %141 : vector<1x49x1xf32> to vector<49x1xf32>
    %143 = vector.broadcast %142 : vector<49x1xf32> to vector<49x512xf32>
    %144 = arith.mulf %140, %143 : vector<49x512xf32>
    %c3_84 = arith.constant 3 : index
    %c0_85 = arith.constant 0 : index
    %c0_86 = arith.constant 0 : index
    %145 = vector.load %arg3[%c3_84, %c0_85, %c0_86] : memref<4x49x1xf32, #tpu.memory_space<vmem>>, vector<1x49x1xf32>
    %146 = vector.shape_cast %145 : vector<1x49x1xf32> to vector<49x1xf32>
    %147 = vector.broadcast %146 : vector<49x1xf32> to vector<49x512xf32>
    %148 = arith.addf %144, %147 : vector<49x512xf32>
    %c3_87 = arith.constant 3 : index
    %c0_88 = arith.constant 0 : index
    %c0_89 = arith.constant 0 : index
    %149 = vector.load %arg4[%c3_87, %c0_88, %c0_89] : memref<4x49x49xf32, #tpu.memory_space<vmem>>, vector<1x49x49xf32>
    %150 = vector.shape_cast %149 : vector<1x49x49xf32> to vector<49x49xf32>
    %cst_90 = arith.constant dense<0.000000e+00> : vector<49x512xf32>
    %151 = tpu.matmul %150, %148, %cst_90 {dimension_numbers = #tpu.dot_dimension_numbers<[1], [0], [0], [1], [0, 0, 1, 1], [], []>} : vector<49x49xf32>, vector<49x512xf32>, vector<49x512xf32> -> vector<49x512xf32>
    %c3_91 = arith.constant 3 : index
    %c0_92 = arith.constant 0 : index
    %c0_93 = arith.constant 0 : index
    %152 = vector.load %arg5[%c3_91, %c0_92, %c0_93] : memref<4x49x1xf32, #tpu.memory_space<vmem>>, vector<1x49x1xf32>
    %153 = vector.shape_cast %152 : vector<1x49x1xf32> to vector<49x1xf32>
    %154 = vector.broadcast %153 : vector<49x1xf32> to vector<49x512xf32>
    %155 = arith.addf %151, %154 : vector<49x512xf32>
    %cst_94 = arith.constant 0.000000e+00 : f32
    %156 = vector.broadcast %cst_94 : f32 to vector<49x512xf32>
    %157 = arith.maximumf %155, %156 : vector<49x512xf32>
    %c3_95 = arith.constant 3 : index
    %c0_96 = arith.constant 0 : index
    %c0_97 = arith.constant 0 : index
    %158 = vector.load %arg6[%c3_95, %c0_96, %c0_97] : memref<4x49x49xf32, #tpu.memory_space<vmem>>, vector<1x49x49xf32>
    %159 = vector.shape_cast %158 : vector<1x49x49xf32> to vector<49x49xf32>
    %cst_98 = arith.constant dense<0.000000e+00> : vector<49x512xf32>
    %160 = tpu.matmul %159, %157, %cst_98 {dimension_numbers = #tpu.dot_dimension_numbers<[1], [0], [0], [1], [0, 0, 1, 1], [], []>} : vector<49x49xf32>, vector<49x512xf32>, vector<49x512xf32> -> vector<49x512xf32>
    %c3_99 = arith.constant 3 : index
    %c0_100 = arith.constant 0 : index
    %c0_101 = arith.constant 0 : index
    %161 = vector.load %arg7[%c3_99, %c0_100, %c0_101] : memref<4x49x1xf32, #tpu.memory_space<vmem>>, vector<1x49x1xf32>
    %162 = vector.shape_cast %161 : vector<1x49x1xf32> to vector<49x1xf32>
    %163 = vector.broadcast %162 : vector<49x1xf32> to vector<49x512xf32>
    %164 = arith.addf %160, %163 : vector<49x512xf32>
    %165 = arith.addf %124, %164 : vector<49x512xf32>
    %c0_102 = arith.constant 0 : index
    %c0_103 = arith.constant 0 : index
    %166 = vector.load %arg8[%c0_102, %c0_103] : memref<4x49xf32, #tpu.memory_space<vmem>>, vector<4x49xf32>
    %cst_104 = arith.constant dense<0.000000e+00> : vector<4x512xf32>
    %167 = tpu.matmul %166, %165, %cst_104 {dimension_numbers = #tpu.dot_dimension_numbers<[1], [0], [0], [1], [0, 0, 1, 1], [], []>} : vector<4x49xf32>, vector<49x512xf32>, vector<4x512xf32> -> vector<4x512xf32>
    %c0_105 = arith.constant 0 : index
    %c0_106 = arith.constant 0 : index
    %168 = vector.load %arg9[%c0_105, %c0_106] : memref<512x512xf32, #tpu.memory_space<vmem>>, vector<512x512xf32>
    %cst_107 = arith.constant dense<0.000000e+00> : vector<4x512xf32>
    %169 = tpu.matmul %167, %168, %cst_107 {dimension_numbers = #tpu.dot_dimension_numbers<[1], [0], [0], [1], [0, 0, 1, 1], [], []>} : vector<4x512xf32>, vector<512x512xf32>, vector<4x512xf32> -> vector<4x512xf32>
    %c0_108 = arith.constant 0 : index
    %c0_109 = arith.constant 0 : index
    %170 = vector.load %arg10[%c0_108, %c0_109] : memref<4x512xf32, #tpu.memory_space<vmem>>, vector<4x512xf32>
    %171 = arith.addf %169, %170 : vector<4x512xf32>
    %172 = arith.mulf %171, %171 : vector<4x512xf32>
    %173 = vector.shape_cast %172 : vector<4x512xf32> to vector<1x4x512xf32>
    %cst_110 = arith.constant dense<0.000000e+00> : vector<1xf32>
    %174 = vector.multi_reduction <add>, %173, %cst_110 [1, 2] : vector<1x4x512xf32> to vector<1xf32>
    %175 = vector.shape_cast %174 : vector<1xf32> to vector<1x1x1xf32>
    %176 = vector.extract %175[0, 0, 0] : f32 from vector<1x1x1xf32>
    %cst_111 = arith.constant 1.000000e-24 : f32
    %177 = arith.maximumf %176, %cst_111 : f32
    %178 = math.rsqrt %177 : f32
    %179 = vector.broadcast %178 : f32 to vector<4x512xf32>
    %180 = arith.mulf %171, %179 : vector<4x512xf32>
    %c0_112 = arith.constant 0 : index
    %c0_113 = arith.constant 0 : index
    %c0_114 = arith.constant 0 : index
    %181 = vector.load %arg11[%c0_112, %c0_113, %c0_114] : memref<2x4x512xf32, #tpu.memory_space<vmem>>, vector<1x4x512xf32>
    %182 = vector.shape_cast %181 : vector<1x4x512xf32> to vector<4x512xf32>
    %183 = vector.shape_cast %180 : vector<4x512xf32> to vector<1x4x512xf32>
    tpu.vector_store %arg11[%c0_112, %c0_113, %c0_114], %183 {strides = array<i32>} : memref<2x4x512xf32, #tpu.memory_space<vmem>>, vector<1x4x512xf32>,
    %c1_115 = arith.constant 1 : index
    %c0_116 = arith.constant 0 : index
    %c0_117 = arith.constant 0 : index
    %184 = vector.load %arg1[%c1_115, %c0_116, %c0_117] : memref<2x49x512xf32, #tpu.memory_space<vmem>>, vector<1x49x512xf32>
    %185 = vector.shape_cast %184 : vector<1x49x512xf32> to vector<49x512xf32>
    %cst_118 = arith.constant dense<0.000000e+00> : vector<512xf32>
    %186 = vector.multi_reduction <add>, %185, %cst_118 [0] : vector<49x512xf32> to vector<512xf32>
    %187 = vector.shape_cast %186 : vector<512xf32> to vector<1x512xf32>
    %cst_119 = arith.constant 4.900000e+01 : f32
    %188 = vector.broadcast %cst_119 : f32 to vector<1x512xf32>
    %189 = arith.divf %187, %188 : vector<1x512xf32>
    %190 = vector.broadcast %189 : vector<1x512xf32> to vector<49x512xf32>
    %191 = arith.subf %185, %190 : vector<49x512xf32>
    %192 = arith.mulf %191, %191 : vector<49x512xf32>
    %cst_120 = arith.constant dense<0.000000e+00> : vector<512xf32>
    %193 = vector.multi_reduction <add>, %192, %cst_120 [0] : vector<49x512xf32> to vector<512xf32>
    %194 = vector.shape_cast %193 : vector<512xf32> to vector<1x512xf32>
    %cst_121 = arith.constant 4.900000e+01 : f32
    %195 = vector.broadcast %cst_121 : f32 to vector<1x512xf32>
    %196 = arith.divf %194, %195 : vector<1x512xf32>
    %cst_122 = arith.constant 9.99999974E-6 : f32
    %197 = vector.broadcast %cst_122 : f32 to vector<1x512xf32>
    %198 = arith.addf %196, %197 : vector<1x512xf32>
    %199 = math.rsqrt %198 : vector<1x512xf32>
    %200 = vector.broadcast %199 : vector<1x512xf32> to vector<49x512xf32>
    %201 = arith.mulf %191, %200 : vector<49x512xf32>
    %c0_123 = arith.constant 0 : index
    %c0_124 = arith.constant 0 : index
    %c0_125 = arith.constant 0 : index
    %202 = vector.load %arg2[%c0_123, %c0_124, %c0_125] : memref<4x49x1xf32, #tpu.memory_space<vmem>>, vector<1x49x1xf32>
    %203 = vector.shape_cast %202 : vector<1x49x1xf32> to vector<49x1xf32>
    %204 = vector.broadcast %203 : vector<49x1xf32> to vector<49x512xf32>
    %205 = arith.mulf %201, %204 : vector<49x512xf32>
    %c0_126 = arith.constant 0 : index
    %c0_127 = arith.constant 0 : index
    %c0_128 = arith.constant 0 : index
    %206 = vector.load %arg3[%c0_126, %c0_127, %c0_128] : memref<4x49x1xf32, #tpu.memory_space<vmem>>, vector<1x49x1xf32>
    %207 = vector.shape_cast %206 : vector<1x49x1xf32> to vector<49x1xf32>
    %208 = vector.broadcast %207 : vector<49x1xf32> to vector<49x512xf32>
    %209 = arith.addf %205, %208 : vector<49x512xf32>
    %c0_129 = arith.constant 0 : index
    %c0_130 = arith.constant 0 : index
    %c0_131 = arith.constant 0 : index
    %210 = vector.load %arg4[%c0_129, %c0_130, %c0_131] : memref<4x49x49xf32, #tpu.memory_space<vmem>>, vector<1x49x49xf32>
    %211 = vector.shape_cast %210 : vector<1x49x49xf32> to vector<49x49xf32>
    %cst_132 = arith.constant dense<0.000000e+00> : vector<49x512xf32>
    %212 = tpu.matmul %211, %209, %cst_132 {dimension_numbers = #tpu.dot_dimension_numbers<[1], [0], [0], [1], [0, 0, 1, 1], [], []>} : vector<49x49xf32>, vector<49x512xf32>, vector<49x512xf32> -> vector<49x512xf32>
    %c0_133 = arith.constant 0 : index
    %c0_134 = arith.constant 0 : index
    %c0_135 = arith.constant 0 : index
    %213 = vector.load %arg5[%c0_133, %c0_134, %c0_135] : memref<4x49x1xf32, #tpu.memory_space<vmem>>, vector<1x49x1xf32>
    %214 = vector.shape_cast %213 : vector<1x49x1xf32> to vector<49x1xf32>
    %215 = vector.broadcast %214 : vector<49x1xf32> to vector<49x512xf32>
    %216 = arith.addf %212, %215 : vector<49x512xf32>
    %cst_136 = arith.constant 0.000000e+00 : f32
    %217 = vector.broadcast %cst_136 : f32 to vector<49x512xf32>
    %218 = arith.maximumf %216, %217 : vector<49x512xf32>
    %c0_137 = arith.constant 0 : index
    %c0_138 = arith.constant 0 : index
    %c0_139 = arith.constant 0 : index
    %219 = vector.load %arg6[%c0_137, %c0_138, %c0_139] : memref<4x49x49xf32, #tpu.memory_space<vmem>>, vector<1x49x49xf32>
    %220 = vector.shape_cast %219 : vector<1x49x49xf32> to vector<49x49xf32>
    %cst_140 = arith.constant dense<0.000000e+00> : vector<49x512xf32>
    %221 = tpu.matmul %220, %218, %cst_140 {dimension_numbers = #tpu.dot_dimension_numbers<[1], [0], [0], [1], [0, 0, 1, 1], [], []>} : vector<49x49xf32>, vector<49x512xf32>, vector<49x512xf32> -> vector<49x512xf32>
    %c0_141 = arith.constant 0 : index
    %c0_142 = arith.constant 0 : index
    %c0_143 = arith.constant 0 : index
    %222 = vector.load %arg7[%c0_141, %c0_142, %c0_143] : memref<4x49x1xf32, #tpu.memory_space<vmem>>, vector<1x49x1xf32>
    %223 = vector.shape_cast %222 : vector<1x49x1xf32> to vector<49x1xf32>
    %224 = vector.broadcast %223 : vector<49x1xf32> to vector<49x512xf32>
    %225 = arith.addf %221, %224 : vector<49x512xf32>
    %226 = arith.addf %185, %225 : vector<49x512xf32>
    %cst_144 = arith.constant dense<0.000000e+00> : vector<512xf32>
    %227 = vector.multi_reduction <add>, %226, %cst_144 [0] : vector<49x512xf32> to vector<512xf32>
    %228 = vector.shape_cast %227 : vector<512xf32> to vector<1x512xf32>
    %cst_145 = arith.constant 4.900000e+01 : f32
    %229 = vector.broadcast %cst_145 : f32 to vector<1x512xf32>
    %230 = arith.divf %228, %229 : vector<1x512xf32>
    %231 = vector.broadcast %230 : vector<1x512xf32> to vector<49x512xf32>
    %232 = arith.subf %226, %231 : vector<49x512xf32>
    %233 = arith.mulf %232, %232 : vector<49x512xf32>
    %cst_146 = arith.constant dense<0.000000e+00> : vector<512xf32>
    %234 = vector.multi_reduction <add>, %233, %cst_146 [0] : vector<49x512xf32> to vector<512xf32>
    %235 = vector.shape_cast %234 : vector<512xf32> to vector<1x512xf32>
    %cst_147 = arith.constant 4.900000e+01 : f32
    %236 = vector.broadcast %cst_147 : f32 to vector<1x512xf32>
    %237 = arith.divf %235, %236 : vector<1x512xf32>
    %cst_148 = arith.constant 9.99999974E-6 : f32
    %238 = vector.broadcast %cst_148 : f32 to vector<1x512xf32>
    %239 = arith.addf %237, %238 : vector<1x512xf32>
    %240 = math.rsqrt %239 : vector<1x512xf32>
    %241 = vector.broadcast %240 : vector<1x512xf32> to vector<49x512xf32>
    %242 = arith.mulf %232, %241 : vector<49x512xf32>
    %c1_149 = arith.constant 1 : index
    %c0_150 = arith.constant 0 : index
    %c0_151 = arith.constant 0 : index
    %243 = vector.load %arg2[%c1_149, %c0_150, %c0_151] : memref<4x49x1xf32, #tpu.memory_space<vmem>>, vector<1x49x1xf32>
    %244 = vector.shape_cast %243 : vector<1x49x1xf32> to vector<49x1xf32>
    %245 = vector.broadcast %244 : vector<49x1xf32> to vector<49x512xf32>
    %246 = arith.mulf %242, %245 : vector<49x512xf32>
    %c1_152 = arith.constant 1 : index
    %c0_153 = arith.constant 0 : index
    %c0_154 = arith.constant 0 : index
    %247 = vector.load %arg3[%c1_152, %c0_153, %c0_154] : memref<4x49x1xf32, #tpu.memory_space<vmem>>, vector<1x49x1xf32>
    %248 = vector.shape_cast %247 : vector<1x49x1xf32> to vector<49x1xf32>
    %249 = vector.broadcast %248 : vector<49x1xf32> to vector<49x512xf32>
    %250 = arith.addf %246, %249 : vector<49x512xf32>
    %c1_155 = arith.constant 1 : index
    %c0_156 = arith.constant 0 : index
    %c0_157 = arith.constant 0 : index
    %251 = vector.load %arg4[%c1_155, %c0_156, %c0_157] : memref<4x49x49xf32, #tpu.memory_space<vmem>>, vector<1x49x49xf32>
    %252 = vector.shape_cast %251 : vector<1x49x49xf32> to vector<49x49xf32>
    %cst_158 = arith.constant dense<0.000000e+00> : vector<49x512xf32>
    %253 = tpu.matmul %252, %250, %cst_158 {dimension_numbers = #tpu.dot_dimension_numbers<[1], [0], [0], [1], [0, 0, 1, 1], [], []>} : vector<49x49xf32>, vector<49x512xf32>, vector<49x512xf32> -> vector<49x512xf32>
    %c1_159 = arith.constant 1 : index
    %c0_160 = arith.constant 0 : index
    %c0_161 = arith.constant 0 : index
    %254 = vector.load %arg5[%c1_159, %c0_160, %c0_161] : memref<4x49x1xf32, #tpu.memory_space<vmem>>, vector<1x49x1xf32>
    %255 = vector.shape_cast %254 : vector<1x49x1xf32> to vector<49x1xf32>
    %256 = vector.broadcast %255 : vector<49x1xf32> to vector<49x512xf32>
    %257 = arith.addf %253, %256 : vector<49x512xf32>
    %cst_162 = arith.constant 0.000000e+00 : f32
    %258 = vector.broadcast %cst_162 : f32 to vector<49x512xf32>
    %259 = arith.maximumf %257, %258 : vector<49x512xf32>
    %c1_163 = arith.constant 1 : index
    %c0_164 = arith.constant 0 : index
    %c0_165 = arith.constant 0 : index
    %260 = vector.load %arg6[%c1_163, %c0_164, %c0_165] : memref<4x49x49xf32, #tpu.memory_space<vmem>>, vector<1x49x49xf32>
    %261 = vector.shape_cast %260 : vector<1x49x49xf32> to vector<49x49xf32>
    %cst_166 = arith.constant dense<0.000000e+00> : vector<49x512xf32>
    %262 = tpu.matmul %261, %259, %cst_166 {dimension_numbers = #tpu.dot_dimension_numbers<[1], [0], [0], [1], [0, 0, 1, 1], [], []>} : vector<49x49xf32>, vector<49x512xf32>, vector<49x512xf32> -> vector<49x512xf32>
    %c1_167 = arith.constant 1 : index
    %c0_168 = arith.constant 0 : index
    %c0_169 = arith.constant 0 : index
    %263 = vector.load %arg7[%c1_167, %c0_168, %c0_169] : memref<4x49x1xf32, #tpu.memory_space<vmem>>, vector<1x49x1xf32>
    %264 = vector.shape_cast %263 : vector<1x49x1xf32> to vector<49x1xf32>
    %265 = vector.broadcast %264 : vector<49x1xf32> to vector<49x512xf32>
    %266 = arith.addf %262, %265 : vector<49x512xf32>
    %267 = arith.addf %226, %266 : vector<49x512xf32>
    %cst_170 = arith.constant dense<0.000000e+00> : vector<512xf32>
    %268 = vector.multi_reduction <add>, %267, %cst_170 [0] : vector<49x512xf32> to vector<512xf32>
    %269 = vector.shape_cast %268 : vector<512xf32> to vector<1x512xf32>
    %cst_171 = arith.constant 4.900000e+01 : f32
    %270 = vector.broadcast %cst_171 : f32 to vector<1x512xf32>
    %271 = arith.divf %269, %270 : vector<1x512xf32>
    %272 = vector.broadcast %271 : vector<1x512xf32> to vector<49x512xf32>
    %273 = arith.subf %267, %272 : vector<49x512xf32>
    %274 = arith.mulf %273, %273 : vector<49x512xf32>
    %cst_172 = arith.constant dense<0.000000e+00> : vector<512xf32>
    %275 = vector.multi_reduction <add>, %274, %cst_172 [0] : vector<49x512xf32> to vector<512xf32>
    %276 = vector.shape_cast %275 : vector<512xf32> to vector<1x512xf32>
    %cst_173 = arith.constant 4.900000e+01 : f32
    %277 = vector.broadcast %cst_173 : f32 to vector<1x512xf32>
    %278 = arith.divf %276, %277 : vector<1x512xf32>
    %cst_174 = arith.constant 9.99999974E-6 : f32
    %279 = vector.broadcast %cst_174 : f32 to vector<1x512xf32>
    %280 = arith.addf %278, %279 : vector<1x512xf32>
    %281 = math.rsqrt %280 : vector<1x512xf32>
    %282 = vector.broadcast %281 : vector<1x512xf32> to vector<49x512xf32>
    %283 = arith.mulf %273, %282 : vector<49x512xf32>
    %c2_175 = arith.constant 2 : index
    %c0_176 = arith.constant 0 : index
    %c0_177 = arith.constant 0 : index
    %284 = vector.load %arg2[%c2_175, %c0_176, %c0_177] : memref<4x49x1xf32, #tpu.memory_space<vmem>>, vector<1x49x1xf32>
    %285 = vector.shape_cast %284 : vector<1x49x1xf32> to vector<49x1xf32>
    %286 = vector.broadcast %285 : vector<49x1xf32> to vector<49x512xf32>
    %287 = arith.mulf %283, %286 : vector<49x512xf32>
    %c2_178 = arith.constant 2 : index
    %c0_179 = arith.constant 0 : index
    %c0_180 = arith.constant 0 : index
    %288 = vector.load %arg3[%c2_178, %c0_179, %c0_180] : memref<4x49x1xf32, #tpu.memory_space<vmem>>, vector<1x49x1xf32>
    %289 = vector.shape_cast %288 : vector<1x49x1xf32> to vector<49x1xf32>
    %290 = vector.broadcast %289 : vector<49x1xf32> to vector<49x512xf32>
    %291 = arith.addf %287, %290 : vector<49x512xf32>
    %c2_181 = arith.constant 2 : index
    %c0_182 = arith.constant 0 : index
    %c0_183 = arith.constant 0 : index
    %292 = vector.load %arg4[%c2_181, %c0_182, %c0_183] : memref<4x49x49xf32, #tpu.memory_space<vmem>>, vector<1x49x49xf32>
    %293 = vector.shape_cast %292 : vector<1x49x49xf32> to vector<49x49xf32>
    %cst_184 = arith.constant dense<0.000000e+00> : vector<49x512xf32>
    %294 = tpu.matmul %293, %291, %cst_184 {dimension_numbers = #tpu.dot_dimension_numbers<[1], [0], [0], [1], [0, 0, 1, 1], [], []>} : vector<49x49xf32>, vector<49x512xf32>, vector<49x512xf32> -> vector<49x512xf32>
    %c2_185 = arith.constant 2 : index
    %c0_186 = arith.constant 0 : index
    %c0_187 = arith.constant 0 : index
    %295 = vector.load %arg5[%c2_185, %c0_186, %c0_187] : memref<4x49x1xf32, #tpu.memory_space<vmem>>, vector<1x49x1xf32>
    %296 = vector.shape_cast %295 : vector<1x49x1xf32> to vector<49x1xf32>
    %297 = vector.broadcast %296 : vector<49x1xf32> to vector<49x512xf32>
    %298 = arith.addf %294, %297 : vector<49x512xf32>
    %cst_188 = arith.constant 0.000000e+00 : f32
    %299 = vector.broadcast %cst_188 : f32 to vector<49x512xf32>
    %300 = arith.maximumf %298, %299 : vector<49x512xf32>
    %c2_189 = arith.constant 2 : index
    %c0_190 = arith.constant 0 : index
    %c0_191 = arith.constant 0 : index
    %301 = vector.load %arg6[%c2_189, %c0_190, %c0_191] : memref<4x49x49xf32, #tpu.memory_space<vmem>>, vector<1x49x49xf32>
    %302 = vector.shape_cast %301 : vector<1x49x49xf32> to vector<49x49xf32>
    %cst_192 = arith.constant dense<0.000000e+00> : vector<49x512xf32>
    %303 = tpu.matmul %302, %300, %cst_192 {dimension_numbers = #tpu.dot_dimension_numbers<[1], [0], [0], [1], [0, 0, 1, 1], [], []>} : vector<49x49xf32>, vector<49x512xf32>, vector<49x512xf32> -> vector<49x512xf32>
    %c2_193 = arith.constant 2 : index
    %c0_194 = arith.constant 0 : index
    %c0_195 = arith.constant 0 : index
    %304 = vector.load %arg7[%c2_193, %c0_194, %c0_195] : memref<4x49x1xf32, #tpu.memory_space<vmem>>, vector<1x49x1xf32>
    %305 = vector.shape_cast %304 : vector<1x49x1xf32> to vector<49x1xf32>
    %306 = vector.broadcast %305 : vector<49x1xf32> to vector<49x512xf32>
    %307 = arith.addf %303, %306 : vector<49x512xf32>
    %308 = arith.addf %267, %307 : vector<49x512xf32>
    %cst_196 = arith.constant dense<0.000000e+00> : vector<512xf32>
    %309 = vector.multi_reduction <add>, %308, %cst_196 [0] : vector<49x512xf32> to vector<512xf32>
    %310 = vector.shape_cast %309 : vector<512xf32> to vector<1x512xf32>
    %cst_197 = arith.constant 4.900000e+01 : f32
    %311 = vector.broadcast %cst_197 : f32 to vector<1x512xf32>
    %312 = arith.divf %310, %311 : vector<1x512xf32>
    %313 = vector.broadcast %312 : vector<1x512xf32> to vector<49x512xf32>
    %314 = arith.subf %308, %313 : vector<49x512xf32>
    %315 = arith.mulf %314, %314 : vector<49x512xf32>
    %cst_198 = arith.constant dense<0.000000e+00> : vector<512xf32>
    %316 = vector.multi_reduction <add>, %315, %cst_198 [0] : vector<49x512xf32> to vector<512xf32>
    %317 = vector.shape_cast %316 : vector<512xf32> to vector<1x512xf32>
    %cst_199 = arith.constant 4.900000e+01 : f32
    %318 = vector.broadcast %cst_199 : f32 to vector<1x512xf32>
    %319 = arith.divf %317, %318 : vector<1x512xf32>
    %cst_200 = arith.constant 9.99999974E-6 : f32
    %320 = vector.broadcast %cst_200 : f32 to vector<1x512xf32>
    %321 = arith.addf %319, %320 : vector<1x512xf32>
    %322 = math.rsqrt %321 : vector<1x512xf32>
    %323 = vector.broadcast %322 : vector<1x512xf32> to vector<49x512xf32>
    %324 = arith.mulf %314, %323 : vector<49x512xf32>
    %c3_201 = arith.constant 3 : index
    %c0_202 = arith.constant 0 : index
    %c0_203 = arith.constant 0 : index
    %325 = vector.load %arg2[%c3_201, %c0_202, %c0_203] : memref<4x49x1xf32, #tpu.memory_space<vmem>>, vector<1x49x1xf32>
    %326 = vector.shape_cast %325 : vector<1x49x1xf32> to vector<49x1xf32>
    %327 = vector.broadcast %326 : vector<49x1xf32> to vector<49x512xf32>
    %328 = arith.mulf %324, %327 : vector<49x512xf32>
    %c3_204 = arith.constant 3 : index
    %c0_205 = arith.constant 0 : index
    %c0_206 = arith.constant 0 : index
    %329 = vector.load %arg3[%c3_204, %c0_205, %c0_206] : memref<4x49x1xf32, #tpu.memory_space<vmem>>, vector<1x49x1xf32>
    %330 = vector.shape_cast %329 : vector<1x49x1xf32> to vector<49x1xf32>
    %331 = vector.broadcast %330 : vector<49x1xf32> to vector<49x512xf32>
    %332 = arith.addf %328, %331 : vector<49x512xf32>
    %c3_207 = arith.constant 3 : index
    %c0_208 = arith.constant 0 : index
    %c0_209 = arith.constant 0 : index
    %333 = vector.load %arg4[%c3_207, %c0_208, %c0_209] : memref<4x49x49xf32, #tpu.memory_space<vmem>>, vector<1x49x49xf32>
    %334 = vector.shape_cast %333 : vector<1x49x49xf32> to vector<49x49xf32>
    %cst_210 = arith.constant dense<0.000000e+00> : vector<49x512xf32>
    %335 = tpu.matmul %334, %332, %cst_210 {dimension_numbers = #tpu.dot_dimension_numbers<[1], [0], [0], [1], [0, 0, 1, 1], [], []>} : vector<49x49xf32>, vector<49x512xf32>, vector<49x512xf32> -> vector<49x512xf32>
    %c3_211 = arith.constant 3 : index
    %c0_212 = arith.constant 0 : index
    %c0_213 = arith.constant 0 : index
    %336 = vector.load %arg5[%c3_211, %c0_212, %c0_213] : memref<4x49x1xf32, #tpu.memory_space<vmem>>, vector<1x49x1xf32>
    %337 = vector.shape_cast %336 : vector<1x49x1xf32> to vector<49x1xf32>
    %338 = vector.broadcast %337 : vector<49x1xf32> to vector<49x512xf32>
    %339 = arith.addf %335, %338 : vector<49x512xf32>
    %cst_214 = arith.constant 0.000000e+00 : f32
    %340 = vector.broadcast %cst_214 : f32 to vector<49x512xf32>
    %341 = arith.maximumf %339, %340 : vector<49x512xf32>
    %c3_215 = arith.constant 3 : index
    %c0_216 = arith.constant 0 : index
    %c0_217 = arith.constant 0 : index
    %342 = vector.load %arg6[%c3_215, %c0_216, %c0_217] : memref<4x49x49xf32, #tpu.memory_space<vmem>>, vector<1x49x49xf32>
    %343 = vector.shape_cast %342 : vector<1x49x49xf32> to vector<49x49xf32>
    %cst_218 = arith.constant dense<0.000000e+00> : vector<49x512xf32>
    %344 = tpu.matmul %343, %341, %cst_218 {dimension_numbers = #tpu.dot_dimension_numbers<[1], [0], [0], [1], [0, 0, 1, 1], [], []>} : vector<49x49xf32>, vector<49x512xf32>, vector<49x512xf32> -> vector<49x512xf32>
    %c3_219 = arith.constant 3 : index
    %c0_220 = arith.constant 0 : index
    %c0_221 = arith.constant 0 : index
    %345 = vector.load %arg7[%c3_219, %c0_220, %c0_221] : memref<4x49x1xf32, #tpu.memory_space<vmem>>, vector<1x49x1xf32>
    %346 = vector.shape_cast %345 : vector<1x49x1xf32> to vector<49x1xf32>
    %347 = vector.broadcast %346 : vector<49x1xf32> to vector<49x512xf32>
    %348 = arith.addf %344, %347 : vector<49x512xf32>
    %349 = arith.addf %308, %348 : vector<49x512xf32>
    %c0_222 = arith.constant 0 : index
    %c0_223 = arith.constant 0 : index
    %350 = vector.load %arg8[%c0_222, %c0_223] : memref<4x49xf32, #tpu.memory_space<vmem>>, vector<4x49xf32>
    %cst_224 = arith.constant dense<0.000000e+00> : vector<4x512xf32>
    %351 = tpu.matmul %350, %349, %cst_224 {dimension_numbers = #tpu.dot_dimension_numbers<[1], [0], [0], [1], [0, 0, 1, 1], [], []>} : vector<4x49xf32>, vector<49x512xf32>, vector<4x512xf32> -> vector<4x512xf32>
    %c0_225 = arith.constant 0 : index
    %c0_226 = arith.constant 0 : index
    %352 = vector.load %arg9[%c0_225, %c0_226] : memref<512x512xf32, #tpu.memory_space<vmem>>, vector<512x512xf32>
    %cst_227 = arith.constant dense<0.000000e+00> : vector<4x512xf32>
    %353 = tpu.matmul %351, %352, %cst_227 {dimension_numbers = #tpu.dot_dimension_numbers<[1], [0], [0], [1], [0, 0, 1, 1], [], []>} : vector<4x512xf32>, vector<512x512xf32>, vector<4x512xf32> -> vector<4x512xf32>
    %c0_228 = arith.constant 0 : index
    %c0_229 = arith.constant 0 : index
    %354 = vector.load %arg10[%c0_228, %c0_229] : memref<4x512xf32, #tpu.memory_space<vmem>>, vector<4x512xf32>
    %355 = arith.addf %353, %354 : vector<4x512xf32>
    %356 = arith.mulf %355, %355 : vector<4x512xf32>
    %357 = vector.shape_cast %356 : vector<4x512xf32> to vector<1x4x512xf32>
    %cst_230 = arith.constant dense<0.000000e+00> : vector<1xf32>
    %358 = vector.multi_reduction <add>, %357, %cst_230 [1, 2] : vector<1x4x512xf32> to vector<1xf32>
    %359 = vector.shape_cast %358 : vector<1xf32> to vector<1x1x1xf32>
    %360 = vector.extract %359[0, 0, 0] : f32 from vector<1x1x1xf32>
    %cst_231 = arith.constant 1.000000e-24 : f32
    %361 = arith.maximumf %360, %cst_231 : f32
    %362 = math.rsqrt %361 : f32
    %363 = vector.broadcast %362 : f32 to vector<4x512xf32>
    %364 = arith.mulf %355, %363 : vector<4x512xf32>
    %c1_232 = arith.constant 1 : index
    %c0_233 = arith.constant 0 : index
    %c0_234 = arith.constant 0 : index
    %365 = vector.load %arg11[%c1_232, %c0_233, %c0_234] : memref<2x4x512xf32, #tpu.memory_space<vmem>>, vector<1x4x512xf32>
    %366 = vector.shape_cast %365 : vector<1x4x512xf32> to vector<4x512xf32>
    %367 = vector.shape_cast %364 : vector<4x512xf32> to vector<1x4x512xf32>
    tpu.vector_store %arg11[%c1_232, %c0_233, %c0_234], %367 {strides = array<i32>} : memref<2x4x512xf32, #tpu.memory_space<vmem>>, vector<1x4x512xf32>,
    return
  }
  func.func @transform_0(%arg0: i32) -> (i32, i32, i32) {
    %c0_i32 = arith.constant 0 : i32
    %c0_i32_0 = arith.constant 0 : i32
    %c0_i32_1 = arith.constant 0 : i32
    return %arg0, %c0_i32, %c0_i32_0 : i32, i32, i32
  }
  func.func @transform_1(%arg0: i32) -> (i32, i32, i32) {
    %c0_i32 = arith.constant 0 : i32
    %c0_i32_0 = arith.constant 0 : i32
    %c0_i32_1 = arith.constant 0 : i32
    %c0_i32_2 = arith.constant 0 : i32
    return %c0_i32, %c0_i32_0, %c0_i32_1 : i32, i32, i32
  }
  func.func @transform_2(%arg0: i32) -> (i32, i32, i32) {
    %c0_i32 = arith.constant 0 : i32
    %c0_i32_0 = arith.constant 0 : i32
    %c0_i32_1 = arith.constant 0 : i32
    %c0_i32_2 = arith.constant 0 : i32
    return %c0_i32, %c0_i32_0, %c0_i32_1 : i32, i32, i32
  }
  func.func @transform_3(%arg0: i32) -> (i32, i32, i32) {
    %c0_i32 = arith.constant 0 : i32
    %c0_i32_0 = arith.constant 0 : i32
    %c0_i32_1 = arith.constant 0 : i32
    %c0_i32_2 = arith.constant 0 : i32
    return %c0_i32, %c0_i32_0, %c0_i32_1 : i32, i32, i32
  }
  func.func @transform_4(%arg0: i32) -> (i32, i32, i32) {
    %c0_i32 = arith.constant 0 : i32
    %c0_i32_0 = arith.constant 0 : i32
    %c0_i32_1 = arith.constant 0 : i32
    %c0_i32_2 = arith.constant 0 : i32
    return %c0_i32, %c0_i32_0, %c0_i32_1 : i32, i32, i32
  }
  func.func @transform_5(%arg0: i32) -> (i32, i32, i32) {
    %c0_i32 = arith.constant 0 : i32
    %c0_i32_0 = arith.constant 0 : i32
    %c0_i32_1 = arith.constant 0 : i32
    %c0_i32_2 = arith.constant 0 : i32
    return %c0_i32, %c0_i32_0, %c0_i32_1 : i32, i32, i32
  }
  func.func @transform_6(%arg0: i32) -> (i32, i32, i32) {
    %c0_i32 = arith.constant 0 : i32
    %c0_i32_0 = arith.constant 0 : i32
    %c0_i32_1 = arith.constant 0 : i32
    %c0_i32_2 = arith.constant 0 : i32
    return %c0_i32, %c0_i32_0, %c0_i32_1 : i32, i32, i32
  }
  func.func @transform_7(%arg0: i32) -> (i32, i32) {
    %c0_i32 = arith.constant 0 : i32
    %c0_i32_0 = arith.constant 0 : i32
    %c0_i32_1 = arith.constant 0 : i32
    return %c0_i32, %c0_i32_0 : i32, i32
  }
  func.func @transform_8(%arg0: i32) -> (i32, i32) {
    %c0_i32 = arith.constant 0 : i32
    %c0_i32_0 = arith.constant 0 : i32
    %c0_i32_1 = arith.constant 0 : i32
    return %c0_i32, %c0_i32_0 : i32, i32
  }
  func.func @transform_9(%arg0: i32) -> (i32, i32) {
    %c0_i32 = arith.constant 0 : i32
    %c0_i32_0 = arith.constant 0 : i32
    %c0_i32_1 = arith.constant 0 : i32
    return %c0_i32, %c0_i32_0 : i32, i32
  }
  func.func @transform_10(%arg0: i32) -> (i32, i32, i32) {
    %c0_i32 = arith.constant 0 : i32
    %c0_i32_0 = arith.constant 0 : i32
    %c0_i32_1 = arith.constant 0 : i32
    return %arg0, %c0_i32, %c0_i32_0 : i32, i32, i32
  }
}

</mosaic_0001>

<bundles_post_ra>
// kernel: tpu_custom_call.1
= control target key start
LH: loop header
LB: loop body
LE: loop exit
PB: predicated region body
PF: predicated region fallthrough
CT: control target
= control target key end

     0   :  { %v11266_v2 = vmov 0   ;;  %vm69_vm0 = vcmask 1040384   ;;  %v18369_v58 = vmov 0.0   ;;  %s18358_s0 = inlined_call_operand.vmem [shape: f32[2,49,512], index: 0, kind: input, shape index: {}]   ;;  %s18359_s1 = inlined_call_operand.vmem [shape: f32[4,49,1], index: 1, kind: input, shape index: {}]   ;;  %s18360_s2 = inlined_call_operand.vmem [shape: f32[4,49,1], index: 2, kind: input, shape index: {}]   ;;  %s18361_s3 = inlined_call_operand.vmem [shape: f32[4,49,49], index: 3, kind: input, shape index: {}]   ;;  %s18362_s4 = inlined_call_operand.vmem [shape: f32[4,49,1], index: 4, kind: input, shape index: {}]   ;;  %s18363_s5 = inlined_call_operand.vmem [shape: f32[4,49,49], index: 5, kind: input, shape index: {}]   ;;  %s18364_s6 = inlined_call_operand.vmem [shape: f32[4,49,1], index: 6, kind: input, shape index: {}]   ;;  %s18365_s7 = inlined_call_operand.vmem [shape: f32[4,49], index: 7, kind: input, shape index: {}]   ;;  %s18366_s8 = inlined_call_operand.vmem [shape: f32[512,512], index: 8, kind: input, shape index: {}]   ;;  %s18367_s9 = inlined_call_operand.vmem [shape: f32[4,512], index: 9, kind: input, shape index: {}]   ;;  %s18368_s10 = inlined_call_operand.hbm [shape: f32[2,4,512], index: 10, kind: output, shape index: {}]  }
   0x1   :  { %v340_v0 = vld [vmem:[%s18360_s2] sm:$0xff]  ;;  %11113 = vset.pattern.permute.xlu1 %v11266_v2  ;;  %11112 = vset.pattern.permute.xlu0 %v11266_v2  ;;  %v341_v3 = vld [vmem:[%s18360_s2 + $0x8] sm:$0xff]  ;;  %v273_v5 = vld [vmem:[%s18359_s1 + $0x18] sm:$0xff] }
   0x2   :  { %v270_v1 = vld [vmem:[%s18359_s1] sm:$0xff]  ;;  %349 = vperm.xlu1 %11113, %v340_v0   ;;  %v271_v4 = vld [vmem:[%s18359_s1 + $0x8] sm:$0xff]  ;;  %v272_v6 = vld [vmem:[%s18359_s1 + $0x10] sm:$0xff]  ;;  %557 = vmatprep.mubr.f32.mxu0 %v18369_v58 }
   0x3   :  { %279 = vperm.xlu0 %11112, %v270_v1   ;;  %v343_v7 = vld [vmem:[%s18360_s2 + $0x18] sm:$0xff]  ;;  %v342_v8 = vld [vmem:[%s18360_s2 + $0x10] sm:$0xff]  ;;  %v275_v9 = vld [vmem:[%s18359_s1 + $0x28] sm:$0xff]  ;;  %664 = vmatprep.mubr.f32.mxu1 %v18369_v58 }
   0x4   :  { %v274_v10 = vld [vmem:[%s18359_s1 + $0x20] sm:$0xff]  ;;  %v345_v11 = vld [vmem:[%s18360_s2 + $0x28] sm:$0xff]  ;;  %v346_v13 = vld [vmem:[%s18360_s2 + $0x30] sm:$0x1] }
   0x5   :  { %v344_v12 = vld [vmem:[%s18360_s2 + $0x20] sm:$0xff]  ;;  %v276_v14 = vld [vmem:[%s18359_s1 + $0x30] sm:$0x1]  ;;  %v11372_v15 = vld [vmem:[%s18358_s0 + $0x8] sm:$0xff] }
   0x6   :  { %354 = vperm.xlu1 %11113, %v341_v3   ;;  %v11377_v16 = vld [vmem:[%s18358_s0 + $0x28] sm:$0xff]  ;;  %v11397_v21 = vld [vmem:[%s18358_s0 + $0x18] sm:$0xff]  ;;  %v417_v22 = vld [vmem:[%s18362_s4] sm:$0xff] }
   0x7   :  { %284 = vperm.xlu0 %11112, %v271_v4   ;;  %v11382_v17 = vld [vmem:[%s18358_s0 + $0x48] sm:$0xff]  ;;  %v78_v18 = vadd.f32 %v11377_v16, %v11372_v15  ;;  %v11406_v24 = vld [vmem:[%s18358_s0 + $0x38] sm:$0xff]  ;;  %v11434_v31 = vld [vmem:[%s18358_s0] sm:$0xff] }
   0x8   :  { %v418_v19 = vld [vmem:[%s18362_s4 + $0x8] sm:$0xff]  ;;  %v11411_v25 = vld [vmem:[%s18358_s0 + $0x58] sm:$0xff]  ;;  %v104_v29 = vadd.f32 %v11406_v24, %v11397_v21  ;;  %v11439_v32 = vld [vmem:[%s18358_s0 + $0x20] sm:$0xff] }
   0x9   :  { %v11392_v20 = vld [vmem:[%s18358_s0 + $0x68] sm:$0xff]  ;;  %v79_v23 = vadd.f32 %v78_v18, %v11382_v17  ;;  %v11426_v28 = vld [vmem:[%s18358_s0 + $0x78] sm:$0xff]  ;;  %v11444_v33 = vld [vmem:[%s18358_s0 + $0x40] sm:$0xff]  ;;  %v64_v38 = vadd.f32 %v11439_v32, %v11434_v31 }
   0xa   :  { %294 = vperm.xlu1 %11113, %v273_v5   ;;  %v11416_v26 = vld [vmem:[%s18358_s0 + $0x88] sm:$0xff]  ;;  %v420_v34 = vld [vmem:[%s18362_s4 + $0x18] sm:$0xff]  ;;  %v105_v37 = vadd.f32 %v104_v29, %v11411_v25  ;;  %v11466_v40 = vld [vmem:[%s18358_s0 + $0x60] sm:$0xff] }
   0xb   :  { %289 = vperm.xlu0 %11112, %v272_v6   ;;  %v11421_v27 = vld [vmem:[%s18358_s0 + $0xc8] sm:$0x1]  ;;  %v80_v30 = vadd.f32 %v79_v23, %v11392_v20  ;;  %v11457_v36 = vld [vmem:[%s18358_s0 + $0x98] sm:$0xff]  ;;  %v11471_v41 = vld [vmem:[%s18358_s0 + $0x10] sm:$0xff]  ;;  %v65_v47 = vadd.f32 %v64_v38, %v11444_v33 }
   0xc   :  { %v11452_v35 = vld [vmem:[%s18358_s0 + $0xa8] sm:$0xff]  ;;  %v11476_v42 = vld [vmem:[%s18358_s0 + $0x30] sm:$0xff]  ;;  %v83_v44 = vsel %vm69_vm0, %v11421_v27, 0.0  ;;  %v11486_v45 = vld [vmem:[%s18358_s0 + $0xd8] sm:$0x1]  ;;  %v106_v46 = vadd.f32 %v105_v37, %v11426_v28 }
   0xd   :  { %v81_v39 = vadd.f32 %v80_v30, %v11416_v26  ;;  %v419_v43 = vld [vmem:[%s18362_s4 + $0x10] sm:$0xff]  ;;  %v91_v49 = vadd.f32 %v11476_v42, %v11471_v41  ;;  %v11501_v51 = vld [vmem:[%s18358_s0 + $0xb8] sm:$0xff]  ;;  %v11506_v52 = vld [vmem:[%s18358_s0 + $0x80] sm:$0xff]  ;;  %v66_v56 = vadd.f32 %v65_v47, %v11466_v40  ;;  %v109_v60 = vsel %vm69_vm0, %v11486_v45, 0.0 }
   0xe   :  { %364 = vperm.xlu1 %11113, %v343_v7   ;;  %v11493_v48 = vld [vmem:[%s18358_s0 + $0x50] sm:$0xff]  ;;  %v107_v54 = vadd.f32 %v106_v46, %v11457_v36  ;;  %v11517_v55 = vld [vmem:[%s18358_s0 + $0xc0] sm:$0x1]  ;;  %v422_v63 = vld [vmem:[%s18362_s4 + $0x28] sm:$0xff] }
   0xf   :  { %359 = vperm.xlu0 %11112, %v342_v8   ;;  %v82_v50 = vadd.f32 %v81_v39, %v11452_v35  ;;  %v11511_v53 = vld [vmem:[%s18358_s0 + $0x70] sm:$0xff]  ;;  %v92_v57 = vadd.f32 %v91_v49, %v11493_v48  ;;  %v11528_v61 = vld [vmem:[%s18358_s0 + $0xa0] sm:$0xff]  ;;  %v67_v2 = vadd.f32 %v66_v56, %v11506_v52  ;;  %v70_v6 = vsel %vm69_vm0, %v11517_v55, 0.0 }
  0x10   :  { %v11533_v62 = vld [vmem:[%s18358_s0 + $0x90] sm:$0xff]  ;;  %v421_v0 = vld [vmem:[%s18362_s4 + $0x20] sm:$0xff]  ;;  %v108_v1 = vadd.f32 %v107_v54, %v11501_v51 }
  0x11   :  { %v84_v59 = vadd.f32 %v83_v44, %v82_v50  ;;  %v11546_v3 = vld [vmem:[%s18358_s0 + $0xd0] sm:$0x1]  ;;  %v93_v4 = vadd.f32 %v92_v57, %v11511_v53 }
  0x12   :  { %304 = vperm.xlu1 %11113, %v275_v9   ;;  %v11554_v7 = vld [vmem:[%s18358_s0 + $0xb0] sm:$0xff]  ;;  %v110_v8 = vadd.f32 %v109_v60, %v108_v1  ;;  %v68_v9 = vadd.f32 %v67_v2, %v11528_v61 }
  0x13   :  { %299 = vperm.xlu0 %11112, %v274_v10   ;;  %v85_v5 = vrot.slane %v84_v59, 4  ;;  %v94_v10 = vadd.f32 %v93_v4, %v11533_v62 }
  0x16   :  { %374 = vperm.xlu1 %11113, %v345_v11  }
  0x17   :  { %369 = vperm.xlu0 %11112, %v344_v12  }
  0x1a   :  { %379 = vperm.xlu1 %11113, %v346_v13  }
  0x1b   :  { %309 = vperm.xlu0 %11112, %v276_v14  }
  0x1e   :  { %431 = vperm.xlu1 %11113, %v418_v19  }
  0x1f   :  { %426 = vperm.xlu0 %11112, %v417_v22  }
  0x22   :  { %441 = vperm.xlu1 %11113, %v420_v34  }
  0x23   :  { %436 = vperm.xlu0 %11112, %v419_v43  }
  0x24   :  { %15 = vsyncpa [#allocation3], 0  ;;  %v86_v11 = vadd.f32 %v85_v5, %v84_v59  ;;  %v96_v12 = vsel %vm69_vm0, %v11546_v3, 0.0  ;;  %v742_v13 = vld [vmem:[%s18364_s6] sm:$0xff]  ;;  %v423_v14 = vld [vmem:[%s18362_s4 + $0x30] sm:$0x1]  ;;  %v71_v19 = vadd.f32 %v70_v6, %v68_v9  ;;  %v95_v22 = vadd.f32 %v94_v10, %v11554_v7 }
  0x25   :  { %v111_v18 = vrot.slane %v110_v8, 4  ;;  %v744_v38 = vld [vmem:[%s18364_s6 + $0x10] sm:$0xff]  ;;  %v743_v39 = vld [vmem:[%s18364_s6 + $0x8] sm:$0xff]  ;;  %v746_v56 = vld [vmem:[%s18364_s6 + $0x20] sm:$0xff]  ;;  %vm459_vm1 = vcmask 400384   ;;  %vm4763_vm2 = vcmask 1043456  }
  0x26   :  { %451 = vperm.xlu1 %11113, %v422_v63   ;;  %v87_v23 = vrot.slane %v86_v11, 2  ;;  %v72_v30 = vrot.slane %v71_v19, 4  ;;  %v97_v34 = vadd.f32 %v96_v12, %v95_v22  ;;  %v745_v57 = vld [vmem:[%s18364_s6 + $0x18] sm:$0xff]  ;;  %v748_v5 = vld [vmem:[%s18364_s6 + $0x30] sm:$0x1]  ;;  %v747_v6 = vld [vmem:[%s18364_s6 + $0x28] sm:$0xff] }
  0x27   :  { %446 = vperm.xlu0 %11112, %v421_v0   ;;  %v112_v29 = vadd.f32 %v111_v18, %v110_v8  ;;  %s11268_s19 = smov 1e-24   ;;  %s11269_s23 = smov [#allocation2]  }
  0x28   :  { %v88_v37 = vadd.f32 %v87_v23, %v86_v11  ;;  %v73_v44 = vadd.f32 %v72_v30, %v71_v19  ;;  %v98_v46 = vrot.slane %v97_v34, 4  ;;  %s9547_s24 = sshll.u32 %s11269_s23, 4  ;;  %s9548_s24 = int_to_ptr.vmem [resolvable:$true] %s9547_s24 }
  0x29   :  { %v113_v43 = vrot.slane %v112_v29, 2  ;;  %s11242_s25 = scalar_lea.vmem %s9548_s24, 512  ;;  %p11247_p1 = scmp.lt.s32.totalorder %s9548_s24, %s9548_s24 }
  0x2a   :  { %751 = vperm.xlu1 %11113, %v742_v13   ;;  %v89_v47 = vrot.slane %v88_v37, 1  ;;  %v99_v50 = vadd.f32 %v98_v46, %v97_v34  ;;  %v74_v60 = vrot.slane %v73_v44, 2  ;;  %p11243_p0 = scmp.ne.s32.totalorder %s9548_s24, %s11242_s25  ;;  %p11248_p2 = scmp.lt.s32.totalorder %s11242_s25, %s11242_s25 }
  0x2b   :  { %456 = vperm.xlu0 %11112, %v423_v14   ;;  %v114_v49 = vadd.f32 %v113_v43, %v112_v29  ;;  %v9594_v14 = vld [vmem:[%s18359_s1 + $0x38] sm:$0xff] }
  0x2c   :  { %v90_v54 = vadd.f32 %v89_v47, %v88_v37  ;;  %v100_v63 = vrot.slane %v99_v50, 2  ;;  %v75_v8 = vadd.f32 %v74_v60, %v73_v44  ;;  %v9602_v37 = vld [vmem:[%s18360_s2 + $0x40] sm:$0xff]  ;;  %p11249_p3 = por %p11248_p2, %p11247_p1 }
  0x2d   :  { %v115_v59 = vrot.slane %v114_v49, 1 }
  0x2e   :  { %761 = vperm.xlu1 %11113, %v744_v38   ;;  %v119_v0 = vmul.f32 0.020408163, %v90_v54  ;;  %v101_v9 = vadd.f32 %v100_v63, %v99_v50  ;;  %v76_v22 = vrot.slane %v75_v8, 1  ;;  %p11250_p4 = pnand %p11249_p3, %p11243_p0 }
  0x2f   :  { %756 = vperm.xlu0 %11112, %v743_v39   ;;  %v116_v1 = vadd.f32 %v115_v59, %v114_v49  ;;  %v9596_v59 = vld [vmem:[%s18359_s1 + $0x48] sm:$0xff] }
  0x30   :  { %v11580_v2 = vsub.f32 %v11372_v15, %v119_v0  ;;  %v11583_v4 = vsub.f32 %v11377_v16, %v119_v0  ;;  %v11592_v10 = vsub.f32 %v11382_v17, %v119_v0  ;;  %v9595_v17 = vld [vmem:[%s18359_s1 + $0x40] sm:$0xff]  ;;  %v11611_v18 = vsub.f32 %v11392_v20, %v119_v0 }
  0x31   :  { %v121_v11 = vmul.f32 0.020408163, %v116_v1  ;;  %v102_v29 = vrot.slane %v101_v9, 1  ;;  %v77_v39 = vadd.f32 %v76_v22, %v75_v8  ;;  %v11644_v54 = vsub.f32 %v11452_v35, %v119_v0 }
  0x32   :  { %771 = vperm.xlu1 %11113, %v746_v56   ;;  %v151_v15 = vmul.f32 %v11580_v2, %v11580_v2  ;;  %v155_v16 = vmul.f32 %v11583_v4, %v11583_v4  ;;  %v163_v43 = vmul.f32 %v11611_v18, %v11611_v18  ;;  %v11647_v56 = vsub.f32 %v11421_v27, %v119_v0 }
  0x33   :  { %766 = vperm.xlu0 %11112, %v745_v57   ;;  %v11599_v12 = vsub.f32 %v11397_v21, %v121_v11  ;;  %v11602_v13 = vsub.f32 %v11406_v24, %v121_v11  ;;  %v11614_v19 = vsub.f32 %v11411_v25, %v121_v11  ;;  %v159_v21 = vmul.f32 %v11592_v10, %v11592_v10 }
  0x34   :  { %v191_v24 = vadd.f32 %v155_v16, %v151_v15  ;;  %v11621_v30 = vsub.f32 %v11426_v28, %v121_v11  ;;  %v11628_v25 = vsub.f32 %v11416_v26, %v119_v0  ;;  %v9601_v28 = vld [vmem:[%s18360_s2 + $0x38] sm:$0xff]  ;;  %v11639_v46 = vsub.f32 %v11457_v36, %v121_v11  ;;  %v9597_v36 = vld [vmem:[%s18359_s1 + $0x50] sm:$0xff]  ;;  %v9603_v15 = vld [vmem:[%s18360_s2 + $0x48] sm:$0xff] }
  0x35   :  { %v153_v23 = vmul.f32 %v11599_v12, %v11599_v12  ;;  %v157_v34 = vmul.f32 %v11602_v13, %v11602_v13  ;;  %v161_v20 = vmul.f32 %v11614_v19, %v11614_v19  ;;  %v103_v47 = vadd.f32 %v102_v29, %v101_v9 }
  0x36   :  { %781 = vperm.xlu1 %11113, %v748_v5   ;;  %v192_v44 = vadd.f32 %v191_v24, %v159_v21  ;;  %v165_v26 = vmul.f32 %v11621_v30, %v11621_v30  ;;  %v118_v50 = vmul.f32 0.020408163, %v77_v39  ;;  %v167_v57 = vmul.f32 %v11628_v25, %v11628_v25 }
  0x37   :  { %776 = vperm.xlu0 %11112, %v747_v6   ;;  %v217_v38 = vadd.f32 %v157_v34, %v153_v23  ;;  %v11658_v60 = vsub.f32 %v11501_v51, %v121_v11  ;;  %v169_v1 = vmul.f32 %v11639_v46, %v11639_v46  ;;  %v120_v6 = vmul.f32 0.020408163, %v103_v47 }
  0x38   :  { %v11661_v35 = vsub.f32 %v11434_v31, %v118_v50  ;;  %v11664_v27 = vsub.f32 %v11439_v32, %v118_v50  ;;  %v11667_v63 = vsub.f32 %v11444_v33, %v118_v50  ;;  %v193_v0 = vadd.f32 %v192_v44, %v163_v43 }
  0x39   :  { %v218_v49 = vadd.f32 %v217_v38, %v161_v20  ;;  %v11672_v5 = vsub.f32 %v11466_v40, %v118_v50  ;;  %v11675_v51 = vsub.f32 %v11506_v52, %v118_v50  ;;  %v171_v33 = vmul.f32 %v11644_v54, %v11644_v54  ;;  %v9604_v52 = vld [vmem:[%s18360_s2 + $0x50] sm:$0xff]  ;;  %v9598_v20 = vld [vmem:[%s18359_s1 + $0x58] sm:$0xff] }
  0x3a   :  { %1278 = vperm.xlu1 %11113, %v9595_v17   ;;  %v150_v31 = vmul.f32 %v11661_v35, %v11661_v35  ;;  %v154_v32 = vmul.f32 %v11664_v27, %v11664_v27  ;;  %v11684_v9 = vsub.f32 %v11486_v45, %v121_v11  ;;  %v158_v40 = vmul.f32 %v11667_v63, %v11667_v63 }
  0x3b   :  { %1273 = vperm.xlu0 %11112, %v9594_v14   ;;  %v219_v8 = vadd.f32 %v218_v49, %v165_v26  ;;  %v173_v16 = vmul.f32 %v11658_v60, %v11658_v60  ;;  %v11697_v17 = vsub.f32 %v11528_v61, %v118_v50  ;;  %v162_v45 = vmul.f32 %v11672_v5, %v11672_v5 }
  0x3c   :  { %v178_v11 = vadd.f32 %v154_v32, %v150_v31  ;;  %v11702_v14 = vsub.f32 %v11517_v55, %v118_v50  ;;  %v11705_v22 = vsub.f32 %v11471_v41, %v120_v6  ;;  %v11708_v21 = vsub.f32 %v11476_v42, %v120_v6 }
  0x3d   :  { %v11711_v24 = vsub.f32 %v11493_v48, %v120_v6  ;;  %v194_v23 = vadd.f32 %v193_v0, %v167_v57  ;;  %v220_v29 = vadd.f32 %v219_v8, %v169_v1  ;;  %v166_v61 = vmul.f32 %v11675_v51, %v11675_v51  ;;  %v9599_v48 = vld [vmem:[%s18359_s1 + $0x60] sm:$0xff] }
  0x3e   :  { %1349 = vperm.xlu1 %11113, %v9602_v37   ;;  %v179_v34 = vadd.f32 %v178_v11, %v158_v40  ;;  %v175_v55 = vmul.f32 %v11647_v56, %v11647_v56  ;;  %v177_v41 = vmul.f32 %v11684_v9, %v11684_v9  ;;  %v11720_v42 = vsub.f32 %v11511_v53, %v120_v6  ;;  %v9606_v0 = vld [vmem:[%s18360_s2 + $0x60] sm:$0xff] }
  0x3f   :  { %1344 = vperm.xlu0 %11112, %v9601_v28   ;;  %v170_v37 = vmul.f32 %v11697_v17, %v11697_v17  ;;  %v152_v38 = vmul.f32 %v11705_v22, %v11705_v22  ;;  %v156_v39 = vmul.f32 %v11708_v21, %v11708_v21  ;;  %v174_v53 = vmul.f32 %v11702_v14, %v11702_v14 }
  0x40   :  { %v180_v28 = vadd.f32 %v179_v34, %v162_v45  ;;  %v11737_v43 = vsub.f32 %v11533_v62, %v120_v6  ;;  %v160_v44 = vmul.f32 %v11711_v24, %v11711_v24  ;;  %v195_v47 = vadd.f32 %v194_v23, %v171_v33  ;;  %v9600_v45 = vld [vmem:[%s18359_s1 + $0x68] sm:$0x1] }
  0x41   :  { %v221_v26 = vadd.f32 %v220_v29, %v173_v16  ;;  %v11742_v50 = vsub.f32 %v11546_v3, %v120_v6  ;;  %v196_v57 = vsel %vm69_vm0, %v175_v55, 0.0  ;;  %v164_v62 = vmul.f32 %v11720_v42, %v11720_v42  ;;  %v9605_v3 = vld [vmem:[%s18360_s2 + $0x58] sm:$0xff]  ;;  %v9607_v16 = vld [vmem:[%s18360_s2 + $0x68] sm:$0x1] }
  0x42   :  { %1288 = vperm.xlu1 %11113, %v9597_v36   ;;  %v181_v49 = vadd.f32 %v180_v28, %v166_v61  ;;  %v11746_v36 = vsub.f32 %v11554_v7, %v120_v6  ;;  %v222_v1 = vsel %vm69_vm0, %v177_v41, 0.0  ;;  %v183_v31 = vsel %vm69_vm0, %v174_v53, 0.0  ;;  %v9616_v41 = vld [vmem:[%s18362_s4 + $0x40] sm:$0xff]  ;;  %v9618_v53 = vld [vmem:[%s18362_s4 + $0x50] sm:$0xff] }
  0x43   :  { %1283 = vperm.xlu0 %11112, %v9596_v59   ;;  %v204_v59 = vadd.f32 %v156_v39, %v152_v38  ;;  %v168_v7 = vmul.f32 %v11737_v43, %v11737_v43  ;;  %v197_v32 = vadd.f32 %v196_v57, %v195_v47  ;;  %v176_v33 = vmul.f32 %v11742_v50, %v11742_v50 }
  0x44   :  { %v182_v8 = vadd.f32 %v181_v49, %v170_v37  ;;  %v223_v40 = vadd.f32 %v222_v1, %v221_v26 }
  0x45   :  { %v205_v6 = vadd.f32 %v204_v59, %v160_v44  ;;  %v198_v29 = vrot.slane %v197_v32, 4  ;;  %v209_v61 = vsel %vm69_vm0, %v176_v33, 0.0  ;;  %v9617_v44 = vld [vmem:[%s18362_s4 + $0x48] sm:$0xff]  ;;  %v9619_v59 = vld [vmem:[%s18362_s4 + $0x58] sm:$0xff] }
  0x46   :  { %1359 = vperm.xlu1 %11113, %v9604_v52   ;;  %v172_v52 = vmul.f32 %v11746_v36, %v11746_v36  ;;  %v184_v11 = vadd.f32 %v183_v31, %v182_v8  ;;  %v224_v34 = vrot.slane %v223_v40, 4  ;;  %v9647_v31 = vld [vmem:[%s18364_s6 + $0x38] sm:$0xff] }
  0x47   :  { %1354 = vperm.xlu0 %11112, %v9603_v15   ;;  %v206_v15 = vadd.f32 %v205_v6, %v164_v62  ;;  %v199_v28 = vadd.f32 %v198_v29, %v197_v32  ;;  %v9620_v62 = vld [vmem:[%s18362_s4 + $0x60] sm:$0xff]  ;;  %v9651_v29 = vld [vmem:[%s18364_s6 + $0x58] sm:$0xff] }
  0x48   :  { %v225_v38 = vadd.f32 %v224_v34, %v223_v40 }
  0x49   :  { %v207_v23 = vadd.f32 %v206_v15, %v168_v7  ;;  %v200_v49 = vrot.slane %v199_v28, 2  ;;  %v9621_v7 = vld [vmem:[%s18362_s4 + $0x68] sm:$0x1]  ;;  %v9648_v15 = vld [vmem:[%s18364_s6 + $0x40] sm:$0xff] }
  0x4a   :  { %1298 = vperm.xlu1 %11113, %v9599_v48   ;;  %v9615_v48 = vld [vmem:[%s18362_s4 + $0x38] sm:$0xff]  ;;  %v226_v57 = vrot.slane %v225_v38, 2 }
  0x4b   :  { %1293 = vperm.xlu0 %11112, %v9598_v20   ;;  %v208_v55 = vadd.f32 %v207_v23, %v172_v52  ;;  %v185_v20 = vrot.slane %v184_v11, 4  ;;  %v201_v1 = vadd.f32 %v200_v49, %v199_v28  ;;  %v9649_v52 = vld [vmem:[%s18364_s6 + $0x48] sm:$0xff] }
  0x4c   :  { %v227_v8 = vadd.f32 %v226_v57, %v225_v38  ;;  %v9680_v57 = vld [vmem:[%s18360_s2 + $0x78] sm:$0xff] }
  0x4d   :  { %v210_v37 = vadd.f32 %v209_v61, %v208_v55  ;;  %v186_v47 = vadd.f32 %v185_v20, %v184_v11  ;;  %v202_v33 = vrot.slane %v201_v1, 1  ;;  %v9650_v61 = vld [vmem:[%s18364_s6 + $0x50] sm:$0xff]  ;;  %v9653_v20 = vld [vmem:[%s18364_s6 + $0x68] sm:$0x1] }
  0x4e   :  { %1369 = vperm.xlu1 %11113, %v9606_v0   ;;  %v228_v40 = vrot.slane %v227_v8, 1 }
  0x4f   :  { %1364 = vperm.xlu0 %11112, %v9605_v3   ;;  %v211_v39 = vrot.slane %v210_v37, 4  ;;  %v187_v0 = vrot.slane %v186_v47, 2  ;;  %v203_v11 = vadd.f32 %v202_v33, %v201_v1  ;;  %v9682_v1 = vld [vmem:[%s18360_s2 + $0x88] sm:$0xff]  ;;  %v9676_v33 = vld [vmem:[%s18359_s1 + $0x90] sm:$0xff] }
  0x50   :  { %v229_v23 = vadd.f32 %v228_v40, %v227_v8  ;;  %v9681_v8 = vld [vmem:[%s18360_s2 + $0x80] sm:$0xff] }
  0x51   :  { %v212_v26 = vadd.f32 %v211_v39, %v210_v37  ;;  %v188_v6 = vadd.f32 %v187_v0, %v186_v47  ;;  %v9652_v37 = vld [vmem:[%s18364_s6 + $0x60] sm:$0xff]  ;;  %v9672_v47 = vld [vmem:[%s18359_s1 + $0x70] sm:$0xff] }
  0x52   :  { %1374 = vperm.xlu1 %11113, %v9607_v16   ;;  %v9674_v0 = vld [vmem:[%s18359_s1 + $0x80] sm:$0xff] }
  0x53   :  { %1303 = vperm.xlu0 %11112, %v9600_v45   ;;  %v213_v3 = vrot.slane %v212_v26, 2  ;;  %v189_v16 = vrot.slane %v188_v6, 1 }
  0x55   :  { %v214_v32 = vadd.f32 %v213_v3, %v212_v26  ;;  %v190_v34 = vadd.f32 %v189_v16, %v188_v6 }
  0x56   :  { %1428 = vperm.xlu1 %11113, %v9616_v41   ;;  %v231_v41 = vmul.f32 0.020408163, %v203_v11 }
  0x57   :  { %1423 = vperm.xlu0 %11112, %v9615_v48   ;;  %v215_v45 = vrot.slane %v214_v32, 1  ;;  %v233_v48 = vmul.f32 0.020408163, %v229_v23  ;;  %v230_v28 = vmul.f32 0.020408163, %v190_v34 }
  0x58   :  { %v235_v39 = vadd.f32 1e-05, %v231_v41 }
  0x59   :  { %v216_v55 = vadd.f32 %v215_v45, %v214_v32  ;;  %v234_v26 = vadd.f32 1e-05, %v230_v28  ;;  %v9677_v32 = vld [vmem:[%s18359_s1 + $0x98] sm:$0xff] }
  0x5a   :  { %1438 = vperm.xlu1 %11113, %v9618_v53   ;;  %v237_v53 = vadd.f32 1e-05, %v233_v48  ;;  %11118 = vrsqrt.f32 %v235_v39 }
  0x5b   :  { %1433 = vperm.xlu0 %11112, %v9617_v44   ;;  %v232_v38 = vmul.f32 0.020408163, %v216_v55  ;;  %v9673_v44 = vld [vmem:[%s18359_s1 + $0x78] sm:$0xff] }
  0x5c   :  { %11120 = vrsqrt.f32 %v237_v53 }
  0x5d   :  { %v236_v49 = vadd.f32 1e-05, %v232_v38  ;;  %11122 = vrsqrt.f32 %v234_v26 }
  0x5e   :  { %1448 = vperm.xlu1 %11113, %v9620_v62   ;;  %v9679_v62 = vld [vmem:[%s18360_s2 + $0x70] sm:$0xff] }
  0x5f   :  { %1443 = vperm.xlu0 %11112, %v9619_v59   ;;  %11124 = vrsqrt.f32 %v236_v49  ;;  %v9675_v59 = vld [vmem:[%s18359_s1 + $0x88] sm:$0xff] }
  0x62   :  { %1749 = vperm.xlu1 %11113, %v9647_v31  }
  0x63   :  { %1453 = vperm.xlu0 %11112, %v9621_v7  }
  0x64   :  { %v11831_v3 = vpop.eup %11118 }
  0x65   :  { %v243_v40 = vmul.f32 %v11831_v3, %v11580_v2  ;;  %v247_v11 = vmul.f32 %v11831_v3, %v11583_v4  ;;  %v9683_v4 = vld [vmem:[%s18360_s2 + $0x90] sm:$0xff]  ;;  %v11881_v55 = vmul.f32 %v11831_v3, %v11628_v25  ;;  %v11885_v41 = vmul.f32 %v11831_v3, %v11644_v54  ;;  %v9685_v54 = vld [vmem:[%s18360_s2 + $0xa0] sm:$0x1] }
  0x66   :  { %1759 = vperm.xlu1 %11113, %v9649_v52   ;;  %v11839_v31 = vpop.eup %11120 }
  0x67   :  { %1754 = vperm.xlu0 %11112, %v9648_v15   ;;  %v11841_v7 = vpop.eup %11122  ;;  %v245_v52 = vmul.f32 %v11839_v31, %v11599_v12  ;;  %v251_v12 = vmul.f32 %v11831_v3, %v11592_v10  ;;  %v253_v10 = vmul.f32 %v11839_v31, %v11614_v19  ;;  %v11893_v19 = vmul.f32 %v11839_v31, %v11639_v46 }
  0x68   :  { %v242_v15 = vmul.f32 %v11841_v7, %v11661_v35  ;;  %v246_v2 = vmul.f32 %v11841_v7, %v11664_v27  ;;  %v9684_v35 = vld [vmem:[%s18360_s2 + $0x98] sm:$0xff]  ;;  %v254_v46 = vmul.f32 %v11841_v7, %v11672_v5 }
  0x69   :  { %v11843_v6 = vpop.eup %11124 }
  0x6a   :  { %1769 = vperm.xlu1 %11113, %v9651_v29   ;;  %v244_v23 = vmul.f32 %v11843_v6, %v11705_v22  ;;  %v249_v29 = vmul.f32 %v11839_v31, %v11602_v13  ;;  %v248_v34 = vmul.f32 %v11843_v6, %v11708_v21  ;;  %v255_v13 = vmul.f32 %v11831_v3, %v11611_v18 }
  0x6b   :  { %1764 = vperm.xlu0 %11112, %v9650_v61   ;;  %v257_v21 = vmul.f32 %v11839_v31, %v11621_v30  ;;  %v250_v18 = vmul.f32 %v11841_v7, %v11667_v63  ;;  %v9678_v30 = vld [vmem:[%s18359_s1 + $0xa0] sm:$0x1] }
  0x6e   :  { %1779 = vperm.xlu1 %11113, %v9653_v20  }
  0x6f   :  { %1774 = vperm.xlu0 %11112, %v9652_v37  }
  0x72   :  { %2276 = vperm.xlu1 %11113, %v9673_v44  }
  0x73   :  { %2271 = vperm.xlu0 %11112, %v9672_v47  }
  0x76   :  { %2347 = vperm.xlu1 %11113, %v9680_v57  }
  0x77   :  { %2342 = vperm.xlu0 %11112, %v9679_v62  }
  0x7a   :  { %2286 = vperm.xlu1 %11113, %v9675_v59  }
  0x7b   :  { %2281 = vperm.xlu0 %11112, %v9674_v0  }
  0x7e   :  { %2357 = vperm.xlu1 %11113, %v9682_v1   ;;  %v252_v1 = vmul.f32 %v11843_v6, %v11711_v24  ;;  %v265_v24 = vmul.f32 %v11839_v31, %v11658_v60  ;;  %v9696_v60 = vld [vmem:[%s18362_s4 + $0x88] sm:$0xff] }
  0x7f   :  { %2352 = vperm.xlu0 %11112, %v9681_v8   ;;  %v256_v8 = vmul.f32 %v11843_v6, %v11720_v42 }
  0x81   :  { %v350_v16 = vpop.permute.xlu1 %349 }
  0x82   :  { %v280_v45 = vpop.permute.xlu0 %279  ;;  %2296 = vperm.xlu1 %11113, %v9677_v32  }
  0x83   :  { %2291 = vperm.xlu0 %11112, %v9676_v33   ;;  %v313_v22 = vmul.f32 %v280_v45, %v243_v40  ;;  %v315_v61 = vmul.f32 %v280_v45, %v245_v52  ;;  %v312_v27 = vmul.f32 %v280_v45, %v242_v15  ;;  %v314_v37 = vmul.f32 %v280_v45, %v244_v23  ;;  %v9694_v52 = vld [vmem:[%s18362_s4 + $0x78] sm:$0xff]  ;;  %v9693_v15 = vld [vmem:[%s18362_s4 + $0x70] sm:$0xff] }
  0x85   :  { %v355_v48 = vpop.permute.xlu1 %354  ;;  %v383_v39 = vadd.f32 %v350_v16, %v313_v22  ;;  %v385_v53 = vadd.f32 %v350_v16, %v315_v61  ;;  %v382_v26 = vadd.f32 %v350_v16, %v312_v27  ;;  %v384_v59 = vadd.f32 %v350_v16, %v314_v37 }
  0x86   :  { %v285_v20 = vpop.permute.xlu0 %284  ;;  %2367 = vperm.xlu1 %11113, %v9684_v35  }
  0x87   :  { %2362 = vperm.xlu0 %11112, %v9683_v4   ;;  %v317_v25 = vmul.f32 %v285_v20, %v247_v11  ;;  %v319_v28 = vmul.f32 %v285_v20, %v249_v29  ;;  %v316_v38 = vmul.f32 %v285_v20, %v246_v2  ;;  %v318_v63 = vmul.f32 %v285_v20, %v248_v34 }
  0x89   :  { %v387_v44 = vadd.f32 %v355_v48, %v317_v25  ;;  %v389_v47 = vadd.f32 %v355_v48, %v319_v28  ;;  %v386_v49 = vadd.f32 %v355_v48, %v316_v38  ;;  %v295_v57 = vpop.permute.xlu1 %294  ;;  %v388_v0 = vadd.f32 %v355_v48, %v318_v63 }
  0x8a   :  { %v290_v62 = vpop.permute.xlu0 %289  ;;  %2372 = vperm.xlu1 %11113, %v9685_v54   ;;  %v325_v45 = vmul.f32 %v295_v57, %v255_v13  ;;  %v327_v11 = vmul.f32 %v295_v57, %v257_v21  ;;  %v324_v35 = vmul.f32 %v295_v57, %v254_v46  ;;  %v326_v22 = vmul.f32 %v295_v57, %v256_v8  ;;  %v9695_v13 = vld [vmem:[%s18362_s4 + $0x80] sm:$0xff] }
  0x8b   :  { %2301 = vperm.xlu0 %11112, %v9678_v30   ;;  %v10138_v32 = vpack.c.bf16 %v387_v44, %v383_v39  ;;  %v10150_v33 = vpack.c.bf16 %v389_v47, %v385_v53  ;;  %v10140_v40 = vpack.c.bf16 %v386_v49, %v382_v26  ;;  %v10152_v5 = vpack.c.bf16 %v388_v0, %v384_v59 }
  0x8c   :  { %v321_v16 = vmul.f32 %v290_v62, %v251_v12  ;;  %v323_v42 = vmul.f32 %v290_v62, %v253_v10  ;;  %v320_v23 = vmul.f32 %v290_v62, %v250_v18  ;;  %v322_v4 = vmul.f32 %v290_v62, %v252_v1  ;;  %v9699_v1 = vld [vmem:[%s18362_s4 + $0xa0] sm:$0x1] }
  0x8d   :  { %10139 = vmatprep.subr.bf16.mxu0 %v10138_v32  ;;  %10151 = vmatprep.subr.bf16.mxu1 %v10150_v33  ;;  %v365_v29 = vpop.permute.xlu1 %364  ;;  %v258_v18 = vmul.f32 %v11841_v7, %v11675_v51  ;;  %v262_v25 = vmul.f32 %v11841_v7, %v11697_v17  ;;  %v260_v39 = vmul.f32 %v11843_v6, %v11737_v43  ;;  %v9698_v17 = vld [vmem:[%s18362_s4 + $0x98] sm:$0xff]  ;;  %v9697_v43 = vld [vmem:[%s18362_s4 + $0x90] sm:$0xff] }
  0x8e   :  { %v360_v2 = vpop.permute.xlu0 %359  ;;  %10141 = vmatpush1.bf16.msra.mxu0 %v10140_v40  ;;  %10153 = vmatpush1.bf16.msra.mxu1 %v10152_v5  ;;  %v395_v12 = vadd.f32 %v365_v29, %v325_v45  ;;  %v397_v27 = vadd.f32 %v365_v29, %v327_v11  ;;  %v394_v48 = vadd.f32 %v365_v29, %v324_v35  ;;  %v9727_v11 = vld [vmem:[%s18364_s6 + $0x80] sm:$0xff] }
  0x8f   :  { %2426 = vperm.xlu1 %11113, %v9694_v52   ;;  %2421 = vperm.xlu0 %11112, %v9693_v15   ;;  %v391_v61 = vadd.f32 %v360_v2, %v321_v16  ;;  %v393_v34 = vadd.f32 %v360_v2, %v323_v42  ;;  %v390_v10 = vadd.f32 %v360_v2, %v320_v23  ;;  %v9726_v23 = vld [vmem:[%s18364_s6 + $0x78] sm:$0xff] }
  0x90   :  { %v392_v20 = vadd.f32 %v360_v2, %v322_v4  ;;  %v396_v21 = vadd.f32 %v365_v29, %v326_v22  ;;  %v264_v53 = vmul.f32 %v11843_v6, %v11746_v36  ;;  %v267_v46 = vmul.f32 %v11831_v3, %v11647_v56 }
  0x91   :  { %v10142_v37 = vpack.c.bf16 %v395_v12, %v391_v61  ;;  %v305_v28 = vpop.permute.xlu1 %304  ;;  %v10154_v54 = vpack.c.bf16 %v397_v27, %v393_v34  ;;  %v10144_v30 = vpack.c.bf16 %v394_v48, %v390_v10  ;;  %v269_v51 = vmul.f32 %v11839_v31, %v11684_v9  ;;  %v410_v12 = vld [vmem:[%s18361_s3] sm:$0xff]  ;;  %v9729_v34 = vld [vmem:[%s18364_s6 + $0x90] sm:$0xff]  ;;  %v411_v10 = vld [vmem:[%s18361_s3 + $0x8] sm:$0xff] }
  0x92   :  { %v300_v38 = vpop.permute.xlu0 %299  ;;  %v10156_v63 = vpack.c.bf16 %v396_v21, %v392_v20  ;;  %v266_v36 = vmul.f32 %v11841_v7, %v11702_v14  ;;  %v268_v44 = vmul.f32 %v11843_v6, %v11742_v50  ;;  %v333_v9 = vmul.f32 %v305_v28, %v11885_v41  ;;  %v9725_v6 = vld [vmem:[%s18364_s6 + $0x70] sm:$0xff]  ;;  %v9731_v48 = vld [vmem:[%s18364_s6 + $0xa0] sm:$0x1]  ;;  %v9730_v20 = vld [vmem:[%s18364_s6 + $0x98] sm:$0xff] }
  0x93   :  { %2436 = vperm.xlu1 %11113, %v9696_v60   ;;  %2431 = vperm.xlu0 %11112, %v9695_v13   ;;  %v329_v56 = vmul.f32 %v300_v38, %v11881_v55  ;;  %v331_v3 = vmul.f32 %v300_v38, %v11893_v19  ;;  %v335_v31 = vmul.f32 %v305_v28, %v265_v24  ;;  %v9728_v60 = vld [vmem:[%s18364_s6 + $0x88] sm:$0xff] }
  0x94   :  { %10143 = vmatprep.subr.bf16.mxu0 %v10142_v37  ;;  %10155 = vmatprep.subr.bf16.mxu1 %v10154_v54  ;;  %v328_v49 = vmul.f32 %v300_v38, %v258_v18  ;;  %v332_v57 = vmul.f32 %v305_v28, %v262_v25  ;;  %v330_v62 = vmul.f32 %v300_v38, %v260_v39  ;;  %v412_v18 = vld [vmem:[%s18361_s3 + $0x10] sm:$0xff] }
  0x95   :  { %10145 = vmatpush1.bf16.msra.mxu0 %v10144_v30  ;;  %10157 = vmatpush1.bf16.msra.mxu1 %v10156_v63  ;;  %v375_v47 = vpop.permute.xlu1 %374  ;;  %v334_v59 = vmul.f32 %v305_v28, %v264_v53  ;;  %v9751_v25 = vld [vmem:[%s18359_s1 + $0xb0] sm:$0xff]  ;;  %v9750_v28 = vld [vmem:[%s18359_s1 + $0xa8] sm:$0xff]  ;;  %v413_v30 = vld [vmem:[%s18361_s3 + $0x18] sm:$0xff] }
  0x96   :  { %v370_v26 = vpop.permute.xlu0 %369  ;;  %v403_v7 = vadd.f32 %v375_v47, %v333_v9  ;;  %v405_v55 = vadd.f32 %v375_v47, %v335_v31  ;;  %v402_v0 = vadd.f32 %v375_v47, %v332_v57  ;;  %v9758_v39 = vld [vmem:[%s18360_s2 + $0xb0] sm:$0xff]  ;;  %v9757_v53 = vld [vmem:[%s18360_s2 + $0xa8] sm:$0xff]  ;;  %v9760_v9 = vld [vmem:[%s18360_s2 + $0xc0] sm:$0xff] }
  0x97   :  { %2446 = vperm.xlu1 %11113, %v9698_v17   ;;  %2441 = vperm.xlu0 %11112, %v9697_v43   ;;  %v399_v14 = vadd.f32 %v370_v26, %v329_v56  ;;  %v401_v50 = vadd.f32 %v370_v26, %v331_v3  ;;  %v398_v41 = vadd.f32 %v370_v26, %v328_v49  ;;  %v9753_v17 = vld [vmem:[%s18359_s1 + $0xc0] sm:$0xff]  ;;  %v9752_v43 = vld [vmem:[%s18359_s1 + $0xb8] sm:$0xff]  ;;  %v415_v56 = vld [vmem:[%s18361_s3 + $0x28] sm:$0xff] }
  0x98   :  { %v400_v19 = vadd.f32 %v370_v26, %v330_v62  ;;  %v404_v32 = vadd.f32 %v375_v47, %v334_v59  ;;  %v9759_v3 = vld [vmem:[%s18360_s2 + $0xb8] sm:$0xff]  ;;  %v416_v26 = vld [vmem:[%s18361_s3 + $0x30] sm:$0x1]  ;;  %v9754_v57 = vld [vmem:[%s18359_s1 + $0xc8] sm:$0xff] }
  0x99   :  { %v10146_v8 = vpack.c.bf16 %v403_v7, %v399_v14  ;;  %v380_v33 = vpop.permute.xlu1 %379  ;;  %v10158_v5 = vpack.c.bf16 %v405_v55, %v401_v50  ;;  %v10148_v52 = vpack.c.bf16 %v402_v0, %v398_v41  ;;  %v9755_v49 = vld [vmem:[%s18359_s1 + $0xd0] sm:$0xff]  ;;  %v9761_v7 = vld [vmem:[%s18360_s2 + $0xc8] sm:$0xff]  ;;  %v9763_v55 = vld [vmem:[%s18360_s2 + $0xd8] sm:$0x1] }
  0x9a   :  { %v310_v40 = vpop.permute.xlu0 %309  ;;  %v10160_v42 = vpack.c.bf16 %v404_v32, %v400_v19  ;;  %v9762_v14 = vld [vmem:[%s18360_s2 + $0xd0] sm:$0xff]  ;;  %v9756_v41 = vld [vmem:[%s18359_s1 + $0xd8] sm:$0x1] }
  0x9b   :  { %v336_v15 = vmul.f32 %v310_v40, %v266_v36  ;;  %v337_v16 = vmul.f32 %v310_v40, %v267_v46  ;;  %v338_v45 = vmul.f32 %v310_v40, %v268_v44  ;;  %v339_v24 = vmul.f32 %v310_v40, %v269_v51  ;;  %2747 = vperm.xlu1 %11113, %v9725_v6   ;;  %v414_v51 = vld [vmem:[%s18361_s3 + $0x20] sm:$0xff] }
  0x9c   :  { %2451 = vperm.xlu0 %11112, %v9699_v1   ;;  %10147 = vmatprep.subr.bf16.mxu0 %v10146_v8  ;;  %v9772_v1 = vld [vmem:[%s18362_s4 + $0xb0] sm:$0xff]  ;;  %v9771_v8 = vld [vmem:[%s18362_s4 + $0xa8] sm:$0xff]  ;;  %v9774_v40 = vld [vmem:[%s18362_s4 + $0xc0] sm:$0xff] }
  0x9d   :  { %10159 = vmatprep.subr.bf16.mxu1 %v10158_v5  ;;  %10149 = vmatpush1.bf16.msra.mxu0 %v10148_v52  ;;  %v407_v29 = vadd.f32 %v380_v33, %v337_v16  ;;  %v409_v2 = vadd.f32 %v380_v33, %v339_v24  ;;  %v406_v35 = vadd.f32 %v380_v33, %v336_v15  ;;  %v11958_v4 = vpop.permute.xlu1 %431  ;;  %v9773_v5 = vld [vmem:[%s18362_s4 + $0xb8] sm:$0xff]  ;;  %v9776_v16 = vld [vmem:[%s18362_s4 + $0xd0] sm:$0xff] }
  0x9e   :  { %10161 = vmatpush1.bf16.msra.mxu1 %v10160_v42  ;;  %v11960_v22 = vpop.permute.xlu0 %426  ;;  %v408_v61 = vadd.f32 %v380_v33, %v338_v45  ;;  %v9775_v45 = vld [vmem:[%s18362_s4 + $0xc8] sm:$0xff] }
  0x9f   :  { %2757 = vperm.xlu1 %11113, %v9727_v11   ;;  %9558 = vmatprep.subr.msk.mxu0 %vm69_vm0, %v407_v29  ;;  %v9803_v11 = vld [vmem:[%s18364_s6 + $0xa8] sm:$0xff] }
  0xa0   :  { %2752 = vperm.xlu0 %11112, %v9726_v23   ;;  %9567 = vmatprep.subr.msk.mxu1 %vm69_vm0, %v409_v2  ;;  %v9777_v23 = vld [vmem:[%s18362_s4 + $0xd8] sm:$0x1] }
  0xa1   :  { %9559 = vmatpush1.msk.msra.mxu0 %vm69_vm0, %v406_v35  ;;  %v11976_v13 = vpop.permute.xlu1 %441  ;;  %v9805_v35 = vld [vmem:[%s18364_s6 + $0xb8] sm:$0xff] }
  0xa2   :  { %9568 = vmatpush1.msk.msra.mxu1 %vm69_vm0, %v408_v61  ;;  %9560 = vmatmul.mubr.msk.f32.vlgmr.msra.gmra.mrb[0].mxu0 %vm459_vm1, %v410_v12  ;;  %v11978_v27 = vpop.permute.xlu0 %436  ;;  %v9804_v61 = vld [vmem:[%s18364_s6 + $0xb0] sm:$0xff] }
  0xa3   :  { %9569 = vmatmul.mubr.msk.f32.vlgmr.msra.gmra.mrb[0].mxu1 %vm459_vm1, %v410_v12  ;;  %2767 = vperm.xlu1 %11113, %v9729_v34  }
  0xa4   :  { %2762 = vperm.xlu0 %11112, %v9728_v60   ;;  %563 = vmatprep.mubr.f32.mxu0 %v18369_v58  ;;  %v9807_v60 = vld [vmem:[%s18364_s6 + $0xc8] sm:$0xff] }
  0xa5   :  { %670 = vmatprep.mubr.f32.mxu1 %v18369_v58  ;;  %v11993_v37 = vpop.permute.xlu1 %451 }
  0xa6   :  { %9561 = vmatmul.mubr.msk.f32.gmra.mrb[2].mxu0 %vm459_vm1, %v411_v10  ;;  %v11995_v21 = vpop.permute.xlu0 %446 }
  0xa7   :  { %9570 = vmatmul.mubr.msk.f32.gmra.mrb[2].mxu1 %vm459_vm1, %v411_v10  ;;  %2777 = vperm.xlu1 %11113, %v9731_v48   ;;  %v9806_v10 = vld [vmem:[%s18364_s6 + $0xc0] sm:$0xff] }
  0xa8   :  { %2772 = vperm.xlu0 %11112, %v9730_v20   ;;  %569 = vmatprep.mubr.f32.mxu0 %v18369_v58 }
  0xa9   :  { %676 = vmatprep.mubr.f32.mxu1 %v18369_v58  ;;  %v12010_v38 = vpop.permute.xlu1 %751 }
  0xaa   :  { %9562 = vmatmul.mubr.msk.f32.gmra.mrb[4].mxu0 %vm459_vm1, %v412_v18  ;;  %v12012_v54 = vpop.permute.xlu0 %456 }
  0xab   :  { %9571 = vmatmul.mubr.msk.f32.gmra.mrb[4].mxu1 %vm459_vm1, %v412_v18  ;;  %3274 = vperm.xlu1 %11113, %v9751_v25   ;;  %v9809_v18 = vld [vmem:[%s18364_s6 + $0xd8] sm:$0x1]  ;;  %v9808_v25 = vld [vmem:[%s18364_s6 + $0xd0] sm:$0xff] }
  0xac   :  { %3269 = vperm.xlu0 %11112, %v9750_v28   ;;  %575 = vmatprep.mubr.f32.mxu0 %v18369_v58 }
  0xad   :  { %682 = vmatprep.mubr.f32.mxu1 %v18369_v58  ;;  %v12027_v63 = vpop.permute.xlu1 %761 }
  0xae   :  { %9563 = vmatmul.mubr.msk.f32.gmra.mrb[6].mxu0 %vm459_vm1, %v413_v30  ;;  %v12029_v46 = vpop.permute.xlu0 %756 }
  0xaf   :  { %9572 = vmatmul.mubr.msk.f32.gmra.mrb[6].mxu1 %vm459_vm1, %v413_v30  ;;  %3345 = vperm.xlu1 %11113, %v9758_v39   ;;  %v5033_v39 = vld [vmem:[%s18359_s1 + $0x8] sm:$0xff] }
  0xb0   :  { %3340 = vperm.xlu0 %11112, %v9757_v53   ;;  %581 = vmatprep.mubr.f32.mxu0 %v18369_v58  ;;  %v5032_v53 = vld [vmem:[%s18359_s1] sm:$0xff] }
  0xb1   :  { %688 = vmatprep.mubr.f32.mxu1 %v18369_v58  ;;  %v12044_v36 = vpop.permute.xlu1 %771 }
  0xb2   :  { %9564 = vmatmul.mubr.msk.f32.gmra.mrb[8].mxu0 %vm459_vm1, %v414_v51  ;;  %v12046_v44 = vpop.permute.xlu0 %766 }
  0xb3   :  { %9573 = vmatmul.mubr.msk.f32.gmra.mrb[8].mxu1 %vm459_vm1, %v414_v51  ;;  %3284 = vperm.xlu1 %11113, %v9753_v17  }
  0xb4   :  { %3279 = vperm.xlu0 %11112, %v9752_v43   ;;  %587 = vmatprep.mubr.f32.mxu0 %v18369_v58  ;;  %v5103_v43 = vld [vmem:[%s18360_s2 + $0x8] sm:$0xff] }
  0xb5   :  { %694 = vmatprep.mubr.f32.mxu1 %v18369_v58  ;;  %v12061_v31 = vpop.permute.xlu1 %781 }
  0xb6   :  { %9565 = vmatmul.mubr.msk.f32.gmra.mrb[10].mxu0 %vm459_vm1, %v415_v56  ;;  %v12063_v47 = vpop.permute.xlu0 %776 }
  0xb7   :  { %9574 = vmatmul.mubr.msk.f32.gmra.mrb[10].mxu1 %vm459_vm1, %v415_v56  ;;  %3355 = vperm.xlu1 %11113, %v9760_v9   ;;  %v5102_v56 = vld [vmem:[%s18360_s2] sm:$0xff] }
  0xb8   :  { %3350 = vperm.xlu0 %11112, %v9759_v3   ;;  %593 = vmatprep.mubr.f32.mxu0 %v18369_v58 }
  0xb9   :  { %700 = vmatprep.mubr.f32.mxu1 %v18369_v58  ;;  %v12078_v62 = vpop.permute.xlu1 %1278 }
  0xba   :  { %9566 = vmatmul.mubr.msk.f32.gmra.mrb[12].mxu0 %vm459_vm1, %v416_v26  ;;  %v12080_v59 = vpop.permute.xlu0 %1273 }
  0xbb   :  { %9575 = vmatmul.mubr.msk.f32.gmra.mrb[12].mxu1 %vm459_vm1, %v416_v26  ;;  %3294 = vperm.xlu1 %11113, %v9755_v49   ;;  %v5035_v26 = vld [vmem:[%s18359_s1 + $0x18] sm:$0xff]  ;;  %v5034_v49 = vld [vmem:[%s18359_s1 + $0x10] sm:$0xff] }
  0xbc   :  { %3289 = vperm.xlu0 %11112, %v9754_v57   ;;  %881 = vmatprep.mubr.f32.mxu0 %v18369_v58 }
  0xbd   :  { %v12090_v50 = vpop.permute.xlu1 %1349  ;;  %988 = vmatprep.mubr.f32.mxu1 %v18369_v58  ;;  %v9908_v58 = vld [vmem:[%s18360_s2 + $0x50] sm:$0xff] }
  0xbe   :  { %v12092_v6 = vpop.permute.xlu0 %1344 }
  0xbf   :  { %3365 = vperm.xlu1 %11113, %v9762_v14  }
  0xc0   :  { %3360 = vperm.xlu0 %11112, %v9761_v7   ;;  %v5105_v7 = vld [vmem:[%s18360_s2 + $0x18] sm:$0xff] }
  0xc1   :  { %v12101_v0 = vpop.permute.xlu1 %1288 }
  0xc2   :  { %v12103_v19 = vpop.permute.xlu0 %1283 }
  0xc3   :  { %3370 = vperm.xlu1 %11113, %v9763_v55   ;;  %v5104_v55 = vld [vmem:[%s18360_s2 + $0x10] sm:$0xff] }
  0xc4   :  { %3299 = vperm.xlu0 %11112, %v9756_v41  }
  0xc5   :  { %v12111_v32 = vpop.permute.xlu1 %1359 }
  0xc6   :  { %v12113_v33 = vpop.permute.xlu0 %1354 }
  0xc7   :  { %3424 = vperm.xlu1 %11113, %v9772_v1  }
  0xc8   :  { %3419 = vperm.xlu0 %11112, %v9771_v8   ;;  %v5037_v8 = vld [vmem:[%s18359_s1 + $0x28] sm:$0xff] }
  0xc9   :  { %v12121_v52 = vpop.permute.xlu1 %1298 }
  0xca   :  { %18619 = vst [vmem:[#allocation5_spill] sm:$0xff] %v12121_v52  ;;  %v12123_v15 = vpop.permute.xlu0 %1293 }
  0xcb   :  { %3434 = vperm.xlu1 %11113, %v9774_v40   ;;  %v5036_v40 = vld [vmem:[%s18359_s1 + $0x20] sm:$0xff] }
  0xcc   :  { %3429 = vperm.xlu0 %11112, %v9773_v5  }
  0xcd   :  { %v12131_v24 = vpop.permute.xlu1 %1369 }
  0xce   :  { %18620 = vst [vmem:[#allocation6_spill] sm:$0xff] %v12131_v24  ;;  %v12133_v42 = vpop.permute.xlu0 %1364 }
  0xcf   :  { %18621 = vst [vmem:[#allocation7_spill] sm:$0xff] %v12133_v42  ;;  %3444 = vperm.xlu1 %11113, %v9776_v16   ;;  %v5107_v16 = vld [vmem:[%s18360_s2 + $0x28] sm:$0xff] }
  0xd0   :  { %3439 = vperm.xlu0 %11112, %v9775_v45  }
  0xd1   :  { %v12141_v29 = vpop.permute.xlu1 %1374 }
  0xd2   :  { %18622 = vst [vmem:[#allocation8_spill] sm:$0xff] %v12141_v29  ;;  %v12143_v2 = vpop.permute.xlu0 %1303 }
  0xd3   :  { %18623 = vst [vmem:[#allocation9_spill] sm:$0xff] %v12143_v2  ;;  %3745 = vperm.xlu1 %11113, %v9803_v11   ;;  %v5106_v11 = vld [vmem:[%s18360_s2 + $0x20] sm:$0xff] }
  0xd4   :  { %3449 = vperm.xlu0 %11112, %v9777_v23   ;;  %v5108_v23 = vld [vmem:[%s18360_s2 + $0x30] sm:$0x1] }
  0xd5   :  { %v12151_v12 = vpop.permute.xlu1 %1428 }
  0xd6   :  { %18624 = vst [vmem:[#allocation10_spill] sm:$0xff] %v12151_v12  ;;  %v12153_v34 = vpop.permute.xlu0 %1423 }
  0xd7   :  { %18625 = vst [vmem:[#allocation11_spill] sm:$0xff] %v12153_v34  ;;  %3755 = vperm.xlu1 %11113, %v9805_v35  }
  0xd8   :  { %3750 = vperm.xlu0 %11112, %v9804_v61   ;;  %v5038_v61 = vld [vmem:[%s18359_s1 + $0x30] sm:$0x1] }
  0xd9   :  { %v12161_v48 = vpop.permute.xlu1 %1438 }
  0xda   :  { %18626 = vst [vmem:[#allocation12_spill] sm:$0xff] %v12161_v48  ;;  %v12163_v20 = vpop.permute.xlu0 %1433 }
  0xdb   :  { %18627 = vst [vmem:[#allocation13_spill] sm:$0xff] %v12163_v20  ;;  %3765 = vperm.xlu1 %11113, %v9807_v60  }
  0xdc   :  { %3760 = vperm.xlu0 %11112, %v9806_v10   ;;  %v5180_v10 = vld [vmem:[%s18362_s4 + $0x8] sm:$0xff] }
  0xdd   :  { %v12171_v28 = vpop.permute.xlu1 %1448 }
  0xde   :  { %18628 = vst [vmem:[#allocation14_spill] sm:$0xff] %v12171_v28  ;;  %v12173_v30 = vpop.permute.xlu0 %1443 }
  0xdf   :  { %18629 = vst [vmem:[#allocation15_spill] sm:$0xff] %v12173_v30  ;;  %3775 = vperm.xlu1 %11113, %v9809_v18   ;;  %v5179_v18 = vld [vmem:[%s18362_s4] sm:$0xff] }
  0xe0   :  { %3770 = vperm.xlu0 %11112, %v9808_v25  }
  0xe1   :  { %v12181_v51 = vpop.permute.xlu1 %1749 }
  0xe2   :  { %18630 = vst [vmem:[#allocation16_spill] sm:$0xff] %v12181_v51  ;;  %v12183_v17 = vpop.permute.xlu0 %1453 }
  0xe3   :  { %18631 = vst [vmem:[#allocation17_spill] sm:$0xff] %v12183_v17  ;;  %5046 = vperm.xlu1 %11113, %v5033_v39   ;;  %v5182_v39 = vld [vmem:[%s18362_s4 + $0x18] sm:$0xff] }
  0xe4   :  { %5041 = vperm.xlu0 %11112, %v5032_v53  }
  0xe5   :  { %v12191_v9 = vpop.permute.xlu1 %1759 }
  0xe6   :  { %18632 = vst [vmem:[#allocation18_spill] sm:$0xff] %v12191_v9  ;;  %v12193_v3 = vpop.permute.xlu0 %1754 }
  0xe7   :  { %18633 = vst [vmem:[#allocation19_spill] sm:$0xff] %v12193_v3  ;;  %5116 = vperm.xlu1 %11113, %v5103_v43   ;;  %v5181_v43 = vld [vmem:[%s18362_s4 + $0x10] sm:$0xff] }
  0xe8   :  { %5111 = vperm.xlu0 %11112, %v5102_v56   ;;  %v5184_v56 = vld [vmem:[%s18362_s4 + $0x28] sm:$0xff] }
  0xe9   :  { %v12201_v57 = vpop.permute.xlu1 %1769 }
  0xea   :  { %18634 = vst [vmem:[#allocation20_spill] sm:$0xff] %v12201_v57  ;;  %v12203_v14 = vpop.permute.xlu0 %1764 }
  0xeb   :  { %18635 = vst [vmem:[#allocation21_spill] sm:$0xff] %v12203_v14  ;;  %5056 = vperm.xlu1 %11113, %v5035_v26  }
  0xec   :  { %5051 = vperm.xlu0 %11112, %v5034_v49   ;;  %v5183_v49 = vld [vmem:[%s18362_s4 + $0x20] sm:$0xff] }
  0xed   :  { %v12211_v41 = vpop.permute.xlu1 %1779 }
  0xee   :  { %18636 = vst [vmem:[#allocation22_spill] sm:$0xff] %v12211_v41  ;;  %v12213_v1 = vpop.permute.xlu0 %1774 }
  0xef   :  { %18637 = vst [vmem:[#allocation23_spill] sm:$0xff] %v12213_v1  ;;  %5126 = vperm.xlu1 %11113, %v5105_v7  }
  0xf0   :  { %5121 = vperm.xlu0 %11112, %v5104_v55   ;;  %v5503_v55 = vld [vmem:[%s18364_s6] sm:$0xff] }
  0xf1   :  { %v12221_v5 = vpop.permute.xlu1 %2276 }
  0xf2   :  { %18638 = vst [vmem:[#allocation24_spill] sm:$0xff] %v12221_v5  ;;  %v12226_v45 = vpop.permute.xlu0 %2271 }
  0xf3   :  { %5066 = vperm.xlu1 %11113, %v5037_v8   ;;  %18639 = vst [vmem:[#allocation25_spill] sm:$0xff] %v12226_v45  ;;  %v5185_v8 = vld [vmem:[%s18362_s4 + $0x30] sm:$0x1] }
  0xf4   :  { %5061 = vperm.xlu0 %11112, %v5036_v40  }
  0xf5   :  { %v12234_v35 = vpop.permute.xlu1 %2347 }
  0xf6   :  { %18640 = vst [vmem:[#allocation26_spill] sm:$0xff] %v12234_v35  ;;  %v12239_v60 = vpop.permute.xlu0 %2342 }
  0xf7   :  { %5136 = vperm.xlu1 %11113, %v5107_v16   ;;  %18641 = vst [vmem:[#allocation27_spill] sm:$0xff] %v12239_v60  ;;  %v5505_v16 = vld [vmem:[%s18364_s6 + $0x10] sm:$0xff] }
  0xf8   :  { %5131 = vperm.xlu0 %11112, %v5106_v11  }
  0xf9   :  { %v12247_v25 = vpop.permute.xlu1 %2286 }
  0xfa   :  { %18642 = vst [vmem:[#allocation28_spill] sm:$0xff] %v12247_v25  ;;  %v12252_v53 = vpop.permute.xlu0 %2281 }
  0xfb   :  { %5141 = vperm.xlu1 %11113, %v5108_v23   ;;  %18643 = vst [vmem:[#allocation29_spill] sm:$0xff] %v12252_v53  ;;  %v5504_v23 = vld [vmem:[%s18364_s6 + $0x8] sm:$0xff] }
  0xfc   :  { %5071 = vperm.xlu0 %11112, %v5038_v61   ;;  %v5507_v61 = vld [vmem:[%s18364_s6 + $0x20] sm:$0xff] }
  0xfd   :  { %v12260_v26 = vpop.permute.xlu1 %2357 }
  0xfe   :  { %18644 = vst [vmem:[#allocation30_spill] sm:$0xff] %v12260_v26  ;;  %v12265_v7 = vpop.permute.xlu0 %2352 }
  0xff   :  { %5193 = vperm.xlu1 %11113, %v5180_v10   ;;  %18645 = vst [vmem:[#allocation31_spill] sm:$0xff] %v12265_v7 }
 0x100   :  { %5188 = vperm.xlu0 %11112, %v5179_v18   ;;  %v5506_v18 = vld [vmem:[%s18364_s6 + $0x18] sm:$0xff] }
 0x101   :  { %v12273_v40 = vpop.permute.xlu1 %2296 }
 0x102   :  { %18646 = vst [vmem:[#allocation32_spill] sm:$0xff] %v12273_v40  ;;  %v12278_v11 = vpop.permute.xlu0 %2291 }
 0x103   :  { %5203 = vperm.xlu1 %11113, %v5182_v39   ;;  %18647 = vst [vmem:[#allocation33_spill] sm:$0xff] %v12278_v11  ;;  %v10031_v11 = vld [vmem:[%s18364_s6 + $0x80] sm:$0xff] }
 0x104   :  { %5198 = vperm.xlu0 %11112, %v5181_v43   ;;  %v5509_v43 = vld [vmem:[%s18364_s6 + $0x30] sm:$0x1] }
 0x105   :  { %v12286_v10 = vpop.permute.xlu1 %2367 }
 0x106   :  { %18648 = vst [vmem:[#allocation34_spill] sm:$0xff] %v12286_v10  ;;  %v12291_v39 = vpop.permute.xlu0 %2362 }
 0x107   :  { %5213 = vperm.xlu1 %11113, %v5184_v56   ;;  %18649 = vst [vmem:[#allocation35_spill] sm:$0xff] %v12291_v39  ;;  %v5508_v56 = vld [vmem:[%s18364_s6 + $0x28] sm:$0xff] }
 0x108   :  { %5208 = vperm.xlu0 %11112, %v5183_v49  }
 0x109   :  { %v12299_v49 = vpop.permute.xlu1 %2372 }
 0x10a   :  { %18650 = vst [vmem:[#allocation36_spill] sm:$0xff] %v12299_v49 }
 0x10b   :  { %5512 = vperm.xlu1 %11113, %v5503_v55   ;;  %v9899_v55 = vld [vmem:[%s18359_s1 + $0x40] sm:$0xff] }
 0x10c   :  { %5218 = vperm.xlu0 %11112, %v5185_v8   ;;  %v12304_v8 = vpop.permute.xlu0 %2301 }
 0x10d   :  { %18651 = vst [vmem:[#allocation37_spill] sm:$0xff] %v12304_v8 }
 0x10f   :  { %5522 = vperm.xlu1 %11113, %v5505_v16   ;;  %v9898_v16 = vld [vmem:[%s18359_s1 + $0x38] sm:$0xff] }
 0x110   :  { %5517 = vperm.xlu0 %11112, %v5504_v23   ;;  %v9906_v23 = vld [vmem:[%s18360_s2 + $0x40] sm:$0xff] }
 0x113   :  { %5532 = vperm.xlu1 %11113, %v5507_v61   ;;  %v12312_v61 = vpop.permute.xlu1 %2426 }
 0x114   :  { %5527 = vperm.xlu0 %11112, %v5506_v18   ;;  %18652 = vst [vmem:[#allocation38_spill] sm:$0xff] %v12312_v61  ;;  %v9905_v18 = vld [vmem:[%s18360_s2 + $0x38] sm:$0xff] }
 0x117   :  { %5542 = vperm.xlu1 %11113, %v5509_v43   ;;  %v12317_v43 = vpop.permute.xlu0 %2421 }
 0x118   :  { %5537 = vperm.xlu0 %11112, %v5508_v56   ;;  %18653 = vst [vmem:[#allocation39_spill] sm:$0xff] %v12317_v43  ;;  %v9901_v56 = vld [vmem:[%s18359_s1 + $0x50] sm:$0xff] }
 0x11b   :  { %6038 = vperm.xlu1 %11113, %v9899_v55   ;;  %v9900_v55 = vld [vmem:[%s18359_s1 + $0x48] sm:$0xff]  ;;  %v12330_v61 = vpop.permute.xlu0 %2431 }
 0x11c   :  { %6033 = vperm.xlu0 %11112, %v9898_v16   ;;  %v12325_v16 = vpop.permute.xlu1 %2436  ;;  %18655 = vst [vmem:[#allocation41_spill] sm:$0xff] %v12330_v61 }
 0x11d   :  { %18654 = vst [vmem:[#allocation40_spill] sm:$0xff] %v12325_v16  ;;  %v9910_v16 = vld [vmem:[%s18360_s2 + $0x60] sm:$0xff] }
 0x11f   :  { %6108 = vperm.xlu1 %11113, %v9906_v23   ;;  %v9907_v23 = vld [vmem:[%s18360_s2 + $0x48] sm:$0xff] }
 0x120   :  { %6103 = vperm.xlu0 %11112, %v9905_v18   ;;  %v9903_v18 = vld [vmem:[%s18359_s1 + $0x60] sm:$0xff]  ;;  %v12338_v43 = vpop.permute.xlu1 %2446 }
 0x121   :  { %18656 = vst [vmem:[#allocation42_spill] sm:$0xff] %v12338_v43  ;;  %v9911_v43 = vld [vmem:[%s18360_s2 + $0x68] sm:$0x1] }
 0x123   :  { %6048 = vperm.xlu1 %11113, %v9901_v56   ;;  %v9902_v56 = vld [vmem:[%s18359_s1 + $0x58] sm:$0xff] }
 0x124   :  { %6043 = vperm.xlu0 %11112, %v9900_v55   ;;  %v12343_v55 = vpop.permute.xlu0 %2441 }
 0x125   :  { %18657 = vst [vmem:[#allocation43_spill] sm:$0xff] %v12343_v55 }
 0x127   :  { %6118 = vperm.xlu1 %11113, %v9908_v58   ;;  %v9909_v58 = vld [vmem:[%s18360_s2 + $0x58] sm:$0xff] }
 0x128   :  { %6113 = vperm.xlu0 %11112, %v9907_v23   ;;  %v12351_v23 = vpop.permute.xlu1 %2747  ;;  %v12356_v61 = vpop.permute.xlu0 %2451 }
 0x129   :  { %18658 = vst [vmem:[#allocation44_spill] sm:$0xff] %v12351_v23  ;;  %18659 = vst [vmem:[#allocation45_spill] sm:$0xff] %v12356_v61  ;;  %v9922_v23 = vld [vmem:[%s18362_s4 + $0x50] sm:$0xff] }
 0x12b   :  { %6058 = vperm.xlu1 %11113, %v9903_v18   ;;  %v9904_v18 = vld [vmem:[%s18359_s1 + $0x68] sm:$0x1] }
 0x12c   :  { %6053 = vperm.xlu0 %11112, %v9902_v56   ;;  %v9920_v56 = vld [vmem:[%s18362_s4 + $0x40] sm:$0xff]  ;;  %v12364_v55 = vpop.permute.xlu1 %2757 }
 0x12d   :  { %18660 = vst [vmem:[#allocation46_spill] sm:$0xff] %v12364_v55  ;;  %v9924_v55 = vld [vmem:[%s18362_s4 + $0x60] sm:$0xff] }
 0x12f   :  { %6128 = vperm.xlu1 %11113, %v9910_v16   ;;  %v9919_v16 = vld [vmem:[%s18362_s4 + $0x38] sm:$0xff] }
 0x130   :  { %6123 = vperm.xlu0 %11112, %v9909_v58   ;;  %v12369_v58 = vpop.permute.xlu0 %2752 }
 0x131   :  { %18661 = vst [vmem:[#allocation47_spill] sm:$0xff] %v12369_v58 }
 0x133   :  { %6133 = vperm.xlu1 %11113, %v9911_v43   ;;  %v9921_v43 = vld [vmem:[%s18362_s4 + $0x48] sm:$0xff] }
 0x134   :  { %6063 = vperm.xlu0 %11112, %v9904_v18   ;;  %v12377_v18 = vpop.permute.xlu1 %2767  ;;  %v12382_v61 = vpop.permute.xlu0 %2762 }
 0x135   :  { %18662 = vst [vmem:[#allocation48_spill] sm:$0xff] %v12377_v18  ;;  %18663 = vst [vmem:[#allocation49_spill] sm:$0xff] %v12382_v61  ;;  %v9953_v18 = vld [vmem:[%s18364_s6 + $0x48] sm:$0xff] }
 0x137   :  { %6185 = vperm.xlu1 %11113, %v9920_v56   ;;  %v9923_v56 = vld [vmem:[%s18362_s4 + $0x58] sm:$0xff] }
 0x138   :  { %6180 = vperm.xlu0 %11112, %v9919_v16   ;;  %v9951_v16 = vld [vmem:[%s18364_s6 + $0x38] sm:$0xff]  ;;  %v12390_v58 = vpop.permute.xlu1 %2777 }
 0x139   :  { %18664 = vst [vmem:[#allocation50_spill] sm:$0xff] %v12390_v58  ;;  %v9955_v58 = vld [vmem:[%s18364_s6 + $0x58] sm:$0xff] }
 0x13b   :  { %6195 = vperm.xlu1 %11113, %v9922_v23   ;;  %v9925_v23 = vld [vmem:[%s18362_s4 + $0x68] sm:$0x1] }
 0x13c   :  { %6190 = vperm.xlu0 %11112, %v9921_v43   ;;  %v12395_v43 = vpop.permute.xlu0 %2772 }
 0x13d   :  { %18665 = vst [vmem:[#allocation51_spill] sm:$0xff] %v12395_v43 }
 0x13f   :  { %6205 = vperm.xlu1 %11113, %v9924_v55   ;;  %v9952_v55 = vld [vmem:[%s18364_s6 + $0x40] sm:$0xff] }
 0x140   :  { %6200 = vperm.xlu0 %11112, %v9923_v56   ;;  %v12403_v56 = vpop.permute.xlu1 %3274  ;;  %v12408_v61 = vpop.permute.xlu0 %3269 }
 0x141   :  { %18666 = vst [vmem:[#allocation52_spill] sm:$0xff] %v12403_v56  ;;  %18667 = vst [vmem:[#allocation53_spill] sm:$0xff] %v12408_v61  ;;  %v9977_v56 = vld [vmem:[%s18359_s1 + $0x78] sm:$0xff] }
 0x143   :  { %6504 = vperm.xlu1 %11113, %v9951_v16   ;;  %v9954_v16 = vld [vmem:[%s18364_s6 + $0x50] sm:$0xff] }
 0x144   :  { %6210 = vperm.xlu0 %11112, %v9925_v23   ;;  %v9957_v23 = vld [vmem:[%s18364_s6 + $0x68] sm:$0x1]  ;;  %v12416_v43 = vpop.permute.xlu1 %3345 }
 0x145   :  { %18668 = vst [vmem:[#allocation54_spill] sm:$0xff] %v12416_v43  ;;  %v9984_v43 = vld [vmem:[%s18360_s2 + $0x78] sm:$0xff] }
 0x147   :  { %6514 = vperm.xlu1 %11113, %v9953_v18   ;;  %v9956_v18 = vld [vmem:[%s18364_s6 + $0x60] sm:$0xff] }
 0x148   :  { %6509 = vperm.xlu0 %11112, %v9952_v55   ;;  %v12421_v55 = vpop.permute.xlu0 %3340 }
 0x149   :  { %18669 = vst [vmem:[#allocation55_spill] sm:$0xff] %v12421_v55 }
 0x14b   :  { %6524 = vperm.xlu1 %11113, %v9955_v58   ;;  %v9976_v58 = vld [vmem:[%s18359_s1 + $0x70] sm:$0xff] }
 0x14c   :  { %6519 = vperm.xlu0 %11112, %v9954_v16   ;;  %v12429_v16 = vpop.permute.xlu1 %3284  ;;  %v12434_v61 = vpop.permute.xlu0 %3279 }
 0x14d   :  { %18670 = vst [vmem:[#allocation56_spill] sm:$0xff] %v12429_v16  ;;  %18671 = vst [vmem:[#allocation57_spill] sm:$0xff] %v12434_v61  ;;  %v9986_v16 = vld [vmem:[%s18360_s2 + $0x88] sm:$0xff] }
 0x14f   :  { %6534 = vperm.xlu1 %11113, %v9957_v23   ;;  %v9983_v23 = vld [vmem:[%s18360_s2 + $0x70] sm:$0xff] }
 0x150   :  { %6529 = vperm.xlu0 %11112, %v9956_v18   ;;  %v9979_v18 = vld [vmem:[%s18359_s1 + $0x88] sm:$0xff]  ;;  %v12442_v55 = vpop.permute.xlu1 %3355 }
 0x151   :  { %18672 = vst [vmem:[#allocation58_spill] sm:$0xff] %v12442_v55  ;;  %v9981_v55 = vld [vmem:[%s18359_s1 + $0x98] sm:$0xff] }
 0x153   :  { %7030 = vperm.xlu1 %11113, %v9977_v56   ;;  %v9978_v56 = vld [vmem:[%s18359_s1 + $0x80] sm:$0xff] }
 0x154   :  { %7025 = vperm.xlu0 %11112, %v9976_v58   ;;  %v12447_v58 = vpop.permute.xlu0 %3350 }
 0x155   :  { %18673 = vst [vmem:[#allocation59_spill] sm:$0xff] %v12447_v58 }
 0x157   :  { %7100 = vperm.xlu1 %11113, %v9984_v43   ;;  %v9985_v43 = vld [vmem:[%s18360_s2 + $0x80] sm:$0xff] }
 0x158   :  { %7095 = vperm.xlu0 %11112, %v9983_v23   ;;  %v12455_v23 = vpop.permute.xlu1 %3294  ;;  %v12460_v61 = vpop.permute.xlu0 %3289 }
 0x159   :  { %18674 = vst [vmem:[#allocation60_spill] sm:$0xff] %v12455_v23  ;;  %18675 = vst [vmem:[#allocation61_spill] sm:$0xff] %v12460_v61  ;;  %v9989_v23 = vld [vmem:[%s18360_s2 + $0xa0] sm:$0x1] }
 0x15b   :  { %7040 = vperm.xlu1 %11113, %v9979_v18   ;;  %v9980_v18 = vld [vmem:[%s18359_s1 + $0x90] sm:$0xff] }
 0x15c   :  { %7035 = vperm.xlu0 %11112, %v9978_v56   ;;  %v9988_v56 = vld [vmem:[%s18360_s2 + $0x98] sm:$0xff]  ;;  %v12468_v58 = vpop.permute.xlu1 %3365 }
 0x15d   :  { %18676 = vst [vmem:[#allocation62_spill] sm:$0xff] %v12468_v58  ;;  %v9998_v58 = vld [vmem:[%s18362_s4 + $0x78] sm:$0xff] }
 0x15f   :  { %7110 = vperm.xlu1 %11113, %v9986_v16   ;;  %v9987_v16 = vld [vmem:[%s18360_s2 + $0x90] sm:$0xff] }
 0x160   :  { %7105 = vperm.xlu0 %11112, %v9985_v43   ;;  %v12473_v43 = vpop.permute.xlu0 %3360 }
 0x161   :  { %18677 = vst [vmem:[#allocation63_spill] sm:$0xff] %v12473_v43 }
 0x163   :  { %7050 = vperm.xlu1 %11113, %v9981_v55   ;;  %v9982_v55 = vld [vmem:[%s18359_s1 + $0xa0] sm:$0x1] }
 0x164   :  { %7045 = vperm.xlu0 %11112, %v9980_v18   ;;  %v12481_v18 = vpop.permute.xlu1 %3370  ;;  %v12486_v61 = vpop.permute.xlu0 %3299 }
 0x165   :  { %18678 = vst [vmem:[#allocation64_spill] sm:$0xff] %v12481_v18  ;;  %18679 = vst [vmem:[#allocation65_spill] sm:$0xff] %v12486_v61  ;;  %v10002_v18 = vld [vmem:[%s18362_s4 + $0x98] sm:$0xff] }
 0x167   :  { %7120 = vperm.xlu1 %11113, %v9988_v56   ;;  %v9997_v56 = vld [vmem:[%s18362_s4 + $0x70] sm:$0xff] }
 0x168   :  { %7115 = vperm.xlu0 %11112, %v9987_v16   ;;  %v10000_v16 = vld [vmem:[%s18362_s4 + $0x88] sm:$0xff]  ;;  %v12494_v43 = vpop.permute.xlu1 %3424 }
 0x169   :  { %18680 = vst [vmem:[#allocation66_spill] sm:$0xff] %v12494_v43 }
 0x16b   :  { %7125 = vperm.xlu1 %11113, %v9989_v23   ;;  %v9999_v23 = vld [vmem:[%s18362_s4 + $0x80] sm:$0xff] }
 0x16c   :  { %7055 = vperm.xlu0 %11112, %v9982_v55   ;;  %v12499_v55 = vpop.permute.xlu0 %3419  ;;  %v12507_v43 = vpop.permute.xlu1 %3434 }
 0x16d   :  { %18681 = vst [vmem:[#allocation67_spill] sm:$0xff] %v12499_v55  ;;  %18682 = vst [vmem:[#allocation68_spill] sm:$0xff] %v12507_v43  ;;  %v10003_v43 = vld [vmem:[%s18362_s4 + $0xa0] sm:$0x1] }
 0x16f   :  { %7177 = vperm.xlu1 %11113, %v9998_v58  }
 0x170   :  { %7172 = vperm.xlu0 %11112, %v9997_v56   ;;  %v10001_v56 = vld [vmem:[%s18362_s4 + $0x90] sm:$0xff] }
 0x173   :  { %7187 = vperm.xlu1 %11113, %v10000_v16   ;;  %v10029_v16 = vld [vmem:[%s18364_s6 + $0x70] sm:$0xff] }
 0x174   :  { %7182 = vperm.xlu0 %11112, %v9999_v23   ;;  %v12513_v23 = vpop.permute.xlu0 %3429 }
 0x175   :  { %v559_v58 = vpop.f32.mrb[0].mxu0  ;;  %18683 = vst [vmem:[#allocation69_spill] sm:$0xff] %v12513_v23 }
 0x176   :  { %v666_v61 = vpop.f32.mrb[0].mxu1  ;;  %v561_v49 = vpop.f32.mrb[1].mxu0  ;;  %v560_v10 = vadd.f32 %v559_v58, %v11960_v22 }
 0x177   :  { %v668_v8 = vpop.f32.mrb[1].mxu1  ;;  %7197 = vperm.xlu1 %11113, %v10002_v18   ;;  %v667_v55 = vadd.f32 %v666_v61, %v11960_v22  ;;  %v562_v39 = vadd.f32 %v561_v49, %v11960_v22 }
 0x178   :  { %7192 = vperm.xlu0 %11112, %v10001_v56   ;;  %v669_v18 = vadd.f32 %v668_v8, %v11960_v22  ;;  %v707_v61 = vmax.f32 %v560_v10, 0.0  ;;  %v12528_v22 = vpop.permute.xlu1 %3444 }
 0x179   :  { %v565_v26 = vpop.f32.mrb[2].mxu0  ;;  %18684 = vst [vmem:[#allocation70_spill] sm:$0xff] %v12528_v22  ;;  %v708_v8 = vmax.f32 %v562_v39, 0.0 }
 0x17a   :  { %v566_v58 = vadd.f32 %v565_v26, %v11958_v4  ;;  %v672_v56 = vpop.f32.mrb[2].mxu1  ;;  %v567_v7 = vpop.f32.mrb[3].mxu0  ;;  %v709_v26 = vmax.f32 %v667_v55, 0.0  ;;  %v710_v10 = vmax.f32 %v669_v18, 0.0 }
 0x17b   :  { %v673_v35 = vadd.f32 %v672_v56, %v11958_v4  ;;  %v568_v60 = vadd.f32 %v567_v7, %v11958_v4  ;;  %v674_v23 = vpop.f32.mrb[3].mxu1  ;;  %7496 = vperm.xlu1 %11113, %v10029_v16   ;;  %v10030_v7 = vld [vmem:[%s18364_s6 + $0x78] sm:$0xff] }
 0x17c   :  { %v711_v40 = vmax.f32 %v566_v58, 0.0  ;;  %v675_v49 = vadd.f32 %v674_v23, %v11958_v4  ;;  %7202 = vperm.xlu0 %11112, %v10003_v43   ;;  %v12533_v23 = vpop.permute.xlu0 %3439 }
 0x17d   :  { %v713_v25 = vmax.f32 %v673_v35, 0.0  ;;  %v712_v53 = vmax.f32 %v568_v60, 0.0  ;;  %v571_v56 = vpop.f32.mrb[4].mxu0  ;;  %18685 = vst [vmem:[#allocation71_spill] sm:$0xff] %v12533_v23  ;;  %v10033_v60 = vld [vmem:[%s18364_s6 + $0x90] sm:$0xff] }
 0x17e   :  { %v10164_v16 = vpack.c.bf16 %v711_v40, %v707_v61  ;;  %v714_v58 = vmax.f32 %v675_v49, 0.0  ;;  %v678_v4 = vpop.f32.mrb[4].mxu1  ;;  %v573_v43 = vpop.f32.mrb[5].mxu0  ;;  %v572_v35 = vadd.f32 %v571_v56, %v11978_v27 }
 0x17f   :  { %v10176_v5 = vpack.c.bf16 %v713_v25, %v709_v26  ;;  %v10162_v45 = vpack.c.bf16 %v712_v53, %v708_v8  ;;  %v680_v41 = vpop.f32.mrb[5].mxu1  ;;  %7506 = vperm.xlu1 %11113, %v10031_v11   ;;  %v679_v39 = vadd.f32 %v678_v4, %v11978_v27  ;;  %v574_v40 = vadd.f32 %v573_v43, %v11978_v27  ;;  %v10032_v25 = vld [vmem:[%s18364_s6 + $0x88] sm:$0xff]  ;;  %v12546_v26 = vpop.permute.xlu1 %3745 }
 0x180   :  { %v10174_v55 = vpack.c.bf16 %v714_v58, %v710_v10  ;;  %7501 = vperm.xlu0 %11112, %v10030_v7   ;;  %v681_v53 = vadd.f32 %v680_v41, %v11978_v27  ;;  %18686 = vst [vmem:[#allocation72_spill] sm:$0xff] %v12546_v26  ;;  %v10035_v27 = vld [vmem:[%s18364_s6 + $0xa0] sm:$0x1]  ;;  %v12554_v41 = vpop.permute.xlu0 %3449 }
 0x181   :  { %v577_v18 = vpop.f32.mrb[6].mxu0  ;;  %10163 = vmatprep.subr.bf16.mxu0 %v10162_v45  ;;  %v715_v45 = vmax.f32 %v572_v35, 0.0  ;;  %18687 = vst [vmem:[#allocation73_spill] sm:$0xff] %v12554_v41  ;;  %v716_v4 = vmax.f32 %v574_v40, 0.0  ;;  %v10055_v40 = vld [vmem:[%s18359_s1 + $0xb0] sm:$0xff] }
 0x182   :  { %v578_v11 = vadd.f32 %v577_v18, %v11976_v13  ;;  %v684_v61 = vpop.f32.mrb[6].mxu1  ;;  %10175 = vmatprep.subr.bf16.mxu1 %v10174_v55  ;;  %v579_v49 = vpop.f32.mrb[7].mxu0  ;;  %10165 = vmatpush1.bf16.msra.mxu0 %v10164_v16  ;;  %v717_v16 = vmax.f32 %v679_v39, 0.0  ;;  %v718_v35 = vmax.f32 %v681_v53, 0.0 }
 0x183   :  { %v685_v8 = vadd.f32 %v684_v61, %v11976_v13  ;;  %v580_v56 = vadd.f32 %v579_v49, %v11976_v13  ;;  %v686_v7 = vpop.f32.mrb[7].mxu1  ;;  %10177 = vmatpush1.bf16.msra.mxu1 %v10176_v5  ;;  %7516 = vperm.xlu1 %11113, %v10033_v60   ;;  %v10034_v5 = vld [vmem:[%s18364_s6 + $0x98] sm:$0xff] }
 0x184   :  { %v719_v10 = vmax.f32 %v578_v11, 0.0  ;;  %v687_v58 = vadd.f32 %v686_v7, %v11976_v13  ;;  %7511 = vperm.xlu0 %11112, %v10032_v25  }
 0x185   :  { %v721_v43 = vmax.f32 %v685_v8, 0.0  ;;  %v720_v55 = vmax.f32 %v580_v56, 0.0  ;;  %v583_v18 = vpop.f32.mrb[8].mxu0  ;;  %v12563_v8 = vpop.permute.xlu1 %3755 }
 0x186   :  { %v10168_v60 = vpack.c.bf16 %v719_v10, %v715_v45  ;;  %v722_v11 = vmax.f32 %v687_v58, 0.0  ;;  %v690_v13 = vpop.f32.mrb[8].mxu1  ;;  %v585_v25 = vpop.f32.mrb[9].mxu0  ;;  %v584_v39 = vadd.f32 %v583_v18, %v11995_v21  ;;  %18688 = vst [vmem:[#allocation74_spill] sm:$0xff] %v12563_v8  ;;  %v10054_v10 = vld [vmem:[%s18359_s1 + $0xa8] sm:$0xff] }
 0x187   :  { %v10180_v61 = vpack.c.bf16 %v721_v43, %v717_v16  ;;  %v10166_v49 = vpack.c.bf16 %v720_v55, %v716_v4  ;;  %v692_v7 = vpop.f32.mrb[9].mxu1  ;;  %7526 = vperm.xlu1 %11113, %v10035_v27   ;;  %v691_v53 = vadd.f32 %v690_v13, %v11995_v21  ;;  %v586_v56 = vadd.f32 %v585_v25, %v11995_v21  ;;  %v12572_v43 = vpop.permute.xlu0 %3750 }
 0x188   :  { %v10178_v26 = vpack.c.bf16 %v722_v11, %v718_v35  ;;  %7521 = vperm.xlu0 %11112, %v10034_v5   ;;  %v693_v58 = vadd.f32 %v692_v7, %v11995_v21  ;;  %18689 = vst [vmem:[#allocation75_spill] sm:$0xff] %v12572_v43  ;;  %v723_v35 = vmax.f32 %v584_v39, 0.0  ;;  %v10062_v21 = vld [vmem:[%s18360_s2 + $0xb0] sm:$0xff] }
 0x189   :  { %v589_v45 = vpop.f32.mrb[10].mxu0  ;;  %10167 = vmatprep.subr.bf16.mxu0 %v10166_v49 }
 0x18a   :  { %v590_v27 = vadd.f32 %v589_v45, %v11993_v37  ;;  %v696_v16 = vpop.f32.mrb[10].mxu1  ;;  %10179 = vmatprep.subr.bf16.mxu1 %v10178_v26  ;;  %v591_v4 = vpop.f32.mrb[11].mxu0  ;;  %10169 = vmatpush1.bf16.msra.mxu0 %v10168_v60  ;;  %v725_v26 = vmax.f32 %v691_v53, 0.0  ;;  %v724_v60 = vmax.f32 %v586_v56, 0.0  ;;  %v10061_v45 = vld [vmem:[%s18360_s2 + $0xa8] sm:$0xff] }
 0x18b   :  { %v697_v55 = vadd.f32 %v696_v16, %v11993_v37  ;;  %v592_v18 = vadd.f32 %v591_v4, %v11993_v37  ;;  %v698_v5 = vpop.f32.mrb[11].mxu1  ;;  %10181 = vmatpush1.bf16.msra.mxu1 %v10180_v61  ;;  %8022 = vperm.xlu1 %11113, %v10055_v40   ;;  %v726_v61 = vmax.f32 %v693_v58, 0.0  ;;  %v12584_v53 = vpop.permute.xlu1 %3765 }
 0x18c   :  { %v727_v11 = vmax.f32 %v590_v27, 0.0  ;;  %v699_v13 = vadd.f32 %v698_v5, %v11993_v37  ;;  %8017 = vperm.xlu0 %11112, %v10054_v10   ;;  %18690 = vst [vmem:[#allocation76_spill] sm:$0xff] %v12584_v53  ;;  %v12588_v8 = vpop.permute.xlu0 %3760 }
 0x18d   :  { %v729_v25 = vmax.f32 %v697_v55, 0.0  ;;  %v728_v49 = vmax.f32 %v592_v18, 0.0  ;;  %v595_v7 = vpop.f32.mrb[12].mxu0  ;;  %18691 = vst [vmem:[#allocation77_spill] sm:$0xff] %v12588_v8 }
 0x18e   :  { %v10172_v40 = vpack.c.bf16 %v727_v11, %v723_v35  ;;  %v730_v39 = vmax.f32 %v699_v13, 0.0  ;;  %v702_v27 = vpop.f32.mrb[12].mxu1  ;;  %v597_v16 = vpop.f32.mrb[13].mxu0  ;;  %v596_v55 = vadd.f32 %v595_v7, %v12012_v54  ;;  %v10057_v11 = vld [vmem:[%s18359_s1 + $0xc0] sm:$0xff]  ;;  %v10063_v7 = vld [vmem:[%s18360_s2 + $0xb8] sm:$0xff] }
 0x18f   :  { %v10184_v37 = vpack.c.bf16 %v729_v25, %v725_v26  ;;  %v10170_v10 = vpack.c.bf16 %v728_v49, %v724_v60  ;;  %v598_v4 = vadd.f32 %v597_v16, %v12012_v54  ;;  %v704_v5 = vpop.f32.mrb[13].mxu1  ;;  %8092 = vperm.xlu1 %11113, %v10062_v21   ;;  %v703_v58 = vadd.f32 %v702_v27, %v12012_v54  ;;  %v10056_v21 = vld [vmem:[%s18359_s1 + $0xb8] sm:$0xff]  ;;  %v10064_v25 = vld [vmem:[%s18360_s2 + $0xc0] sm:$0xff]  ;;  %v12605_v49 = vpop.permute.xlu1 %3775  ;;  %v10058_v27 = vld [vmem:[%s18359_s1 + $0xc8] sm:$0xff] }
 0x190   :  { %v10182_v56 = vpack.c.bf16 %v730_v39, %v726_v61  ;;  %v705_v18 = vadd.f32 %v704_v5, %v12012_v54  ;;  %8087 = vperm.xlu0 %11112, %v10061_v45   ;;  %v731_v26 = vmax.f32 %v596_v55, 0.0  ;;  %v735_v54 = vld [vmem:[%s18363_s5] sm:$0xff]  ;;  %18692 = vst [vmem:[#allocation78_spill] sm:$0xff] %v12605_v49  ;;  %v12611_v45 = vpop.permute.xlu0 %3770  ;;  %v736_v61 = vld [vmem:[%s18363_s5 + $0x8] sm:$0xff]  ;;  %v10059_v39 = vld [vmem:[%s18359_s1 + $0xd0] sm:$0xff] }
 0x191   :  { %v732_v35 = vmax.f32 %v598_v4, 0.0  ;;  %10171 = vmatprep.subr.bf16.mxu0 %v10170_v10  ;;  %v733_v60 = vmax.f32 %v703_v58, 0.0  ;;  %18693 = vst [vmem:[#allocation79_spill] sm:$0xff] %v12611_v45  ;;  %v10066_v4 = vld [vmem:[%s18360_s2 + $0xd0] sm:$0xff]  ;;  %v10065_v5 = vld [vmem:[%s18360_s2 + $0xc8] sm:$0xff] }
 0x192   :  { %v734_v13 = vmax.f32 %v705_v18, 0.0  ;;  %10183 = vmatprep.subr.bf16.mxu1 %v10182_v56  ;;  %10173 = vmatpush1.bf16.msra.mxu0 %v10172_v40  ;;  %v18694_v40 = vmov 0.0   ;;  %v738_v56 = vld [vmem:[%s18363_s5 + $0x18] sm:$0xff] }
 0x193   :  { %10185 = vmatpush1.bf16.msra.mxu1 %v10184_v37  ;;  %9576 = vmatprep.subr.msk.mxu0 %vm69_vm0, %v732_v35  ;;  %v12628_v16 = vpop.permute.xlu1 %5046  ;;  %v737_v37 = vld [vmem:[%s18363_s5 + $0x10] sm:$0xff]  ;;  %v10067_v55 = vld [vmem:[%s18360_s2 + $0xd8] sm:$0x1] }
 0x194   :  { %9585 = vmatprep.subr.msk.mxu1 %vm69_vm0, %v734_v13  ;;  %8032 = vperm.xlu1 %11113, %v10057_v11   ;;  %18695 = vst [vmem:[#allocation80_spill] sm:$0xff] %v12628_v16  ;;  %v12634_v10 = vpop.permute.xlu0 %5041  ;;  %v10060_v58 = vld [vmem:[%s18359_s1 + $0xd8] sm:$0x1]  ;;  %v739_v11 = vld [vmem:[%s18363_s5 + $0x20] sm:$0xff]  ;;  %v10076_v13 = vld [vmem:[%s18362_s4 + $0xb0] sm:$0xff] }
 0x195   :  { %8027 = vperm.xlu0 %11112, %v10056_v21   ;;  %18696 = vst [vmem:[#allocation81_spill] sm:$0xff] %v12634_v10  ;;  %v10075_v21 = vld [vmem:[%s18362_s4 + $0xa8] sm:$0xff] }
 0x196   :  { %9577 = vmatpush1.msk.msra.mxu0 %vm69_vm0, %v731_v26 }
 0x197   :  { %9586 = vmatpush1.msk.msra.mxu1 %vm69_vm0, %v733_v60  ;;  %9578 = vmatmul.mubr.msk.f32.vlgmr.msra.gmra.mrb[14].mxu0 %vm459_vm1, %v735_v54  ;;  %v12653_v18 = vpop.permute.xlu1 %5116 }
 0x198   :  { %9587 = vmatmul.mubr.msk.f32.vlgmr.msra.gmra.mrb[14].mxu1 %vm459_vm1, %v735_v54  ;;  %8102 = vperm.xlu1 %11113, %v10064_v25   ;;  %18697 = vst [vmem:[#allocation82_spill] sm:$0xff] %v12653_v18  ;;  %v12659_v35 = vpop.permute.xlu0 %5111  ;;  %v740_v54 = vld [vmem:[%s18363_s5 + $0x28] sm:$0xff]  ;;  %v10078_v25 = vld [vmem:[%s18362_s4 + $0xc0] sm:$0xff] }
 0x199   :  { %8097 = vperm.xlu0 %11112, %v10063_v7   ;;  %887 = vmatprep.mubr.f32.mxu0 %v18694_v40  ;;  %18698 = vst [vmem:[#allocation83_spill] sm:$0xff] %v12659_v35  ;;  %v10077_v7 = vld [vmem:[%s18362_s4 + $0xb8] sm:$0xff] }
 0x19a   :  { %994 = vmatprep.mubr.f32.mxu1 %v18694_v40 }
 0x19b   :  { %9579 = vmatmul.mubr.msk.f32.gmra.mrb[16].mxu0 %vm459_vm1, %v736_v61  ;;  %v12675_v26 = vpop.permute.xlu1 %5056 }
 0x19c   :  { %9588 = vmatmul.mubr.msk.f32.gmra.mrb[16].mxu1 %vm459_vm1, %v736_v61  ;;  %8042 = vperm.xlu1 %11113, %v10059_v39   ;;  %18699 = vst [vmem:[#allocation84_spill] sm:$0xff] %v12675_v26  ;;  %v12681_v60 = vpop.permute.xlu0 %5051  ;;  %v741_v61 = vld [vmem:[%s18363_s5 + $0x30] sm:$0x1] }
 0x19d   :  { %8037 = vperm.xlu0 %11112, %v10058_v27   ;;  %893 = vmatprep.mubr.f32.mxu0 %v18694_v40  ;;  %18700 = vst [vmem:[#allocation85_spill] sm:$0xff] %v12681_v60  ;;  %v10080_v39 = vld [vmem:[%s18362_s4 + $0xd0] sm:$0xff] }
 0x19e   :  { %1000 = vmatprep.mubr.f32.mxu1 %v18694_v40 }
 0x19f   :  { %9580 = vmatmul.mubr.msk.f32.gmra.mrb[18].mxu0 %vm459_vm1, %v737_v37  ;;  %v12700_v27 = vpop.permute.xlu1 %5126 }
 0x1a0   :  { %9589 = vmatmul.mubr.msk.f32.gmra.mrb[18].mxu1 %vm459_vm1, %v737_v37  ;;  %8112 = vperm.xlu1 %11113, %v10066_v4   ;;  %18701 = vst [vmem:[#allocation86_spill] sm:$0xff] %v12700_v27  ;;  %v10079_v37 = vld [vmem:[%s18362_s4 + $0xc8] sm:$0xff]  ;;  %v12706_v4 = vpop.permute.xlu0 %5121 }
 0x1a1   :  { %8107 = vperm.xlu0 %11112, %v10065_v5   ;;  %899 = vmatprep.mubr.f32.mxu0 %v18694_v40  ;;  %18702 = vst [vmem:[#allocation87_spill] sm:$0xff] %v12706_v4  ;;  %v10107_v5 = vld [vmem:[%s18364_s6 + $0xa8] sm:$0xff] }
 0x1a2   :  { %1006 = vmatprep.mubr.f32.mxu1 %v18694_v40 }
 0x1a3   :  { %9581 = vmatmul.mubr.msk.f32.gmra.mrb[20].mxu0 %vm459_vm1, %v738_v56 }
 0x1a4   :  { %9590 = vmatmul.mubr.msk.f32.gmra.mrb[20].mxu1 %vm459_vm1, %v738_v56  ;;  %8117 = vperm.xlu1 %11113, %v10067_v55   ;;  %v10081_v56 = vld [vmem:[%s18362_s4 + $0xd8] sm:$0x1]  ;;  %v12718_v55 = vpop.permute.xlu1 %5066 }
 0x1a5   :  { %8047 = vperm.xlu0 %11112, %v10060_v58   ;;  %905 = vmatprep.mubr.f32.mxu0 %v18694_v40  ;;  %18703 = vst [vmem:[#allocation88_spill] sm:$0xff] %v12718_v55  ;;  %v12720_v58 = vpop.permute.xlu0 %5061 }
 0x1a6   :  { %1012 = vmatprep.mubr.f32.mxu1 %v18694_v40  ;;  %18704 = vst [vmem:[#allocation89_spill] sm:$0xff] %v12720_v58 }
 0x1a7   :  { %9582 = vmatmul.mubr.msk.f32.gmra.mrb[22].mxu0 %vm459_vm1, %v739_v11 }
 0x1a8   :  { %9591 = vmatmul.mubr.msk.f32.gmra.mrb[22].mxu1 %vm459_vm1, %v739_v11  ;;  %8169 = vperm.xlu1 %11113, %v10076_v13   ;;  %v10109_v11 = vld [vmem:[%s18364_s6 + $0xb8] sm:$0xff]  ;;  %v10108_v13 = vld [vmem:[%s18364_s6 + $0xb0] sm:$0xff] }
 0x1a9   :  { %8164 = vperm.xlu0 %11112, %v10075_v21   ;;  %911 = vmatprep.mubr.f32.mxu0 %v18694_v40  ;;  %v10111_v21 = vld [vmem:[%s18364_s6 + $0xc8] sm:$0xff] }
 0x1aa   :  { %1018 = vmatprep.mubr.f32.mxu1 %v18694_v40 }
 0x1ab   :  { %9583 = vmatmul.mubr.msk.f32.gmra.mrb[24].mxu0 %vm459_vm1, %v740_v54 }
 0x1ac   :  { %9592 = vmatmul.mubr.msk.f32.gmra.mrb[24].mxu1 %vm459_vm1, %v740_v54  ;;  %8179 = vperm.xlu1 %11113, %v10078_v25   ;;  %v12731_v54 = vpop.permute.xlu1 %5136  ;;  %v10110_v25 = vld [vmem:[%s18364_s6 + $0xc0] sm:$0xff] }
 0x1ad   :  { %8174 = vperm.xlu0 %11112, %v10077_v7   ;;  %917 = vmatprep.mubr.f32.mxu0 %v18694_v40  ;;  %18705 = vst [vmem:[#allocation90_spill] sm:$0xff] %v12731_v54  ;;  %v12736_v7 = vpop.permute.xlu0 %5131 }
 0x1ae   :  { %1024 = vmatprep.mubr.f32.mxu1 %v18694_v40  ;;  %18706 = vst [vmem:[#allocation91_spill] sm:$0xff] %v12736_v7 }
 0x1af   :  { %9584 = vmatmul.mubr.msk.f32.gmra.mrb[26].mxu0 %vm459_vm1, %v741_v61 }
 0x1b0   :  { %9593 = vmatmul.mubr.msk.f32.gmra.mrb[26].mxu1 %vm459_vm1, %v741_v61  ;;  %8189 = vperm.xlu1 %11113, %v10080_v39   ;;  %v10113_v61 = vld [vmem:[%s18364_s6 + $0xd8] sm:$0x1]  ;;  %v10112_v39 = vld [vmem:[%s18364_s6 + $0xd0] sm:$0xff] }
 0x1b1   :  { %8184 = vperm.xlu0 %11112, %v10079_v37   ;;  %1553 = vmatprep.mubr.f32.mxu0 %v18694_v40  ;;  %v12744_v37 = vpop.permute.xlu1 %5141 }
 0x1b2   :  { %1660 = vmatprep.mubr.f32.mxu1 %v18694_v40  ;;  %18707 = vst [vmem:[#allocation92_spill] sm:$0xff] %v12744_v37 }
 0x1b4   :  { %8488 = vperm.xlu1 %11113, %v10107_v5   ;;  %v12746_v5 = vpop.permute.xlu0 %5071 }
 0x1b5   :  { %8194 = vperm.xlu0 %11112, %v10081_v56   ;;  %18708 = vst [vmem:[#allocation93_spill] sm:$0xff] %v12746_v5 }
 0x1b8   :  { %8498 = vperm.xlu1 %11113, %v10109_v11  }
 0x1b9   :  { %8493 = vperm.xlu0 %11112, %v10108_v13  }
 0x1bc   :  { %8508 = vperm.xlu1 %11113, %v10111_v21  }
 0x1bd   :  { %8503 = vperm.xlu0 %11112, %v10110_v25  }
 0x1c0   :  { %8518 = vperm.xlu1 %11113, %v10113_v61  }
 0x1c1   :  { %8513 = vperm.xlu0 %11112, %v10112_v39  }
 0x26a   :  { %v883_v56 = vpop.f32.mrb[14].mxu0 }
 0x26b   :  { %v990_v11 = vpop.f32.mrb[14].mxu1  ;;  %v885_v13 = vpop.f32.mrb[15].mxu0  ;;  %v884_v26 = vadd.f32 %v883_v56, %v12010_v38  ;;  %v11186_v56 = vld [vmem:[%s18358_s0 + $0x20] sm:$0xff] }
 0x26c   :  { %v992_v54 = vpop.f32.mrb[15].mxu1  ;;  %v991_v5 = vadd.f32 %v990_v11, %v12010_v38  ;;  %v886_v18 = vadd.f32 %v885_v13, %v12010_v38 }
 0x26d   :  { %v993_v16 = vadd.f32 %v992_v54, %v12010_v38 }
 0x26e   :  { %v889_v21 = vpop.f32.mrb[16].mxu0 }
 0x26f   :  { %v996_v25 = vpop.f32.mrb[16].mxu1  ;;  %v891_v7 = vpop.f32.mrb[17].mxu0  ;;  %v890_v27 = vadd.f32 %v889_v21, %v12029_v46 }
 0x270   :  { %v998_v55 = vpop.f32.mrb[17].mxu1  ;;  %v997_v61 = vadd.f32 %v996_v25, %v12029_v46  ;;  %v892_v37 = vadd.f32 %v891_v7, %v12029_v46 }
 0x271   :  { %v999_v35 = vadd.f32 %v998_v55, %v12029_v46  ;;  %v12760_v49 = vadd.f32 %v11186_v56, %v890_v27  ;;  %v11187_v46 = vld [vmem:[%s18358_s0] sm:$0xff]  ;;  %v11188_v55 = vld [vmem:[%s18358_s0 + $0x30] sm:$0xff]  ;;  %v11189_v27 = vld [vmem:[%s18358_s0 + $0x28] sm:$0xff] }
 0x272   :  { %v895_v58 = vpop.f32.mrb[18].mxu0  ;;  %v12767_v38 = vadd.f32 %v11187_v46, %v884_v26  ;;  %v11190_v26 = vld [vmem:[%s18358_s0 + $0x10] sm:$0xff] }
 0x273   :  { %v1002_v4 = vpop.f32.mrb[18].mxu1  ;;  %v897_v60 = vpop.f32.mrb[19].mxu0  ;;  %v896_v10 = vadd.f32 %v895_v58, %v12027_v63  ;;  %v12772_v58 = vadd.f32 %v11188_v55, %v997_v61  ;;  %v12783_v13 = vadd.f32 %v11190_v26, %v991_v5  ;;  %v11191_v61 = vld [vmem:[%s18358_s0 + $0x8] sm:$0xff]  ;;  %v11194_v55 = vld [vmem:[%s18358_s0 + $0x40] sm:$0xff] }
 0x274   :  { %v1004_v39 = vpop.f32.mrb[19].mxu1  ;;  %v1003_v7 = vadd.f32 %v1002_v4, %v12027_v63  ;;  %v898_v25 = vadd.f32 %v897_v60, %v12027_v63  ;;  %18709 = vst [vmem:[#allocation94_spill] sm:$0xff] %v12767_v38  ;;  %v12777_v4 = vadd.f32 %v11189_v27, %v892_v37  ;;  %v12788_v56 = vadd.f32 %v11191_v61, %v886_v18  ;;  %v11192_v37 = vld [vmem:[%s18358_s0 + $0x38] sm:$0xff]  ;;  %v11195_v61 = vld [vmem:[%s18358_s0 + $0x50] sm:$0xff] }
 0x275   :  { %18710 = vst [vmem:[#allocation95_spill] sm:$0xff] %v12772_v58  ;;  %v1005_v60 = vadd.f32 %v1004_v39, %v12027_v63  ;;  %18711 = vst [vmem:[#allocation96_spill] sm:$0xff] %v12783_v13  ;;  %v12793_v46 = vadd.f32 %v11192_v37, %v999_v35  ;;  %v11193_v39 = vld [vmem:[%s18358_s0 + $0x18] sm:$0xff]  ;;  %v12804_v18 = vadd.f32 %v11194_v55, %v896_v10  ;;  %v11196_v37 = vld [vmem:[%s18358_s0 + $0x48] sm:$0xff] }
 0x276   :  { %v901_v21 = vpop.f32.mrb[20].mxu0  ;;  %18712 = vst [vmem:[#allocation97_spill] sm:$0xff] %v12788_v56  ;;  %v12799_v5 = vadd.f32 %v11193_v39, %v993_v16  ;;  %v12813_v16 = vadd.f32 %v11195_v61, %v1003_v7  ;;  %v12818_v10 = vadd.f32 %v11196_v37, %v898_v25  ;;  %v1085_v55 = vadd.f32 %v12772_v58, %v12783_v13  ;;  %v11197_v7 = vld [vmem:[%s18358_s0 + $0x58] sm:$0xff] }
 0x277   :  { %v1008_v11 = vpop.f32.mrb[20].mxu1  ;;  %v903_v45 = vpop.f32.mrb[21].mxu0  ;;  %18713 = vst [vmem:[#allocation98_spill] sm:$0xff] %v12793_v46  ;;  %v902_v63 = vadd.f32 %v901_v21, %v12046_v44  ;;  %18715 = vst [vmem:[#allocation100_spill] sm:$0xff] %v12804_v18  ;;  %v1059_v21 = vadd.f32 %v12760_v49, %v12767_v38  ;;  %v1072_v53 = vadd.f32 %v12777_v4, %v12788_v56 }
 0x278   :  { %v1010_v54 = vpop.f32.mrb[21].mxu1  ;;  %18714 = vst [vmem:[#allocation99_spill] sm:$0xff] %v12799_v5  ;;  %v1009_v27 = vadd.f32 %v1008_v11, %v12046_v44  ;;  %v904_v26 = vadd.f32 %v903_v45, %v12046_v44  ;;  %18716 = vst [vmem:[#allocation101_spill] sm:$0xff] %v12813_v16  ;;  %v12828_v61 = vadd.f32 %v11197_v7, %v1005_v60  ;;  %v11199_v60 = vld [vmem:[%s18358_s0 + $0x70] sm:$0xff]  ;;  %v11200_v7 = vld [vmem:[%s18358_s0 + $0x68] sm:$0xff] }
 0x279   :  { %18717 = vst [vmem:[#allocation102_spill] sm:$0xff] %v12818_v10  ;;  %v1011_v11 = vadd.f32 %v1010_v54, %v12046_v44  ;;  %v1098_v44 = vadd.f32 %v12793_v46, %v12799_v5  ;;  %v11198_v54 = vld [vmem:[%s18358_s0 + $0x60] sm:$0xff]  ;;  %v1060_v22 = vadd.f32 %v1059_v21, %v12804_v18  ;;  %v11201_v21 = vld [vmem:[%s18358_s0 + $0x78] sm:$0xff] }
 0x27a   :  { %v907_v35 = vpop.f32.mrb[22].mxu0  ;;  %18718 = vst [vmem:[#allocation103_spill] sm:$0xff] %v12828_v61  ;;  %v12836_v37 = vadd.f32 %v11198_v54, %v902_v63  ;;  %v12849_v23 = vadd.f32 %v11200_v7, %v904_v26 }
 0x27b   :  { %v1014_v39 = vpop.f32.mrb[22].mxu1  ;;  %v909_v45 = vpop.f32.mrb[23].mxu0  ;;  %v908_v8 = vadd.f32 %v907_v35, %v12044_v36  ;;  %v12844_v35 = vadd.f32 %v11199_v60, %v1009_v27  ;;  %v12857_v1 = vadd.f32 %v11201_v21, %v1011_v11  ;;  %v1099_v26 = vadd.f32 %v1098_v44, %v12828_v61  ;;  %v11204_v44 = vld [vmem:[%s18358_s0 + $0x88] sm:$0xff] }
 0x27c   :  { %v1016_v25 = vpop.f32.mrb[23].mxu1  ;;  %18719 = vst [vmem:[#allocation104_spill] sm:$0xff] %v12836_v37  ;;  %v1015_v43 = vadd.f32 %v1014_v39, %v12044_v36  ;;  %v910_v41 = vadd.f32 %v909_v45, %v12044_v36  ;;  %18721 = vst [vmem:[#allocation106_spill] sm:$0xff] %v12849_v23  ;;  %v1086_v39 = vadd.f32 %v1085_v55, %v12813_v16 }
 0x27d   :  { %18720 = vst [vmem:[#allocation105_spill] sm:$0xff] %v12844_v35  ;;  %v1017_v63 = vadd.f32 %v1016_v25, %v12044_v36  ;;  %v1073_v45 = vadd.f32 %v1072_v53, %v12818_v10  ;;  %18722 = vst [vmem:[#allocation107_spill] sm:$0xff] %v12857_v1  ;;  %v11202_v36 = vld [vmem:[%s18358_s0 + $0x80] sm:$0xff]  ;;  %v1061_v11 = vadd.f32 %v1060_v22, %v12836_v37  ;;  %v11205_v22 = vld [vmem:[%s18358_s0 + $0x98] sm:$0xff] }
 0x27e   :  { %v913_v54 = vpop.f32.mrb[24].mxu0  ;;  %v12864_v25 = vadd.f32 %v11202_v36, %v908_v8  ;;  %v12877_v14 = vadd.f32 %v11204_v44, %v910_v41  ;;  %v1100_v44 = vadd.f32 %v1099_v26, %v12857_v1  ;;  %v11209_v26 = vld [vmem:[%s18358_s0 + $0xb8] sm:$0xff] }
 0x27f   :  { %v914_v27 = vadd.f32 %v913_v54, %v12063_v47  ;;  %v1020_v60 = vpop.f32.mrb[24].mxu1  ;;  %v915_v57 = vpop.f32.mrb[25].mxu0  ;;  %v11203_v54 = vld [vmem:[%s18358_s0 + $0x90] sm:$0xff]  ;;  %v12885_v36 = vadd.f32 %v11205_v22, %v1017_v63  ;;  %v11208_v63 = vld [vmem:[%s18358_s0 + $0xa8] sm:$0xff] }
 0x280   :  { %18723 = vst [vmem:[#allocation108_spill] sm:$0xff] %v12864_v25  ;;  %v1021_v53 = vadd.f32 %v1020_v60, %v12063_v47  ;;  %v916_v55 = vadd.f32 %v915_v57, %v12063_v47  ;;  %v1022_v7 = vpop.f32.mrb[25].mxu1  ;;  %v12872_v21 = vadd.f32 %v11203_v54, %v1015_v43  ;;  %18725 = vst [vmem:[#allocation110_spill] sm:$0xff] %v12877_v14  ;;  %v11206_v43 = vld [vmem:[%s18358_s0 + $0xa0] sm:$0xff] }
 0x281   :  { %v1023_v8 = vadd.f32 %v1022_v7, %v12063_v47  ;;  %v1087_v60 = vadd.f32 %v1086_v39, %v12844_v35  ;;  %v1074_v57 = vadd.f32 %v1073_v45, %v12849_v23  ;;  %18726 = vst [vmem:[#allocation111_spill] sm:$0xff] %v12885_v36  ;;  %v12890_v54 = vadd.f32 %v11206_v43, %v914_v27  ;;  %v11207_v47 = vld [vmem:[%s18358_s0 + $0xb0] sm:$0xff] }
 0x282   :  { %18724 = vst [vmem:[#allocation109_spill] sm:$0xff] %v12872_v21  ;;  %v919_v41 = vpop.f32.mrb[26].mxu0  ;;  %v12896_v39 = vadd.f32 %v11207_v47, %v1021_v53  ;;  %v12901_v45 = vadd.f32 %v11208_v63, %v916_v55  ;;  %v1062_v43 = vadd.f32 %v1061_v11, %v12864_v25 }
 0x283   :  { %18727 = vst [vmem:[#allocation112_spill] sm:$0xff] %v12890_v54  ;;  %v920_v7 = vadd.f32 %v919_v41, %v12061_v31  ;;  %v1026_v22 = vpop.f32.mrb[26].mxu1  ;;  %v921_v27 = vpop.f32.mrb[27].mxu0  ;;  %v12908_v9 = vadd.f32 %v11209_v26, %v1023_v8  ;;  %v1088_v55 = vadd.f32 %v1087_v60, %v12872_v21  ;;  %v1075_v63 = vadd.f32 %v1074_v57, %v12877_v14  ;;  %v11210_v41 = vld [vmem:[%s18358_s0 + $0xc0] sm:$0x1] }
 0x284   :  { %18728 = vst [vmem:[#allocation113_spill] sm:$0xff] %v12896_v39  ;;  %18729 = vst [vmem:[#allocation114_spill] sm:$0xff] %v12901_v45  ;;  %v1027_v53 = vadd.f32 %v1026_v22, %v12061_v31  ;;  %v922_v47 = vadd.f32 %v921_v27, %v12061_v31  ;;  %v1028_v51 = vpop.f32.mrb[27].mxu1  ;;  %v1101_v8 = vadd.f32 %v1100_v44, %v12885_v36  ;;  %v11211_v22 = vld [vmem:[%s18358_s0 + $0xd0] sm:$0x1] }
 0x285   :  { %18730 = vst [vmem:[#allocation115_spill] sm:$0xff] %v12908_v9  ;;  %v12917_v11 = vadd.f32 %v11210_v41, %v920_v7  ;;  %v1029_v3 = vadd.f32 %v1028_v51, %v12061_v31  ;;  %v1063_v26 = vadd.f32 %v1062_v43, %v12890_v54  ;;  %v11212_v60 = vld [vmem:[%s18358_s0 + $0xc8] sm:$0x1]  ;;  %v1089_v7 = vadd.f32 %v1088_v55, %v12896_v39  ;;  %v11213_v44 = vld [vmem:[%s18358_s0 + $0xd8] sm:$0x1] }
 0x286   :  { %v12925_v27 = vadd.f32 %v11211_v22, %v1027_v53  ;;  %v12930_v57 = vadd.f32 %v11212_v60, %v922_v47  ;;  %v1076_v31 = vadd.f32 %v1075_v63, %v12901_v45  ;;  %v1102_v53 = vadd.f32 %v1101_v8, %v12908_v9 }
 0x287   :  { %18731 = vst [vmem:[#allocation116_spill] sm:$0xff] %v12917_v11  ;;  %v1064_v51 = vsel %vm69_vm0, %v12917_v11, 0.0  ;;  %v12939_v43 = vadd.f32 %v11213_v44, %v1029_v3 }
 0x288   :  { %18732 = vst [vmem:[#allocation117_spill] sm:$0xff] %v12925_v27  ;;  %18733 = vst [vmem:[#allocation118_spill] sm:$0xff] %v12930_v57  ;;  %v1065_v41 = vadd.f32 %v1064_v51, %v1063_v26  ;;  %v1090_v47 = vsel %vm69_vm0, %v12925_v27, 0.0  ;;  %v1077_v55 = vsel %vm69_vm0, %v12930_v57, 0.0 }
 0x289   :  { %18734 = vst [vmem:[#allocation119_spill] sm:$0xff] %v12939_v43  ;;  %v1091_v22 = vadd.f32 %v1090_v47, %v1089_v7  ;;  %v1078_v63 = vadd.f32 %v1077_v55, %v1076_v31  ;;  %v1103_v60 = vsel %vm69_vm0, %v12939_v43, 0.0 }
 0x28a   :  { %v1066_v17 = vrot.slane %v1065_v41, 4  ;;  %v1104_v28 = vadd.f32 %v1103_v60, %v1102_v53 }
 0x28b   :  { %v1092_v30 = vrot.slane %v1091_v22, 4  ;;  %v1079_v48 = vrot.slane %v1078_v63, 4 }
 0x28c   :  { %v1067_v3 = vadd.f32 %v1066_v17, %v1065_v41  ;;  %v1105_v8 = vrot.slane %v1104_v28, 4 }
 0x28d   :  { %v1093_v44 = vadd.f32 %v1092_v30, %v1091_v22  ;;  %v1080_v20 = vadd.f32 %v1079_v48, %v1078_v63 }
 0x28e   :  { %v1068_v26 = vrot.slane %v1067_v3, 2  ;;  %v1106_v2 = vadd.f32 %v1105_v8, %v1104_v28 }
 0x28f   :  { %v1094_v51 = vrot.slane %v1093_v44, 2  ;;  %v1081_v12 = vrot.slane %v1080_v20, 2 }
 0x290   :  { %v1069_v34 = vadd.f32 %v1068_v26, %v1067_v3  ;;  %v1107_v42 = vrot.slane %v1106_v2, 2 }
 0x291   :  { %v1095_v40 = vadd.f32 %v1094_v51, %v1093_v44  ;;  %v1082_v29 = vadd.f32 %v1081_v12, %v1080_v20 }
 0x292   :  { %v1070_v7 = vrot.slane %v1069_v34, 1 }
 0x293   :  { %v1096_v31 = vrot.slane %v1095_v40, 1  ;;  %v1083_v47 = vrot.slane %v1082_v29, 1 }
 0x294   :  { %v1071_v55 = vadd.f32 %v1070_v7, %v1069_v34  ;;  %v1108_v34 = vadd.f32 %v1107_v42, %v1106_v2 }
 0x295   :  { %v1097_v24 = vadd.f32 %v1096_v31, %v1095_v40  ;;  %v1084_v52 = vadd.f32 %v1083_v47, %v1082_v29 }
 0x296   :  { %v1111_v53 = vmul.f32 0.020408163, %v1071_v55  ;;  %v1109_v26 = vrot.slane %v1108_v34, 1 }
 0x297   :  { %v1113_v60 = vmul.f32 0.020408163, %v1097_v24  ;;  %v1112_v22 = vmul.f32 0.020408163, %v1084_v52 }
 0x298   :  { %v12949_v30 = vsub.f32 %v12767_v38, %v1111_v53  ;;  %v12952_v48 = vsub.f32 %v12760_v49, %v1111_v53  ;;  %v12955_v17 = vsub.f32 %v12804_v18, %v1111_v53  ;;  %v12958_v12 = vsub.f32 %v12836_v37, %v1111_v53 }
 0x299   :  { %v12961_v20 = vsub.f32 %v12783_v13, %v1113_v60  ;;  %v12964_v28 = vsub.f32 %v12864_v25, %v1111_v53  ;;  %v12971_v40 = vsub.f32 %v12917_v11, %v1111_v53  ;;  %v12974_v41 = vsub.f32 %v12772_v58, %v1113_v60 }
 0x29a   :  { %v1143_v24 = vmul.f32 %v12949_v30, %v12949_v30  ;;  %v1147_v29 = vmul.f32 %v12952_v48, %v12952_v48  ;;  %v1151_v63 = vmul.f32 %v12955_v17, %v12955_v17  ;;  %v12979_v2 = vsub.f32 %v12813_v16, %v1113_v60 }
 0x29b   :  { %v12982_v3 = vsub.f32 %v12890_v54, %v1111_v53  ;;  %v1155_v44 = vmul.f32 %v12958_v12, %v12958_v12  ;;  %v1145_v8 = vmul.f32 %v12961_v20, %v12961_v20  ;;  %v1159_v52 = vmul.f32 %v12964_v28, %v12964_v28 }
 0x29c   :  { %v1171_v42 = vadd.f32 %v1147_v29, %v1143_v24  ;;  %v12991_v7 = vsub.f32 %v12844_v35, %v1113_v60  ;;  %v1149_v31 = vmul.f32 %v12974_v41, %v12974_v41  ;;  %v1167_v47 = vmul.f32 %v12971_v40, %v12971_v40 }
 0x29d   :  { %v12998_v55 = vsub.f32 %v12872_v21, %v1113_v60  ;;  %v13001_v53 = vsub.f32 %v12925_v27, %v1113_v60  ;;  %v13004_v24 = vsub.f32 %v12788_v56, %v1112_v22  ;;  %v13009_v11 = vsub.f32 %v12777_v4, %v1112_v22 }
 0x29e   :  { %v1172_v51 = vadd.f32 %v1171_v42, %v1151_v63  ;;  %v1153_v63 = vmul.f32 %v12979_v2, %v12979_v2  ;;  %v1197_v42 = vadd.f32 %v1149_v31, %v1145_v8  ;;  %v1163_v35 = vmul.f32 %v12982_v3, %v12982_v3 }
 0x29f   :  { %v13014_v21 = vsub.f32 %v12896_v39, %v1113_v60  ;;  %v13017_v27 = vsub.f32 %v12818_v10, %v1112_v22  ;;  %v1110_v54 = vadd.f32 %v1109_v26, %v1108_v34  ;;  %v1144_v8 = vmul.f32 %v13004_v24, %v13004_v24 }
 0x2a0   :  { %v1173_v29 = vadd.f32 %v1172_v51, %v1155_v44  ;;  %v1157_v44 = vmul.f32 %v12991_v7, %v12991_v7  ;;  %v1198_v51 = vadd.f32 %v1197_v42, %v1153_v63  ;;  %v1176_v31 = vsel %vm69_vm0, %v1167_v47, 0.0 }
 0x2a1   :  { %v1161_v16 = vmul.f32 %v12998_v55, %v12998_v55  ;;  %v13027_v60 = vsub.f32 %v12849_v23, %v1112_v22  ;;  %v1148_v39 = vmul.f32 %v13009_v11, %v13009_v11  ;;  %v1169_v26 = vmul.f32 %v13001_v53, %v13001_v53 }
 0x2a2   :  { %v1174_v25 = vadd.f32 %v1173_v29, %v1159_v52  ;;  %v1199_v52 = vadd.f32 %v1198_v51, %v1157_v44  ;;  %v13034_v29 = vsub.f32 %v12877_v14, %v1112_v22  ;;  %v13037_v63 = vsub.f32 %v12930_v57, %v1112_v22 }
 0x2a3   :  { %v1152_v47 = vmul.f32 %v13017_v27, %v13017_v27  ;;  %v1184_v42 = vadd.f32 %v1148_v39, %v1144_v8  ;;  %v1114_v23 = vmul.f32 0.020408163, %v1110_v54  ;;  %v1165_v13 = vmul.f32 %v13014_v21, %v13014_v21 }
 0x2a4   :  { %v1175_v34 = vadd.f32 %v1174_v25, %v1163_v35  ;;  %v1200_v35 = vadd.f32 %v1199_v52, %v1161_v16  ;;  %v13044_v25 = vsub.f32 %v12901_v45, %v1112_v22  ;;  %v1156_v44 = vmul.f32 %v13027_v60, %v13027_v60 }
 0x2a5   :  { %v1185_v51 = vadd.f32 %v1184_v42, %v1152_v47  ;;  %v13049_v57 = vsub.f32 %v12799_v5, %v1114_v23  ;;  %v13052_v14 = vsub.f32 %v12793_v46, %v1114_v23  ;;  %v1202_v8 = vsel %vm69_vm0, %v1169_v26, 0.0 }
 0x2a6   :  { %v1177_v37 = vadd.f32 %v1176_v31, %v1175_v34  ;;  %v1201_v54 = vadd.f32 %v1200_v35, %v1165_v13  ;;  %v13056_v31 = vsub.f32 %v12828_v61, %v1114_v23  ;;  %v1160_v16 = vmul.f32 %v13034_v29, %v13034_v29 }
 0x2a7   :  { %v1168_v22 = vmul.f32 %v13037_v63, %v13037_v63  ;;  %v1186_v34 = vadd.f32 %v1185_v51, %v1156_v44  ;;  %v1146_v52 = vmul.f32 %v13049_v57, %v13049_v57  ;;  %v13065_v45 = vsub.f32 %v12857_v1, %v1114_v23 }
 0x2a8   :  { %v1178_v39 = vrot.slane %v1177_v37, 4  ;;  %v1203_v42 = vadd.f32 %v1202_v8, %v1201_v54  ;;  %v1150_v13 = vmul.f32 %v13052_v14, %v13052_v14  ;;  %v1164_v26 = vmul.f32 %v13044_v25, %v13044_v25 }
 0x2a9   :  { %v1187_v35 = vadd.f32 %v1186_v34, %v1160_v16  ;;  %v13072_v61 = vsub.f32 %v12885_v36, %v1114_v23  ;;  %v1154_v51 = vmul.f32 %v13056_v31, %v13056_v31  ;;  %v1189_v54 = vsel %vm69_vm0, %v1168_v22, 0.0 }
 0x2aa   :  { %v1179_v47 = vadd.f32 %v1178_v39, %v1177_v37  ;;  %v1204_v44 = vrot.slane %v1203_v42, 4  ;;  %v1210_v37 = vadd.f32 %v1150_v13, %v1146_v52  ;;  %v13078_v8 = vsub.f32 %v12908_v9, %v1114_v23 }
 0x2ab   :  { %v1188_v39 = vadd.f32 %v1187_v35, %v1164_v26  ;;  %v13081_v1 = vsub.f32 %v12939_v43, %v1114_v23  ;;  %v1158_v34 = vmul.f32 %v13065_v45, %v13065_v45  ;;  %v1162_v52 = vmul.f32 %v13072_v61, %v13072_v61 }
 0x2ac   :  { %v1180_v5 = vrot.slane %v1179_v47, 2  ;;  %v1205_v16 = vadd.f32 %v1204_v44, %v1203_v42  ;;  %v1211_v36 = vadd.f32 %v1210_v37, %v1154_v51 }
 0x2ad   :  { %v1190_v10 = vadd.f32 %v1189_v54, %v1188_v39  ;;  %v1170_v26 = vmul.f32 %v13081_v1, %v13081_v1 }
 0x2ae   :  { %v1181_v46 = vadd.f32 %v1180_v5, %v1179_v47  ;;  %v1206_v56 = vrot.slane %v1205_v16, 2  ;;  %v1212_v13 = vadd.f32 %v1211_v36, %v1158_v34  ;;  %v1166_v5 = vmul.f32 %v13078_v8, %v13078_v8 }
 0x2af   :  { %v1191_v22 = vrot.slane %v1190_v10, 4  ;;  %v1215_v54 = vsel %vm69_vm0, %v1170_v26, 0.0 }
 0x2b0   :  { %v1182_v58 = vrot.slane %v1181_v46, 1  ;;  %v1207_v23 = vadd.f32 %v1206_v56, %v1205_v16  ;;  %v1213_v47 = vadd.f32 %v1212_v13, %v1162_v52 }
 0x2b1   :  { %v1192_v42 = vadd.f32 %v1191_v22, %v1190_v10 }
 0x2b2   :  { %v1183_v35 = vadd.f32 %v1182_v58, %v1181_v46  ;;  %v1208_v51 = vrot.slane %v1207_v23, 1  ;;  %v1214_v37 = vadd.f32 %v1213_v47, %v1166_v5 }
 0x2b3   :  { %v1193_v39 = vrot.slane %v1192_v42, 2 }
 0x2b4   :  { %v1223_v44 = vmul.f32 0.020408163, %v1183_v35  ;;  %v1209_v9 = vadd.f32 %v1208_v51, %v1207_v23  ;;  %v1216_v36 = vadd.f32 %v1215_v54, %v1214_v37 }
 0x2b5   :  { %v1194_v34 = vadd.f32 %v1193_v39, %v1192_v42 }
 0x2b6   :  { %v1227_v43 = vadd.f32 1e-05, %v1223_v44  ;;  %v1225_v18 = vmul.f32 0.020408163, %v1209_v9  ;;  %v1217_v38 = vrot.slane %v1216_v36, 4 }
 0x2b7   :  { %v1195_v58 = vrot.slane %v1194_v34, 1 }
 0x2b8   :  { %11126 = vrsqrt.f32 %v1227_v43  ;;  %v1229_v56 = vadd.f32 1e-05, %v1225_v18  ;;  %v1218_v46 = vadd.f32 %v1217_v38, %v1216_v36 }
 0x2b9   :  { %v1196_v16 = vadd.f32 %v1195_v58, %v1194_v34 }
 0x2ba   :  { %11128 = vrsqrt.f32 %v1229_v56  ;;  %v1219_v52 = vrot.slane %v1218_v46, 2 }
 0x2bb   :  { %v1224_v10 = vmul.f32 0.020408163, %v1196_v16 }
 0x2bc   :  { %v1220_v13 = vadd.f32 %v1219_v52, %v1218_v46 }
 0x2bd   :  { %v1228_v22 = vadd.f32 1e-05, %v1224_v10 }
 0x2be   :  { %v1221_v35 = vrot.slane %v1220_v13, 1 }
 0x2bf   :  { %11130 = vrsqrt.f32 %v1228_v22 }
 0x2c0   :  { %v1222_v26 = vadd.f32 %v1221_v35, %v1220_v13 }
 0x2c2   :  { %v11127_v5 = vpop.eup %11126  ;;  %v1226_v43 = vmul.f32 0.020408163, %v1222_v26 }
 0x2c3   :  { %v1235_v23 = vmul.f32 %v11127_v5, %v12949_v30  ;;  %v1239_v47 = vmul.f32 %v11127_v5, %v12952_v48  ;;  %v1243_v9 = vmul.f32 %v11127_v5, %v12955_v17  ;;  %v1247_v18 = vmul.f32 %v11127_v5, %v12958_v12 }
 0x2c4   :  { %v13099_v51 = vpop.eup %11128  ;;  %v1230_v37 = vadd.f32 1e-05, %v1226_v43  ;;  %v1251_v17 = vmul.f32 %v11127_v5, %v12964_v28  ;;  %v1255_v54 = vmul.f32 %v11127_v5, %v12982_v3  ;;  %v1259_v46 = vmul.f32 %v11127_v5, %v12971_v40  ;;  %v18735_v3 = vld [vmem:[#allocation5_spill] sm:$0xff] }
 0x2c5   :  { %v1306_v38 = vmul.f32 %v12080_v59, %v1235_v23  ;;  %v1310_v42 = vmul.f32 %v12078_v62, %v1239_v47  ;;  %v1314_v44 = vmul.f32 %v12103_v19, %v1243_v9  ;;  %v1318_v39 = vmul.f32 %v12101_v0, %v1247_v18  ;;  %v18736_v9 = vld [vmem:[#allocation7_spill] sm:$0xff] }
 0x2c6   :  { %11132 = vrsqrt.f32 %v1230_v37  ;;  %v1237_v12 = vmul.f32 %v13099_v51, %v12961_v20  ;;  %v1241_v36 = vmul.f32 %v13099_v51, %v12974_v41  ;;  %v1322_v28 = vmul.f32 %v12123_v15, %v1251_v17 }
 0x2c7   :  { %v1377_v30 = vadd.f32 %v12092_v6, %v1306_v38  ;;  %v1381_v48 = vadd.f32 %v12090_v50, %v1310_v42  ;;  %v13111_v34 = vadd.f32 %v12113_v33, %v1314_v44  ;;  %v13114_v58 = vadd.f32 %v12111_v32, %v1318_v39 }
 0x2c8   :  { %v1326_v52 = vmul.f32 %v18735_v3, %v1255_v54  ;;  %v1308_v41 = vmul.f32 %v12080_v59, %v1237_v12  ;;  %v1245_v13 = vmul.f32 %v13099_v51, %v12979_v2  ;;  %v1312_v22 = vmul.f32 %v12078_v62, %v1241_v36 }
 0x2c9   :  { %v11131_v56 = vpop.eup %11130  ;;  %v10188_v16 = vpack.c.bf16 %v1381_v48, %v1377_v30  ;;  %v10192_v5 = vpack.c.bf16 %v13114_v58, %v13111_v34  ;;  %v18737_v48 = vld [vmem:[#allocation6_spill] sm:$0xff]  ;;  %v1253_v54 = vmul.f32 %v13099_v51, %v12998_v55 }
 0x2ca   :  { %v1236_v10 = vmul.f32 %v11131_v56, %v13004_v24  ;;  %v1240_v20 = vmul.f32 %v11131_v56, %v13009_v11  ;;  %v1244_v35 = vmul.f32 %v11131_v56, %v13017_v27  ;;  %v1248_v40 = vmul.f32 %v11131_v56, %v13027_v60 }
 0x2cb   :  { %v1249_v11 = vmul.f32 %v13099_v51, %v12991_v7  ;;  %v1252_v23 = vmul.f32 %v11131_v56, %v13034_v29  ;;  %v1256_v27 = vmul.f32 %v11131_v56, %v13044_v25  ;;  %v1393_v60 = vadd.f32 %v18736_v9, %v1322_v28 }
 0x2cc   :  { %v1307_v26 = vmul.f32 %v12080_v59, %v1236_v10  ;;  %v1311_v24 = vmul.f32 %v12078_v62, %v1240_v20  ;;  %v1315_v2 = vmul.f32 %v12103_v19, %v1244_v35  ;;  %v1319_v47 = vmul.f32 %v12101_v0, %v1248_v40 }
 0x2cd   :  { %v1379_v38 = vadd.f32 %v12092_v6, %v1308_v41  ;;  %v1323_v42 = vmul.f32 %v12123_v15, %v1252_v23  ;;  %v1316_v44 = vmul.f32 %v12103_v19, %v1245_v13  ;;  %v1327_v37 = vmul.f32 %v18735_v3, %v1256_v27  ;;  %v18738_v13 = vld [vmem:[#allocation9_spill] sm:$0xff] }
 0x2ce   :  { %v1378_v43 = vadd.f32 %v12092_v6, %v1307_v26  ;;  %v1382_v18 = vadd.f32 %v12090_v50, %v1311_v24  ;;  %v1386_v7 = vadd.f32 %v12113_v33, %v1315_v2  ;;  %v1390_v29 = vadd.f32 %v12111_v32, %v1319_v47 }
 0x2cf   :  { %v1260_v25 = vmul.f32 %v11131_v56, %v13037_v63  ;;  %v1397_v17 = vadd.f32 %v18737_v48, %v1326_v52  ;;  %v1394_v58 = vadd.f32 %v18736_v9, %v1323_v42  ;;  %v1398_v63 = vadd.f32 %v18737_v48, %v1327_v37  ;;  %v9609_v42 = vld [vmem:[%s18361_s3 + $0x40] sm:$0xff]  ;;  %v9612_v37 = vld [vmem:[%s18361_s3 + $0x58] sm:$0xff] }
 0x2d0   :  { %v11133_v39 = vpop.eup %11132  ;;  %v10186_v30 = vpack.c.bf16 %v1382_v18, %v1378_v43  ;;  %v10190_v34 = vpack.c.bf16 %v1390_v29, %v1386_v7  ;;  %v1257_v41 = vmul.f32 %v13099_v51, %v13014_v21  ;;  %v1387_v21 = vadd.f32 %v12113_v33, %v1316_v44  ;;  %v9608_v18 = vld [vmem:[%s18361_s3 + $0x38] sm:$0xff]  ;;  %v9610_v29 = vld [vmem:[%s18361_s3 + $0x48] sm:$0xff]  ;;  %v9611_v44 = vld [vmem:[%s18361_s3 + $0x50] sm:$0xff] }
 0x2d1   :  { %v1238_v12 = vmul.f32 %v11133_v39, %v13049_v57  ;;  %v1242_v36 = vmul.f32 %v11133_v39, %v13052_v14  ;;  %v1246_v28 = vmul.f32 %v11133_v39, %v13056_v31  ;;  %v1250_v10 = vmul.f32 %v11133_v39, %v13065_v45 }
 0x2d2   :  { %10187 = vmatprep.subr.bf16.mxu0 %v10186_v30  ;;  %v1254_v56 = vmul.f32 %v11133_v39, %v13072_v61  ;;  %v1383_v57 = vadd.f32 %v12090_v50, %v1312_v22  ;;  %v1258_v14 = vmul.f32 %v11133_v39, %v13078_v8  ;;  %v1320_v45 = vmul.f32 %v12101_v0, %v1249_v11 }
 0x2d3   :  { %v1309_v52 = vmul.f32 %v12080_v59, %v1238_v12  ;;  %v1313_v55 = vmul.f32 %v12078_v62, %v1242_v36  ;;  %10189 = vmatpush1.bf16.msra.mxu0 %v10188_v16  ;;  %v1317_v20 = vmul.f32 %v12103_v19, %v1246_v28  ;;  %v1321_v31 = vmul.f32 %v12101_v0, %v1250_v10 }
 0x2d4   :  { %10191 = vmatprep.subr.bf16.mxu0 %v10190_v34  ;;  %v1325_v62 = vmul.f32 %v12123_v15, %v1254_v56  ;;  %v1329_v16 = vmul.f32 %v18735_v3, %v1258_v14  ;;  %v1330_v8 = vmul.f32 %v18738_v13, %v1259_v46  ;;  %v10194_v35 = vpack.c.bf16 %v1398_v63, %v1394_v58  ;;  %v18742_v34 = vld [vmem:[#allocation10_spill] sm:$0xff] }
 0x2d5   :  { %v1380_v61 = vadd.f32 %v12092_v6, %v1309_v52  ;;  %v1384_v59 = vadd.f32 %v12090_v50, %v1313_v55  ;;  %v1388_v22 = vadd.f32 %v12113_v33, %v1317_v20  ;;  %v1392_v19 = vadd.f32 %v12111_v32, %v1321_v31  ;;  %v18739_v33 = vld [vmem:[#allocation8_spill] sm:$0xff] }
 0x2d6   :  { %v10200_v0 = vpack.c.bf16 %v1383_v57, %v1379_v38  ;;  %v1331_v6 = vmul.f32 %v18738_v13, %v1260_v25  ;;  %v1391_v50 = vadd.f32 %v12111_v32, %v1320_v45  ;;  %v10196_v26 = vpack.c.bf16 %v1397_v17, %v1393_v60  ;;  %v9614_v25 = vld [vmem:[%s18361_s3 + $0x68] sm:$0x1]  ;;  %v18741_v17 = vld [vmem:[#allocation11_spill] sm:$0xff] }
 0x2d7   :  { %v10198_v40 = vpack.c.bf16 %v1384_v59, %v1380_v61  ;;  %10193 = vmatpush1.bf16.msra.mxu0 %v10192_v5  ;;  %v1324_v24 = vmul.f32 %v12123_v15, %v1253_v54  ;;  %v1328_v46 = vmul.f32 %v18735_v3, %v1257_v41  ;;  %v1262_v11 = vmul.f32 %v11133_v39, %v13081_v1  ;;  %v9613_v39 = vld [vmem:[%s18361_s3 + $0x60] sm:$0xff] }
 0x2d8   :  { %10195 = vmatprep.subr.bf16.mxu0 %v10194_v35  ;;  %v10202_v23 = vpack.c.bf16 %v1392_v19, %v1388_v22  ;;  %v1396_v2 = vadd.f32 %v18736_v9, %v1325_v62  ;;  %v1400_v5 = vadd.f32 %v18737_v48, %v1329_v16  ;;  %v1402_v47 = vadd.f32 %v18739_v33, %v1331_v6  ;;  %v18743_v16 = vld [vmem:[#allocation13_spill] sm:$0xff] }
 0x2d9   :  { %10199 = vmatprep.subr.bf16.mxu1 %v10198_v40  ;;  %v1261_v32 = vmul.f32 %v13099_v51, %v13001_v53  ;;  %v10204_v27 = vpack.c.bf16 %v1391_v50, %v1387_v21  ;;  %v1395_v15 = vadd.f32 %v18736_v9, %v1324_v24  ;;  %v1399_v3 = vadd.f32 %v18737_v48, %v1328_v46 }
 0x2da   :  { %10201 = vmatpush1.bf16.msra.mxu1 %v10200_v0  ;;  %v10206_v1 = vpack.c.bf16 %v1400_v5, %v1396_v2  ;;  %v1333_v60 = vmul.f32 %v18738_v13, %v1262_v11  ;;  %v1401_v43 = vadd.f32 %v18739_v33, %v1330_v8  ;;  %v18740_v38 = vmov 0.0   ;;  %v18744_v0 = vld [vmem:[#allocation12_spill] sm:$0xff] }
 0x2db   :  { %10203 = vmatprep.subr.bf16.mxu1 %v10202_v23  ;;  %10197 = vmatpush1.bf16.msra.mxu0 %v10196_v26  ;;  %v1332_v53 = vmul.f32 %v18738_v13, %v1261_v32  ;;  %v10208_v51 = vpack.c.bf16 %v1399_v3, %v1395_v15 }
 0x2dc   :  { %9622 = vmatprep.subr.msk.mxu0 %vm69_vm0, %v1402_v47  ;;  %v1404_v9 = vadd.f32 %v18739_v33, %v1333_v60 }
 0x2dd   :  { %v1403_v7 = vadd.f32 %v18739_v33, %v1332_v53 }
 0x2de   :  { %10205 = vmatpush1.bf16.msra.mxu1 %v10204_v27 }
 0x2df   :  { %10207 = vmatprep.subr.bf16.mxu1 %v10206_v1  ;;  %9623 = vmatpush1.msk.msra.mxu0 %vm69_vm0, %v1401_v43 }
 0x2e0   :  { %9624 = vmatmul.mubr.msk.f32.vlgmr.msra.gmra.mrb[28].mxu0 %vm459_vm1, %v9608_v18 }
 0x2e1   :  { %1559 = vmatprep.mubr.f32.mxu0 %v18740_v38 }
 0x2e2   :  { %10209 = vmatpush1.bf16.msra.mxu1 %v10208_v51 }
 0x2e3   :  { %9631 = vmatprep.subr.msk.mxu1 %vm69_vm0, %v1404_v9  ;;  %v18745_v9 = vld [vmem:[#allocation15_spill] sm:$0xff] }
 0x2e4   :  { %9625 = vmatmul.mubr.msk.f32.gmra.mrb[30].mxu0 %vm459_vm1, %v9609_v42 }
 0x2e5   :  { %1565 = vmatprep.mubr.f32.mxu0 %v18740_v38 }
 0x2e6   :  { %9632 = vmatpush1.msk.msra.mxu1 %vm69_vm0, %v1403_v7 }
 0x2e7   :  { %9633 = vmatmul.mubr.msk.f32.vlgmr.msra.gmra.mrb[28].mxu1 %vm459_vm1, %v9608_v18 }
 0x2e8   :  { %1666 = vmatprep.mubr.f32.mxu1 %v18740_v38  ;;  %9626 = vmatmul.mubr.msk.f32.gmra.mrb[32].mxu0 %vm459_vm1, %v9610_v29 }
 0x2e9   :  { %1571 = vmatprep.mubr.f32.mxu0 %v18740_v38 }
 0x2eb   :  { %9634 = vmatmul.mubr.msk.f32.gmra.mrb[30].mxu1 %vm459_vm1, %v9609_v42 }
 0x2ec   :  { %1672 = vmatprep.mubr.f32.mxu1 %v18740_v38  ;;  %9627 = vmatmul.mubr.msk.f32.gmra.mrb[34].mxu0 %vm459_vm1, %v9611_v44 }
 0x2ed   :  { %1577 = vmatprep.mubr.f32.mxu0 %v18740_v38 }
 0x2ef   :  { %9635 = vmatmul.mubr.msk.f32.gmra.mrb[32].mxu1 %vm459_vm1, %v9610_v29 }
 0x2f0   :  { %1678 = vmatprep.mubr.f32.mxu1 %v18740_v38  ;;  %9628 = vmatmul.mubr.msk.f32.gmra.mrb[36].mxu0 %vm459_vm1, %v9612_v37 }
 0x2f1   :  { %1583 = vmatprep.mubr.f32.mxu0 %v18740_v38 }
 0x2f3   :  { %9636 = vmatmul.mubr.msk.f32.gmra.mrb[34].mxu1 %vm459_vm1, %v9611_v44 }
 0x2f4   :  { %1684 = vmatprep.mubr.f32.mxu1 %v18740_v38  ;;  %9629 = vmatmul.mubr.msk.f32.gmra.mrb[38].mxu0 %vm459_vm1, %v9613_v39 }
 0x2f5   :  { %1589 = vmatprep.mubr.f32.mxu0 %v18740_v38 }
 0x2f7   :  { %9637 = vmatmul.mubr.msk.f32.gmra.mrb[36].mxu1 %vm459_vm1, %v9612_v37 }
 0x2f8   :  { %1690 = vmatprep.mubr.f32.mxu1 %v18740_v38  ;;  %9630 = vmatmul.mubr.msk.f32.gmra.mrb[40].mxu0 %vm459_vm1, %v9614_v25 }
 0x2f9   :  { %1879 = vmatprep.mubr.f32.mxu0 %v18740_v38 }
 0x2fb   :  { %9638 = vmatmul.mubr.msk.f32.gmra.mrb[38].mxu1 %vm459_vm1, %v9613_v39 }
 0x2fc   :  { %1696 = vmatprep.mubr.f32.mxu1 %v18740_v38 }
 0x2ff   :  { %9639 = vmatmul.mubr.msk.f32.gmra.mrb[40].mxu1 %vm459_vm1, %v9614_v25  ;;  %v18746_v25 = vld [vmem:[#allocation14_spill] sm:$0xff] }
 0x300   :  { %1986 = vmatprep.mubr.f32.mxu1 %v18740_v38 }
 0x3b3   :  { %v1555_v30 = vpop.f32.mrb[28].mxu0 }
 0x3b4   :  { %v1557_v48 = vpop.f32.mrb[29].mxu0  ;;  %v1556_v54 = vadd.f32 %v1555_v30, %v18741_v17 }
 0x3b5   :  { %v1558_v12 = vadd.f32 %v1557_v48, %v18741_v17 }
 0x3b6   :  { %v1703_v63 = vmax.f32 %v1556_v54, 0.0 }
 0x3b7   :  { %v1561_v36 = vpop.f32.mrb[30].mxu0  ;;  %v1704_v55 = vmax.f32 %v1558_v12, 0.0 }
 0x3b8   :  { %v1562_v58 = vadd.f32 %v1561_v36, %v18742_v34  ;;  %v1563_v28 = vpop.f32.mrb[31].mxu0 }
 0x3b9   :  { %v1564_v10 = vadd.f32 %v1563_v28, %v18742_v34 }
 0x3ba   :  { %v1662_v56 = vpop.f32.mrb[28].mxu1  ;;  %v1707_v52 = vmax.f32 %v1562_v58, 0.0 }
 0x3bb   :  { %v1664_v57 = vpop.f32.mrb[29].mxu1  ;;  %v1708_v14 = vmax.f32 %v1564_v10, 0.0  ;;  %v1567_v20 = vpop.f32.mrb[32].mxu0  ;;  %v1663_v41 = vadd.f32 %v1662_v56, %v18741_v17 }
 0x3bc   :  { %v10212_v31 = vpack.c.bf16 %v1707_v52, %v1703_v63  ;;  %v1569_v45 = vpop.f32.mrb[33].mxu0  ;;  %v1665_v59 = vadd.f32 %v1664_v57, %v18741_v17  ;;  %v1568_v13 = vadd.f32 %v1567_v20, %v18743_v16 }
 0x3bd   :  { %v10210_v61 = vpack.c.bf16 %v1708_v14, %v1704_v55  ;;  %v1570_v19 = vadd.f32 %v1569_v45, %v18743_v16  ;;  %v1705_v50 = vmax.f32 %v1663_v41, 0.0 }
 0x3be   :  { %v1668_v62 = vpop.f32.mrb[30].mxu1  ;;  %v1706_v46 = vmax.f32 %v1665_v59, 0.0  ;;  %v1711_v23 = vmax.f32 %v1568_v13, 0.0 }
 0x3bf   :  { %v1669_v8 = vadd.f32 %v1668_v62, %v18742_v34  ;;  %v1670_v22 = vpop.f32.mrb[31].mxu1  ;;  %v1573_v35 = vpop.f32.mrb[34].mxu0  ;;  %10211 = vmatprep.subr.bf16.mxu0 %v10210_v61  ;;  %v1712_v47 = vmax.f32 %v1570_v19, 0.0  ;;  %v18747_v61 = vld [vmem:[#allocation17_spill] sm:$0xff] }
 0x3c0   :  { %v1671_v40 = vadd.f32 %v1670_v22, %v18742_v34  ;;  %v1574_v21 = vadd.f32 %v1573_v35, %v18744_v0  ;;  %v1575_v6 = vpop.f32.mrb[35].mxu0  ;;  %10213 = vmatpush1.bf16.msra.mxu0 %v10212_v31 }
 0x3c1   :  { %v1709_v26 = vmax.f32 %v1669_v8, 0.0  ;;  %v1576_v24 = vadd.f32 %v1575_v6, %v18744_v0 }
 0x3c2   :  { %v1710_v11 = vmax.f32 %v1671_v40, 0.0  ;;  %v1674_v2 = vpop.f32.mrb[32].mxu1  ;;  %v1715_v5 = vmax.f32 %v1574_v21, 0.0 }
 0x3c3   :  { %v10224_v33 = vpack.c.bf16 %v1709_v26, %v1705_v50  ;;  %v1676_v32 = vpop.f32.mrb[33].mxu1  ;;  %v1716_v27 = vmax.f32 %v1576_v24, 0.0  ;;  %v1579_v15 = vpop.f32.mrb[36].mxu0  ;;  %v1675_v43 = vadd.f32 %v1674_v2, %v18743_v16  ;;  %v9640_v24 = vld [vmem:[%s18363_s5 + $0x38] sm:$0xff] }
 0x3c4   :  { %v10222_v3 = vpack.c.bf16 %v1710_v11, %v1706_v46  ;;  %v10216_v1 = vpack.c.bf16 %v1715_v5, %v1711_v23  ;;  %v1581_v60 = vpop.f32.mrb[37].mxu0  ;;  %v1677_v53 = vadd.f32 %v1676_v32, %v18743_v16  ;;  %v1580_v42 = vadd.f32 %v1579_v15, %v18745_v9  ;;  %v9643_v15 = vld [vmem:[%s18363_s5 + $0x50] sm:$0xff] }
 0x3c5   :  { %v10214_v18 = vpack.c.bf16 %v1716_v27, %v1712_v47  ;;  %v1582_v44 = vadd.f32 %v1581_v60, %v18745_v9  ;;  %v1713_v17 = vmax.f32 %v1675_v43, 0.0  ;;  %v9641_v47 = vld [vmem:[%s18363_s5 + $0x40] sm:$0xff]  ;;  %v9642_v27 = vld [vmem:[%s18363_s5 + $0x48] sm:$0xff] }
 0x3c6   :  { %v1680_v51 = vpop.f32.mrb[34].mxu1  ;;  %10223 = vmatprep.subr.bf16.mxu1 %v10222_v3  ;;  %v1714_v36 = vmax.f32 %v1677_v53, 0.0  ;;  %v1719_v58 = vmax.f32 %v1580_v42, 0.0  ;;  %v9644_v3 = vld [vmem:[%s18363_s5 + $0x58] sm:$0xff]  ;;  %v9646_v60 = vld [vmem:[%s18363_s5 + $0x68] sm:$0x1] }
 0x3c7   :  { %v1681_v7 = vadd.f32 %v1680_v51, %v18744_v0  ;;  %v1682_v29 = vpop.f32.mrb[35].mxu1  ;;  %10225 = vmatpush1.bf16.msra.mxu1 %v10224_v33  ;;  %v1585_v37 = vpop.f32.mrb[38].mxu0  ;;  %10215 = vmatprep.subr.bf16.mxu0 %v10214_v18  ;;  %v1720_v56 = vmax.f32 %v1582_v44, 0.0  ;;  %v18748_v44 = vld [vmem:[#allocation19_spill] sm:$0xff] }
 0x3c8   :  { %v1683_v39 = vadd.f32 %v1682_v29, %v18744_v0  ;;  %v1586_v30 = vadd.f32 %v1585_v37, %v18746_v25  ;;  %v1587_v48 = vpop.f32.mrb[39].mxu0  ;;  %10217 = vmatpush1.bf16.msra.mxu0 %v10216_v1  ;;  %v9645_v1 = vld [vmem:[%s18363_s5 + $0x60] sm:$0xff] }
 0x3c9   :  { %v1717_v54 = vmax.f32 %v1681_v7, 0.0  ;;  %v1588_v12 = vadd.f32 %v1587_v48, %v18746_v25 }
 0x3ca   :  { %v1718_v34 = vmax.f32 %v1683_v39, 0.0  ;;  %v1686_v28 = vpop.f32.mrb[36].mxu1  ;;  %v1723_v10 = vmax.f32 %v1586_v30, 0.0 }
 0x3cb   :  { %v10228_v63 = vpack.c.bf16 %v1717_v54, %v1713_v17  ;;  %v1688_v52 = vpop.f32.mrb[37].mxu1  ;;  %v1724_v55 = vmax.f32 %v1588_v12, 0.0  ;;  %v1591_v57 = vpop.f32.mrb[40].mxu0  ;;  %v1687_v45 = vadd.f32 %v1686_v28, %v18745_v9  ;;  %v18749_v17 = vld [vmem:[#allocation16_spill] sm:$0xff]  ;;  %v18750_v12 = vld [vmem:[#allocation18_spill] sm:$0xff] }
 0x3cc   :  { %v10226_v14 = vpack.c.bf16 %v1718_v34, %v1714_v36  ;;  %v10220_v20 = vpack.c.bf16 %v1723_v10, %v1719_v58  ;;  %v1593_v31 = vpop.f32.mrb[41].mxu0  ;;  %v1689_v62 = vadd.f32 %v1688_v52, %v18745_v9  ;;  %v1592_v13 = vadd.f32 %v1591_v57, %v18747_v61 }
 0x3cd   :  { %v10218_v41 = vpack.c.bf16 %v1724_v55, %v1720_v56  ;;  %v1594_v59 = vadd.f32 %v1593_v31, %v18747_v61  ;;  %v1721_v40 = vmax.f32 %v1687_v45, 0.0 }
 0x3ce   :  { %v1692_v16 = vpop.f32.mrb[38].mxu1  ;;  %10227 = vmatprep.subr.bf16.mxu1 %v10226_v14  ;;  %v1722_v21 = vmax.f32 %v1689_v62, 0.0  ;;  %v1727_v50 = vmax.f32 %v1592_v13, 0.0 }
 0x3cf   :  { %v1693_v8 = vadd.f32 %v1692_v16, %v18746_v25  ;;  %v1694_v22 = vpop.f32.mrb[39].mxu1  ;;  %10229 = vmatpush1.bf16.msra.mxu1 %v10228_v63  ;;  %v1728_v19 = vmax.f32 %v1594_v59, 0.0  ;;  %10219 = vmatprep.subr.bf16.mxu0 %v10218_v41  ;;  %v18752_v41 = vld [vmem:[#allocation94_spill] sm:$0xff]  ;;  %v18753_v59 = vld [vmem:[#allocation100_spill] sm:$0xff] }
 0x3d0   :  { %v1695_v35 = vadd.f32 %v1694_v22, %v18746_v25  ;;  %10221 = vmatpush1.bf16.msra.mxu0 %v10220_v20  ;;  %v18751_v20 = vld [vmem:[#allocation21_spill] sm:$0xff] }
 0x3d1   :  { %v1725_v0 = vmax.f32 %v1693_v8, 0.0  ;;  %9654 = vmatprep.subr.msk.mxu0 %vm69_vm0, %v1728_v19  ;;  %v18754_v8 = vld [vmem:[#allocation97_spill] sm:$0xff]  ;;  %v18755_v19 = vld [vmem:[#allocation20_spill] sm:$0xff] }
 0x3d2   :  { %v1726_v6 = vmax.f32 %v1695_v35, 0.0  ;;  %v1698_v26 = vpop.f32.mrb[40].mxu1 }
 0x3d3   :  { %v10232_v46 = vpack.c.bf16 %v1725_v0, %v1721_v40  ;;  %v1700_v11 = vpop.f32.mrb[41].mxu1  ;;  %v1699_v5 = vadd.f32 %v1698_v26, %v18747_v61  ;;  %v18756_v0 = vld [vmem:[#allocation95_spill] sm:$0xff] }
 0x3d4   :  { %v10230_v23 = vpack.c.bf16 %v1726_v6, %v1722_v21  ;;  %v1701_v2 = vadd.f32 %v1700_v11, %v18747_v61  ;;  %9655 = vmatpush1.msk.msra.mxu0 %vm69_vm0, %v1727_v50  ;;  %v18758_v6 = vld [vmem:[#allocation102_spill] sm:$0xff] }
 0x3d5   :  { %9656 = vmatmul.mubr.msk.f32.vlgmr.msra.gmra.mrb[42].mxu0 %vm459_vm1, %v9640_v24  ;;  %v1729_v32 = vmax.f32 %v1699_v5, 0.0 }
 0x3d6   :  { %v1730_v33 = vmax.f32 %v1701_v2, 0.0  ;;  %10231 = vmatprep.subr.bf16.mxu1 %v10230_v23  ;;  %1885 = vmatprep.mubr.f32.mxu0 %v18740_v38  ;;  %v18761_v2 = vld [vmem:[#allocation98_spill] sm:$0xff] }
 0x3d7   :  { %10233 = vmatpush1.bf16.msra.mxu1 %v10232_v46  ;;  %v18759_v46 = vld [vmem:[#allocation96_spill] sm:$0xff] }
 0x3d8   :  { %9663 = vmatprep.subr.msk.mxu1 %vm69_vm0, %v1730_v33  ;;  %v18763_v33 = vld [vmem:[#allocation104_spill] sm:$0xff] }
 0x3d9   :  { %9657 = vmatmul.mubr.msk.f32.gmra.mrb[44].mxu0 %vm459_vm1, %v9641_v47 }
 0x3da   :  { %1891 = vmatprep.mubr.f32.mxu0 %v18740_v38 }
 0x3db   :  { %9664 = vmatpush1.msk.msra.mxu1 %vm69_vm0, %v1729_v32 }
 0x3dc   :  { %9665 = vmatmul.mubr.msk.f32.vlgmr.msra.gmra.mrb[42].mxu1 %vm459_vm1, %v9640_v24 }
 0x3dd   :  { %1992 = vmatprep.mubr.f32.mxu1 %v18740_v38  ;;  %9658 = vmatmul.mubr.msk.f32.gmra.mrb[46].mxu0 %vm459_vm1, %v9642_v27 }
 0x3de   :  { %1897 = vmatprep.mubr.f32.mxu0 %v18740_v38 }
 0x3e0   :  { %9666 = vmatmul.mubr.msk.f32.gmra.mrb[44].mxu1 %vm459_vm1, %v9641_v47 }
 0x3e1   :  { %1998 = vmatprep.mubr.f32.mxu1 %v18740_v38  ;;  %9659 = vmatmul.mubr.msk.f32.gmra.mrb[48].mxu0 %vm459_vm1, %v9643_v15 }
 0x3e2   :  { %1903 = vmatprep.mubr.f32.mxu0 %v18740_v38 }
 0x3e4   :  { %9667 = vmatmul.mubr.msk.f32.gmra.mrb[46].mxu1 %vm459_vm1, %v9642_v27 }
 0x3e5   :  { %2004 = vmatprep.mubr.f32.mxu1 %v18740_v38  ;;  %9660 = vmatmul.mubr.msk.f32.gmra.mrb[50].mxu0 %vm459_vm1, %v9644_v3 }
 0x3e6   :  { %1909 = vmatprep.mubr.f32.mxu0 %v18740_v38 }
 0x3e8   :  { %9668 = vmatmul.mubr.msk.f32.gmra.mrb[48].mxu1 %vm459_vm1, %v9643_v15  ;;  %v18764_v15 = vld [vmem:[#allocation99_spill] sm:$0xff] }
 0x3e9   :  { %2010 = vmatprep.mubr.f32.mxu1 %v18740_v38  ;;  %9661 = vmatmul.mubr.msk.f32.gmra.mrb[52].mxu0 %vm459_vm1, %v9645_v1 }
 0x3ea   :  { %1915 = vmatprep.mubr.f32.mxu0 %v18740_v38 }
 0x3ec   :  { %9669 = vmatmul.mubr.msk.f32.gmra.mrb[50].mxu1 %vm459_vm1, %v9644_v3 }
 0x3ed   :  { %2016 = vmatprep.mubr.f32.mxu1 %v18740_v38  ;;  %9662 = vmatmul.mubr.msk.f32.gmra.mrb[54].mxu0 %vm459_vm1, %v9646_v60 }
 0x3ee   :  { %2551 = vmatprep.mubr.f32.mxu0 %v18740_v38 }
 0x3f0   :  { %9670 = vmatmul.mubr.msk.f32.gmra.mrb[52].mxu1 %vm459_vm1, %v9645_v1 }
 0x3f1   :  { %2022 = vmatprep.mubr.f32.mxu1 %v18740_v38 }
 0x3f4   :  { %9671 = vmatmul.mubr.msk.f32.gmra.mrb[54].mxu1 %vm459_vm1, %v9646_v60  ;;  %v18766_v60 = vld [vmem:[#allocation106_spill] sm:$0xff] }
 0x3f5   :  { %2658 = vmatprep.mubr.f32.mxu1 %v18740_v38 }
 0x4a8   :  { %v1881_v43 = vpop.f32.mrb[42].mxu0 }
 0x4a9   :  { %v1883_v18 = vpop.f32.mrb[43].mxu0  ;;  %v1882_v54 = vadd.f32 %v1881_v43, %v18749_v17 }
 0x4aa   :  { %v1884_v58 = vadd.f32 %v1883_v18, %v18749_v17  ;;  %v18767_v18 = vld [vmem:[#allocation23_spill] sm:$0xff] }
 0x4ab   :  { %v13342_v61 = vadd.f32 %v1882_v54, %v18752_v41 }
 0x4ac   :  { %v1887_v53 = vpop.f32.mrb[44].mxu0 }
 0x4ad   :  { %v1889_v51 = vpop.f32.mrb[45].mxu0  ;;  %v1888_v37 = vadd.f32 %v1887_v53, %v18748_v44 }
 0x4ae   :  { %v1890_v25 = vadd.f32 %v1889_v51, %v18748_v44 }
 0x4af   :  { %v1988_v9 = vpop.f32.mrb[42].mxu1  ;;  %v13331_v28 = vadd.f32 %v1888_v37, %v12760_v49 }
 0x4b0   :  { %v1990_v42 = vpop.f32.mrb[43].mxu1  ;;  %v1893_v7 = vpop.f32.mrb[46].mxu0  ;;  %v1989_v52 = vadd.f32 %v1988_v9, %v18749_v17  ;;  %v13337_v55 = vadd.f32 %v1890_v25, %v12777_v4  ;;  %v13350_v4 = vadd.f32 %v1884_v58, %v18754_v8  ;;  %v18768_v9 = vld [vmem:[#allocation101_spill] sm:$0xff] }
 0x4b1   :  { %v1895_v29 = vpop.f32.mrb[47].mxu0  ;;  %v1894_v36 = vadd.f32 %v1893_v7, %v18750_v12  ;;  %v1991_v49 = vadd.f32 %v1990_v42, %v18749_v17  ;;  %v2057_v40 = vadd.f32 %v13331_v28, %v13342_v61  ;;  %v18771_v17 = vld [vmem:[#allocation110_spill] sm:$0xff] }
 0x4b2   :  { %v1896_v56 = vadd.f32 %v1895_v29, %v18750_v12  ;;  %v13364_v11 = vadd.f32 %v1989_v52, %v18759_v46  ;;  %v2070_v23 = vadd.f32 %v13337_v55, %v13350_v4  ;;  %v18770_v29 = vld [vmem:[#allocation108_spill] sm:$0xff]  ;;  %v18783_v46 = vld [vmem:[#allocation107_spill] sm:$0xff] }
 0x4b3   :  { %v1994_v39 = vpop.f32.mrb[44].mxu1  ;;  %v13346_v62 = vadd.f32 %v1894_v36, %v18753_v59  ;;  %v13375_v3 = vadd.f32 %v1991_v49, %v18764_v15 }
 0x4b4   :  { %v1996_v30 = vpop.f32.mrb[45].mxu1  ;;  %v1899_v48 = vpop.f32.mrb[48].mxu0  ;;  %v1995_v10 = vadd.f32 %v1994_v39, %v18748_v44  ;;  %v13360_v50 = vadd.f32 %v1896_v56, %v18758_v6  ;;  %18760 = vst [vmem:[#allocation7_spill] sm:$0xff] %v13364_v11 }
 0x4b5   :  { %v1901_v34 = vpop.f32.mrb[49].mxu0  ;;  %v1997_v57 = vadd.f32 %v1996_v30, %v18748_v44  ;;  %v1900_v31 = vadd.f32 %v1899_v48, %v18751_v20  ;;  %18765 = vst [vmem:[#allocation9_spill] sm:$0xff] %v13375_v3  ;;  %v2058_v1 = vadd.f32 %v2057_v40, %v13346_v62 }
 0x4b6   :  { %v1902_v16 = vadd.f32 %v1901_v34, %v18751_v20  ;;  %v13357_v21 = vadd.f32 %v1995_v10, %v18756_v0  ;;  %v2071_v25 = vadd.f32 %v2070_v23, %v13360_v50  ;;  %v18772_v10 = vld [vmem:[#allocation112_spill] sm:$0xff] }
 0x4b7   :  { %v2000_v63 = vpop.f32.mrb[46].mxu1  ;;  %v13369_v5 = vadd.f32 %v1997_v57, %v18761_v2  ;;  %v13372_v47 = vadd.f32 %v1900_v31, %v18763_v33 }
 0x4b8   :  { %v2002_v14 = vpop.f32.mrb[47].mxu1  ;;  %v1905_v45 = vpop.f32.mrb[50].mxu0  ;;  %v2001_v22 = vadd.f32 %v2000_v63, %v18750_v12  ;;  %18757 = vst [vmem:[#allocation5_spill] sm:$0xff] %v13357_v21  ;;  %v13379_v43 = vadd.f32 %v1902_v16, %v18766_v60  ;;  %v2083_v39 = vadd.f32 %v13357_v21, %v13364_v11  ;;  %v18777_v16 = vld [vmem:[#allocation103_spill] sm:$0xff] }
 0x4b9   :  { %v1907_v13 = vpop.f32.mrb[51].mxu0  ;;  %v1906_v35 = vadd.f32 %v1905_v45, %v18755_v19  ;;  %18762 = vst [vmem:[#allocation6_spill] sm:$0xff] %v13369_v5  ;;  %v2003_v7 = vadd.f32 %v2002_v14, %v18750_v12  ;;  %v2096_v36 = vadd.f32 %v13369_v5, %v13375_v3  ;;  %v2059_v12 = vadd.f32 %v2058_v1, %v13372_v47  ;;  %v18774_v14 = vld [vmem:[#allocation114_spill] sm:$0xff]  ;;  %v18787_v1 = vld [vmem:[#allocation109_spill] sm:$0xff] }
 0x4ba   :  { %v1908_v24 = vadd.f32 %v1907_v13, %v18755_v19  ;;  %v13383_v42 = vadd.f32 %v2001_v22, %v18768_v9  ;;  %v2072_v52 = vadd.f32 %v2071_v25, %v13379_v43  ;;  %v18776_v45 = vld [vmem:[#allocation22_spill] sm:$0xff]  ;;  %v18779_v22 = vld [vmem:[#allocation105_spill] sm:$0xff] }
 0x4bb   :  { %v2006_v26 = vpop.f32.mrb[48].mxu1  ;;  %v13387_v44 = vadd.f32 %v1906_v35, %v18770_v29  ;;  %v13412_v13 = vadd.f32 %v2003_v7, %v18777_v16 }
 0x4bc   :  { %v2008_v32 = vpop.f32.mrb[49].mxu1  ;;  %v1911_v27 = vpop.f32.mrb[52].mxu0  ;;  %18769 = vst [vmem:[#allocation8_spill] sm:$0xff] %v13383_v42  ;;  %v2007_v30 = vadd.f32 %v2006_v26, %v18751_v20  ;;  %v13395_v54 = vadd.f32 %v1908_v24, %v18771_v17  ;;  %v2084_v59 = vadd.f32 %v2083_v39, %v13383_v42  ;;  %v18781_v26 = vld [vmem:[#allocation116_spill] sm:$0xff]  ;;  %v18789_v39 = vld [vmem:[#allocation111_spill] sm:$0xff] }
 0x4bd   :  { %v1912_v53 = vadd.f32 %v1911_v27, %v18767_v18  ;;  %v1913_v51 = vpop.f32.mrb[53].mxu0  ;;  %v2009_v34 = vadd.f32 %v2008_v32, %v18751_v20  ;;  %18778 = vst [vmem:[#allocation13_spill] sm:$0xff] %v13412_v13  ;;  %v2060_v20 = vadd.f32 %v2059_v12, %v13387_v44  ;;  %v18785_v27 = vld [vmem:[#allocation118_spill] sm:$0xff]  ;;  %v2097_v9 = vadd.f32 %v2096_v36, %v13412_v13 }
 0x4be   :  { %v1914_v37 = vadd.f32 %v1913_v51, %v18767_v18  ;;  %v13417_v35 = vadd.f32 %v2007_v30, %v18779_v22  ;;  %v2073_v40 = vadd.f32 %v2072_v52, %v13395_v54  ;;  %v18791_v30 = vld [vmem:[#allocation113_spill] sm:$0xff]  ;;  %v18797_v22 = vld [vmem:[#allocation119_spill] sm:$0xff] }
 0x4bf   :  { %v2012_v48 = vpop.f32.mrb[50].mxu1  ;;  %v13402_v63 = vadd.f32 %v1912_v53, %v18772_v10  ;;  %v13425_v23 = vadd.f32 %v2009_v34, %v18783_v46 }
 0x4c0   :  { %v2014_v58 = vpop.f32.mrb[51].mxu1  ;;  %v1917_v56 = vpop.f32.mrb[54].mxu0  ;;  %v2013_v57 = vadd.f32 %v2012_v48, %v18755_v19  ;;  %v13407_v31 = vadd.f32 %v1914_v37, %v18774_v14  ;;  %18780 = vst [vmem:[#allocation12_spill] sm:$0xff] %v13417_v35  ;;  %v2085_v37 = vadd.f32 %v2084_v59, %v13417_v35 }
 0x4c1   :  { %18773 = vst [vmem:[#allocation11_spill] sm:$0xff] %v13402_v63  ;;  %v1918_v41 = vadd.f32 %v1917_v56, %v18776_v45  ;;  %v1919_v49 = vpop.f32.mrb[55].mxu0  ;;  %v2015_v0 = vadd.f32 %v2014_v58, %v18755_v19  ;;  %18784 = vst [vmem:[#allocation14_spill] sm:$0xff] %v13425_v23  ;;  %v2061_v2 = vadd.f32 %v2060_v20, %v13402_v63  ;;  %v18793_v56 = vld [vmem:[#allocation115_spill] sm:$0xff] }
 0x4c2   :  { %18775 = vst [vmem:[#allocation10_spill] sm:$0xff] %v13407_v31  ;;  %v1920_v8 = vadd.f32 %v1919_v49, %v18776_v45  ;;  %v13433_v60 = vadd.f32 %v2013_v57, %v18787_v1  ;;  %v2074_v19 = vadd.f32 %v2073_v40, %v13407_v31  ;;  %v18795_v49 = vld [vmem:[#allocation117_spill] sm:$0xff] }
 0x4c3   :  { %v2018_v6 = vpop.f32.mrb[52].mxu1  ;;  %v13422_v24 = vadd.f32 %v1918_v41, %v18781_v26  ;;  %v13444_v25 = vadd.f32 %v2015_v0, %v18789_v39 }
 0x4c4   :  { %v2019_v33 = vadd.f32 %v2018_v6, %v18767_v18  ;;  %v2020_v32 = vpop.f32.mrb[53].mxu1  ;;  %v13430_v15 = vadd.f32 %v1920_v8, %v18785_v27  ;;  %18788 = vst [vmem:[#allocation19_spill] sm:$0xff] %v13433_v60  ;;  %v2086_v10 = vadd.f32 %v2085_v37, %v13433_v60 }
 0x4c5   :  { %18782 = vst [vmem:[#allocation15_spill] sm:$0xff] %v13422_v24  ;;  %v2021_v53 = vadd.f32 %v2020_v32, %v18767_v18  ;;  %v2062_v51 = vsel %vm69_vm0, %v13422_v24, 0.0  ;;  %18790 = vst [vmem:[#allocation16_spill] sm:$0xff] %v13444_v25  ;;  %v2098_v18 = vadd.f32 %v2097_v9, %v13425_v23 }
 0x4c6   :  { %18786 = vst [vmem:[#allocation17_spill] sm:$0xff] %v13430_v15  ;;  %v2063_v7 = vadd.f32 %v2062_v51, %v2061_v2  ;;  %v2075_v29 = vsel %vm69_vm0, %v13430_v15, 0.0  ;;  %v13447_v48 = vadd.f32 %v2019_v33, %v18791_v30 }
 0x4c7   :  { %v2024_v17 = vpop.f32.mrb[54].mxu1  ;;  %v2076_v12 = vadd.f32 %v2075_v29, %v2074_v19  ;;  %v13453_v52 = vadd.f32 %v2021_v53, %v18793_v56  ;;  %v2099_v16 = vadd.f32 %v2098_v18, %v13444_v25 }
 0x4c8   :  { %18792 = vst [vmem:[#allocation18_spill] sm:$0xff] %v13447_v48  ;;  %v2064_v34 = vrot.slane %v2063_v7, 4  ;;  %v2025_v58 = vadd.f32 %v2024_v17, %v18776_v45  ;;  %v2026_v36 = vpop.f32.mrb[55].mxu1  ;;  %v2087_v20 = vadd.f32 %v2086_v10, %v13447_v48 }
 0x4c9   :  { %18794 = vst [vmem:[#allocation21_spill] sm:$0xff] %v13453_v52  ;;  %v2077_v57 = vrot.slane %v2076_v12, 4  ;;  %v2027_v14 = vadd.f32 %v2026_v36, %v18776_v45  ;;  %v2100_v26 = vadd.f32 %v2099_v16, %v13453_v52 }
 0x4ca   :  { %v2065_v41 = vadd.f32 %v2064_v34, %v2063_v7  ;;  %v13457_v59 = vadd.f32 %v2025_v58, %v18795_v49 }
 0x4cb   :  { %v2078_v8 = vadd.f32 %v2077_v57, %v2076_v12  ;;  %v13462_v40 = vadd.f32 %v2027_v14, %v18797_v22 }
 0x4cc   :  { %18796 = vst [vmem:[#allocation94_spill] sm:$0xff] %v13457_v59  ;;  %v2066_v0 = vrot.slane %v2065_v41, 2  ;;  %v2088_v6 = vsel %vm69_vm0, %v13457_v59, 0.0 }
 0x4cd   :  { %18798 = vst [vmem:[#allocation100_spill] sm:$0xff] %v13462_v40  ;;  %v2089_v46 = vadd.f32 %v2088_v6, %v2087_v20  ;;  %v2079_v45 = vrot.slane %v2078_v8, 2  ;;  %v2101_v2 = vsel %vm69_vm0, %v13462_v40, 0.0 }
 0x4ce   :  { %v2067_v33 = vadd.f32 %v2066_v0, %v2065_v41  ;;  %v2102_v1 = vadd.f32 %v2101_v2, %v2100_v26 }
 0x4cf   :  { %v2090_v32 = vrot.slane %v2089_v46, 4  ;;  %v2080_v27 = vadd.f32 %v2079_v45, %v2078_v8 }
 0x4d0   :  { %v2068_v19 = vrot.slane %v2067_v33, 1  ;;  %v2103_v37 = vrot.slane %v2102_v1, 4 }
 0x4d1   :  { %v2091_v53 = vadd.f32 %v2090_v32, %v2089_v46  ;;  %v2081_v51 = vrot.slane %v2080_v27, 1 }
 0x4d2   :  { %v2069_v9 = vadd.f32 %v2068_v19, %v2067_v33  ;;  %v2104_v36 = vadd.f32 %v2103_v37, %v2102_v1 }
 0x4d3   :  { %v2092_v7 = vrot.slane %v2091_v53, 2  ;;  %v2082_v29 = vadd.f32 %v2081_v51, %v2080_v27 }
 0x4d4   :  { %v2109_v39 = vmul.f32 0.020408163, %v2069_v9  ;;  %v2105_v45 = vrot.slane %v2104_v36, 2 }
 0x4d5   :  { %v2093_v30 = vadd.f32 %v2092_v7, %v2091_v53  ;;  %v2110_v58 = vmul.f32 0.020408163, %v2082_v29 }
 0x4d6   :  { %v13470_v17 = vsub.f32 %v13342_v61, %v2109_v39  ;;  %v13473_v12 = vsub.f32 %v13331_v28, %v2109_v39  ;;  %v13476_v18 = vsub.f32 %v13346_v62, %v2109_v39  ;;  %v13479_v10 = vsub.f32 %v13372_v47, %v2109_v39 }
 0x4d7   :  { %v2094_v34 = vrot.slane %v2093_v30, 1  ;;  %v13482_v56 = vsub.f32 %v13422_v24, %v2109_v39  ;;  %v13489_v49 = vsub.f32 %v13387_v44, %v2109_v39  ;;  %v13492_v16 = vsub.f32 %v13402_v63, %v2109_v39 }
 0x4d8   :  { %v2141_v57 = vmul.f32 %v13470_v17, %v13470_v17  ;;  %v2145_v14 = vmul.f32 %v13473_v12, %v13473_v12  ;;  %v2149_v20 = vmul.f32 %v13476_v18, %v13476_v18  ;;  %v13497_v0 = vsub.f32 %v13350_v4, %v2110_v58 }
 0x4d9   :  { %v2095_v41 = vadd.f32 %v2094_v34, %v2093_v30  ;;  %v2153_v6 = vmul.f32 %v13479_v10, %v13479_v10  ;;  %v2165_v26 = vmul.f32 %v13482_v56, %v13482_v56  ;;  %v13513_v27 = vsub.f32 %v13337_v55, %v2110_v58 }
 0x4da   :  { %v2169_v8 = vadd.f32 %v2145_v14, %v2141_v57  ;;  %v2157_v1 = vmul.f32 %v13489_v49, %v13489_v49  ;;  %v2161_v19 = vmul.f32 %v13492_v16, %v13492_v16  ;;  %v13527_v29 = vsub.f32 %v13360_v50, %v2110_v58 }
 0x4db   :  { %v2111_v22 = vmul.f32 0.020408163, %v2095_v41  ;;  %v2142_v37 = vmul.f32 %v13497_v0, %v13497_v0  ;;  %v2174_v30 = vsel %vm69_vm0, %v2165_v26, 0.0  ;;  %v13536_v57 = vsub.f32 %v13379_v43, %v2110_v58 }
 0x4dc   :  { %v2170_v46 = vadd.f32 %v2169_v8, %v2149_v20  ;;  %v13541_v20 = vsub.f32 %v13395_v54, %v2110_v58  ;;  %v2146_v8 = vmul.f32 %v13513_v27, %v13513_v27 }
 0x4dd   :  { %v13504_v2 = vsub.f32 %v13364_v11, %v2111_v22  ;;  %v13507_v33 = vsub.f32 %v13357_v21, %v2111_v22  ;;  %v13510_v32 = vsub.f32 %v13383_v42, %v2111_v22  ;;  %v13520_v51 = vsub.f32 %v13417_v35, %v2111_v22 }
 0x4de   :  { %v2171_v53 = vadd.f32 %v2170_v46, %v2153_v6  ;;  %v13533_v34 = vsub.f32 %v13433_v60, %v2111_v22  ;;  %v13546_v46 = vsub.f32 %v13447_v48, %v2111_v22  ;;  %v13549_v26 = vsub.f32 %v13457_v59, %v2111_v22 }
 0x4df   :  { %v2143_v9 = vmul.f32 %v13504_v2, %v13504_v2  ;;  %v2147_v7 = vmul.f32 %v13507_v33, %v13507_v33  ;;  %v2151_v14 = vmul.f32 %v13510_v32, %v13510_v32  ;;  %v2106_v60 = vadd.f32 %v2105_v45, %v2104_v36 }
 0x4e0   :  { %v2172_v39 = vadd.f32 %v2171_v53, %v2157_v1  ;;  %v2155_v1 = vmul.f32 %v13520_v51, %v13520_v51  ;;  %v2159_v42 = vmul.f32 %v13533_v34, %v13533_v34  ;;  %v2154_v59 = vmul.f32 %v13536_v57, %v13536_v57 }
 0x4e1   :  { %v2195_v41 = vadd.f32 %v2147_v7, %v2143_v9  ;;  %v2150_v9 = vmul.f32 %v13527_v29, %v13527_v29  ;;  %v2182_v7 = vadd.f32 %v2146_v8, %v2142_v37  ;;  %v2163_v36 = vmul.f32 %v13546_v46, %v13546_v46 }
 0x4e2   :  { %v2173_v6 = vadd.f32 %v2172_v39, %v2161_v19  ;;  %v13558_v19 = vsub.f32 %v13407_v31, %v2110_v58  ;;  %v13561_v39 = vsub.f32 %v13430_v15, %v2110_v58  ;;  %v2167_v45 = vmul.f32 %v13549_v26, %v13549_v26 }
 0x4e3   :  { %v2196_v53 = vadd.f32 %v2195_v41, %v2151_v14  ;;  %v2183_v14 = vadd.f32 %v2182_v7, %v2150_v9  ;;  %v2107_v41 = vrot.slane %v2106_v60, 1 }
 0x4e4   :  { %v2175_v35 = vadd.f32 %v2174_v30, %v2173_v6  ;;  %v2158_v30 = vmul.f32 %v13541_v20, %v13541_v20  ;;  %v2162_v9 = vmul.f32 %v13558_v19, %v13558_v19  ;;  %v2200_v21 = vsel %vm69_vm0, %v2167_v45, 0.0 }
 0x4e5   :  { %v2197_v22 = vadd.f32 %v2196_v53, %v2155_v1  ;;  %v2184_v8 = vadd.f32 %v2183_v14, %v2154_v59  ;;  %v2108_v58 = vadd.f32 %v2107_v41, %v2106_v60  ;;  %v2166_v1 = vmul.f32 %v13561_v39, %v13561_v39 }
 0x4e6   :  { %v2176_v48 = vrot.slane %v2175_v35, 4 }
 0x4e7   :  { %v2198_v37 = vadd.f32 %v2197_v22, %v2159_v42  ;;  %v2185_v7 = vadd.f32 %v2184_v8, %v2158_v30  ;;  %v2112_v11 = vmul.f32 0.020408163, %v2108_v58 }
 0x4e8   :  { %v2177_v6 = vadd.f32 %v2176_v48, %v2175_v35  ;;  %v2187_v48 = vsel %vm69_vm0, %v2166_v1, 0.0 }
 0x4e9   :  { %v2199_v53 = vadd.f32 %v2198_v37, %v2163_v36  ;;  %v2186_v42 = vadd.f32 %v2185_v7, %v2162_v9  ;;  %v13577_v22 = vsub.f32 %v13375_v3, %v2112_v11  ;;  %v13580_v60 = vsub.f32 %v13369_v5, %v2112_v11 }
 0x4ea   :  { %v2178_v15 = vrot.slane %v2177_v6, 2  ;;  %v13584_v59 = vsub.f32 %v13412_v13, %v2112_v11  ;;  %v13587_v37 = vsub.f32 %v13425_v23, %v2112_v11  ;;  %v13594_v58 = vsub.f32 %v13444_v25, %v2112_v11 }
 0x4eb   :  { %v2201_v24 = vadd.f32 %v2200_v21, %v2199_v53  ;;  %v2188_v41 = vadd.f32 %v2187_v48, %v2186_v42  ;;  %v2144_v21 = vmul.f32 %v13577_v22, %v13577_v22  ;;  %v2148_v45 = vmul.f32 %v13580_v60, %v13580_v60 }
 0x4ec   :  { %v2179_v35 = vadd.f32 %v2178_v15, %v2177_v6  ;;  %v2152_v6 = vmul.f32 %v13584_v59, %v13584_v59  ;;  %v13599_v7 = vsub.f32 %v13462_v40, %v2112_v11  ;;  %v13602_v48 = vsub.f32 %v13453_v52, %v2112_v11 }
 0x4ed   :  { %v2202_v14 = vrot.slane %v2201_v24, 4  ;;  %v2189_v8 = vrot.slane %v2188_v41, 4  ;;  %v2208_v1 = vadd.f32 %v2148_v45, %v2144_v21  ;;  %v2160_v23 = vmul.f32 %v13594_v58, %v13594_v58 }
 0x4ee   :  { %v2180_v36 = vrot.slane %v2179_v35, 1  ;;  %v2164_v11 = vmul.f32 %v13602_v48, %v13602_v48 }
 0x4ef   :  { %v2203_v30 = vadd.f32 %v2202_v14, %v2201_v24  ;;  %v2190_v9 = vadd.f32 %v2189_v8, %v2188_v41  ;;  %v2156_v24 = vmul.f32 %v13587_v37, %v13587_v37  ;;  %v2168_v8 = vmul.f32 %v13599_v7, %v13599_v7 }
 0x4f0   :  { %v2181_v15 = vadd.f32 %v2180_v36, %v2179_v35  ;;  %v2209_v35 = vadd.f32 %v2208_v1, %v2152_v6 }
 0x4f1   :  { %v2204_v53 = vrot.slane %v2203_v30, 2  ;;  %v2191_v36 = vrot.slane %v2190_v9, 2 }
 0x4f2   :  { %v2221_v42 = vmul.f32 0.020408163, %v2181_v15  ;;  %v2210_v21 = vadd.f32 %v2209_v35, %v2156_v24 }
 0x4f3   :  { %v2205_v14 = vadd.f32 %v2204_v53, %v2203_v30  ;;  %v2192_v41 = vadd.f32 %v2191_v36, %v2190_v9  ;;  %v2213_v53 = vsel %vm69_vm0, %v2168_v8, 0.0  ;;  %v18799_v8 = vld [vmem:[#allocation25_spill] sm:$0xff] }
 0x4f4   :  { %v2225_v25 = vadd.f32 1e-05, %v2221_v42  ;;  %v2211_v15 = vadd.f32 %v2210_v21, %v2160_v23 }
 0x4f5   :  { %v2206_v45 = vrot.slane %v2205_v14, 1  ;;  %v2193_v40 = vrot.slane %v2192_v41, 1 }
 0x4f6   :  { %11134 = vrsqrt.f32 %v2225_v25  ;;  %v2212_v6 = vadd.f32 %v2211_v15, %v2164_v11 }
 0x4f7   :  { %v2207_v52 = vadd.f32 %v2206_v45, %v2205_v14  ;;  %v2194_v1 = vadd.f32 %v2193_v40, %v2192_v41 }
 0x4f8   :  { %v2214_v42 = vadd.f32 %v2213_v53, %v2212_v6  ;;  %v18800_v6 = vld [vmem:[#allocation24_spill] sm:$0xff] }
 0x4f9   :  { %v2223_v30 = vmul.f32 0.020408163, %v2207_v52  ;;  %v2222_v13 = vmul.f32 0.020408163, %v2194_v1 }
 0x4fa   :  { %v2215_v24 = vrot.slane %v2214_v42, 4 }
 0x4fb   :  { %v2227_v35 = vadd.f32 1e-05, %v2223_v30  ;;  %v2226_v9 = vadd.f32 1e-05, %v2222_v13  ;;  %v18801_v30 = vld [vmem:[#allocation29_spill] sm:$0xff] }
 0x4fc   :  { %v2216_v36 = vadd.f32 %v2215_v24, %v2214_v42  ;;  %v18803_v42 = vld [vmem:[#allocation33_spill] sm:$0xff] }
 0x4fd   :  { %11136 = vrsqrt.f32 %v2226_v9 }
 0x4fe   :  { %v2217_v3 = vrot.slane %v2216_v36, 2  ;;  %11138 = vrsqrt.f32 %v2227_v35  ;;  %v18804_v35 = vld [vmem:[#allocation32_spill] sm:$0xff] }
 0x500   :  { %v11135_v5 = vpop.eup %11134  ;;  %v2218_v31 = vadd.f32 %v2217_v3, %v2216_v36 }
 0x501   :  { %v2233_v25 = vmul.f32 %v11135_v5, %v13470_v17  ;;  %v2237_v14 = vmul.f32 %v11135_v5, %v13473_v12  ;;  %v2241_v52 = vmul.f32 %v11135_v5, %v13476_v18  ;;  %v2245_v21 = vmul.f32 %v11135_v5, %v13479_v10 }
 0x502   :  { %v2219_v23 = vrot.slane %v2218_v31, 1  ;;  %v2249_v45 = vmul.f32 %v11135_v5, %v13489_v49  ;;  %v2253_v13 = vmul.f32 %v11135_v5, %v13492_v16  ;;  %v2257_v17 = vmul.f32 %v11135_v5, %v13482_v56 }
 0x503   :  { %v2304_v11 = vmul.f32 %v18799_v8, %v2233_v25  ;;  %v2308_v3 = vmul.f32 %v18800_v6, %v2237_v14  ;;  %v2312_v1 = vmul.f32 %v18801_v30, %v2241_v52  ;;  %v18806_v25 = vld [vmem:[#allocation26_spill] sm:$0xff] }
 0x504   :  { %v2220_v40 = vadd.f32 %v2219_v23, %v2218_v31  ;;  %v18802_v31 = vld [vmem:[#allocation28_spill] sm:$0xff]  ;;  %v2320_v24 = vmul.f32 %v18803_v42, %v2249_v45  ;;  %v2324_v9 = vmul.f32 %v18804_v35, %v2253_v13  ;;  %v18805_v23 = vld [vmem:[#allocation27_spill] sm:$0xff] }
 0x505   :  { %v2316_v53 = vmul.f32 %v18802_v31, %v2245_v21  ;;  %v2375_v5 = vadd.f32 %v18805_v23, %v2304_v11  ;;  %v2379_v14 = vadd.f32 %v18806_v25, %v2308_v3  ;;  %v18808_v11 = vld [vmem:[#allocation30_spill] sm:$0xff] }
 0x506   :  { %v2224_v41 = vmul.f32 0.020408163, %v2220_v40 }
 0x507   :  { %v11137_v15 = vpop.eup %11136  ;;  %v2387_v3 = vadd.f32 %v18808_v11, %v2316_v53 }
 0x508   :  { %v2228_v12 = vadd.f32 1e-05, %v2224_v41  ;;  %v2234_v18 = vmul.f32 %v11137_v15, %v13497_v0  ;;  %v13625_v10 = vpop.eup %11138  ;;  %v2238_v49 = vmul.f32 %v11137_v15, %v13513_v27  ;;  %v2242_v16 = vmul.f32 %v11137_v15, %v13527_v29  ;;  %v18807_v27 = vld [vmem:[#allocation31_spill] sm:$0xff] }
 0x509   :  { %v2246_v56 = vmul.f32 %v11137_v15, %v13536_v57  ;;  %v2383_v40 = vadd.f32 %v18807_v27, %v2312_v1  ;;  %v2235_v21 = vmul.f32 %v13625_v10, %v13504_v2  ;;  %v2239_v45 = vmul.f32 %v13625_v10, %v13507_v33  ;;  %v18810_v2 = vld [vmem:[#allocation34_spill] sm:$0xff] }
 0x50a   :  { %11140 = vrsqrt.f32 %v2228_v12  ;;  %v2305_v36 = vmul.f32 %v18799_v8, %v2234_v18  ;;  %v2309_v0 = vmul.f32 %v18800_v6, %v2238_v49  ;;  %v2313_v52 = vmul.f32 %v18801_v30, %v2242_v16  ;;  %v18809_v49 = vld [vmem:[#allocation35_spill] sm:$0xff] }
 0x50b   :  { %v2317_v13 = vmul.f32 %v18802_v31, %v2246_v56  ;;  %v2250_v12 = vmul.f32 %v11137_v15, %v13541_v20  ;;  %v2254_v18 = vmul.f32 %v11137_v15, %v13558_v19  ;;  %v2391_v16 = vadd.f32 %v18809_v49, %v2320_v24 }
 0x50c   :  { %v2376_v29 = vadd.f32 %v18805_v23, %v2305_v36  ;;  %v2380_v57 = vadd.f32 %v18806_v25, %v2309_v0  ;;  %v2384_v41 = vadd.f32 %v18807_v27, %v2313_v52  ;;  %v2395_v36 = vadd.f32 %v18810_v2, %v2324_v9 }
 0x50d   :  { %v2388_v1 = vadd.f32 %v18808_v11, %v2317_v13  ;;  %v10236_v33 = vpack.c.bf16 %v2379_v14, %v2375_v5  ;;  %v2243_v56 = vmul.f32 %v13625_v10, %v13510_v32  ;;  %v2321_v0 = vmul.f32 %v18803_v42, %v2250_v12  ;;  %v18811_v5 = vld [vmem:[#allocation37_spill] sm:$0xff] }
 0x50e   :  { %v10234_v63 = vpack.c.bf16 %v2380_v57, %v2376_v29  ;;  %v2258_v52 = vmul.f32 %v11137_v15, %v13561_v39  ;;  %v2306_v53 = vmul.f32 %v18799_v8, %v2235_v21  ;;  %v2310_v20 = vmul.f32 %v18800_v6, %v2239_v45 }
 0x50f   :  { %v2325_v13 = vmul.f32 %v18804_v35, %v2254_v18  ;;  %v10238_v19 = vpack.c.bf16 %v2388_v1, %v2384_v41  ;;  %v2392_v24 = vadd.f32 %v18809_v49, %v2321_v0  ;;  %v2247_v9 = vmul.f32 %v13625_v10, %v13520_v51 }
 0x510   :  { %10235 = vmatprep.subr.bf16.mxu0 %v10234_v63  ;;  %v2328_v14 = vmul.f32 %v18811_v5, %v2257_v17  ;;  %v10240_v39 = vpack.c.bf16 %v2387_v3, %v2383_v40  ;;  %v10244_v15 = vpack.c.bf16 %v2395_v36, %v2391_v16  ;;  %v2377_v21 = vadd.f32 %v18805_v23, %v2306_v53 }
 0x511   :  { %10237 = vmatpush1.bf16.msra.mxu0 %v10236_v33  ;;  %v2396_v32 = vadd.f32 %v18810_v2, %v2325_v13  ;;  %v2381_v45 = vadd.f32 %v18806_v25, %v2310_v20  ;;  %v2314_v63 = vmul.f32 %v18801_v30, %v2243_v56  ;;  %v2329_v57 = vmul.f32 %v18811_v5, %v2258_v52  ;;  %v9686_v20 = vld [vmem:[%s18361_s3 + $0x70] sm:$0xff] }
 0x512   :  { %10239 = vmatprep.subr.bf16.mxu0 %v10238_v19  ;;  %v2318_v40 = vmul.f32 %v18802_v31, %v2247_v9  ;;  %v2255_v33 = vmul.f32 %v13625_v10, %v13546_v46  ;;  %v9687_v9 = vld [vmem:[%s18361_s3 + $0x78] sm:$0xff] }
 0x513   :  { %v10242_v1 = vpack.c.bf16 %v2396_v32, %v2392_v24  ;;  %v10248_v52 = vpack.c.bf16 %v2381_v45, %v2377_v21  ;;  %v9692_v21 = vld [vmem:[%s18361_s3 + $0xa0] sm:$0x1] }
 0x514   :  { %v11141_v29 = vpop.eup %11140  ;;  %v2389_v53 = vadd.f32 %v18808_v11, %v2318_v40 }
 0x515   :  { %v2236_v41 = vmul.f32 %v11141_v29, %v13577_v22  ;;  %v2240_v51 = vmul.f32 %v11141_v29, %v13580_v60  ;;  %v2244_v12 = vmul.f32 %v11141_v29, %v13584_v59  ;;  %v2248_v17 = vmul.f32 %v11141_v29, %v13587_v37  ;;  %10241 = vmatpush1.bf16.msra.mxu0 %v10240_v39 }
 0x516   :  { %v2252_v3 = vmul.f32 %v11141_v29, %v13594_v58  ;;  %v2256_v18 = vmul.f32 %v11141_v29, %v13602_v48  ;;  %10243 = vmatprep.subr.bf16.mxu0 %v10242_v1  ;;  %v2251_v60 = vmul.f32 %v13625_v10, %v13533_v34  ;;  %v18812_v58 = vld [vmem:[#allocation36_spill] sm:$0xff]  ;;  %v2260_v13 = vmul.f32 %v11141_v29, %v13599_v7  ;;  %v18814_v1 = vld [vmem:[#allocation38_spill] sm:$0xff] }
 0x517   :  { %v2307_v16 = vmul.f32 %v18799_v8, %v2236_v41  ;;  %v2311_v36 = vmul.f32 %v18800_v6, %v2240_v51  ;;  %v2315_v22 = vmul.f32 %v18801_v30, %v2244_v12  ;;  %v2319_v59 = vmul.f32 %v18802_v31, %v2248_v17  ;;  %v9691_v29 = vld [vmem:[%s18361_s3 + $0x98] sm:$0xff] }
 0x518   :  { %v2323_v37 = vmul.f32 %v18803_v42, %v2252_v3  ;;  %v2400_v56 = vadd.f32 %v18812_v58, %v2329_v57  ;;  %v2327_v30 = vmul.f32 %v18804_v35, %v2256_v18  ;;  %v2385_v31 = vadd.f32 %v18807_v27, %v2314_v63  ;;  %v18813_v57 = vld [vmem:[#allocation39_spill] sm:$0xff] }
 0x519   :  { %v2378_v48 = vadd.f32 %v18805_v23, %v2307_v16  ;;  %v2382_v8 = vadd.f32 %v18806_v25, %v2311_v36  ;;  %v2386_v6 = vadd.f32 %v18807_v27, %v2315_v22  ;;  %v2390_v0 = vadd.f32 %v18808_v11, %v2319_v59  ;;  %10245 = vmatpush1.bf16.msra.mxu0 %v10244_v15  ;;  %v9690_v15 = vld [vmem:[%s18361_s3 + $0x90] sm:$0xff] }
 0x51a   :  { %9700 = vmatprep.subr.msk.mxu0 %vm69_vm0, %v2400_v56  ;;  %v2399_v46 = vadd.f32 %v18812_v58, %v2328_v14  ;;  %v2322_v23 = vmul.f32 %v18803_v42, %v2251_v60  ;;  %v2326_v25 = vmul.f32 %v18804_v35, %v2255_v33  ;;  %v2394_v27 = vadd.f32 %v18809_v49, %v2323_v37 }
 0x51b   :  { %v10246_v34 = vpack.c.bf16 %v2382_v8, %v2378_v48  ;;  %v10250_v19 = vpack.c.bf16 %v2390_v0, %v2386_v6  ;;  %v2398_v24 = vadd.f32 %v18810_v2, %v2327_v30  ;;  %v2259_v42 = vmul.f32 %v13625_v10, %v13549_v26  ;;  %v18816_v0 = vld [vmem:[#allocation40_spill] sm:$0xff] }
 0x51c   :  { %v10252_v35 = vpack.c.bf16 %v2389_v53, %v2385_v31  ;;  %v2393_v11 = vadd.f32 %v18809_v49, %v2322_v23  ;;  %v2397_v7 = vadd.f32 %v18810_v2, %v2326_v25  ;;  %v2331_v14 = vmul.f32 %v18811_v5, %v2260_v13  ;;  %v9688_v49 = vld [vmem:[%s18361_s3 + $0x80] sm:$0xff] }
 0x51d   :  { %10247 = vmatprep.subr.bf16.mxu1 %v10246_v34  ;;  %9701 = vmatpush1.msk.msra.mxu0 %vm69_vm0, %v2399_v46  ;;  %v10254_v32 = vpack.c.bf16 %v2398_v24, %v2394_v27  ;;  %v2330_v26 = vmul.f32 %v18811_v5, %v2259_v42  ;;  %v9689_v5 = vld [vmem:[%s18361_s3 + $0x88] sm:$0xff] }
 0x51e   :  { %10249 = vmatpush1.bf16.msra.mxu1 %v10248_v52  ;;  %9702 = vmatmul.mubr.msk.f32.vlgmr.msra.gmra.mrb[56].mxu0 %vm459_vm1, %v9686_v20  ;;  %v10256_v10 = vpack.c.bf16 %v2397_v7, %v2393_v11  ;;  %v2402_v2 = vadd.f32 %v18812_v58, %v2331_v14 }
 0x51f   :  { %10251 = vmatprep.subr.bf16.mxu1 %v10250_v19  ;;  %2557 = vmatprep.mubr.f32.mxu0 %v18740_v38  ;;  %v2401_v39 = vadd.f32 %v18812_v58, %v2330_v26  ;;  %v18815_v58 = vld [vmem:[#allocation41_spill] sm:$0xff]  ;;  %v18817_v26 = vld [vmem:[#allocation43_spill] sm:$0xff] }
 0x522   :  { %10253 = vmatpush1.bf16.msra.mxu1 %v10252_v35  ;;  %9703 = vmatmul.mubr.msk.f32.gmra.mrb[58].mxu0 %vm459_vm1, %v9687_v9 }
 0x523   :  { %10255 = vmatprep.subr.bf16.mxu1 %v10254_v32  ;;  %2563 = vmatprep.mubr.f32.mxu0 %v18740_v38 }
 0x526   :  { %10257 = vmatpush1.bf16.msra.mxu1 %v10256_v10  ;;  %9704 = vmatmul.mubr.msk.f32.gmra.mrb[60].mxu0 %vm459_vm1, %v9688_v49 }
 0x527   :  { %9709 = vmatprep.subr.msk.mxu1 %vm69_vm0, %v2402_v2  ;;  %2569 = vmatprep.mubr.f32.mxu0 %v18740_v38 }
 0x52a   :  { %9710 = vmatpush1.msk.msra.mxu1 %vm69_vm0, %v2401_v39  ;;  %9705 = vmatmul.mubr.msk.f32.gmra.mrb[62].mxu0 %vm459_vm1, %v9689_v5 }
 0x52b   :  { %9711 = vmatmul.mubr.msk.f32.vlgmr.msra.gmra.mrb[56].mxu1 %vm459_vm1, %v9686_v20  ;;  %2575 = vmatprep.mubr.f32.mxu0 %v18740_v38 }
 0x52c   :  { %2664 = vmatprep.mubr.f32.mxu1 %v18740_v38 }
 0x52e   :  { %9706 = vmatmul.mubr.msk.f32.gmra.mrb[64].mxu0 %vm459_vm1, %v9690_v15 }
 0x52f   :  { %9712 = vmatmul.mubr.msk.f32.gmra.mrb[58].mxu1 %vm459_vm1, %v9687_v9  ;;  %2581 = vmatprep.mubr.f32.mxu0 %v18740_v38 }
 0x530   :  { %2670 = vmatprep.mubr.f32.mxu1 %v18740_v38 }
 0x532   :  { %9707 = vmatmul.mubr.msk.f32.gmra.mrb[66].mxu0 %vm459_vm1, %v9691_v29 }
 0x533   :  { %9713 = vmatmul.mubr.msk.f32.gmra.mrb[60].mxu1 %vm459_vm1, %v9688_v49  ;;  %2587 = vmatprep.mubr.f32.mxu0 %v18740_v38 }
 0x534   :  { %2676 = vmatprep.mubr.f32.mxu1 %v18740_v38 }
 0x536   :  { %9708 = vmatmul.mubr.msk.f32.gmra.mrb[68].mxu0 %vm459_vm1, %v9692_v21 }
 0x537   :  { %9714 = vmatmul.mubr.msk.f32.gmra.mrb[62].mxu1 %vm459_vm1, %v9689_v5  ;;  %2877 = vmatprep.mubr.f32.mxu0 %v18740_v38 }
 0x538   :  { %2682 = vmatprep.mubr.f32.mxu1 %v18740_v38 }
 0x53b   :  { %9715 = vmatmul.mubr.msk.f32.gmra.mrb[64].mxu1 %vm459_vm1, %v9690_v15 }
 0x53c   :  { %2688 = vmatprep.mubr.f32.mxu1 %v18740_v38 }
 0x53f   :  { %9716 = vmatmul.mubr.msk.f32.gmra.mrb[66].mxu1 %vm459_vm1, %v9691_v29 }
 0x540   :  { %2694 = vmatprep.mubr.f32.mxu1 %v18740_v38 }
 0x543   :  { %9717 = vmatmul.mubr.msk.f32.gmra.mrb[68].mxu1 %vm459_vm1, %v9692_v21 }
 0x544   :  { %2984 = vmatprep.mubr.f32.mxu1 %v18740_v38 }
 0x5f1   :  { %v2553_v45 = vpop.f32.mrb[56].mxu0 }
 0x5f2   :  { %v2555_v63 = vpop.f32.mrb[57].mxu0  ;;  %v2554_v41 = vadd.f32 %v2553_v45, %v18813_v57  ;;  %v18818_v45 = vld [vmem:[#allocation42_spill] sm:$0xff] }
 0x5f3   :  { %v2556_v51 = vadd.f32 %v2555_v63, %v18813_v57 }
 0x5f4   :  { %v2701_v18 = vmax.f32 %v2554_v41, 0.0 }
 0x5f5   :  { %v2559_v12 = vpop.f32.mrb[58].mxu0  ;;  %v2702_v36 = vmax.f32 %v2556_v51, 0.0 }
 0x5f6   :  { %v2560_v17 = vadd.f32 %v2559_v12, %v18814_v1  ;;  %v2561_v40 = vpop.f32.mrb[59].mxu0 }
 0x5f7   :  { %v2562_v3 = vadd.f32 %v2561_v40, %v18814_v1 }
 0x5f8   :  { %v2705_v16 = vmax.f32 %v2560_v17, 0.0 }
 0x5f9   :  { %v2706_v22 = vmax.f32 %v2562_v3, 0.0  ;;  %v2565_v60 = vpop.f32.mrb[60].mxu0 }
 0x5fa   :  { %v10260_v59 = vpack.c.bf16 %v2705_v16, %v2701_v18  ;;  %v2567_v37 = vpop.f32.mrb[61].mxu0  ;;  %v2566_v56 = vadd.f32 %v2565_v60, %v18815_v58 }
 0x5fb   :  { %v10258_v33 = vpack.c.bf16 %v2706_v22, %v2702_v36  ;;  %v2568_v8 = vadd.f32 %v2567_v37, %v18815_v58 }
 0x5fc   :  { %v2709_v53 = vmax.f32 %v2566_v56, 0.0 }
 0x5fd   :  { %v2571_v6 = vpop.f32.mrb[62].mxu0  ;;  %10259 = vmatprep.subr.bf16.mxu0 %v10258_v33  ;;  %v2710_v13 = vmax.f32 %v2568_v8, 0.0 }
 0x5fe   :  { %v2660_v48 = vpop.f32.mrb[56].mxu1  ;;  %v2572_v34 = vadd.f32 %v2571_v6, %v18816_v0  ;;  %v2573_v31 = vpop.f32.mrb[63].mxu0  ;;  %10261 = vmatpush1.bf16.msra.mxu0 %v10260_v59 }
 0x5ff   :  { %v2662_v30 = vpop.f32.mrb[57].mxu1  ;;  %v2574_v46 = vadd.f32 %v2573_v31, %v18816_v0  ;;  %v2661_v52 = vadd.f32 %v2660_v48, %v18813_v57  ;;  %v18819_v48 = vld [vmem:[#allocation45_spill] sm:$0xff] }
 0x600   :  { %v2713_v23 = vmax.f32 %v2572_v34, 0.0  ;;  %v2663_v25 = vadd.f32 %v2662_v30, %v18813_v57 }
 0x601   :  { %v2714_v19 = vmax.f32 %v2574_v46, 0.0  ;;  %v2577_v27 = vpop.f32.mrb[64].mxu0  ;;  %v2703_v32 = vmax.f32 %v2661_v52, 0.0 }
 0x602   :  { %v2666_v20 = vpop.f32.mrb[58].mxu1  ;;  %v10264_v35 = vpack.c.bf16 %v2713_v23, %v2709_v53  ;;  %v2579_v11 = vpop.f32.mrb[65].mxu0  ;;  %v2578_v10 = vadd.f32 %v2577_v27, %v18817_v26  ;;  %v2704_v49 = vmax.f32 %v2663_v25, 0.0 }
 0x603   :  { %v2667_v24 = vadd.f32 %v2666_v20, %v18814_v1  ;;  %v2668_v42 = vpop.f32.mrb[59].mxu1  ;;  %v10262_v9 = vpack.c.bf16 %v2714_v19, %v2710_v13  ;;  %v2580_v5 = vadd.f32 %v2579_v11, %v18817_v26  ;;  %v9718_v13 = vld [vmem:[%s18363_s5 + $0x70] sm:$0xff] }
 0x604   :  { %v2669_v7 = vadd.f32 %v2668_v42, %v18814_v1  ;;  %v2717_v1 = vmax.f32 %v2578_v10, 0.0 }
 0x605   :  { %v2707_v14 = vmax.f32 %v2667_v24, 0.0  ;;  %v2583_v15 = vpop.f32.mrb[66].mxu0  ;;  %10263 = vmatprep.subr.bf16.mxu0 %v10262_v9  ;;  %v2718_v18 = vmax.f32 %v2580_v5, 0.0  ;;  %v9719_v9 = vld [vmem:[%s18363_s5 + $0x78] sm:$0xff] }
 0x606   :  { %v2708_v2 = vmax.f32 %v2669_v7, 0.0  ;;  %v2672_v39 = vpop.f32.mrb[60].mxu1  ;;  %v2584_v63 = vadd.f32 %v2583_v15, %v18818_v45  ;;  %v2585_v57 = vpop.f32.mrb[67].mxu0  ;;  %10265 = vmatpush1.bf16.msra.mxu0 %v10264_v35  ;;  %v9720_v15 = vld [vmem:[%s18363_s5 + $0x80] sm:$0xff] }
 0x607   :  { %v10272_v29 = vpack.c.bf16 %v2707_v14, %v2703_v32  ;;  %v2674_v21 = vpop.f32.mrb[61].mxu1  ;;  %v2586_v51 = vadd.f32 %v2585_v57, %v18818_v45  ;;  %v2673_v12 = vadd.f32 %v2672_v39, %v18815_v58  ;;  %v9723_v57 = vld [vmem:[%s18363_s5 + $0x98] sm:$0xff] }
 0x608   :  { %v10270_v41 = vpack.c.bf16 %v2708_v2, %v2704_v49  ;;  %v2721_v17 = vmax.f32 %v2584_v63, 0.0  ;;  %v2675_v40 = vadd.f32 %v2674_v21, %v18815_v58  ;;  %v9722_v63 = vld [vmem:[%s18363_s5 + $0x90] sm:$0xff] }
 0x609   :  { %v2722_v16 = vmax.f32 %v2586_v51, 0.0  ;;  %v2589_v36 = vpop.f32.mrb[68].mxu0  ;;  %v2711_v6 = vmax.f32 %v2673_v12, 0.0 }
 0x60a   :  { %v2678_v3 = vpop.f32.mrb[62].mxu1  ;;  %10271 = vmatprep.subr.bf16.mxu1 %v10270_v41  ;;  %v10268_v59 = vpack.c.bf16 %v2721_v17, %v2717_v1  ;;  %v2591_v37 = vpop.f32.mrb[69].mxu0  ;;  %v2590_v58 = vadd.f32 %v2589_v36, %v18819_v48  ;;  %v2712_v34 = vmax.f32 %v2675_v40, 0.0  ;;  %v9724_v41 = vld [vmem:[%s18363_s5 + $0xa0] sm:$0x1] }
 0x60b   :  { %v2679_v22 = vadd.f32 %v2678_v3, %v18816_v0  ;;  %v2680_v60 = vpop.f32.mrb[63].mxu1  ;;  %10273 = vmatpush1.bf16.msra.mxu1 %v10272_v29  ;;  %v10266_v56 = vpack.c.bf16 %v2722_v16, %v2718_v18  ;;  %v2592_v8 = vadd.f32 %v2591_v37, %v18819_v48  ;;  %v18820_v16 = vld [vmem:[#allocation47_spill] sm:$0xff] }
 0x60c   :  { %v2681_v33 = vadd.f32 %v2680_v60, %v18816_v0  ;;  %v2725_v20 = vmax.f32 %v2590_v58, 0.0 }
 0x60d   :  { %v2715_v30 = vmax.f32 %v2679_v22, 0.0  ;;  %v2726_v52 = vmax.f32 %v2592_v8, 0.0  ;;  %10267 = vmatprep.subr.bf16.mxu0 %v10266_v56 }
 0x60e   :  { %v2716_v31 = vmax.f32 %v2681_v33, 0.0  ;;  %v2684_v46 = vpop.f32.mrb[64].mxu1  ;;  %10269 = vmatpush1.bf16.msra.mxu0 %v10268_v59  ;;  %v18821_v33 = vld [vmem:[#allocation44_spill] sm:$0xff] }
 0x60f   :  { %v10276_v53 = vpack.c.bf16 %v2715_v30, %v2711_v6  ;;  %v2686_v23 = vpop.f32.mrb[65].mxu1  ;;  %9732 = vmatprep.subr.msk.mxu0 %vm69_vm0, %v2726_v52  ;;  %v2685_v0 = vadd.f32 %v2684_v46, %v18817_v26 }
 0x610   :  { %v10274_v25 = vpack.c.bf16 %v2716_v31, %v2712_v34  ;;  %v2687_v19 = vadd.f32 %v2686_v23, %v18817_v26  ;;  %v18823_v31 = vld [vmem:[#allocation49_spill] sm:$0xff] }
 0x611   :  { %v2719_v11 = vmax.f32 %v2685_v0, 0.0 }
 0x612   :  { %v2690_v27 = vpop.f32.mrb[66].mxu1  ;;  %10275 = vmatprep.subr.bf16.mxu1 %v10274_v25  ;;  %9733 = vmatpush1.msk.msra.mxu0 %vm69_vm0, %v2725_v20  ;;  %v2720_v32 = vmax.f32 %v2687_v19, 0.0  ;;  %v18824_v19 = vld [vmem:[#allocation48_spill] sm:$0xff] }
 0x613   :  { %v2691_v24 = vadd.f32 %v2690_v27, %v18818_v45  ;;  %v2692_v42 = vpop.f32.mrb[67].mxu1  ;;  %10277 = vmatpush1.bf16.msra.mxu1 %v10276_v53  ;;  %9734 = vmatmul.mubr.msk.f32.vlgmr.msra.gmra.mrb[70].mxu0 %vm459_vm1, %v9718_v13 }
 0x614   :  { %v2693_v35 = vadd.f32 %v2692_v42, %v18818_v45  ;;  %2883 = vmatprep.mubr.f32.mxu0 %v18740_v38  ;;  %v9721_v45 = vld [vmem:[%s18363_s5 + $0x88] sm:$0xff] }
 0x615   :  { %v2723_v7 = vmax.f32 %v2691_v24, 0.0 }
 0x616   :  { %v2724_v14 = vmax.f32 %v2693_v35, 0.0  ;;  %v2696_v26 = vpop.f32.mrb[68].mxu1 }
 0x617   :  { %v10280_v10 = vpack.c.bf16 %v2723_v7, %v2719_v11  ;;  %v2698_v49 = vpop.f32.mrb[69].mxu1  ;;  %9735 = vmatmul.mubr.msk.f32.gmra.mrb[72].mxu0 %vm459_vm1, %v9719_v9  ;;  %v2697_v5 = vadd.f32 %v2696_v26, %v18819_v48 }
 0x618   :  { %v10278_v2 = vpack.c.bf16 %v2724_v14, %v2720_v32  ;;  %v2699_v39 = vadd.f32 %v2698_v49, %v18819_v48  ;;  %2889 = vmatprep.mubr.f32.mxu0 %v18740_v38  ;;  %v18822_v48 = vld [vmem:[#allocation46_spill] sm:$0xff] }
 0x619   :  { %v2727_v21 = vmax.f32 %v2697_v5, 0.0  ;;  %v18827_v5 = vld [vmem:[#allocation11_spill] sm:$0xff] }
 0x61a   :  { %v2728_v29 = vmax.f32 %v2699_v39, 0.0  ;;  %10279 = vmatprep.subr.bf16.mxu1 %v10278_v2 }
 0x61b   :  { %10281 = vmatpush1.bf16.msra.mxu1 %v10280_v10  ;;  %9736 = vmatmul.mubr.msk.f32.gmra.mrb[74].mxu0 %vm459_vm1, %v9720_v15 }
 0x61c   :  { %9741 = vmatprep.subr.msk.mxu1 %vm69_vm0, %v2728_v29  ;;  %2895 = vmatprep.mubr.f32.mxu0 %v18740_v38 }
 0x61f   :  { %9742 = vmatpush1.msk.msra.mxu1 %vm69_vm0, %v2727_v21  ;;  %9737 = vmatmul.mubr.msk.f32.gmra.mrb[76].mxu0 %vm459_vm1, %v9721_v45 }
 0x620   :  { %9743 = vmatmul.mubr.msk.f32.vlgmr.msra.gmra.mrb[70].mxu1 %vm459_vm1, %v9718_v13  ;;  %2901 = vmatprep.mubr.f32.mxu0 %v18740_v38 }
 0x621   :  { %2990 = vmatprep.mubr.f32.mxu1 %v18740_v38 }
 0x623   :  { %9738 = vmatmul.mubr.msk.f32.gmra.mrb[78].mxu0 %vm459_vm1, %v9722_v63 }
 0x624   :  { %9744 = vmatmul.mubr.msk.f32.gmra.mrb[72].mxu1 %vm459_vm1, %v9719_v9  ;;  %2907 = vmatprep.mubr.f32.mxu0 %v18740_v38  ;;  %v18825_v9 = vld [vmem:[#allocation51_spill] sm:$0xff] }
 0x625   :  { %2996 = vmatprep.mubr.f32.mxu1 %v18740_v38 }
 0x627   :  { %9739 = vmatmul.mubr.msk.f32.gmra.mrb[80].mxu0 %vm459_vm1, %v9723_v57 }
 0x628   :  { %9745 = vmatmul.mubr.msk.f32.gmra.mrb[74].mxu1 %vm459_vm1, %v9720_v15  ;;  %2913 = vmatprep.mubr.f32.mxu0 %v18740_v38 }
 0x629   :  { %3002 = vmatprep.mubr.f32.mxu1 %v18740_v38 }
 0x62b   :  { %9740 = vmatmul.mubr.msk.f32.gmra.mrb[82].mxu0 %vm459_vm1, %v9724_v41 }
 0x62c   :  { %9746 = vmatmul.mubr.msk.f32.gmra.mrb[76].mxu1 %vm459_vm1, %v9721_v45  ;;  %3549 = vmatprep.mubr.f32.mxu0 %v18740_v38 }
 0x62d   :  { %3008 = vmatprep.mubr.f32.mxu1 %v18740_v38 }
 0x630   :  { %9747 = vmatmul.mubr.msk.f32.gmra.mrb[78].mxu1 %vm459_vm1, %v9722_v63  ;;  %v18828_v63 = vld [vmem:[#allocation10_spill] sm:$0xff] }
 0x631   :  { %3014 = vmatprep.mubr.f32.mxu1 %v18740_v38 }
 0x634   :  { %9748 = vmatmul.mubr.msk.f32.gmra.mrb[80].mxu1 %vm459_vm1, %v9723_v57 }
 0x635   :  { %3020 = vmatprep.mubr.f32.mxu1 %v18740_v38 }
 0x638   :  { %9749 = vmatmul.mubr.msk.f32.gmra.mrb[82].mxu1 %vm459_vm1, %v9724_v41  ;;  %v18830_v41 = vld [vmem:[#allocation50_spill] sm:$0xff] }
 0x639   :  { %3656 = vmatprep.mubr.f32.mxu1 %v18740_v38 }
 0x6e6   :  { %v2879_v51 = vpop.f32.mrb[70].mxu0 }
 0x6e7   :  { %v2881_v12 = vpop.f32.mrb[71].mxu0  ;;  %v2880_v56 = vadd.f32 %v2879_v51, %v18821_v33 }
 0x6e8   :  { %v2882_v6 = vadd.f32 %v2881_v12, %v18821_v33 }
 0x6e9   :  { %v13855_v20 = vadd.f32 %v2880_v56, %v13342_v61 }
 0x6ea   :  { %v2885_v1 = vpop.f32.mrb[72].mxu0  ;;  %v13862_v27 = vadd.f32 %v2882_v6, %v13350_v4  ;;  %v18835_v6 = vld [vmem:[#allocation17_spill] sm:$0xff] }
 0x6eb   :  { %v2887_v17 = vpop.f32.mrb[73].mxu0  ;;  %v2886_v36 = vadd.f32 %v2885_v1, %v18820_v16 }
 0x6ec   :  { %v2888_v59 = vadd.f32 %v2887_v17, %v18820_v16 }
 0x6ed   :  { %v13847_v58 = vadd.f32 %v2886_v36, %v13331_v28 }
 0x6ee   :  { %v2891_v40 = vpop.f32.mrb[74].mxu0  ;;  %v13851_v53 = vadd.f32 %v2888_v59, %v13337_v55 }
 0x6ef   :  { %v2893_v3 = vpop.f32.mrb[75].mxu0  ;;  %v2892_v8 = vadd.f32 %v2891_v40, %v18822_v48  ;;  %v3055_v42 = vadd.f32 %v13847_v58, %v13855_v20 }
 0x6f0   :  { %v2894_v30 = vadd.f32 %v2893_v3, %v18822_v48 }
 0x6f1   :  { %v13858_v13 = vadd.f32 %v2892_v8, %v13346_v62  ;;  %v3068_v62 = vadd.f32 %v13851_v53, %v13862_v27 }
 0x6f2   :  { %v2897_v22 = vpop.f32.mrb[76].mxu0  ;;  %v13865_v24 = vadd.f32 %v2894_v30, %v13360_v50 }
 0x6f3   :  { %v2986_v18 = vpop.f32.mrb[70].mxu1  ;;  %v2899_v37 = vpop.f32.mrb[77].mxu0  ;;  %v2898_v46 = vadd.f32 %v2897_v22, %v18823_v31  ;;  %v3056_v14 = vadd.f32 %v3055_v42, %v13858_v13  ;;  %v18833_v22 = vld [vmem:[#allocation5_spill] sm:$0xff] }
 0x6f4   :  { %v2988_v60 = vpop.f32.mrb[71].mxu1  ;;  %v2900_v25 = vadd.f32 %v2899_v37, %v18823_v31  ;;  %v2987_v21 = vadd.f32 %v2986_v18, %v18821_v33  ;;  %v18831_v18 = vld [vmem:[#allocation15_spill] sm:$0xff] }
 0x6f5   :  { %v13871_v61 = vadd.f32 %v2898_v46, %v13372_v47  ;;  %v3069_v47 = vadd.f32 %v3068_v62, %v13865_v24 }
 0x6f6   :  { %v2903_v52 = vpop.f32.mrb[78].mxu0  ;;  %v13876_v4 = vadd.f32 %v2900_v25, %v13379_v43 }
 0x6f7   :  { %v2992_v34 = vpop.f32.mrb[72].mxu1  ;;  %v2905_v0 = vpop.f32.mrb[79].mxu0  ;;  %v2904_v28 = vadd.f32 %v2903_v52, %v18824_v19  ;;  %v3057_v43 = vadd.f32 %v3056_v14, %v13871_v61 }
 0x6f8   :  { %v2994_v23 = vpop.f32.mrb[73].mxu1  ;;  %v2906_v55 = vadd.f32 %v2905_v0, %v18824_v19  ;;  %v2993_v2 = vadd.f32 %v2992_v34, %v18820_v16  ;;  %v18837_v34 = vld [vmem:[#allocation7_spill] sm:$0xff]  ;;  %v18839_v0 = vld [vmem:[#allocation8_spill] sm:$0xff] }
 0x6f9   :  { %v13881_v26 = vadd.f32 %v2904_v28, %v13387_v44  ;;  %v3070_v44 = vadd.f32 %v3069_v47, %v13876_v4  ;;  %v2995_v40 = vadd.f32 %v2994_v23, %v18820_v16  ;;  %v13916_v46 = vadd.f32 %v2987_v21, %v18837_v34  ;;  %v18847_v21 = vld [vmem:[#allocation19_spill] sm:$0xff] }
 0x6fa   :  { %v2909_v11 = vpop.f32.mrb[80].mxu0  ;;  %v13886_v49 = vadd.f32 %v2906_v55, %v13395_v54  ;;  %v13908_v59 = vadd.f32 %v2993_v2, %v18833_v22  ;;  %v2989_v16 = vadd.f32 %v2988_v60, %v18821_v33  ;;  %v18841_v33 = vld [vmem:[#allocation6_spill] sm:$0xff] }
 0x6fb   :  { %v2998_v35 = vpop.f32.mrb[74].mxu1  ;;  %v2910_v50 = vadd.f32 %v2909_v11, %v18825_v9  ;;  %v2911_v32 = vpop.f32.mrb[81].mxu0  ;;  %v3058_v1 = vadd.f32 %v3057_v43, %v13881_v26  ;;  %18838 = vst [vmem:[#allocation98_spill] sm:$0xff] %v13916_v46  ;;  %v18853_v22 = vld [vmem:[#allocation14_spill] sm:$0xff] }
 0x6fc   :  { %v3000_v7 = vpop.f32.mrb[75].mxu1  ;;  %v2912_v10 = vadd.f32 %v2911_v32, %v18825_v9  ;;  %18826 = vst [vmem:[#allocation97_spill] sm:$0xff] %v13886_v49  ;;  %v2999_v12 = vadd.f32 %v2998_v35, %v18822_v48  ;;  %v3071_v3 = vadd.f32 %v3070_v44, %v13886_v49  ;;  %18834 = vst [vmem:[#allocation102_spill] sm:$0xff] %v13908_v59  ;;  %v18843_v32 = vld [vmem:[#allocation12_spill] sm:$0xff] }
 0x6fd   :  { %v13891_v15 = vadd.f32 %v2910_v50, %v18827_v5  ;;  %v3001_v11 = vadd.f32 %v3000_v7, %v18822_v48  ;;  %v3081_v60 = vadd.f32 %v13908_v59, %v13916_v46  ;;  %v13932_v50 = vadd.f32 %v2995_v40, %v18841_v33 }
 0x6fe   :  { %v2915_v29 = vpop.f32.mrb[82].mxu0  ;;  %v13896_v57 = vadd.f32 %v2912_v10, %v18828_v63  ;;  %v13923_v28 = vadd.f32 %v2999_v12, %v18839_v0 }
 0x6ff   :  { %v3004_v39 = vpop.f32.mrb[76].mxu1  ;;  %v2916_v54 = vadd.f32 %v2915_v29, %v18830_v41  ;;  %v2917_v51 = vpop.f32.mrb[83].mxu0  ;;  %v3059_v8 = vadd.f32 %v3058_v1, %v13891_v15  ;;  %18842 = vst [vmem:[#allocation99_spill] sm:$0xff] %v13932_v50  ;;  %v18845_v29 = vld [vmem:[#allocation9_spill] sm:$0xff] }
 0x700   :  { %v3006_v45 = vpop.f32.mrb[77].mxu1  ;;  %18829 = vst [vmem:[#allocation20_spill] sm:$0xff] %v13896_v57  ;;  %v2918_v17 = vadd.f32 %v2917_v51, %v18830_v41  ;;  %v3005_v37 = vadd.f32 %v3004_v39, %v18823_v31  ;;  %v3072_v23 = vadd.f32 %v3071_v3, %v13896_v57  ;;  %18840 = vst [vmem:[#allocation104_spill] sm:$0xff] %v13923_v28 }
 0x701   :  { %v13905_v36 = vadd.f32 %v2916_v54, %v18831_v18  ;;  %v3007_v2 = vadd.f32 %v3006_v45, %v18823_v31  ;;  %v13940_v48 = vadd.f32 %v2989_v16, %v18845_v29  ;;  %v3082_v7 = vadd.f32 %v3081_v60, %v13923_v28  ;;  %v18849_v54 = vld [vmem:[#allocation13_spill] sm:$0xff] }
 0x702   :  { %v13913_v30 = vadd.f32 %v2918_v17, %v18835_v6  ;;  %v13935_v14 = vadd.f32 %v3005_v37, %v18843_v32  ;;  %v13947_v51 = vadd.f32 %v3001_v11, %v18849_v54  ;;  %v18851_v17 = vld [vmem:[#allocation18_spill] sm:$0xff]  ;;  %v18861_v32 = vld [vmem:[#allocation21_spill] sm:$0xff] }
 0x703   :  { %18832 = vst [vmem:[#allocation95_spill] sm:$0xff] %v13905_v36  ;;  %v3010_v56 = vpop.f32.mrb[78].mxu1  ;;  %v3060_v25 = vsel %vm69_vm0, %v13905_v36, 0.0  ;;  %18846 = vst [vmem:[#allocation23_spill] sm:$0xff] %v13940_v48  ;;  %v3094_v31 = vadd.f32 %v13932_v50, %v13940_v48  ;;  %v13957_v37 = vadd.f32 %v3007_v2, %v18853_v22 }
 0x704   :  { %18836 = vst [vmem:[#allocation96_spill] sm:$0xff] %v13913_v30  ;;  %v3012_v52 = vpop.f32.mrb[79].mxu1  ;;  %v3011_v55 = vadd.f32 %v3010_v56, %v18824_v19  ;;  %v3061_v42 = vadd.f32 %v3060_v25, %v3059_v8  ;;  %v3073_v35 = vsel %vm69_vm0, %v13913_v30, 0.0  ;;  %18844 = vst [vmem:[#allocation106_spill] sm:$0xff] %v13935_v14  ;;  %v3083_v45 = vadd.f32 %v3082_v7, %v13935_v14  ;;  %v18855_v25 = vld [vmem:[#allocation16_spill] sm:$0xff] }
 0x705   :  { %v3074_v62 = vadd.f32 %v3073_v35, %v3072_v23  ;;  %18850 = vst [vmem:[#allocation108_spill] sm:$0xff] %v13947_v51  ;;  %v3013_v12 = vadd.f32 %v3012_v52, %v18824_v19  ;;  %18854 = vst [vmem:[#allocation112_spill] sm:$0xff] %v13957_v37  ;;  %v3095_v23 = vadd.f32 %v3094_v31, %v13947_v51 }
 0x706   :  { %v3062_v47 = vrot.slane %v3061_v42, 4  ;;  %v13944_v44 = vadd.f32 %v3011_v55, %v18847_v21  ;;  %v18857_v55 = vld [vmem:[#allocation94_spill] sm:$0xff] }
 0x707   :  { %v3016_v10 = vpop.f32.mrb[80].mxu1  ;;  %v3075_v5 = vrot.slane %v3074_v62, 4  ;;  %v13965_v0 = vadd.f32 %v3013_v12, %v18855_v25  ;;  %v3096_v33 = vadd.f32 %v3095_v23, %v13957_v37 }
 0x708   :  { %v3017_v43 = vadd.f32 %v3016_v10, %v18825_v9  ;;  %v3018_v39 = vpop.f32.mrb[81].mxu1  ;;  %18848 = vst [vmem:[#allocation101_spill] sm:$0xff] %v13944_v44  ;;  %v3063_v63 = vadd.f32 %v3062_v47, %v3061_v42  ;;  %v3084_v34 = vadd.f32 %v3083_v45, %v13944_v44 }
 0x709   :  { %v3076_v1 = vadd.f32 %v3075_v5, %v3074_v62  ;;  %v3019_v56 = vadd.f32 %v3018_v39, %v18825_v9  ;;  %18856 = vst [vmem:[#allocation114_spill] sm:$0xff] %v13965_v0  ;;  %v18859_v62 = vld [vmem:[#allocation100_spill] sm:$0xff]  ;;  %v3097_v39 = vadd.f32 %v3096_v33, %v13965_v0 }
 0x70a   :  { %v13954_v40 = vadd.f32 %v3017_v43, %v18851_v17  ;;  %v3064_v3 = vrot.slane %v3063_v63, 2 }
 0x70b   :  { %v3022_v18 = vpop.f32.mrb[82].mxu1  ;;  %v3077_v6 = vrot.slane %v3076_v1, 2  ;;  %v13976_v10 = vadd.f32 %v3019_v56, %v18861_v32 }
 0x70c   :  { %18852 = vst [vmem:[#allocation110_spill] sm:$0xff] %v13954_v40  ;;  %v3023_v8 = vadd.f32 %v3022_v18, %v18830_v41  ;;  %v3024_v19 = vpop.f32.mrb[83].mxu1  ;;  %v3065_v16 = vadd.f32 %v3064_v3, %v3063_v63  ;;  %v3085_v9 = vadd.f32 %v3084_v34, %v13954_v40 }
 0x70d   :  { %v3025_v52 = vadd.f32 %v3024_v19, %v18830_v41  ;;  %v3078_v35 = vadd.f32 %v3077_v6, %v3076_v1  ;;  %18862 = vst [vmem:[#allocation105_spill] sm:$0xff] %v13976_v10  ;;  %v3098_v63 = vadd.f32 %v3097_v39, %v13976_v10 }
 0x70e   :  { %v13968_v42 = vadd.f32 %v3023_v8, %v18857_v55  ;;  %v3066_v11 = vrot.slane %v3065_v16, 1 }
 0x70f   :  { %v13972_v60 = vadd.f32 %v3025_v52, %v18859_v62  ;;  %v3079_v47 = vrot.slane %v3078_v35, 1 }
 0x710   :  { %18858 = vst [vmem:[#allocation22_spill] sm:$0xff] %v13968_v42  ;;  %v3086_v41 = vsel %vm69_vm0, %v13968_v42, 0.0  ;;  %v3067_v2 = vadd.f32 %v3066_v11, %v3065_v16 }
 0x711   :  { %18860 = vst [vmem:[#allocation103_spill] sm:$0xff] %v13972_v60  ;;  %v3087_v43 = vadd.f32 %v3086_v41, %v3085_v9  ;;  %v3080_v5 = vadd.f32 %v3079_v47, %v3078_v35  ;;  %v3099_v21 = vsel %vm69_vm0, %v13972_v60, 0.0 }
 0x712   :  { %v3107_v29 = vmul.f32 0.020408163, %v3067_v2  ;;  %v3100_v17 = vadd.f32 %v3099_v21, %v3098_v63 }
 0x713   :  { %v3088_v7 = vrot.slane %v3087_v43, 4  ;;  %v3108_v31 = vmul.f32 0.020408163, %v3080_v5 }
 0x714   :  { %v13985_v54 = vsub.f32 %v13855_v20, %v3107_v29  ;;  %v13988_v12 = vsub.f32 %v13847_v58, %v3107_v29  ;;  %v13991_v1 = vsub.f32 %v13858_v13, %v3107_v29  ;;  %v13994_v3 = vsub.f32 %v13871_v61, %v3107_v29 }
 0x715   :  { %v3089_v45 = vadd.f32 %v3088_v7, %v3087_v43  ;;  %v14001_v56 = vsub.f32 %v13881_v26, %v3107_v29  ;;  %v14004_v8 = vsub.f32 %v13905_v36, %v3107_v29  ;;  %v14009_v16 = vsub.f32 %v13862_v27, %v3108_v31 }
 0x716   :  { %v3139_v18 = vmul.f32 %v13985_v54, %v13985_v54  ;;  %v3143_v22 = vmul.f32 %v13988_v12, %v13988_v12  ;;  %v3147_v19 = vmul.f32 %v13991_v1, %v13991_v1  ;;  %v14012_v52 = vsub.f32 %v13851_v53, %v3108_v31 }
 0x717   :  { %v3090_v6 = vrot.slane %v3089_v45, 2  ;;  %v14015_v23 = vsub.f32 %v13891_v15, %v3107_v29  ;;  %v3101_v55 = vrot.slane %v3100_v17, 4  ;;  %v3151_v35 = vmul.f32 %v13994_v3, %v13994_v3 }
 0x718   :  { %v3167_v34 = vadd.f32 %v3143_v22, %v3139_v18  ;;  %v14020_v11 = vsub.f32 %v13865_v24, %v3108_v31  ;;  %v3140_v62 = vmul.f32 %v14009_v16, %v14009_v16  ;;  %v3163_v33 = vmul.f32 %v14004_v8, %v14004_v8 }
 0x719   :  { %v3091_v25 = vadd.f32 %v3090_v6, %v3089_v45  ;;  %v3144_v41 = vmul.f32 %v14012_v52, %v14012_v52  ;;  %v3155_v47 = vmul.f32 %v14001_v56, %v14001_v56  ;;  %v3102_v5 = vadd.f32 %v3101_v55, %v3100_v17 }
 0x71a   :  { %v3168_v9 = vadd.f32 %v3167_v34, %v3147_v19  ;;  %v3159_v29 = vmul.f32 %v14015_v23, %v14015_v23  ;;  %v3148_v21 = vmul.f32 %v14020_v11, %v14020_v11  ;;  %v3172_v63 = vsel %vm69_vm0, %v3163_v33, 0.0 }
 0x71b   :  { %v3092_v32 = vrot.slane %v3091_v25, 1  ;;  %v3180_v39 = vadd.f32 %v3144_v41, %v3140_v62  ;;  %v14036_v18 = vsub.f32 %v13876_v4, %v3108_v31  ;;  %v14039_v6 = vsub.f32 %v13886_v49, %v3108_v31 }
 0x71c   :  { %v3169_v2 = vadd.f32 %v3168_v9, %v3151_v35  ;;  %v14042_v19 = vsub.f32 %v13896_v57, %v3108_v31  ;;  %v3103_v35 = vrot.slane %v3102_v5, 2  ;;  %v14054_v62 = vsub.f32 %v13913_v30, %v3108_v31 }
 0x71d   :  { %v3093_v43 = vadd.f32 %v3092_v32, %v3091_v25  ;;  %v3181_v17 = vadd.f32 %v3180_v39, %v3148_v21  ;;  %v3156_v31 = vmul.f32 %v14039_v6, %v14039_v6 }
 0x71e   :  { %v3170_v7 = vadd.f32 %v3169_v2, %v3155_v47  ;;  %v3152_v47 = vmul.f32 %v14036_v18, %v14036_v18  ;;  %v3160_v39 = vmul.f32 %v14042_v19, %v14042_v19 }
 0x71f   :  { %v3109_v45 = vmul.f32 0.020408163, %v3093_v43 }
 0x720   :  { %v3171_v22 = vadd.f32 %v3170_v7, %v3159_v29  ;;  %v3182_v21 = vadd.f32 %v3181_v17, %v3152_v47 }
 0x721   :  { %v14045_v34 = vsub.f32 %v13916_v46, %v3109_v45  ;;  %v14048_v25 = vsub.f32 %v13908_v59, %v3109_v45  ;;  %v14051_v55 = vsub.f32 %v13923_v28, %v3109_v45  ;;  %v14057_v33 = vsub.f32 %v13935_v14, %v3109_v45 }
 0x722   :  { %v3173_v9 = vadd.f32 %v3172_v63, %v3171_v22  ;;  %v14066_v43 = vsub.f32 %v13944_v44, %v3109_v45  ;;  %v3104_v63 = vadd.f32 %v3103_v35, %v3102_v5  ;;  %v14075_v14 = vsub.f32 %v13954_v40, %v3109_v45 }
 0x723   :  { %v3141_v32 = vmul.f32 %v14045_v34, %v14045_v34  ;;  %v3145_v41 = vmul.f32 %v14048_v25, %v14048_v25  ;;  %v3149_v29 = vmul.f32 %v14051_v55, %v14051_v55  ;;  %v14078_v28 = vsub.f32 %v13968_v42, %v3109_v45 }
 0x724   :  { %v3174_v2 = vrot.slane %v3173_v9, 4  ;;  %v3164_v44 = vmul.f32 %v14054_v62, %v14054_v62  ;;  %v3153_v36 = vmul.f32 %v14057_v33, %v14057_v33  ;;  %v3183_v57 = vadd.f32 %v3182_v21, %v3156_v31 }
 0x725   :  { %v3193_v7 = vadd.f32 %v3145_v41, %v3141_v32  ;;  %v3105_v49 = vrot.slane %v3104_v63, 1  ;;  %v3157_v5 = vmul.f32 %v14066_v43, %v14066_v43  ;;  %v3165_v45 = vmul.f32 %v14078_v28, %v14078_v28 }
 0x726   :  { %v3175_v22 = vadd.f32 %v3174_v2, %v3173_v9  ;;  %v3184_v35 = vadd.f32 %v3183_v57, %v3160_v39  ;;  %v3185_v41 = vsel %vm69_vm0, %v3164_v44, 0.0  ;;  %v3161_v47 = vmul.f32 %v14075_v14, %v14075_v14 }
 0x727   :  { %v3194_v30 = vadd.f32 %v3193_v7, %v3149_v29  ;;  %v3106_v9 = vadd.f32 %v3105_v49, %v3104_v63 }
 0x728   :  { %v3176_v59 = vrot.slane %v3175_v22, 2  ;;  %v3186_v29 = vadd.f32 %v3185_v41, %v3184_v35 }
 0x729   :  { %v3195_v17 = vadd.f32 %v3194_v30, %v3153_v36  ;;  %v3110_v31 = vmul.f32 0.020408163, %v3106_v9  ;;  %v3198_v36 = vsel %vm69_vm0, %v3165_v45, 0.0 }
 0x72a   :  { %v3177_v32 = vadd.f32 %v3176_v59, %v3175_v22  ;;  %v3187_v42 = vrot.slane %v3186_v29, 4 }
 0x72b   :  { %v3196_v2 = vadd.f32 %v3195_v17, %v3157_v5  ;;  %v14092_v40 = vsub.f32 %v13940_v48, %v3110_v31  ;;  %v14095_v49 = vsub.f32 %v13932_v50, %v3110_v31  ;;  %v14099_v59 = vsub.f32 %v13947_v51, %v3110_v31 }
 0x72c   :  { %v3178_v7 = vrot.slane %v3177_v32, 1  ;;  %v3188_v44 = vadd.f32 %v3187_v42, %v3186_v29  ;;  %v14102_v63 = vsub.f32 %v13957_v37, %v3110_v31  ;;  %v14117_v29 = vsub.f32 %v13976_v10, %v3110_v31 }
 0x72d   :  { %v3197_v21 = vadd.f32 %v3196_v2, %v3161_v47  ;;  %v3142_v22 = vmul.f32 %v14092_v40, %v14092_v40  ;;  %v3146_v5 = vmul.f32 %v14095_v49, %v14095_v49  ;;  %v3150_v45 = vmul.f32 %v14099_v59, %v14099_v59 }
 0x72e   :  { %v3179_v57 = vadd.f32 %v3178_v7, %v3177_v32  ;;  %v3189_v35 = vrot.slane %v3188_v44, 2  ;;  %v14109_v32 = vsub.f32 %v13965_v0, %v3110_v31  ;;  %v14114_v2 = vsub.f32 %v13972_v60, %v3110_v31 }
 0x72f   :  { %v3199_v30 = vadd.f32 %v3198_v36, %v3197_v21  ;;  %v3206_v42 = vadd.f32 %v3146_v5, %v3142_v22  ;;  %v3154_v7 = vmul.f32 %v14102_v63, %v14102_v63  ;;  %v3162_v31 = vmul.f32 %v14117_v29, %v14117_v29 }
 0x730   :  { %v3219_v39 = vmul.f32 0.020408163, %v3179_v57  ;;  %v3190_v47 = vadd.f32 %v3189_v35, %v3188_v44  ;;  %v3166_v44 = vmul.f32 %v14114_v2, %v14114_v2 }
 0x731   :  { %v3200_v17 = vrot.slane %v3199_v30, 4  ;;  %v3207_v21 = vadd.f32 %v3206_v42, %v3150_v45 }
 0x732   :  { %v3223_v9 = vadd.f32 1e-05, %v3219_v39  ;;  %v3191_v36 = vrot.slane %v3190_v47, 1  ;;  %v3158_v39 = vmul.f32 %v14109_v32, %v14109_v32  ;;  %v3211_v42 = vsel %vm69_vm0, %v3166_v44, 0.0  ;;  %v18863_v44 = vld [vmem:[#allocation53_spill] sm:$0xff] }
 0x733   :  { %v3201_v41 = vadd.f32 %v3200_v17, %v3199_v30  ;;  %v3208_v0 = vadd.f32 %v3207_v21, %v3154_v7 }
 0x734   :  { %11142 = vrsqrt.f32 %v3223_v9  ;;  %v3192_v30 = vadd.f32 %v3191_v36, %v3190_v47 }
 0x735   :  { %v3202_v57 = vrot.slane %v3201_v41, 2  ;;  %v3209_v5 = vadd.f32 %v3208_v0, %v3158_v39 }
 0x736   :  { %v3220_v35 = vmul.f32 0.020408163, %v3192_v30 }
 0x737   :  { %v3203_v22 = vadd.f32 %v3202_v57, %v3201_v41  ;;  %v3210_v60 = vadd.f32 %v3209_v5, %v3162_v31  ;;  %v18864_v5 = vld [vmem:[#allocation52_spill] sm:$0xff] }
 0x738   :  { %v3224_v9 = vadd.f32 1e-05, %v3220_v35  ;;  %v18865_v35 = vld [vmem:[#allocation57_spill] sm:$0xff] }
 0x739   :  { %v3204_v17 = vrot.slane %v3203_v22, 1  ;;  %v3212_v10 = vadd.f32 %v3211_v42, %v3210_v60 }
 0x73a   :  { %11144 = vrsqrt.f32 %v3224_v9 }
 0x73b   :  { %v3205_v45 = vadd.f32 %v3204_v17, %v3203_v22  ;;  %v3213_v7 = vrot.slane %v3212_v10, 4 }
 0x73d   :  { %v3221_v37 = vmul.f32 0.020408163, %v3205_v45  ;;  %v3214_v47 = vadd.f32 %v3213_v7, %v3212_v10 }
 0x73e   :  { %v11143_v41 = vpop.eup %11142 }
 0x73f   :  { %v3225_v21 = vadd.f32 1e-05, %v3221_v37  ;;  %v3215_v57 = vrot.slane %v3214_v47, 2  ;;  %v3231_v36 = vmul.f32 %v11143_v41, %v13985_v54  ;;  %v3235_v51 = vmul.f32 %v11143_v41, %v13988_v12  ;;  %v18866_v37 = vld [vmem:[#allocation56_spill] sm:$0xff] }
 0x740   :  { %v3239_v0 = vmul.f32 %v11143_v41, %v13991_v1  ;;  %v3243_v39 = vmul.f32 %v11143_v41, %v13994_v3  ;;  %v3247_v54 = vmul.f32 %v11143_v41, %v14001_v56  ;;  %v3251_v3 = vmul.f32 %v11143_v41, %v14015_v23 }
 0x741   :  { %v3216_v22 = vadd.f32 %v3215_v57, %v3214_v47  ;;  %11146 = vrsqrt.f32 %v3225_v21  ;;  %v3302_v60 = vmul.f32 %v18863_v44, %v3231_v36  ;;  %v3306_v17 = vmul.f32 %v18864_v5, %v3235_v51  ;;  %v18867_v36 = vld [vmem:[#allocation55_spill] sm:$0xff] }
 0x742   :  { %v3310_v10 = vmul.f32 %v18865_v35, %v3239_v0  ;;  %v3314_v45 = vmul.f32 %v18866_v37, %v3243_v39 }
 0x743   :  { %v3217_v30 = vrot.slane %v3216_v22, 1  ;;  %v3373_v0 = vadd.f32 %v18867_v36, %v3302_v60  ;;  %v3255_v60 = vmul.f32 %v11143_v41, %v14004_v8  ;;  %v18874_v8 = vld [vmem:[#allocation62_spill] sm:$0xff] }
 0x744   :  { %v11145_v31 = vpop.eup %11144 }
 0x745   :  { %v3218_v9 = vadd.f32 %v3217_v30, %v3216_v22  ;;  %v3232_v12 = vmul.f32 %v11145_v31, %v14009_v16  ;;  %v3236_v1 = vmul.f32 %v11145_v31, %v14012_v52  ;;  %v3240_v42 = vmul.f32 %v11145_v31, %v14020_v11  ;;  %v18868_v16 = vld [vmem:[#allocation54_spill] sm:$0xff]  ;;  %v18869_v11 = vld [vmem:[#allocation61_spill] sm:$0xff]  ;;  %v18870_v30 = vld [vmem:[#allocation60_spill] sm:$0xff] }
 0x746   :  { %v3244_v7 = vmul.f32 %v11145_v31, %v14036_v18  ;;  %v3248_v47 = vmul.f32 %v11145_v31, %v14039_v6  ;;  %v3252_v51 = vmul.f32 %v11145_v31, %v14042_v19  ;;  %v3377_v39 = vadd.f32 %v18868_v16, %v3306_v17 }
 0x747   :  { %v3222_v21 = vmul.f32 0.020408163, %v3218_v9  ;;  %v3303_v57 = vmul.f32 %v18863_v44, %v3232_v12  ;;  %v3307_v56 = vmul.f32 %v18864_v5, %v3236_v1  ;;  %v3311_v52 = vmul.f32 %v18865_v35, %v3240_v42  ;;  %v18871_v12 = vld [vmem:[#allocation59_spill] sm:$0xff]  ;;  %v18872_v1 = vld [vmem:[#allocation58_spill] sm:$0xff] }
 0x748   :  { %v3315_v23 = vmul.f32 %v18866_v37, %v3244_v7  ;;  %v3319_v22 = vmul.f32 %v18869_v11, %v3248_v47  ;;  %v3323_v9 = vmul.f32 %v18870_v30, %v3252_v51  ;;  %v3318_v42 = vmul.f32 %v18869_v11, %v3247_v54 }
 0x749   :  { %v3226_v18 = vadd.f32 1e-05, %v3222_v21  ;;  %v3374_v6 = vadd.f32 %v18867_v36, %v3303_v57  ;;  %v3378_v19 = vadd.f32 %v18868_v16, %v3307_v56  ;;  %v3382_v50 = vadd.f32 %v18871_v12, %v3311_v52 }
 0x74a   :  { %v3386_v48 = vadd.f32 %v18872_v1, %v3315_v23  ;;  %v10284_v47 = vpack.c.bf16 %v3377_v39, %v3373_v0  ;;  %v3381_v21 = vadd.f32 %v18871_v12, %v3310_v10  ;;  %v3385_v57 = vadd.f32 %v18872_v1, %v3314_v45  ;;  %v18873_v23 = vld [vmem:[#allocation63_spill] sm:$0xff] }
 0x74b   :  { %11148 = vrsqrt.f32 %v3226_v18  ;;  %v10282_v17 = vpack.c.bf16 %v3378_v19, %v3374_v6  ;;  %v14158_v7 = vpop.eup %11146  ;;  %v3322_v56 = vmul.f32 %v18870_v30, %v3251_v3  ;;  %v3256_v51 = vmul.f32 %v11145_v31, %v14054_v62  ;;  %v18875_v62 = vld [vmem:[#allocation65_spill] sm:$0xff] }
 0x74c   :  { %v10286_v52 = vpack.c.bf16 %v3386_v48, %v3382_v50  ;;  %v3390_v46 = vadd.f32 %v18873_v23, %v3319_v22  ;;  %v3394_v41 = vadd.f32 %v18874_v8, %v3323_v9  ;;  %v3233_v54 = vmul.f32 %v14158_v7, %v14045_v34  ;;  %v18876_v9 = vld [vmem:[#allocation64_spill] sm:$0xff] }
 0x74d   :  { %10283 = vmatprep.subr.bf16.mxu0 %v10282_v17  ;;  %v3237_v10 = vmul.f32 %v14158_v7, %v14048_v25  ;;  %v10288_v0 = vpack.c.bf16 %v3385_v57, %v3381_v21  ;;  %v3389_v45 = vadd.f32 %v18873_v23, %v3318_v42  ;;  %v3393_v3 = vadd.f32 %v18874_v8, %v3322_v56 }
 0x74e   :  { %10285 = vmatpush1.bf16.msra.mxu0 %v10284_v47  ;;  %v3326_v31 = vmul.f32 %v18875_v62, %v3255_v60  ;;  %v3241_v50 = vmul.f32 %v14158_v7, %v14051_v55  ;;  %v10290_v48 = vpack.c.bf16 %v3394_v41, %v3390_v46  ;;  %v3327_v39 = vmul.f32 %v18875_v62, %v3256_v51 }
 0x74f   :  { %10287 = vmatprep.subr.bf16.mxu0 %v10286_v52  ;;  %v3304_v34 = vmul.f32 %v18863_v44, %v3233_v54  ;;  %v3308_v22 = vmul.f32 %v18864_v5, %v3237_v10  ;;  %v10292_v25 = vpack.c.bf16 %v3393_v3, %v3389_v45  ;;  %v3245_v6 = vmul.f32 %v14158_v7, %v14057_v33 }
 0x750   :  { %v3312_v19 = vmul.f32 %v18865_v35, %v3241_v50  ;;  %v3398_v60 = vadd.f32 %v18876_v9, %v3327_v39  ;;  %v3397_v55 = vadd.f32 %v18876_v9, %v3326_v31  ;;  %v3249_v47 = vmul.f32 %v14158_v7, %v14066_v43  ;;  %v9764_v43 = vld [vmem:[%s18361_s3 + $0xa8] sm:$0xff] }
 0x751   :  { %v3375_v21 = vadd.f32 %v18867_v36, %v3304_v34  ;;  %v3253_v52 = vmul.f32 %v14158_v7, %v14075_v14  ;;  %v9765_v14 = vld [vmem:[%s18361_s3 + $0xb0] sm:$0xff] }
 0x752   :  { %10289 = vmatpush1.bf16.msra.mxu0 %v10288_v0  ;;  %v3383_v10 = vadd.f32 %v18871_v12, %v3312_v19  ;;  %v3320_v0 = vmul.f32 %v18869_v11, %v3249_v47 }
 0x753   :  { %10291 = vmatprep.subr.bf16.mxu0 %v10290_v48  ;;  %v3324_v45 = vmul.f32 %v18870_v30, %v3253_v52 }
 0x755   :  { %v11149_v18 = vpop.eup %11148  ;;  %v3395_v48 = vadd.f32 %v18874_v8, %v3324_v45 }
 0x756   :  { %v3234_v46 = vmul.f32 %v11149_v18, %v14092_v40  ;;  %v3238_v17 = vmul.f32 %v11149_v18, %v14095_v49  ;;  %v3242_v42 = vmul.f32 %v11149_v18, %v14099_v59  ;;  %10293 = vmatpush1.bf16.msra.mxu0 %v10292_v25  ;;  %v3246_v33 = vmul.f32 %v11149_v18, %v14102_v63 }
 0x757   :  { %v3250_v57 = vmul.f32 %v11149_v18, %v14109_v32  ;;  %v3254_v56 = vmul.f32 %v11149_v18, %v14117_v29  ;;  %9778 = vmatprep.subr.msk.mxu0 %vm69_vm0, %v3398_v60  ;;  %v3379_v59 = vadd.f32 %v18868_v16, %v3308_v22  ;;  %v3316_v32 = vmul.f32 %v18866_v37, %v3245_v6  ;;  %v9767_v22 = vld [vmem:[%s18361_s3 + $0xc0] sm:$0xff] }
 0x758   :  { %v3305_v40 = vmul.f32 %v18863_v44, %v3234_v46  ;;  %v3309_v49 = vmul.f32 %v18864_v5, %v3238_v17  ;;  %v3313_v51 = vmul.f32 %v18865_v35, %v3242_v42  ;;  %v3317_v63 = vmul.f32 %v18866_v37, %v3246_v33  ;;  %v18878_v17 = vld [vmem:[#allocation66_spill] sm:$0xff] }
 0x759   :  { %v3321_v29 = vmul.f32 %v18869_v11, %v3250_v57  ;;  %v3325_v35 = vmul.f32 %v18870_v30, %v3254_v56  ;;  %v3258_v3 = vmul.f32 %v11149_v18, %v14114_v2  ;;  %v9766_v11 = vld [vmem:[%s18361_s3 + $0xb8] sm:$0xff]  ;;  %v3257_v30 = vmul.f32 %v14158_v7, %v14078_v28 }
 0x75a   :  { %v3376_v44 = vadd.f32 %v18867_v36, %v3305_v40  ;;  %v3380_v5 = vadd.f32 %v18868_v16, %v3309_v49  ;;  %v3384_v41 = vadd.f32 %v18871_v12, %v3313_v51  ;;  %9779 = vmatpush1.msk.msra.mxu0 %vm69_vm0, %v3397_v55  ;;  %v3388_v54 = vadd.f32 %v18872_v1, %v3317_v63  ;;  %v9770_v18 = vld [vmem:[%s18361_s3 + $0xd8] sm:$0x1]  ;;  %v18879_v63 = vld [vmem:[#allocation69_spill] sm:$0xff] }
 0x75b   :  { %9780 = vmatmul.mubr.msk.f32.vlgmr.msra.gmra.mrb[84].mxu0 %vm459_vm1, %v9764_v43  ;;  %v10296_v36 = vpack.c.bf16 %v3379_v59, %v3375_v21  ;;  %v3387_v16 = vadd.f32 %v18872_v1, %v3316_v32  ;;  %v3392_v50 = vadd.f32 %v18873_v23, %v3321_v29  ;;  %v3396_v12 = vadd.f32 %v18874_v8, %v3325_v35  ;;  %v9768_v8 = vld [vmem:[%s18361_s3 + $0xc8] sm:$0xff] }
 0x75c   :  { %v10294_v37 = vpack.c.bf16 %v3380_v5, %v3376_v44  ;;  %3555 = vmatprep.mubr.f32.mxu0 %v18740_v38  ;;  %v10298_v31 = vpack.c.bf16 %v3388_v54, %v3384_v41  ;;  %v3391_v1 = vadd.f32 %v18873_v23, %v3320_v0  ;;  %v3329_v34 = vmul.f32 %v18875_v62, %v3258_v3  ;;  %v18880_v44 = vld [vmem:[#allocation68_spill] sm:$0xff] }
 0x75d   :  { %v10300_v2 = vpack.c.bf16 %v3387_v16, %v3383_v10  ;;  %v10302_v39 = vpack.c.bf16 %v3396_v12, %v3392_v50  ;;  %v3328_v28 = vmul.f32 %v18875_v62, %v3257_v30  ;;  %v9769_v62 = vld [vmem:[%s18361_s3 + $0xd0] sm:$0xff] }
 0x75e   :  { %10295 = vmatprep.subr.bf16.mxu1 %v10294_v37  ;;  %v10304_v7 = vpack.c.bf16 %v3395_v48, %v3391_v1  ;;  %v3400_v23 = vadd.f32 %v18876_v9, %v3329_v34  ;;  %v18881_v50 = vld [vmem:[#allocation71_spill] sm:$0xff] }
 0x75f   :  { %10297 = vmatpush1.bf16.msra.mxu1 %v10296_v36  ;;  %9781 = vmatmul.mubr.msk.f32.gmra.mrb[86].mxu0 %vm459_vm1, %v9765_v14  ;;  %v3399_v25 = vadd.f32 %v18876_v9, %v3328_v28  ;;  %v18877_v9 = vld [vmem:[#allocation67_spill] sm:$0xff] }
 0x760   :  { %10299 = vmatprep.subr.bf16.mxu1 %v10298_v31  ;;  %3561 = vmatprep.mubr.f32.mxu0 %v18740_v38 }
 0x763   :  { %10301 = vmatpush1.bf16.msra.mxu1 %v10300_v2  ;;  %9782 = vmatmul.mubr.msk.f32.gmra.mrb[88].mxu0 %vm459_vm1, %v9766_v11 }
 0x764   :  { %10303 = vmatprep.subr.bf16.mxu1 %v10302_v39  ;;  %3567 = vmatprep.mubr.f32.mxu0 %v18740_v38  ;;  %v18882_v39 = vld [vmem:[#allocation70_spill] sm:$0xff] }
 0x767   :  { %10305 = vmatpush1.bf16.msra.mxu1 %v10304_v7  ;;  %9783 = vmatmul.mubr.msk.f32.gmra.mrb[90].mxu0 %vm459_vm1, %v9767_v22 }
 0x768   :  { %9787 = vmatprep.subr.msk.mxu1 %vm69_vm0, %v3400_v23  ;;  %3573 = vmatprep.mubr.f32.mxu0 %v18740_v38 }
 0x76b   :  { %9788 = vmatpush1.msk.msra.mxu1 %vm69_vm0, %v3399_v25  ;;  %9784 = vmatmul.mubr.msk.f32.gmra.mrb[92].mxu0 %vm459_vm1, %v9768_v8 }
 0x76c   :  { %9789 = vmatmul.mubr.msk.f32.vlgmr.msra.gmra.mrb[84].mxu1 %vm459_vm1, %v9764_v43  ;;  %3579 = vmatprep.mubr.f32.mxu0 %v18740_v38 }
 0x76d   :  { %3662 = vmatprep.mubr.f32.mxu1 %v18740_v38 }
 0x76f   :  { %9785 = vmatmul.mubr.msk.f32.gmra.mrb[94].mxu0 %vm459_vm1, %v9769_v62 }
 0x770   :  { %9790 = vmatmul.mubr.msk.f32.gmra.mrb[86].mxu1 %vm459_vm1, %v9765_v14  ;;  %3585 = vmatprep.mubr.f32.mxu0 %v18740_v38 }
 0x771   :  { %3668 = vmatprep.mubr.f32.mxu1 %v18740_v38 }
 0x773   :  { %9786 = vmatmul.mubr.msk.f32.gmra.mrb[96].mxu0 %vm459_vm1, %v9770_v18 }
 0x774   :  { %9791 = vmatmul.mubr.msk.f32.gmra.mrb[88].mxu1 %vm459_vm1, %v9766_v11  ;;  %3875 = vmatprep.mubr.f32.mxu0 %v18740_v38 }
 0x775   :  { %3674 = vmatprep.mubr.f32.mxu1 %v18740_v38 }
 0x778   :  { %9792 = vmatmul.mubr.msk.f32.gmra.mrb[90].mxu1 %vm459_vm1, %v9767_v22 }
 0x779   :  { %3680 = vmatprep.mubr.f32.mxu1 %v18740_v38 }
 0x77c   :  { %9793 = vmatmul.mubr.msk.f32.gmra.mrb[92].mxu1 %vm459_vm1, %v9768_v8 }
 0x77d   :  { %3686 = vmatprep.mubr.f32.mxu1 %v18740_v38 }
 0x780   :  { %9794 = vmatmul.mubr.msk.f32.gmra.mrb[94].mxu1 %vm459_vm1, %v9769_v62 }
 0x781   :  { %3692 = vmatprep.mubr.f32.mxu1 %v18740_v38 }
 0x784   :  { %9795 = vmatmul.mubr.msk.f32.gmra.mrb[96].mxu1 %vm459_vm1, %v9770_v18 }
 0x785   :  { %3982 = vmatprep.mubr.f32.mxu1 %v18740_v38 }
 0x82e   :  { %v3551_v6 = vpop.f32.mrb[84].mxu0 }
 0x82f   :  { %v3553_v19 = vpop.f32.mrb[85].mxu0  ;;  %v3552_v60 = vadd.f32 %v3551_v6, %v18877_v9 }
 0x830   :  { %v3554_v55 = vadd.f32 %v3553_v19, %v18877_v9 }
 0x831   :  { %v3699_v33 = vmax.f32 %v3552_v60, 0.0 }
 0x832   :  { %v3557_v46 = vpop.f32.mrb[86].mxu0  ;;  %v3700_v56 = vmax.f32 %v3554_v55, 0.0 }
 0x833   :  { %v3558_v42 = vadd.f32 %v3557_v46, %v18878_v17  ;;  %v3559_v47 = vpop.f32.mrb[87].mxu0 }
 0x834   :  { %v3560_v21 = vadd.f32 %v3559_v47, %v18878_v17 }
 0x835   :  { %v3703_v57 = vmax.f32 %v3558_v42, 0.0 }
 0x836   :  { %v3704_v40 = vmax.f32 %v3560_v21, 0.0  ;;  %v3563_v49 = vpop.f32.mrb[88].mxu0 }
 0x837   :  { %v10308_v59 = vpack.c.bf16 %v3703_v57, %v3699_v33  ;;  %v3565_v51 = vpop.f32.mrb[89].mxu0  ;;  %v3564_v32 = vadd.f32 %v3563_v49, %v18879_v63 }
 0x838   :  { %v10306_v43 = vpack.c.bf16 %v3704_v40, %v3700_v56  ;;  %v3566_v29 = vadd.f32 %v3565_v51, %v18879_v63  ;;  %v18883_v40 = vld [vmem:[#allocation73_spill] sm:$0xff] }
 0x839   :  { %v3707_v54 = vmax.f32 %v3564_v32, 0.0 }
 0x83a   :  { %v3569_v52 = vpop.f32.mrb[90].mxu0  ;;  %10307 = vmatprep.subr.bf16.mxu0 %v10306_v43  ;;  %v3708_v10 = vmax.f32 %v3566_v29, 0.0 }
 0x83b   :  { %v3570_v5 = vadd.f32 %v3569_v52, %v18880_v44  ;;  %v3571_v41 = vpop.f32.mrb[91].mxu0  ;;  %10309 = vmatpush1.bf16.msra.mxu0 %v10308_v59 }
 0x83c   :  { %v3572_v35 = vadd.f32 %v3571_v41, %v18880_v44 }
 0x83d   :  { %v3711_v37 = vmax.f32 %v3570_v5, 0.0 }
 0x83e   :  { %v3712_v14 = vmax.f32 %v3572_v35, 0.0  ;;  %v3575_v36 = vpop.f32.mrb[92].mxu0 }
 0x83f   :  { %v3658_v16 = vpop.f32.mrb[84].mxu1  ;;  %v10312_v0 = vpack.c.bf16 %v3711_v37, %v3707_v54  ;;  %v3577_v45 = vpop.f32.mrb[93].mxu0  ;;  %v3576_v12 = vadd.f32 %v3575_v36, %v18881_v50  ;;  %v9796_v54 = vld [vmem:[%s18363_s5 + $0xa8] sm:$0xff] }
 0x840   :  { %v3660_v3 = vpop.f32.mrb[85].mxu1  ;;  %v10310_v31 = vpack.c.bf16 %v3712_v14, %v3708_v10  ;;  %v3659_v11 = vadd.f32 %v3658_v16, %v18877_v9  ;;  %v3578_v30 = vadd.f32 %v3577_v45, %v18881_v50 }
 0x841   :  { %v3661_v1 = vadd.f32 %v3660_v3, %v18877_v9  ;;  %v3715_v25 = vmax.f32 %v3576_v12, 0.0 }
 0x842   :  { %v3581_v2 = vpop.f32.mrb[94].mxu0  ;;  %10311 = vmatprep.subr.bf16.mxu0 %v10310_v31  ;;  %v3701_v18 = vmax.f32 %v3659_v11, 0.0  ;;  %v3716_v19 = vmax.f32 %v3578_v30, 0.0 }
 0x843   :  { %v3664_v48 = vpop.f32.mrb[86].mxu1  ;;  %v3582_v34 = vadd.f32 %v3581_v2, %v18882_v39  ;;  %v3583_v22 = vpop.f32.mrb[95].mxu0  ;;  %10313 = vmatpush1.bf16.msra.mxu0 %v10312_v0  ;;  %v3702_v9 = vmax.f32 %v3661_v1, 0.0  ;;  %v9798_v1 = vld [vmem:[%s18363_s5 + $0xb8] sm:$0xff] }
 0x844   :  { %v3665_v28 = vadd.f32 %v3664_v48, %v18878_v17  ;;  %v3666_v7 = vpop.f32.mrb[87].mxu1  ;;  %v3584_v23 = vadd.f32 %v3583_v22, %v18882_v39 }
 0x845   :  { %v3667_v8 = vadd.f32 %v3666_v7, %v18878_v17  ;;  %v3719_v62 = vmax.f32 %v3582_v34, 0.0 }
 0x846   :  { %v3705_v6 = vmax.f32 %v3665_v28, 0.0  ;;  %v3720_v60 = vmax.f32 %v3584_v23, 0.0  ;;  %v3587_v55 = vpop.f32.mrb[96].mxu0 }
 0x847   :  { %v3706_v46 = vmax.f32 %v3667_v8, 0.0  ;;  %v3670_v42 = vpop.f32.mrb[88].mxu1  ;;  %v10316_v47 = vpack.c.bf16 %v3719_v62, %v3715_v25  ;;  %v3589_v21 = vpop.f32.mrb[97].mxu0  ;;  %v3588_v17 = vadd.f32 %v3587_v55, %v18883_v40  ;;  %v9802_v55 = vld [vmem:[%s18363_s5 + $0xd8] sm:$0x1] }
 0x848   :  { %v10320_v33 = vpack.c.bf16 %v3705_v6, %v3701_v18  ;;  %v3672_v57 = vpop.f32.mrb[89].mxu1  ;;  %v10314_v56 = vpack.c.bf16 %v3720_v60, %v3716_v19  ;;  %v3590_v49 = vadd.f32 %v3589_v21, %v18883_v40  ;;  %v3671_v51 = vadd.f32 %v3670_v42, %v18879_v63  ;;  %v9800_v6 = vld [vmem:[%s18363_s5 + $0xc8] sm:$0xff]  ;;  %v9801_v60 = vld [vmem:[%s18363_s5 + $0xd0] sm:$0xff]  ;;  %v18884_v42 = vld [vmem:[#allocation72_spill] sm:$0xff] }
 0x849   :  { %v10318_v59 = vpack.c.bf16 %v3706_v46, %v3702_v9  ;;  %v3673_v32 = vadd.f32 %v3672_v57, %v18879_v63  ;;  %v3723_v35 = vmax.f32 %v3588_v17, 0.0  ;;  %v18885_v57 = vld [vmem:[#allocation75_spill] sm:$0xff] }
 0x84a   :  { %v3724_v43 = vmax.f32 %v3590_v49, 0.0  ;;  %10315 = vmatprep.subr.bf16.mxu0 %v10314_v56  ;;  %v3709_v37 = vmax.f32 %v3671_v51, 0.0 }
 0x84b   :  { %v3676_v29 = vpop.f32.mrb[90].mxu1  ;;  %10319 = vmatprep.subr.bf16.mxu1 %v10318_v59  ;;  %10317 = vmatpush1.bf16.msra.mxu0 %v10316_v47  ;;  %v3710_v14 = vmax.f32 %v3673_v32, 0.0 }
 0x84c   :  { %v3677_v52 = vadd.f32 %v3676_v29, %v18880_v44  ;;  %v3678_v5 = vpop.f32.mrb[91].mxu1  ;;  %10321 = vmatpush1.bf16.msra.mxu1 %v10320_v33  ;;  %9810 = vmatprep.subr.msk.mxu0 %vm69_vm0, %v3724_v43 }
 0x84d   :  { %v3679_v41 = vadd.f32 %v3678_v5, %v18880_v44  ;;  %v9797_v44 = vld [vmem:[%s18363_s5 + $0xb0] sm:$0xff] }
 0x84e   :  { %v3713_v10 = vmax.f32 %v3677_v52, 0.0 }
 0x84f   :  { %v3714_v63 = vmax.f32 %v3679_v41, 0.0  ;;  %v3682_v36 = vpop.f32.mrb[92].mxu1  ;;  %9811 = vmatpush1.msk.msra.mxu0 %vm69_vm0, %v3723_v35  ;;  %v18886_v41 = vld [vmem:[#allocation74_spill] sm:$0xff] }
 0x850   :  { %v10324_v16 = vpack.c.bf16 %v3713_v10, %v3709_v37  ;;  %v3684_v0 = vpop.f32.mrb[93].mxu1  ;;  %9812 = vmatmul.mubr.msk.f32.vlgmr.msra.gmra.mrb[98].mxu0 %vm459_vm1, %v9796_v54  ;;  %v3683_v3 = vadd.f32 %v3682_v36, %v18881_v50  ;;  %v18887_v10 = vld [vmem:[#allocation77_spill] sm:$0xff] }
 0x851   :  { %v10322_v45 = vpack.c.bf16 %v3714_v63, %v3710_v14  ;;  %3881 = vmatprep.mubr.f32.mxu0 %v18740_v38  ;;  %v3685_v31 = vadd.f32 %v3684_v0, %v18881_v50 }
 0x852   :  { %v3717_v48 = vmax.f32 %v3683_v3, 0.0 }
 0x853   :  { %v3688_v12 = vpop.f32.mrb[94].mxu1  ;;  %10323 = vmatprep.subr.bf16.mxu1 %v10322_v45  ;;  %v3718_v22 = vmax.f32 %v3685_v31, 0.0 }
 0x854   :  { %v3689_v11 = vadd.f32 %v3688_v12, %v18882_v39  ;;  %v3690_v30 = vpop.f32.mrb[95].mxu1  ;;  %10325 = vmatpush1.bf16.msra.mxu1 %v10324_v16  ;;  %9813 = vmatmul.mubr.msk.f32.gmra.mrb[100].mxu0 %vm459_vm1, %v9797_v44  ;;  %v18888_v12 = vld [vmem:[#allocation76_spill] sm:$0xff] }
 0x855   :  { %v3691_v2 = vadd.f32 %v3690_v30, %v18882_v39  ;;  %3887 = vmatprep.mubr.f32.mxu0 %v18740_v38  ;;  %v9799_v39 = vld [vmem:[%s18363_s5 + $0xc0] sm:$0xff] }
 0x856   :  { %v3721_v34 = vmax.f32 %v3689_v11, 0.0 }
 0x857   :  { %v3722_v50 = vmax.f32 %v3691_v2, 0.0  ;;  %v3694_v28 = vpop.f32.mrb[96].mxu1 }
 0x858   :  { %v10328_v7 = vpack.c.bf16 %v3721_v34, %v3717_v48  ;;  %v3696_v23 = vpop.f32.mrb[97].mxu1  ;;  %9814 = vmatmul.mubr.msk.f32.gmra.mrb[102].mxu0 %vm459_vm1, %v9798_v1  ;;  %v3695_v62 = vadd.f32 %v3694_v28, %v18883_v40 }
 0x859   :  { %v10326_v8 = vpack.c.bf16 %v3722_v50, %v3718_v22  ;;  %v3697_v25 = vadd.f32 %v3696_v23, %v18883_v40  ;;  %3893 = vmatprep.mubr.f32.mxu0 %v18740_v38 }
 0x85a   :  { %v3725_v19 = vmax.f32 %v3695_v62, 0.0 }
 0x85b   :  { %v3726_v18 = vmax.f32 %v3697_v25, 0.0  ;;  %10327 = vmatprep.subr.bf16.mxu1 %v10326_v8  ;;  %v18890_v8 = vld [vmem:[#allocation98_spill] sm:$0xff] }
 0x85c   :  { %10329 = vmatpush1.bf16.msra.mxu1 %v10328_v7  ;;  %9815 = vmatmul.mubr.msk.f32.gmra.mrb[104].mxu0 %vm459_vm1, %v9799_v39 }
 0x85d   :  { %9819 = vmatprep.subr.msk.mxu1 %vm69_vm0, %v3726_v18  ;;  %3899 = vmatprep.mubr.f32.mxu0 %v18740_v38  ;;  %v18892_v18 = vld [vmem:[#allocation97_spill] sm:$0xff] }
 0x860   :  { %9820 = vmatpush1.msk.msra.mxu1 %vm69_vm0, %v3725_v19  ;;  %9816 = vmatmul.mubr.msk.f32.gmra.mrb[106].mxu0 %vm459_vm1, %v9800_v6  ;;  %v18893_v19 = vld [vmem:[#allocation20_spill] sm:$0xff] }
 0x861   :  { %9821 = vmatmul.mubr.msk.f32.vlgmr.msra.gmra.mrb[98].mxu1 %vm459_vm1, %v9796_v54  ;;  %3905 = vmatprep.mubr.f32.mxu0 %v18740_v38 }
 0x862   :  { %3988 = vmatprep.mubr.f32.mxu1 %v18740_v38 }
 0x864   :  { %9817 = vmatmul.mubr.msk.f32.gmra.mrb[108].mxu0 %vm459_vm1, %v9801_v60 }
 0x865   :  { %9822 = vmatmul.mubr.msk.f32.gmra.mrb[100].mxu1 %vm459_vm1, %v9797_v44  ;;  %3911 = vmatprep.mubr.f32.mxu0 %v18740_v38 }
 0x866   :  { %3994 = vmatprep.mubr.f32.mxu1 %v18740_v38 }
 0x868   :  { %9818 = vmatmul.mubr.msk.f32.gmra.mrb[110].mxu0 %vm459_vm1, %v9802_v55 }
 0x869   :  { %9823 = vmatmul.mubr.msk.f32.gmra.mrb[102].mxu1 %vm459_vm1, %v9798_v1  ;;  %4133 = vmatprep.mubr.f32.mxu0 %v18740_v38 }
 0x86a   :  { %4000 = vmatprep.mubr.f32.mxu1 %v18740_v38 }
 0x86d   :  { %9824 = vmatmul.mubr.msk.f32.gmra.mrb[104].mxu1 %vm459_vm1, %v9799_v39  ;;  %v18891_v39 = vld [vmem:[#allocation102_spill] sm:$0xff] }
 0x86e   :  { %4006 = vmatprep.mubr.f32.mxu1 %v18740_v38 }
 0x871   :  { %9825 = vmatmul.mubr.msk.f32.gmra.mrb[106].mxu1 %vm459_vm1, %v9800_v6 }
 0x872   :  { %4012 = vmatprep.mubr.f32.mxu1 %v18740_v38 }
 0x875   :  { %9826 = vmatmul.mubr.msk.f32.gmra.mrb[108].mxu1 %vm459_vm1, %v9801_v60 }
 0x876   :  { %4018 = vmatprep.mubr.f32.mxu1 %v18740_v38 }
 0x879   :  { %9827 = vmatmul.mubr.msk.f32.gmra.mrb[110].mxu1 %vm459_vm1, %v9802_v55 }
 0x87a   :  { %4204 = vmatprep.mubr.f32.mxu1 %v18740_v38 }
 0x923   :  { %v3877_v9 = vpop.f32.mrb[98].mxu0 }
 0x924   :  { %v3879_v46 = vpop.f32.mrb[99].mxu0  ;;  %v3878_v47 = vadd.f32 %v3877_v9, %v18884_v42  ;;  %v18894_v9 = vld [vmem:[#allocation23_spill] sm:$0xff] }
 0x925   :  { %v3880_v21 = vadd.f32 %v3879_v46, %v18884_v42 }
 0x926   :  { %v4025_v59 = vadd.f32 %v3878_v47, %v13855_v20 }
 0x927   :  { %v3883_v33 = vpop.f32.mrb[100].mxu0  ;;  %v4026_v51 = vadd.f32 %v3880_v21, %v13862_v27 }
 0x928   :  { %v3884_v56 = vadd.f32 %v3883_v33, %v18885_v57  ;;  %v3885_v40 = vpop.f32.mrb[101].mxu0 }
 0x929   :  { %v3886_v49 = vadd.f32 %v3885_v40, %v18885_v57  ;;  %v18896_v40 = vld [vmem:[#allocation78_spill] sm:$0xff] }
 0x92a   :  { %v4029_v17 = vadd.f32 %v3884_v56, %v13847_v58 }
 0x92b   :  { %v4030_v43 = vadd.f32 %v3886_v49, %v13851_v53  ;;  %v3889_v32 = vpop.f32.mrb[102].mxu0 }
 0x92c   :  { %v10332_v29 = vpack.c.bf16 %v4029_v17, %v4025_v59  ;;  %v3891_v52 = vpop.f32.mrb[103].mxu0  ;;  %v3890_v35 = vadd.f32 %v3889_v32, %v18886_v41 }
 0x92d   :  { %v10330_v5 = vpack.c.bf16 %v4030_v43, %v4026_v51  ;;  %v3892_v54 = vadd.f32 %v3891_v52, %v18886_v41  ;;  %v4212_v51 = vld [vmem:[%s18366_s8 + $0x8] sm:$0xff] }
 0x92e   :  { %v4033_v20 = vadd.f32 %v3890_v35, %v13858_v13  ;;  %v4216_v43 = vld [vmem:[%s18366_s8 + $0x28] sm:$0xff]  ;;  %v4215_v35 = vld [vmem:[%s18366_s8 + $0x20] sm:$0xff] }
 0x92f   :  { %v3895_v37 = vpop.f32.mrb[104].mxu0  ;;  %10331 = vmatprep.subr.bf16.mxu0 %v10330_v5  ;;  %v4034_v27 = vadd.f32 %v3892_v54, %v13865_v24  ;;  %v18889_v24 = vld [vmem:[#allocation79_spill] sm:$0xff]  ;;  %v4211_v5 = vld [vmem:[%s18366_s8] sm:$0xff] }
 0x930   :  { %v3896_v14 = vadd.f32 %v3895_v37, %v18887_v10  ;;  %v3897_v63 = vpop.f32.mrb[105].mxu0  ;;  %10333 = vmatpush1.bf16.msra.mxu0 %v10332_v29  ;;  %v18897_v29 = vld [vmem:[#allocation96_spill] sm:$0xff] }
 0x931   :  { %v3898_v58 = vadd.f32 %v3897_v63, %v18887_v10  ;;  %v4224_v63 = vld [vmem:[%s18366_s8 + $0x68] sm:$0xff] }
 0x932   :  { %v4037_v53 = vadd.f32 %v3896_v14, %v13871_v61  ;;  %v4220_v14 = vld [vmem:[%s18366_s8 + $0x48] sm:$0xff] }
 0x933   :  { %v4038_v36 = vadd.f32 %v3898_v58, %v13876_v4  ;;  %v3901_v16 = vpop.f32.mrb[106].mxu0 }
 0x934   :  { %v3984_v0 = vpop.f32.mrb[98].mxu1  ;;  %v10336_v45 = vpack.c.bf16 %v4037_v53, %v4033_v20  ;;  %v3903_v44 = vpop.f32.mrb[107].mxu0  ;;  %v3902_v11 = vadd.f32 %v3901_v16, %v18888_v12  ;;  %v10354_v53 = vpack.c.bf16 %v4216_v43, %v4212_v51  ;;  %v14417_v16 = vld [vmem:[%s18365_s7] sm:$0xf]  ;;  %v4248_v51 = vld [vmem:[%s18366_s8 + $0x128] sm:$0xff] }
 0x935   :  { %v3986_v3 = vpop.f32.mrb[99].mxu1  ;;  %v10334_v31 = vpack.c.bf16 %v4038_v36, %v4034_v27  ;;  %v3985_v30 = vadd.f32 %v3984_v0, %v18884_v42  ;;  %v3904_v2 = vadd.f32 %v3903_v44, %v18888_v12  ;;  %v18898_v27 = vld [vmem:[#allocation95_spill] sm:$0xff]  ;;  %v10356_v0 = vpack.c.bf16 %v4215_v35, %v4211_v5  ;;  %v4214_v5 = vld [vmem:[%s18366_s8 + $0x18] sm:$0xff] }
 0x936   :  { %v3987_v13 = vadd.f32 %v3986_v3, %v18884_v42  ;;  %v4041_v7 = vadd.f32 %v3902_v11, %v13881_v26  ;;  %v18895_v42 = vld [vmem:[#allocation99_spill] sm:$0xff]  ;;  %v18900_v3 = vld [vmem:[#allocation106_spill] sm:$0xff]  ;;  %v10358_v11 = vpack.c.bf16 %v4224_v63, %v4220_v14 }
 0x937   :  { %v3907_v1 = vpop.f32.mrb[108].mxu0  ;;  %10335 = vmatprep.subr.bf16.mxu0 %v10334_v31  ;;  %v4027_v25 = vadd.f32 %v3985_v30, %v18890_v8  ;;  %v4042_v6 = vadd.f32 %v3904_v2, %v18892_v18  ;;  %v4219_v30 = vld [vmem:[%s18366_s8 + $0x40] sm:$0xff]  ;;  %v18901_v2 = vld [vmem:[#allocation108_spill] sm:$0xff]  ;;  %v4213_v14 = vld [vmem:[%s18366_s8 + $0x10] sm:$0xff] }
 0x938   :  { %v3990_v61 = vpop.f32.mrb[100].mxu1  ;;  %v3908_v48 = vadd.f32 %v3907_v1, %v18889_v24  ;;  %v3909_v4 = vpop.f32.mrb[109].mxu0  ;;  %10337 = vmatpush1.bf16.msra.mxu0 %v10336_v45  ;;  %v4028_v46 = vadd.f32 %v3987_v13, %v18894_v9  ;;  %v18899_v45 = vld [vmem:[#allocation104_spill] sm:$0xff]  ;;  %v4217_v63 = vld [vmem:[%s18366_s8 + $0x30] sm:$0xff] }
 0x939   :  { %v3991_v34 = vadd.f32 %v3990_v61, %v18885_v57  ;;  %v3992_v22 = vpop.f32.mrb[101].mxu1  ;;  %v3910_v50 = vadd.f32 %v3909_v4, %v18889_v24  ;;  %v18902_v13 = vld [vmem:[#allocation112_spill] sm:$0xff]  ;;  %v4228_v4 = vld [vmem:[%s18366_s8 + $0x88] sm:$0xff] }
 0x93a   :  { %v3993_v28 = vadd.f32 %v3992_v22, %v18885_v57  ;;  %v4045_v23 = vadd.f32 %v3908_v48, %v13891_v15 }
 0x93b   :  { %v4031_v62 = vadd.f32 %v3991_v34, %v18891_v39  ;;  %v4046_v60 = vadd.f32 %v3910_v50, %v18893_v19  ;;  %v3913_v55 = vpop.f32.mrb[110].mxu0  ;;  %v4232_v34 = vld [vmem:[%s18366_s8 + $0xa8] sm:$0xff]  ;;  %v4231_v39 = vld [vmem:[%s18366_s8 + $0xa0] sm:$0xff] }
 0x93c   :  { %v4032_v47 = vadd.f32 %v3993_v28, %v18895_v42  ;;  %v3996_v21 = vpop.f32.mrb[102].mxu1  ;;  %v10340_v33 = vpack.c.bf16 %v4045_v23, %v4041_v7  ;;  %v3915_v57 = vpop.f32.mrb[111].mxu0  ;;  %v3914_v17 = vadd.f32 %v3913_v55, %v18896_v40  ;;  %v10362_v8 = vpack.c.bf16 %v4232_v34, %v4228_v4  ;;  %v4240_v19 = vld [vmem:[%s18366_s8 + $0xe8] sm:$0xff]  ;;  %v18903_v42 = vld [vmem:[#allocation101_spill] sm:$0xff]  ;;  %v4234_v34 = vld [vmem:[%s18366_s8 + $0xb8] sm:$0xff] }
 0x93d   :  { %v10344_v56 = vpack.c.bf16 %v4031_v62, %v4027_v25  ;;  %v3998_v26 = vpop.f32.mrb[103].mxu1  ;;  %v3916_v15 = vadd.f32 %v3915_v57, %v18896_v40  ;;  %v10338_v49 = vpack.c.bf16 %v4046_v60, %v4042_v6  ;;  %v3997_v32 = vadd.f32 %v3996_v21, %v18886_v41  ;;  %v4227_v25 = vld [vmem:[%s18366_s8 + $0x80] sm:$0xff]  ;;  %v4236_v6 = vld [vmem:[%s18366_s8 + $0xc8] sm:$0xff] }
 0x93e   :  { %v10342_v59 = vpack.c.bf16 %v4032_v47, %v4028_v46  ;;  %v3999_v54 = vadd.f32 %v3998_v26, %v18886_v41  ;;  %v4049_v36 = vadd.f32 %v3914_v17, %v18898_v27  ;;  %v10364_v46 = vpack.c.bf16 %v4231_v39, %v4227_v25  ;;  %v18904_v47 = vld [vmem:[#allocation110_spill] sm:$0xff]  ;;  %v4235_v57 = vld [vmem:[%s18366_s8 + $0xc0] sm:$0xff]  ;;  %v4238_v39 = vld [vmem:[%s18366_s8 + $0xd8] sm:$0xff] }
 0x93f   :  { %v4050_v52 = vadd.f32 %v3916_v15, %v18897_v29  ;;  %10339 = vmatprep.subr.bf16.mxu0 %v10338_v49  ;;  %v4035_v44 = vadd.f32 %v3997_v32, %v18899_v45  ;;  %v18905_v26 = vld [vmem:[#allocation114_spill] sm:$0xff]  ;;  %v18906_v49 = vld [vmem:[#allocation105_spill] sm:$0xff] }
 0x940   :  { %v4002_v37 = vpop.f32.mrb[104].mxu1  ;;  %10343 = vmatprep.subr.bf16.mxu1 %v10342_v59  ;;  %10341 = vmatpush1.bf16.msra.mxu0 %v10340_v33  ;;  %v4036_v1 = vadd.f32 %v3999_v54, %v18901_v2  ;;  %v10366_v33 = vpack.c.bf16 %v4240_v19, %v4236_v6  ;;  %v4244_v17 = vld [vmem:[%s18366_s8 + $0x108] sm:$0xff]  ;;  %v4247_v27 = vld [vmem:[%s18366_s8 + $0x120] sm:$0xff]  ;;  %v4242_v6 = vld [vmem:[%s18366_s8 + $0xf8] sm:$0xff] }
 0x941   :  { %v4003_v58 = vadd.f32 %v4002_v37, %v18887_v10  ;;  %v4004_v20 = vpop.f32.mrb[105].mxu1  ;;  %10345 = vmatpush1.bf16.msra.mxu1 %v10344_v56  ;;  %9828 = vmatprep.subr.msk.mxu0 %vm69_vm0, %v4050_v52  ;;  %v4239_v56 = vld [vmem:[%s18366_s8 + $0xe0] sm:$0xff]  ;;  %v4218_v37 = vld [vmem:[%s18366_s8 + $0x38] sm:$0xff]  ;;  %v4256_v45 = vld [vmem:[%s18366_s8 + $0x168] sm:$0xff] }
 0x942   :  { %v4005_v41 = vadd.f32 %v4004_v20, %v18887_v10  ;;  %v4223_v10 = vld [vmem:[%s18366_s8 + $0x60] sm:$0xff]  ;;  %v10368_v35 = vpack.c.bf16 %v4239_v56, %v4235_v57  ;;  %v18907_v20 = vld [vmem:[#allocation103_spill] sm:$0xff]  ;;  %v4268_v19 = vld [vmem:[%s18366_s8 + $0x1c8] sm:$0xff] }
 0x943   :  { %v4039_v31 = vadd.f32 %v4003_v58, %v18900_v3  ;;  %v10360_v7 = vpack.c.bf16 %v4223_v10, %v4219_v30  ;;  %v10370_v58 = vpack.c.bf16 %v4248_v51, %v4244_v17  ;;  %v18908_v3 = vld [vmem:[#allocation22_spill] sm:$0xff]  ;;  %v4221_v30 = vld [vmem:[%s18366_s8 + $0x50] sm:$0xff]  ;;  %v4255_v4 = vld [vmem:[%s18366_s8 + $0x160] sm:$0xff] }
 0x944   :  { %v4040_v61 = vadd.f32 %v4005_v41, %v18902_v13  ;;  %v4008_v48 = vpop.f32.mrb[106].mxu1  ;;  %9829 = vmatpush1.msk.msra.mxu0 %vm69_vm0, %v4049_v36  ;;  %v4243_v41 = vld [vmem:[%s18366_s8 + $0x100] sm:$0xff]  ;;  %v4226_v36 = vld [vmem:[%s18366_s8 + $0x78] sm:$0xff]  ;;  %v4225_v10 = vld [vmem:[%s18366_s8 + $0x70] sm:$0xff] }
 0x945   :  { %v10348_v22 = vpack.c.bf16 %v4039_v31, %v4035_v44  ;;  %v4010_v50 = vpop.f32.mrb[107].mxu1  ;;  %9830 = vmatmul.mubr.msk.f32.vlgmr.msra.gmra.mrb[112].mxu0 %vm459_vm1, %v14417_v16  ;;  %10355 = vmatprep.subr.bf16.mxu0 %v10354_v53  ;;  %v4009_v23 = vadd.f32 %v4008_v48, %v18888_v12  ;;  %v10482_v44 = vpack.c.bf16 %v4218_v37, %v4214_v5  ;;  %v4230_v13 = vld [vmem:[%s18366_s8 + $0x98] sm:$0xff]  ;;  %v4251_v48 = vld [vmem:[%s18366_s8 + $0x140] sm:$0xff] }
 0x946   :  { %v10346_v28 = vpack.c.bf16 %v4040_v61, %v4036_v1  ;;  %10357 = vmatpush1.bf16.msra.mxu0 %v10356_v0  ;;  %v4011_v62 = vadd.f32 %v4010_v50, %v18888_v12  ;;  %v4252_v0 = vld [vmem:[%s18366_s8 + $0x148] sm:$0xff]  ;;  %v10372_v2 = vpack.c.bf16 %v4247_v27, %v4243_v41  ;;  %v10490_v25 = vpack.c.bf16 %v4234_v34, %v4230_v13  ;;  %v4271_v57 = vld [vmem:[%s18366_s8 + $0x1e0] sm:$0xff]  ;;  %v4250_v56 = vld [vmem:[%s18366_s8 + $0x138] sm:$0xff] }
 0x947   :  { %10359 = vmatprep.subr.bf16.mxu0 %v10358_v11  ;;  %v4043_v12 = vadd.f32 %v4009_v23, %v18903_v42  ;;  %v10484_v11 = vpack.c.bf16 %v4217_v63, %v4213_v14  ;;  %v10374_v61 = vpack.c.bf16 %v4256_v45, %v4252_v0  ;;  %v4264_v50 = vld [vmem:[%s18366_s8 + $0x1a8] sm:$0xff]  ;;  %v4233_v23 = vld [vmem:[%s18366_s8 + $0xb0] sm:$0xff]  ;;  %v4258_v5 = vld [vmem:[%s18366_s8 + $0x178] sm:$0xff] }
 0x948   :  { %v4014_v18 = vpop.f32.mrb[108].mxu1  ;;  %10347 = vmatprep.subr.bf16.mxu1 %v10346_v28  ;;  %v4044_v15 = vadd.f32 %v4011_v62, %v18905_v26  ;;  %v10488_v28 = vpack.c.bf16 %v4225_v10, %v4221_v30  ;;  %v4259_v62 = vld [vmem:[%s18366_s8 + $0x180] sm:$0xff]  ;;  %v4276_v26 = vld [vmem:[%s18366_s8 + $0x208] sm:$0xff]  ;;  %v4253_v14 = vld [vmem:[%s18366_s8 + $0x150] sm:$0xff] }
 0x949   :  { %v4015_v60 = vadd.f32 %v4014_v18, %v18889_v24  ;;  %v4016_v55 = vpop.f32.mrb[109].mxu1  ;;  %10349 = vmatpush1.bf16.msra.mxu1 %v10348_v22  ;;  %v4260_v22 = vld [vmem:[%s18366_s8 + $0x188] sm:$0xff]  ;;  %v4263_v18 = vld [vmem:[%s18366_s8 + $0x1a0] sm:$0xff]  ;;  %v4257_v63 = vld [vmem:[%s18366_s8 + $0x170] sm:$0xff] }
 0x94a   :  { %v4017_v9 = vadd.f32 %v4016_v55, %v18889_v24  ;;  %10361 = vmatpush1.bf16.msra.mxu0 %v10360_v7  ;;  %v4229_v7 = vld [vmem:[%s18366_s8 + $0x90] sm:$0xff]  ;;  %v10380_v42 = vpack.c.bf16 %v4263_v18, %v4259_v62  ;;  %v4283_v41 = vld [vmem:[%s18366_s8 + $0x240] sm:$0xff]  ;;  %v4292_v0 = vld [vmem:[%s18366_s8 + $0x288] sm:$0xff] }
 0x94b   :  { %v4047_v21 = vadd.f32 %v4015_v60, %v18904_v47  ;;  %10363 = vmatprep.subr.bf16.mxu0 %v10362_v8  ;;  %v10376_v8 = vpack.c.bf16 %v4255_v4, %v4251_v48  ;;  %v4272_v60 = vld [vmem:[%s18366_s8 + $0x1e8] sm:$0xff]  ;;  %v10492_v55 = vpack.c.bf16 %v4233_v23, %v4229_v7  ;;  %v4246_v47 = vld [vmem:[%s18366_s8 + $0x118] sm:$0xff]  ;;  %v4287_v27 = vld [vmem:[%s18366_s8 + $0x260] sm:$0xff] }
 0x94c   :  { %v4048_v24 = vadd.f32 %v4017_v9, %v18906_v49  ;;  %v4020_v59 = vpop.f32.mrb[110].mxu1  ;;  %v4237_v9 = vld [vmem:[%s18366_s8 + $0xd0] sm:$0xff]  ;;  %v10498_v51 = vpack.c.bf16 %v4250_v56, %v4246_v47  ;;  %v4296_v45 = vld [vmem:[%s18366_s8 + $0x2a8] sm:$0xff]  ;;  %v4270_v10 = vld [vmem:[%s18366_s8 + $0x1d8] sm:$0xff] }
 0x94d   :  { %v10352_v43 = vpack.c.bf16 %v4047_v21, %v4043_v12  ;;  %v4022_v32 = vpop.f32.mrb[111].mxu1  ;;  %v4021_v54 = vadd.f32 %v4020_v59, %v18896_v40  ;;  %v10494_v12 = vpack.c.bf16 %v4242_v6, %v4238_v39  ;;  %v10382_v21 = vpack.c.bf16 %v4272_v60, %v4268_v19  ;;  %v4249_v59 = vld [vmem:[%s18366_s8 + $0x130] sm:$0xff]  ;;  %v4295_v13 = vld [vmem:[%s18366_s8 + $0x2a0] sm:$0xff]  ;;  %v4300_v48 = vld [vmem:[%s18366_s8 + $0x2c8] sm:$0xff] }
 0x94e   :  { %v4023_v29 = vadd.f32 %v4022_v32, %v18896_v40  ;;  %v10350_v52 = vpack.c.bf16 %v4048_v24, %v4044_v15  ;;  %10365 = vmatpush1.bf16.msra.mxu0 %v10364_v46  ;;  %v4222_v40 = vld [vmem:[%s18366_s8 + $0x58] sm:$0xff]  ;;  %v4241_v46 = vld [vmem:[%s18366_s8 + $0xf0] sm:$0xff]  ;;  %v4280_v15 = vld [vmem:[%s18366_s8 + $0x228] sm:$0xff] }
 0x94f   :  { %10367 = vmatprep.subr.bf16.mxu0 %v10366_v33  ;;  %v4051_v31 = vadd.f32 %v4021_v54, %v18908_v3  ;;  %v10486_v1 = vpack.c.bf16 %v4226_v36, %v4222_v40  ;;  %v4267_v33 = vld [vmem:[%s18366_s8 + $0x1c0] sm:$0xff]  ;;  %v10496_v49 = vpack.c.bf16 %v4241_v46, %v4237_v9  ;;  %v4245_v24 = vld [vmem:[%s18366_s8 + $0x110] sm:$0xff]  ;;  %v10386_v32 = vpack.c.bf16 %v4280_v15, %v4276_v26  ;;  %v4288_v54 = vld [vmem:[%s18366_s8 + $0x268] sm:$0xff] }
 0x950   :  { %v4052_v53 = vadd.f32 %v4023_v29, %v18907_v20  ;;  %10351 = vmatprep.subr.bf16.mxu1 %v10350_v52  ;;  %v10384_v17 = vpack.c.bf16 %v4271_v57, %v4267_v33  ;;  %v4275_v29 = vld [vmem:[%s18366_s8 + $0x200] sm:$0xff]  ;;  %v10500_v37 = vpack.c.bf16 %v4249_v59, %v4245_v24  ;;  %v4266_v36 = vld [vmem:[%s18366_s8 + $0x1b8] sm:$0xff]  ;;  %v4261_v3 = vld [vmem:[%s18366_s8 + $0x190] sm:$0xff] }
 0x951   :  { %10353 = vmatpush1.bf16.msra.mxu1 %v10352_v43  ;;  %v4254_v43 = vld [vmem:[%s18366_s8 + $0x158] sm:$0xff]  ;;  %v4279_v52 = vld [vmem:[%s18366_s8 + $0x220] sm:$0xff]  ;;  %v4304_v4 = vld [vmem:[%s18366_s8 + $0x2e8] sm:$0xff] }
 0x952   :  { %9831 = vmatprep.subr.msk.mxu1 %vm69_vm0, %v4052_v53  ;;  %10369 = vmatpush1.bf16.msra.mxu0 %v10368_v35  ;;  %v4284_v35 = vld [vmem:[%s18366_s8 + $0x248] sm:$0xff]  ;;  %v10502_v20 = vpack.c.bf16 %v4258_v5, %v4254_v43  ;;  %v4262_v53 = vld [vmem:[%s18366_s8 + $0x198] sm:$0xff]  ;;  %v4303_v39 = vld [vmem:[%s18366_s8 + $0x2e0] sm:$0xff] }
 0x953   :  { %10371 = vmatprep.subr.bf16.mxu0 %v10370_v58  ;;  %v10388_v58 = vpack.c.bf16 %v4279_v52, %v4275_v29  ;;  %v10390_v40 = vpack.c.bf16 %v4288_v54, %v4284_v35  ;;  %v10506_v30 = vpack.c.bf16 %v4266_v36, %v4262_v53  ;;  %v4278_v23 = vld [vmem:[%s18366_s8 + $0x218] sm:$0xff]  ;;  %v4308_v62 = vld [vmem:[%s18366_s8 + $0x308] sm:$0xff]  ;;  %v4277_v19 = vld [vmem:[%s18366_s8 + $0x210] sm:$0xff] }
 0x954   :  { %v4312_v18 = vld [vmem:[%s18366_s8 + $0x328] sm:$0xff]  ;;  %v4281_v60 = vld [vmem:[%s18366_s8 + $0x230] sm:$0xff]  ;;  %v4286_v46 = vld [vmem:[%s18366_s8 + $0x258] sm:$0xff] }
 0x955   :  { %9832 = vmatpush1.msk.msra.mxu1 %vm69_vm0, %v4051_v31  ;;  %v4265_v31 = vld [vmem:[%s18366_s8 + $0x1b0] sm:$0xff]  ;;  %v4311_v47 = vld [vmem:[%s18366_s8 + $0x320] sm:$0xff]  ;;  %v4316_v33 = vld [vmem:[%s18366_s8 + $0x348] sm:$0xff]  ;;  %v10516_v56 = vpack.c.bf16 %v4281_v60, %v4277_v19 }
 0x956   :  { %9833 = vmatmul.mubr.msk.f32.vlgmr.msra.gmra.mrb[112].mxu1 %vm459_vm1, %v14417_v16  ;;  %10483 = vmatprep.subr.bf16.mxu1 %v10482_v44  ;;  %v10378_v16 = vpack.c.bf16 %v4264_v50, %v4260_v22  ;;  %v10504_v44 = vpack.c.bf16 %v4257_v63, %v4253_v14  ;;  %v10508_v34 = vpack.c.bf16 %v4265_v31, %v4261_v3  ;;  %v4269_v22 = vld [vmem:[%s18366_s8 + $0x1d0] sm:$0xff]  ;;  %v4320_v57 = vld [vmem:[%s18366_s8 + $0x368] sm:$0xff]  ;;  %v4294_v59 = vld [vmem:[%s18366_s8 + $0x298] sm:$0xff] }
 0x957   :  { %10485 = vmatpush1.bf16.msra.mxu1 %v10484_v11  ;;  %10373 = vmatpush1.bf16.msra.mxu0 %v10372_v2  ;;  %v10392_v11 = vpack.c.bf16 %v4287_v27, %v4283_v41  ;;  %v10394_v2 = vpack.c.bf16 %v4296_v45, %v4292_v0  ;;  %v4273_v50 = vld [vmem:[%s18366_s8 + $0x1f0] sm:$0xff]  ;;  %v4319_v43 = vld [vmem:[%s18366_s8 + $0x360] sm:$0xff]  ;;  %v4324_v29 = vld [vmem:[%s18366_s8 + $0x388] sm:$0xff] }
 0x958   :  { %10487 = vmatprep.subr.bf16.mxu1 %v10486_v1  ;;  %10375 = vmatprep.subr.bf16.mxu0 %v10374_v61  ;;  %v4291_v1 = vld [vmem:[%s18366_s8 + $0x280] sm:$0xff]  ;;  %v4274_v61 = vld [vmem:[%s18366_s8 + $0x1f8] sm:$0xff]  ;;  %v10512_v6 = vpack.c.bf16 %v4273_v50, %v4269_v22  ;;  %v4285_v26 = vld [vmem:[%s18366_s8 + $0x250] sm:$0xff] }
 0x959   :  { %v10510_v7 = vpack.c.bf16 %v4274_v61, %v4270_v10  ;;  %v4289_v15 = vld [vmem:[%s18366_s8 + $0x270] sm:$0xff]  ;;  %v4328_v52 = vld [vmem:[%s18366_s8 + $0x3a8] sm:$0xff]  ;;  %v4302_v63 = vld [vmem:[%s18366_s8 + $0x2d8] sm:$0xff] }
 0x95a   :  { %v10520_v5 = vpack.c.bf16 %v4289_v15, %v4285_v26  ;;  %v4293_v35 = vld [vmem:[%s18366_s8 + $0x290] sm:$0xff]  ;;  %v4327_v53 = vld [vmem:[%s18366_s8 + $0x3a0] sm:$0xff]  ;;  %v4332_v41 = vld [vmem:[%s18366_s8 + $0x3c8] sm:$0xff] }
 0x95b   :  { %10489 = vmatpush1.bf16.msra.mxu1 %v10488_v28  ;;  %10377 = vmatpush1.bf16.msra.mxu0 %v10376_v8  ;;  %v10396_v28 = vpack.c.bf16 %v4295_v13, %v4291_v1  ;;  %v10398_v8 = vpack.c.bf16 %v4304_v4, %v4300_v48  ;;  %v4297_v54 = vld [vmem:[%s18366_s8 + $0x2b0] sm:$0xff]  ;;  %v4336_v27 = vld [vmem:[%s18366_s8 + $0x3e8] sm:$0xff]  ;;  %v4310_v10 = vld [vmem:[%s18366_s8 + $0x318] sm:$0xff] }
 0x95c   :  { %10491 = vmatprep.subr.bf16.mxu1 %v10490_v25  ;;  %10379 = vmatprep.subr.bf16.mxu0 %v10378_v16  ;;  %v4299_v25 = vld [vmem:[%s18366_s8 + $0x2c0] sm:$0xff]  ;;  %v4282_v16 = vld [vmem:[%s18366_s8 + $0x238] sm:$0xff]  ;;  %v10524_v36 = vpack.c.bf16 %v4297_v54, %v4293_v35  ;;  %v4301_v0 = vld [vmem:[%s18366_s8 + $0x2d0] sm:$0xff]  ;;  %v10414_v31 = vpack.c.bf16 %v4336_v27, %v4332_v41 }
 0x95d   :  { %v10514_v9 = vpack.c.bf16 %v4282_v16, %v4278_v23  ;;  %v4305_v3 = vld [vmem:[%s18366_s8 + $0x2f0] sm:$0xff]  ;;  %v4322_v22 = vld [vmem:[%s18366_s8 + $0x378] sm:$0xff]  ;;  %v14823_v26 = vld [vmem:[%s18358_s0 + $0xe0] sm:$0xff] }
 0x95e   :  { %v10528_v1 = vpack.c.bf16 %v4305_v3, %v4301_v0  ;;  %v4309_v48 = vld [vmem:[%s18366_s8 + $0x310] sm:$0xff]  ;;  %v4338_v19 = vld [vmem:[%s18366_s8 + $0x3f8] sm:$0xff]  ;;  %v14828_v15 = vld [vmem:[%s18358_s0 + $0x100] sm:$0xff] }
 0x95f   :  { %10493 = vmatpush1.bf16.msra.mxu1 %v10492_v55  ;;  %10381 = vmatpush1.bf16.msra.mxu0 %v10380_v42  ;;  %v10400_v55 = vpack.c.bf16 %v4303_v39, %v4299_v25  ;;  %v10402_v42 = vpack.c.bf16 %v4312_v18, %v4308_v62  ;;  %v4313_v4 = vld [vmem:[%s18366_s8 + $0x330] sm:$0xff]  ;;  %v4330_v25 = vld [vmem:[%s18366_s8 + $0x3b8] sm:$0xff]  ;;  %v14878_v54 = vld [vmem:[%s18358_s0 + $0x140] sm:$0xff] }
 0x960   :  { %10495 = vmatprep.subr.bf16.mxu1 %v10494_v12  ;;  %10383 = vmatprep.subr.bf16.mxu0 %v10382_v21  ;;  %v4307_v12 = vld [vmem:[%s18366_s8 + $0x300] sm:$0xff]  ;;  %v4290_v21 = vld [vmem:[%s18366_s8 + $0x278] sm:$0xff]  ;;  %v10532_v50 = vpack.c.bf16 %v4313_v4, %v4309_v48  ;;  %v4321_v23 = vld [vmem:[%s18366_s8 + $0x370] sm:$0xff] }
 0x961   :  { %v10518_v24 = vpack.c.bf16 %v4290_v21, %v4286_v46  ;;  %v4325_v62 = vld [vmem:[%s18366_s8 + $0x390] sm:$0xff]  ;;  %v4342_v21 = vld [vmem:[%s18366_s8 + $0x418] sm:$0xff]  ;;  %v14904_v41 = vld [vmem:[%s18358_s0 + $0x160] sm:$0xff] }
 0x962   :  { %v4329_v18 = vld [vmem:[%s18366_s8 + $0x3b0] sm:$0xff]  ;;  %v14873_v35 = vld [vmem:[%s18358_s0 + $0x118] sm:$0xff] }
 0x963   :  { %10497 = vmatpush1.bf16.msra.mxu1 %v10496_v49  ;;  %10385 = vmatpush1.bf16.msra.mxu0 %v10384_v17  ;;  %v10404_v49 = vpack.c.bf16 %v4311_v47, %v4307_v12  ;;  %v10406_v17 = vpack.c.bf16 %v4320_v57, %v4316_v33  ;;  %v10540_v60 = vpack.c.bf16 %v4329_v18, %v4325_v62  ;;  %v4337_v46 = vld [vmem:[%s18366_s8 + $0x3f0] sm:$0xff]  ;;  %v4340_v12 = vld [vmem:[%s18366_s8 + $0x408] sm:$0xff]  ;;  %v4346_v57 = vld [vmem:[%s18366_s8 + $0x438] sm:$0xff] }
 0x964   :  { %10499 = vmatprep.subr.bf16.mxu1 %v10498_v51  ;;  %10387 = vmatprep.subr.bf16.mxu0 %v10386_v32  ;;  %v4315_v51 = vld [vmem:[%s18366_s8 + $0x340] sm:$0xff]  ;;  %v4298_v32 = vld [vmem:[%s18366_s8 + $0x2b8] sm:$0xff]  ;;  %v4344_v47 = vld [vmem:[%s18366_s8 + $0x428] sm:$0xff] }
 0x965   :  { %v10522_v14 = vpack.c.bf16 %v4298_v32, %v4294_v59  ;;  %v10418_v33 = vpack.c.bf16 %v4344_v47, %v4340_v12  ;;  %v4828_v59 = vadd.f32 %v14828_v15, %v14823_v26  ;;  %v14857_v32 = vld [vmem:[%s18358_s0 + $0xe8] sm:$0xff]  ;;  %v14984_v18 = vld [vmem:[%s18358_s0 + $0x1b8] sm:$0x1] }
 0x967   :  { %10501 = vmatpush1.bf16.msra.mxu1 %v10500_v37  ;;  %10389 = vmatpush1.bf16.msra.mxu0 %v10388_v58  ;;  %v10408_v37 = vpack.c.bf16 %v4319_v43, %v4315_v51  ;;  %v10410_v58 = vpack.c.bf16 %v4328_v52, %v4324_v29  ;;  %v14852_v43 = vld [vmem:[%s18358_s0 + $0x130] sm:$0xff]  ;;  %v14862_v29 = vld [vmem:[%s18358_s0 + $0x108] sm:$0xff] }
 0x968   :  { %10503 = vmatprep.subr.bf16.mxu1 %v10502_v20  ;;  %10391 = vmatprep.subr.bf16.mxu0 %v10390_v40  ;;  %v4323_v20 = vld [vmem:[%s18366_s8 + $0x380] sm:$0xff]  ;;  %v4306_v40 = vld [vmem:[%s18366_s8 + $0x2f8] sm:$0xff] }
 0x969   :  { %v10412_v45 = vpack.c.bf16 %v4327_v53, %v4323_v20 }
 0x96b   :  { %10505 = vmatpush1.bf16.msra.mxu1 %v10504_v44  ;;  %10393 = vmatpush1.bf16.msra.mxu0 %v10392_v11  ;;  %v10526_v44 = vpack.c.bf16 %v4306_v40, %v4302_v63  ;;  %v4331_v11 = vld [vmem:[%s18366_s8 + $0x3c0] sm:$0xff]  ;;  %v4841_v63 = vadd.f32 %v14862_v29, %v14857_v32  ;;  %v14899_v40 = vld [vmem:[%s18358_s0 + $0x138] sm:$0xff] }
 0x96c   :  { %10507 = vmatprep.subr.bf16.mxu1 %v10506_v30  ;;  %10395 = vmatprep.subr.bf16.mxu0 %v10394_v2  ;;  %v4335_v30 = vld [vmem:[%s18366_s8 + $0x3e0] sm:$0xff]  ;;  %v4314_v2 = vld [vmem:[%s18366_s8 + $0x338] sm:$0xff] }
 0x96d   :  { %v10416_v13 = vpack.c.bf16 %v4335_v30, %v4331_v11  ;;  %v10530_v61 = vpack.c.bf16 %v4314_v2, %v4310_v10  ;;  %v14928_v11 = vld [vmem:[%s18358_s0 + $0x180] sm:$0xff]  ;;  %v14934_v10 = vld [vmem:[%s18358_s0 + $0x190] sm:$0xff] }
 0x96e   :  { %v14939_v2 = vld [vmem:[%s18358_s0 + $0x1a0] sm:$0x1] }
 0x96f   :  { %10509 = vmatpush1.bf16.msra.mxu1 %v10508_v34  ;;  %10397 = vmatpush1.bf16.msra.mxu0 %v10396_v28  ;;  %v4318_v34 = vld [vmem:[%s18366_s8 + $0x358] sm:$0xff] }
 0x970   :  { %10511 = vmatprep.subr.bf16.mxu1 %v10510_v7  ;;  %10399 = vmatprep.subr.bf16.mxu0 %v10398_v8  ;;  %v10534_v28 = vpack.c.bf16 %v4322_v22, %v4318_v34  ;;  %v4317_v7 = vld [vmem:[%s18366_s8 + $0x350] sm:$0xff]  ;;  %v4326_v8 = vld [vmem:[%s18366_s8 + $0x398] sm:$0xff] }
 0x971   :  { %v10536_v39 = vpack.c.bf16 %v4321_v23, %v4317_v7  ;;  %v10538_v16 = vpack.c.bf16 %v4330_v25, %v4326_v8  ;;  %v14957_v34 = vld [vmem:[%s18358_s0 + $0x178] sm:$0xff]  ;;  %v14968_v23 = vld [vmem:[%s18358_s0 + $0x188] sm:$0xff] }
 0x973   :  { %10513 = vmatpush1.bf16.msra.mxu1 %v10512_v6  ;;  %10401 = vmatpush1.bf16.msra.mxu0 %v10400_v55  ;;  %v4334_v6 = vld [vmem:[%s18366_s8 + $0x3d8] sm:$0xff] }
 0x974   :  { %10515 = vmatprep.subr.bf16.mxu1 %v10514_v9  ;;  %10403 = vmatprep.subr.bf16.mxu0 %v10402_v42  ;;  %v10542_v55 = vpack.c.bf16 %v4338_v19, %v4334_v6  ;;  %v4333_v9 = vld [vmem:[%s18366_s8 + $0x3d0] sm:$0xff] }
 0x975   :  { %v10544_v42 = vpack.c.bf16 %v4337_v46, %v4333_v9  ;;  %v4872_v9 = vsel %vm69_vm0, %v14984_v18, 0.0 }
 0x977   :  { %10517 = vmatpush1.bf16.msra.mxu1 %v10516_v56  ;;  %10405 = vmatpush1.bf16.msra.mxu0 %v10404_v49  ;;  %v10546_v56 = vpack.c.bf16 %v4346_v57, %v4342_v21  ;;  %v14833_v49 = vld [vmem:[%s18358_s0 + $0xf0] sm:$0xff] }
 0x978   :  { %10519 = vmatprep.subr.bf16.mxu1 %v10518_v24  ;;  %10407 = vmatprep.subr.bf16.mxu0 %v10406_v17  ;;  %v14838_v24 = vld [vmem:[%s18358_s0 + $0x110] sm:$0xff]  ;;  %v14845_v17 = vld [vmem:[%s18358_s0 + $0x120] sm:$0xff] }
 0x979   :  { %v4854_v51 = vadd.f32 %v14838_v24, %v14833_v49  ;;  %v4829_v52 = vadd.f32 %v14845_v17, %v4828_v59 }
 0x97b   :  { %10521 = vmatpush1.bf16.msra.mxu1 %v10520_v5  ;;  %10409 = vmatpush1.bf16.msra.mxu0 %v10408_v37  ;;  %v14868_v5 = vld [vmem:[%s18358_s0 + $0xf8] sm:$0xff]  ;;  %v4855_v37 = vadd.f32 %v14852_v43, %v4854_v51  ;;  %v4830_v53 = vadd.f32 %v14878_v54, %v4829_v52 }
 0x97c   :  { %10523 = vmatprep.subr.bf16.mxu1 %v10522_v14  ;;  %10411 = vmatprep.subr.bf16.mxu0 %v10410_v58  ;;  %v14884_v14 = vld [vmem:[%s18358_s0 + $0x150] sm:$0xff]  ;;  %v14891_v58 = vld [vmem:[%s18358_s0 + $0x128] sm:$0xff]  ;;  %v4867_v20 = vadd.f32 %v14873_v35, %v14868_v5 }
 0x97d   :  { %v4856_v27 = vadd.f32 %v14884_v14, %v4855_v37  ;;  %v4842_v0 = vadd.f32 %v14891_v58, %v4841_v63  ;;  %v4831_v3 = vadd.f32 %v14904_v41, %v4830_v53 }
 0x97f   :  { %10525 = vmatpush1.bf16.msra.mxu1 %v10524_v36  ;;  %10413 = vmatpush1.bf16.msra.mxu0 %v10412_v45  ;;  %v14910_v36 = vld [vmem:[%s18358_s0 + $0x170] sm:$0xff]  ;;  %v14916_v45 = vld [vmem:[%s18358_s0 + $0x148] sm:$0xff]  ;;  %v4832_v4 = vadd.f32 %v14928_v11, %v4831_v3 }
 0x980   :  { %10527 = vmatprep.subr.bf16.mxu1 %v10526_v44  ;;  %10415 = vmatprep.subr.bf16.mxu0 %v10414_v31  ;;  %v4868_v44 = vadd.f32 %v14899_v40, %v4867_v20  ;;  %v14923_v31 = vld [vmem:[%s18358_s0 + $0x158] sm:$0xff]  ;;  %v4857_v30 = vadd.f32 %v14910_v36, %v4856_v27 }
 0x982   :  { %v4869_v48 = vadd.f32 %v14923_v31, %v4868_v44  ;;  %v4858_v22 = vadd.f32 %v14934_v10, %v4857_v30 }
 0x983   :  { %10529 = vmatpush1.bf16.msra.mxu1 %v10528_v1  ;;  %10417 = vmatpush1.bf16.msra.mxu0 %v10416_v13  ;;  %v4843_v1 = vadd.f32 %v14916_v45, %v4842_v0  ;;  %v14945_v13 = vld [vmem:[%s18358_s0 + $0x1b0] sm:$0x1] }
 0x984   :  { %10531 = vmatprep.subr.bf16.mxu1 %v10530_v61  ;;  %10419 = vmatprep.subr.bf16.mxu0 %v10418_v33  ;;  %v14950_v61 = vld [vmem:[%s18358_s0 + $0x168] sm:$0xff]  ;;  %v4870_v8 = vadd.f32 %v14957_v34, %v4869_v48 }
 0x985   :  { %v4844_v7 = vadd.f32 %v14950_v61, %v4843_v1 }
 0x987   :  { %10533 = vmatpush1.bf16.msra.mxu1 %v10532_v50  ;;  %v4833_v50 = vsel %vm69_vm0, %v14939_v2, 0.0  ;;  %v4845_v6 = vadd.f32 %v14968_v23, %v4844_v7 }
 0x988   :  { %10535 = vmatprep.subr.bf16.mxu1 %v10534_v28  ;;  %v4859_v28 = vsel %vm69_vm0, %v14945_v13, 0.0  ;;  %v4834_v25 = vadd.f32 %v4833_v50, %v4832_v4 }
 0x989   :  { %v4860_v62 = vadd.f32 %v4859_v28, %v4858_v22 }
 0x98b   :  { %10537 = vmatpush1.bf16.msra.mxu1 %v10536_v39  ;;  %v14974_v39 = vld [vmem:[%s18358_s0 + $0x198] sm:$0xff]  ;;  %v4861_v46 = vrot.slane %v4860_v62, 4 }
 0x98c   :  { %10539 = vmatprep.subr.bf16.mxu1 %v10538_v16  ;;  %v14979_v16 = vld [vmem:[%s18358_s0 + $0x1a8] sm:$0x1]  ;;  %v4871_v19 = vadd.f32 %v14974_v39, %v4870_v8 }
 0x98d   :  { %v4862_v21 = vadd.f32 %v4861_v46, %v4860_v62 }
 0x98e   :  { %v4873_v12 = vadd.f32 %v4872_v9, %v4871_v19 }
 0x98f   :  { %10541 = vmatpush1.bf16.msra.mxu1 %v10540_v60  ;;  %v4846_v60 = vsel %vm69_vm0, %v14979_v16, 0.0  ;;  %v4863_v59 = vrot.slane %v4862_v21, 2 }
 0x990   :  { %10543 = vmatprep.subr.bf16.mxu1 %v10542_v55  ;;  %v4835_v55 = vrot.slane %v4834_v25, 4  ;;  %v4874_v57 = vrot.slane %v4873_v12, 4 }
 0x991   :  { %v4864_v63 = vadd.f32 %v4863_v59, %v4862_v21 }
 0x992   :  { %v4836_v47 = vadd.f32 %v4835_v55, %v4834_v25  ;;  %v4875_v52 = vadd.f32 %v4874_v57, %v4873_v12 }
 0x993   :  { %10545 = vmatpush1.bf16.msra.mxu1 %v10544_v42  ;;  %v4847_v42 = vadd.f32 %v4846_v60, %v4845_v6  ;;  %v4865_v0 = vrot.slane %v4864_v63, 1 }
 0x994   :  { %10547 = vmatprep.subr.bf16.mxu1 %v10546_v56  ;;  %v4837_v56 = vrot.slane %v4836_v47, 2  ;;  %v4876_v53 = vrot.slane %v4875_v52, 2 }
 0x995   :  { %v4848_v33 = vrot.slane %v4847_v42, 4  ;;  %v4866_v1 = vadd.f32 %v4865_v0, %v4864_v63 }
 0x996   :  { %v4838_v37 = vadd.f32 %v4837_v56, %v4836_v47  ;;  %v4877_v3 = vadd.f32 %v4876_v53, %v4875_v52 }
 0x997   :  { %v4849_v51 = vadd.f32 %v4848_v33, %v4847_v42  ;;  %v4882_v50 = vmul.f32 0.020408163, %v4866_v1 }
 0x998   :  { %v4839_v27 = vrot.slane %v4838_v37, 1  ;;  %v4878_v4 = vrot.slane %v4877_v3, 1 }
 0x999   :  { %v4850_v20 = vrot.slane %v4849_v51, 2  ;;  %v14999_v62 = vsub.f32 %v14833_v49, %v4882_v50  ;;  %v15002_v6 = vsub.f32 %v14838_v24, %v4882_v50  ;;  %v15065_v52 = vsub.f32 %v14910_v36, %v4882_v50 }
 0x99a   :  { %v4840_v30 = vadd.f32 %v4839_v27, %v4838_v37  ;;  %v4879_v7 = vadd.f32 %v4878_v4, %v4877_v3  ;;  %v15086_v3 = vsub.f32 %v14934_v10, %v4882_v50 }
 0x99b   :  { %v4851_v44 = vadd.f32 %v4850_v20, %v4849_v51  ;;  %v4914_v49 = vmul.f32 %v14999_v62, %v14999_v62  ;;  %v4918_v24 = vmul.f32 %v15002_v6, %v15002_v6 }
 0x99c   :  { %v4880_v22 = vmul.f32 0.020408163, %v4840_v30  ;;  %v15004_v60 = vmul.f32 0.020408163, %v4879_v7 }
 0x99d   :  { %v4852_v48 = vrot.slane %v4851_v44, 1  ;;  %v4966_v33 = vadd.f32 %v4918_v24, %v4914_v49 }
 0x99e   :  { %v14993_v8 = vsub.f32 %v14823_v26, %v4880_v22  ;;  %v14996_v25 = vsub.f32 %v14828_v15, %v4880_v22  ;;  %v15007_v55 = vsub.f32 %v14845_v17, %v4880_v22  ;;  %v15014_v15 = vsub.f32 %v14852_v43, %v4882_v50 }
 0x99f   :  { %v4853_v28 = vadd.f32 %v4852_v48, %v4851_v44  ;;  %v15028_v42 = vsub.f32 %v14868_v5, %v15004_v60  ;;  %v15032_v43 = vsub.f32 %v14873_v35, %v15004_v60  ;;  %v15035_v12 = vsub.f32 %v14878_v54, %v4880_v22 }
 0x9a0   :  { %v4912_v9 = vmul.f32 %v14993_v8, %v14993_v8  ;;  %v4916_v26 = vmul.f32 %v14996_v25, %v14996_v25  ;;  %v4920_v47 = vmul.f32 %v15007_v55, %v15007_v55  ;;  %v15053_v57 = vsub.f32 %v14899_v40, %v15004_v60 }
 0x9a1   :  { %v4881_v19 = vmul.f32 0.020408163, %v4853_v28  ;;  %v4919_v56 = vmul.f32 %v15032_v43, %v15032_v43  ;;  %v15060_v59 = vsub.f32 %v14904_v41, %v4880_v22  ;;  %v15076_v41 = vsub.f32 %v14923_v31, %v15004_v60 }
 0x9a2   :  { %v4940_v21 = vadd.f32 %v4916_v26, %v4912_v9  ;;  %v4923_v27 = vmul.f32 %v15053_v57, %v15053_v57  ;;  %v15081_v0 = vsub.f32 %v14928_v11, %v4880_v22  ;;  %v15089_v30 = vsub.f32 %v14939_v2, %v4880_v22 }
 0x9a3   :  { %v15021_v46 = vsub.f32 %v14857_v32, %v4881_v19  ;;  %v15024_v17 = vsub.f32 %v14862_v29, %v4881_v19  ;;  %v15040_v32 = vsub.f32 %v14884_v14, %v4882_v50  ;;  %v4922_v29 = vmul.f32 %v15014_v15, %v15014_v15 }
 0x9a4   :  { %v15045_v5 = vsub.f32 %v14891_v58, %v4881_v19  ;;  %v4915_v14 = vmul.f32 %v15028_v42, %v15028_v42  ;;  %v4924_v58 = vmul.f32 %v15035_v12, %v15035_v12  ;;  %v4941_v51 = vadd.f32 %v4940_v21, %v4920_v47 }
 0x9a5   :  { %v4913_v35 = vmul.f32 %v15021_v46, %v15021_v46  ;;  %v4917_v54 = vmul.f32 %v15024_v17, %v15024_v17  ;;  %v4926_v40 = vmul.f32 %v15040_v32, %v15040_v32  ;;  %v4967_v37 = vadd.f32 %v4966_v33, %v4922_v29 }
 0x9a6   :  { %v15070_v63 = vsub.f32 %v14916_v45, %v4881_v19  ;;  %v4921_v20 = vmul.f32 %v15045_v5, %v15045_v5  ;;  %v4979_v36 = vadd.f32 %v4919_v56, %v4915_v14  ;;  %v4928_v44 = vmul.f32 %v15060_v59, %v15060_v59 }
 0x9a7   :  { %v4953_v53 = vadd.f32 %v4917_v54, %v4913_v35  ;;  %v4942_v45 = vadd.f32 %v4941_v51, %v4924_v58  ;;  %v4930_v31 = vmul.f32 %v15065_v52, %v15065_v52  ;;  %v4968_v1 = vadd.f32 %v4967_v37, %v4926_v40 }
 0x9a8   :  { %v15094_v48 = vsub.f32 %v14945_v13, %v4882_v50  ;;  %v15097_v11 = vsub.f32 %v14950_v61, %v4881_v19  ;;  %v4925_v4 = vmul.f32 %v15070_v63, %v15070_v63  ;;  %v15103_v10 = vsub.f32 %v14957_v34, %v15004_v60 }
 0x9a9   :  { %v4954_v28 = vadd.f32 %v4953_v53, %v4921_v20  ;;  %v4927_v2 = vmul.f32 %v15076_v41, %v15076_v41  ;;  %v4980_v22 = vadd.f32 %v4979_v36, %v4923_v27  ;;  %v4932_v7 = vmul.f32 %v15081_v0, %v15081_v0 }
 0x9aa   :  { %v4943_v13 = vadd.f32 %v4942_v45, %v4928_v44  ;;  %v4934_v61 = vmul.f32 %v15086_v3, %v15086_v3  ;;  %v4936_v50 = vmul.f32 %v15089_v30, %v15089_v30  ;;  %v4969_v9 = vadd.f32 %v4968_v1, %v4930_v31  ;;  %v4339_v45 = vld [vmem:[%s18366_s8 + $0x400] sm:$0xff] }
 0x9ab   :  { %v4938_v26 = vmul.f32 %v15094_v48, %v15094_v48  ;;  %v15116_v34 = vsub.f32 %v14968_v23, %v4881_v19  ;;  %v4929_v49 = vmul.f32 %v15097_v11, %v15097_v11  ;;  %v4955_v24 = vadd.f32 %v4954_v28, %v4925_v4  ;;  %v4343_v31 = vld [vmem:[%s18366_s8 + $0x420] sm:$0xff]  ;;  %v4341_v4 = vld [vmem:[%s18366_s8 + $0x410] sm:$0xff] }
 0x9ac   :  { %v15122_v47 = vsub.f32 %v14974_v39, %v15004_v60  ;;  %v15125_v21 = vsub.f32 %v14979_v16, %v4881_v19  ;;  %v4931_v29 = vmul.f32 %v15103_v10, %v15103_v10  ;;  %v4981_v33 = vadd.f32 %v4980_v22, %v4927_v2  ;;  %v4345_v28 = vld [vmem:[%s18366_s8 + $0x430] sm:$0xff]  ;;  %v4348_v2 = vld [vmem:[%s18366_s8 + $0x448] sm:$0xff] }
 0x9ad   :  { %v4944_v35 = vadd.f32 %v4943_v13, %v4932_v7  ;;  %v15131_v23 = vsub.f32 %v14984_v18, %v15004_v60  ;;  %v4945_v54 = vsel %vm69_vm0, %v4936_v50, 0.0  ;;  %v4970_v14 = vadd.f32 %v4969_v9, %v4934_v61  ;;  %v4352_v7 = vld [vmem:[%s18366_s8 + $0x468] sm:$0xff]  ;;  %v4350_v13 = vld [vmem:[%s18366_s8 + $0x458] sm:$0xff] }
 0x9ae   :  { %v4971_v56 = vsel %vm69_vm0, %v4938_v26, 0.0  ;;  %v4933_v39 = vmul.f32 %v15116_v34, %v15116_v34  ;;  %v4956_v58 = vadd.f32 %v4955_v24, %v4929_v49  ;;  %v4935_v16 = vmul.f32 %v15122_v47, %v15122_v47  ;;  %v4354_v61 = vld [vmem:[%s18366_s8 + $0x478] sm:$0xff] }
 0x9af   :  { %v4937_v19 = vmul.f32 %v15125_v21, %v15125_v21  ;;  %v4982_v51 = vadd.f32 %v4981_v33, %v4931_v29  ;;  %v4946_v40 = vadd.f32 %v4945_v54, %v4944_v35  ;;  %v4939_v18 = vmul.f32 %v15131_v23, %v15131_v23  ;;  %v4347_v29 = vld [vmem:[%s18366_s8 + $0x440] sm:$0xff] }
 0x9b0   :  { %v4972_v60 = vadd.f32 %v4971_v56, %v4970_v14  ;;  %v4957_v37 = vadd.f32 %v4956_v58, %v4933_v39  ;;  %v10420_v49 = vpack.c.bf16 %v4343_v31, %v4339_v45  ;;  %v10548_v24 = vpack.c.bf16 %v4345_v28, %v4341_v4  ;;  %v4351_v33 = vld [vmem:[%s18366_s8 + $0x460] sm:$0xff]  ;;  %v4349_v39 = vld [vmem:[%s18366_s8 + $0x450] sm:$0xff] }
 0x9b1   :  { %v4958_v20 = vsel %vm69_vm0, %v4937_v19, 0.0  ;;  %v4983_v53 = vadd.f32 %v4982_v51, %v4935_v16  ;;  %v4947_v27 = vrot.slane %v4946_v40, 4  ;;  %v4984_v36 = vsel %vm69_vm0, %v4939_v18, 0.0  ;;  %v4353_v58 = vld [vmem:[%s18366_s8 + $0x470] sm:$0xff]  ;;  %v4356_v16 = vld [vmem:[%s18366_s8 + $0x488] sm:$0xff]  ;;  %v4362_v18 = vld [vmem:[%s18366_s8 + $0x4b8] sm:$0xff] }
 0x9b2   :  { %v4973_v44 = vrot.slane %v4972_v60, 4  ;;  %v4959_v1 = vadd.f32 %v4958_v20, %v4957_v37  ;;  %v10422_v14 = vpack.c.bf16 %v4352_v7, %v4348_v2  ;;  %v10550_v56 = vpack.c.bf16 %v4354_v61, %v4350_v13  ;;  %v4360_v51 = vld [vmem:[%s18366_s8 + $0x4a8] sm:$0xff]  ;;  %v4357_v4 = vld [vmem:[%s18366_s8 + $0x490] sm:$0xff]  ;;  %v4366_v13 = vld [vmem:[%s18366_s8 + $0x4d8] sm:$0xff] }
 0x9b3   :  { %v4985_v22 = vadd.f32 %v4984_v36, %v4983_v53  ;;  %v4948_v50 = vadd.f32 %v4947_v27, %v4946_v40  ;;  %v4358_v40 = vld [vmem:[%s18366_s8 + $0x498] sm:$0xff]  ;;  %v10424_v20 = vpack.c.bf16 %v4351_v33, %v4347_v29  ;;  %v10552_v53 = vpack.c.bf16 %v4353_v58, %v4349_v39  ;;  %v4355_v27 = vld [vmem:[%s18366_s8 + $0x480] sm:$0xff]  ;;  %v4361_v28 = vld [vmem:[%s18366_s8 + $0x4b0] sm:$0xff] }
 0x9b4   :  { %v4974_v9 = vadd.f32 %v4973_v44, %v4972_v60  ;;  %v4960_v35 = vrot.slane %v4959_v1, 4  ;;  %v4359_v36 = vld [vmem:[%s18366_s8 + $0x4a0] sm:$0xff]  ;;  %v10426_v45 = vpack.c.bf16 %v4360_v51, %v4356_v16  ;;  %v10554_v31 = vpack.c.bf16 %v4362_v18, %v4358_v40  ;;  %v4364_v2 = vld [vmem:[%s18366_s8 + $0x4c8] sm:$0xff]  ;;  %v4370_v61 = vld [vmem:[%s18366_s8 + $0x4f8] sm:$0xff] }
 0x9b5   :  { %v4986_v19 = vrot.slane %v4985_v22, 4  ;;  %v4949_v60 = vrot.slane %v4948_v50, 2  ;;  %v10556_v29 = vpack.c.bf16 %v4361_v28, %v4357_v4  ;;  %v4367_v33 = vld [vmem:[%s18366_s8 + $0x4e0] sm:$0xff]  ;;  %v4376_v58 = vld [vmem:[%s18366_s8 + $0x528] sm:$0xff]  ;;  %v4374_v16 = vld [vmem:[%s18366_s8 + $0x518] sm:$0xff] }
 0x9b6   :  { %v4975_v37 = vrot.slane %v4974_v9, 2  ;;  %v4961_v44 = vadd.f32 %v4960_v35, %v4959_v1  ;;  %v4368_v1 = vld [vmem:[%s18366_s8 + $0x4e8] sm:$0xff] }
 0x9b7   :  { %v4987_v7 = vadd.f32 %v4986_v19, %v4985_v22  ;;  %v4363_v22 = vld [vmem:[%s18366_s8 + $0x4c0] sm:$0xff]  ;;  %v4378_v19 = vld [vmem:[%s18366_s8 + $0x538] sm:$0xff]  ;;  %v4380_v4 = vld [vmem:[%s18366_s8 + $0x548] sm:$0xff] }
 0x9b8   :  { %v4962_v35 = vrot.slane %v4961_v44, 2  ;;  %v10432_v18 = vpack.c.bf16 %v4367_v33, %v4363_v22  ;;  %v4383_v22 = vld [vmem:[%s18366_s8 + $0x560] sm:$0xff] }
 0x9b9   :  { %v4988_v39 = vrot.slane %v4987_v7, 2 }
 0x9bb   :  { %v4989_v28 = vadd.f32 %v4988_v39, %v4987_v7  ;;  %v4379_v7 = vld [vmem:[%s18366_s8 + $0x540] sm:$0xff]  ;;  %v4390_v39 = vld [vmem:[%s18366_s8 + $0x598] sm:$0xff] }
 0xa18   :  { %v4135_v26 = vpop.f32.mrb[112].mxu0 }
 0xa19   :  { %v4137_v54 = vpop.f32.mrb[113].mxu0 }
 0xa1a   :  { %4539 = vmatprep.mubr.f32.mxu0 %v4137_v54  ;;  %4681 = vmatprep.mubr.f32.mxu1 %v4137_v54  ;;  %v10430_v54 = vpack.c.bf16 %v4368_v1, %v4364_v2  ;;  %v4382_v2 = vld [vmem:[%s18366_s8 + $0x558] sm:$0xff] }
 0xa1b   :  { %4540 = vmatmul.mubr.f32.vlgmr.msra.gmra.mrb[114].mxu0 %v4135_v26  ;;  %4682 = vmatmul.mubr.f32.vlgmr.msra.gmra.mrb[114].mxu1 %v4135_v26  ;;  %v4950_v26 = vadd.f32 %v4949_v60, %v4948_v50  ;;  %v4365_v50 = vld [vmem:[%s18366_s8 + $0x4d0] sm:$0xff]  ;;  %v4386_v1 = vld [vmem:[%s18366_s8 + $0x578] sm:$0xff] }
 0xa1c   :  { %10421 = vmatpush1.bf16.msra.mxu0 %v10420_v49  ;;  %10549 = vmatpush1.bf16.msra.mxu1 %v10548_v24  ;;  %v4976_v49 = vadd.f32 %v4975_v37, %v4974_v9  ;;  %v10428_v24 = vpack.c.bf16 %v4359_v36, %v4355_v27  ;;  %v4369_v9 = vld [vmem:[%s18366_s8 + $0x4f0] sm:$0xff]  ;;  %v4371_v37 = vld [vmem:[%s18366_s8 + $0x500] sm:$0xff]  ;;  %v10562_v36 = vpack.c.bf16 %v4378_v19, %v4374_v16 }
 0xa1d   :  { %10423 = vmatprep.subr.bf16.mxu0 %v10422_v14  ;;  %10551 = vmatprep.subr.bf16.mxu1 %v10550_v56  ;;  %v10558_v14 = vpack.c.bf16 %v4370_v61, %v4366_v13  ;;  %v4372_v56 = vld [vmem:[%s18366_s8 + $0x508] sm:$0xff]  ;;  %v4951_v51 = vrot.slane %v4950_v26, 1  ;;  %v10560_v60 = vpack.c.bf16 %v4369_v9, %v4365_v50  ;;  %v4990_v9 = vrot.slane %v4989_v28, 1 }
 0xa1e   :  { %v4977_v40 = vrot.slane %v4976_v49, 1  ;;  %v10434_v27 = vpack.c.bf16 %v4376_v58, %v4372_v56  ;;  %v4392_v56 = vld [vmem:[%s18366_s8 + $0x5a8] sm:$0xff]  ;;  %v4394_v58 = vld [vmem:[%s18366_s8 + $0x5b8] sm:$0xff] }
 0xa1f   :  { %v4952_v13 = vadd.f32 %v4951_v51, %v4950_v26  ;;  %v4381_v26 = vld [vmem:[%s18366_s8 + $0x550] sm:$0xff] }
 0xa20   :  { %10425 = vmatpush1.bf16.msra.mxu0 %v10424_v20  ;;  %10553 = vmatpush1.bf16.msra.mxu1 %v10552_v53  ;;  %v4375_v20 = vld [vmem:[%s18366_s8 + $0x520] sm:$0xff]  ;;  %v4963_v53 = vadd.f32 %v4962_v35, %v4961_v44  ;;  %v4384_v44 = vld [vmem:[%s18366_s8 + $0x568] sm:$0xff]  ;;  %v4978_v61 = vadd.f32 %v4977_v40, %v4976_v49  ;;  %v4385_v49 = vld [vmem:[%s18366_s8 + $0x570] sm:$0xff]  ;;  %v10440_v40 = vpack.c.bf16 %v4383_v22, %v4379_v7 }
 0xa21   :  { %10427 = vmatprep.subr.bf16.mxu0 %v10426_v45  ;;  %10555 = vmatprep.subr.bf16.mxu1 %v10554_v31  ;;  %v4373_v45 = vld [vmem:[%s18366_s8 + $0x510] sm:$0xff]  ;;  %v10438_v35 = vpack.c.bf16 %v4384_v44, %v4380_v4  ;;  %v4992_v19 = vmul.f32 0.020408163, %v4952_v13  ;;  %v4396_v4 = vld [vmem:[%s18366_s8 + $0x5c8] sm:$0xff]  ;;  %v4991_v44 = vadd.f32 %v4990_v9, %v4989_v28  ;;  %v4395_v28 = vld [vmem:[%s18366_s8 + $0x5c0] sm:$0xff] }
 0xa22   :  { %v4377_v31 = vld [vmem:[%s18366_s8 + $0x530] sm:$0xff]  ;;  %v4964_v33 = vrot.slane %v4963_v53, 1  ;;  %v4994_v51 = vmul.f32 0.020408163, %v4978_v61  ;;  %v4399_v7 = vld [vmem:[%s18366_s8 + $0x5e0] sm:$0xff]  ;;  %v4408_v9 = vld [vmem:[%s18366_s8 + $0x628] sm:$0xff] }
 0xa23   :  { %v4996_v13 = vadd.f32 1e-05, %v4992_v19  ;;  %v4403_v19 = vld [vmem:[%s18366_s8 + $0x600] sm:$0xff] }
 0xa24   :  { %10429 = vmatpush1.bf16.msra.mxu0 %v10428_v24  ;;  %10557 = vmatpush1.bf16.msra.mxu1 %v10556_v29  ;;  %v10436_v24 = vpack.c.bf16 %v4375_v20, %v4371_v37  ;;  %v10564_v29 = vpack.c.bf16 %v4377_v31, %v4373_v45  ;;  %v4391_v37 = vld [vmem:[%s18366_s8 + $0x5a0] sm:$0xff]  ;;  %v4965_v20 = vadd.f32 %v4964_v33, %v4963_v53  ;;  %v4389_v45 = vld [vmem:[%s18366_s8 + $0x590] sm:$0xff]  ;;  %v4400_v53 = vld [vmem:[%s18366_s8 + $0x5e8] sm:$0xff]  ;;  %v4998_v61 = vadd.f32 1e-05, %v4994_v51 }
 0xa25   :  { %10431 = vmatprep.subr.bf16.mxu0 %v10430_v54  ;;  %10559 = vmatprep.subr.bf16.mxu1 %v10558_v14  ;;  %v10566_v54 = vpack.c.bf16 %v4386_v1, %v4382_v2  ;;  %v4388_v14 = vld [vmem:[%s18366_s8 + $0x588] sm:$0xff]  ;;  %v4393_v31 = vld [vmem:[%s18366_s8 + $0x5b0] sm:$0xff]  ;;  %v4398_v2 = vld [vmem:[%s18366_s8 + $0x5d8] sm:$0xff]  ;;  %v10446_v33 = vpack.c.bf16 %v4400_v53, %v4396_v4  ;;  %11150 = vrsqrt.f32 %v4996_v13 }
 0xa26   :  { %v4402_v1 = vld [vmem:[%s18366_s8 + $0x5f8] sm:$0xff]  ;;  %v4993_v22 = vmul.f32 0.020408163, %v4965_v20  ;;  %v4407_v51 = vld [vmem:[%s18366_s8 + $0x620] sm:$0xff]  ;;  %11152 = vrsqrt.f32 %v4998_v61  ;;  %v4409_v20 = vld [vmem:[%s18366_s8 + $0x630] sm:$0xff] }
 0xa27   :  { %v4418_v4 = vld [vmem:[%s18366_s8 + $0x678] sm:$0xff] }
 0xa28   :  { %10433 = vmatpush1.bf16.msra.mxu0 %v10432_v18  ;;  %10561 = vmatpush1.bf16.msra.mxu1 %v10560_v60  ;;  %v10568_v18 = vpack.c.bf16 %v4385_v49, %v4381_v26  ;;  %v4387_v60 = vld [vmem:[%s18366_s8 + $0x580] sm:$0xff]  ;;  %v4401_v26 = vld [vmem:[%s18366_s8 + $0x5f0] sm:$0xff]  ;;  %v4404_v49 = vld [vmem:[%s18366_s8 + $0x608] sm:$0xff] }
 0xa29   :  { %10435 = vmatprep.subr.bf16.mxu0 %v10434_v27  ;;  %10563 = vmatprep.subr.bf16.mxu1 %v10562_v36  ;;  %v15280_v50 = vpop.f32.mrb[112].mxu1  ;;  %v10442_v27 = vpack.c.bf16 %v4392_v56, %v4388_v14  ;;  %v10570_v36 = vpack.c.bf16 %v4394_v58, %v4390_v39  ;;  %v4995_v14 = vmul.f32 0.020408163, %v4991_v44  ;;  %v4406_v56 = vld [vmem:[%s18366_s8 + $0x618] sm:$0xff]  ;;  %v10448_v58 = vpack.c.bf16 %v4399_v7, %v4395_v28  ;;  %v4420_v28 = vld [vmem:[%s18366_s8 + $0x688] sm:$0xff] }
 0xa2a   :  { %v4208_v16 = vpop.f32.mrb[113].mxu1  ;;  %v4410_v39 = vld [vmem:[%s18366_s8 + $0x638] sm:$0xff]  ;;  %v10452_v44 = vpack.c.bf16 %v4407_v51, %v4403_v19  ;;  %v4424_v7 = vld [vmem:[%s18366_s8 + $0x6a8] sm:$0xff] }
 0xa2b   :  { %4610 = vmatprep.mubr.f32.mxu0 %v4208_v16  ;;  %4752 = vmatprep.mubr.f32.mxu1 %v4208_v16  ;;  %v4432_v19 = vld [vmem:[%s18366_s8 + $0x6e8] sm:$0xff]  ;;  %v4430_v51 = vld [vmem:[%s18366_s8 + $0x6d8] sm:$0xff] }
 0xa2c   :  { %10437 = vmatpush1.bf16.msra.mxu0 %v10436_v24  ;;  %10565 = vmatpush1.bf16.msra.mxu1 %v10564_v29  ;;  %v10444_v24 = vpack.c.bf16 %v4391_v37, %v4387_v60  ;;  %v10572_v29 = vpack.c.bf16 %v4393_v31, %v4389_v45  ;;  %v10578_v60 = vpack.c.bf16 %v4410_v39, %v4406_v56  ;;  %v4405_v37 = vld [vmem:[%s18366_s8 + $0x610] sm:$0xff]  ;;  %v4416_v45 = vld [vmem:[%s18366_s8 + $0x668] sm:$0xff]  ;;  %v4414_v31 = vld [vmem:[%s18366_s8 + $0x658] sm:$0xff] }
 0xa2d   :  { %10439 = vmatprep.subr.bf16.mxu0 %v10438_v35  ;;  %10567 = vmatprep.subr.bf16.mxu1 %v10566_v54  ;;  %v10574_v35 = vpack.c.bf16 %v4402_v1, %v4398_v2  ;;  %v4397_v54 = vld [vmem:[%s18366_s8 + $0x5d0] sm:$0xff]  ;;  %v10580_v53 = vpack.c.bf16 %v4409_v20, %v4405_v37  ;;  %v4411_v2 = vld [vmem:[%s18366_s8 + $0x640] sm:$0xff]  ;;  %v10582_v61 = vpack.c.bf16 %v4418_v4, %v4414_v31 }
 0xa2e   :  { %v10576_v16 = vpack.c.bf16 %v4401_v26, %v4397_v54  ;;  %v4415_v1 = vld [vmem:[%s18366_s8 + $0x660] sm:$0xff]  ;;  %v4421_v39 = vld [vmem:[%s18366_s8 + $0x690] sm:$0xff] }
 0xa2f   :  { %v4419_v26 = vld [vmem:[%s18366_s8 + $0x680] sm:$0xff]  ;;  %v4429_v4 = vld [vmem:[%s18366_s8 + $0x6d0] sm:$0xff] }
 0xa30   :  { %10441 = vmatpush1.bf16.msra.mxu0 %v10440_v40  ;;  %10569 = vmatpush1.bf16.msra.mxu1 %v10568_v18  ;;  %v4997_v40 = vadd.f32 1e-05, %v4993_v22  ;;  %v10450_v18 = vpack.c.bf16 %v4408_v9, %v4404_v49  ;;  %v4422_v22 = vld [vmem:[%s18366_s8 + $0x698] sm:$0xff]  ;;  %v4423_v49 = vld [vmem:[%s18366_s8 + $0x6a0] sm:$0xff]  ;;  %v10458_v9 = vpack.c.bf16 %v4424_v7, %v4420_v28 }
 0xa31   :  { %10443 = vmatprep.subr.bf16.mxu0 %v10442_v27  ;;  %10571 = vmatprep.subr.bf16.mxu1 %v10570_v36  ;;  %v4412_v27 = vld [vmem:[%s18366_s8 + $0x648] sm:$0xff]  ;;  %v4999_v36 = vadd.f32 1e-05, %v4995_v14  ;;  %v11151_v14 = vpop.eup %11150  ;;  %v10460_v37 = vpack.c.bf16 %v4423_v49, %v4419_v26  ;;  %v4441_v26 = vld [vmem:[%s18366_s8 + $0x730] sm:$0xff] }
 0xa32   :  { %11154 = vrsqrt.f32 %v4997_v40  ;;  %v10454_v13 = vpack.c.bf16 %v4416_v45, %v4412_v27  ;;  %v4434_v40 = vld [vmem:[%s18366_s8 + $0x6f8] sm:$0xff]  ;;  %v4427_v27 = vld [vmem:[%s18366_s8 + $0x6c0] sm:$0xff]  ;;  %v15421_v45 = vmul.f32 %v11151_v14, %v14993_v8  ;;  %v4444_v49 = vld [vmem:[%s18366_s8 + $0x748] sm:$0xff] }
 0xa33   :  { %11156 = vrsqrt.f32 %v4999_v36  ;;  %v4431_v36 = vld [vmem:[%s18366_s8 + $0x6e0] sm:$0xff] }
 0xa34   :  { %10445 = vmatpush1.bf16.msra.mxu0 %v10444_v24  ;;  %10573 = vmatpush1.bf16.msra.mxu1 %v10572_v29  ;;  %v4413_v24 = vld [vmem:[%s18366_s8 + $0x650] sm:$0xff] }
 0xa35   :  { %10447 = vmatprep.subr.bf16.mxu0 %v10446_v33  ;;  %10575 = vmatprep.subr.bf16.mxu1 %v10574_v35  ;;  %v4417_v29 = vld [vmem:[%s18366_s8 + $0x670] sm:$0xff]  ;;  %v4426_v33 = vld [vmem:[%s18366_s8 + $0x6b8] sm:$0xff]  ;;  %v10456_v35 = vpack.c.bf16 %v4415_v1, %v4411_v2  ;;  %v15439_v1 = vmul.f32 %v11151_v14, %v15035_v12 }
 0xa36   :  { %v10584_v54 = vpack.c.bf16 %v4417_v29, %v4413_v24  ;;  %v10586_v56 = vpack.c.bf16 %v4426_v33, %v4422_v22  ;;  %v4438_v24 = vld [vmem:[%s18366_s8 + $0x718] sm:$0xff]  ;;  %v15454_v29 = vmul.f32 %v11151_v14, %v15007_v55  ;;  %v15468_v22 = vmul.f32 %v11151_v14, %v15060_v59  ;;  %v4435_v55 = vld [vmem:[%s18366_s8 + $0x700] sm:$0xff] }
 0xa37   :  { %v10464_v33 = vpack.c.bf16 %v4431_v36, %v4427_v27  ;;  %v4454_v36 = vld [vmem:[%s18366_s8 + $0x798] sm:$0xff] }
 0xa38   :  { %10449 = vmatpush1.bf16.msra.mxu0 %v10448_v58  ;;  %10577 = vmatpush1.bf16.msra.mxu1 %v10576_v16  ;;  %v4425_v58 = vld [vmem:[%s18366_s8 + $0x6b0] sm:$0xff]  ;;  %v4428_v16 = vld [vmem:[%s18366_s8 + $0x6c8] sm:$0xff] }
 0xa39   :  { %10451 = vmatprep.subr.bf16.mxu0 %v10450_v18  ;;  %10579 = vmatprep.subr.bf16.mxu1 %v10578_v60  ;;  %v11153_v18 = vpop.eup %11152  ;;  %v15412_v60 = vmul.f32 %v11151_v14, %v14996_v25  ;;  %v10588_v20 = vpack.c.bf16 %v4425_v58, %v4421_v39  ;;  %v10462_v31 = vpack.c.bf16 %v4432_v19, %v4428_v16  ;;  %v4448_v58 = vld [vmem:[%s18366_s8 + $0x768] sm:$0xff]  ;;  %v4446_v16 = vld [vmem:[%s18366_s8 + $0x758] sm:$0xff] }
 0xa3a   :  { %v10590_v25 = vpack.c.bf16 %v4434_v40, %v4430_v51  ;;  %v15433_v2 = vmul.f32 %v11153_v18, %v15002_v6  ;;  %v15436_v8 = vmul.f32 %v11153_v18, %v14999_v62  ;;  %v4442_v6 = vld [vmem:[%s18366_s8 + $0x738] sm:$0xff]  ;;  %v15457_v12 = vmul.f32 %v11153_v18, %v15014_v15  ;;  %v4439_v15 = vld [vmem:[%s18366_s8 + $0x720] sm:$0xff] }
 0xa3b   :  { %v15463_v28 = vmul.f32 %v11153_v18, %v15086_v3  ;;  %v10594_v59 = vpack.c.bf16 %v4442_v6, %v4438_v24  ;;  %v10468_v19 = vpack.c.bf16 %v4439_v15, %v4435_v55  ;;  %v4443_v40 = vld [vmem:[%s18366_s8 + $0x740] sm:$0xff]  ;;  %v18910_v24 = vld [vmem:[#allocation80_spill] sm:$0xff] }
 0xa3c   :  { %10453 = vmatpush1.bf16.msra.mxu0 %v10452_v44  ;;  %10581 = vmatpush1.bf16.msra.mxu1 %v10580_v53  ;;  %v4433_v44 = vld [vmem:[%s18366_s8 + $0x6f0] sm:$0xff]  ;;  %v4436_v53 = vld [vmem:[%s18366_s8 + $0x708] sm:$0xff]  ;;  %v11155_v62 = vpop.eup %11154  ;;  %v5078_v55 = vmul.f32 %v18910_v24, %v15412_v60 }
 0xa3d   :  { %10455 = vmatprep.subr.bf16.mxu0 %v10454_v13  ;;  %10583 = vmatprep.subr.bf16.mxu1 %v10582_v61  ;;  %v15442_v13 = vmul.f32 %v11153_v18, %v15040_v32  ;;  %v4440_v61 = vld [vmem:[%s18366_s8 + $0x728] sm:$0xff]  ;;  %v15460_v32 = vmul.f32 %v11151_v14, %v15081_v0  ;;  %v15465_v7 = vpop.eup %11156  ;;  %v15477_v0 = vmul.f32 %v11153_v18, %v15065_v52 }
 0xa3e   :  { %v10466_v3 = vpack.c.bf16 %v4440_v61, %v4436_v53  ;;  %v15492_v52 = vmul.f32 %v11155_v62, %v15125_v21  ;;  %v15499_v39 = vmul.f32 %v15465_v7, %v15131_v23  ;;  %v5005_v21 = vmul.f32 %v11155_v62, %v15021_v46  ;;  %v4447_v46 = vld [vmem:[%s18366_s8 + $0x760] sm:$0xff]  ;;  %v4464_v60 = vld [vmem:[%s18366_s8 + $0x7e8] sm:$0xff] }
 0xa3f   :  { %v5007_v23 = vmul.f32 %v15465_v7, %v15028_v42  ;;  %v10470_v42 = vpack.c.bf16 %v4448_v58, %v4444_v49  ;;  %v5017_v27 = vmul.f32 %v11155_v62, %v15070_v63  ;;  %v15549_v63 = vmul.f32 %v11155_v62, %v15097_v11  ;;  %v18909_v53 = vld [vmem:[#allocation81_spill] sm:$0xff]  ;;  %v4466_v49 = vld [vmem:[%s18366_s8 + $0x7f8] sm:$0xff]  ;;  %v18911_v58 = vld [vmem:[#allocation83_spill] sm:$0xff] }
 0xa40   :  { %10457 = vmatpush1.bf16.msra.mxu0 %v10456_v35  ;;  %10585 = vmatpush1.bf16.msra.mxu1 %v10584_v54  ;;  %v10592_v35 = vpack.c.bf16 %v4433_v44, %v4429_v4  ;;  %v4437_v54 = vld [vmem:[%s18366_s8 + $0x710] sm:$0xff]  ;;  %v5019_v4 = vmul.f32 %v15465_v7, %v15076_v41  ;;  %v15552_v44 = vmul.f32 %v11155_v62, %v15116_v34  ;;  %v4451_v11 = vld [vmem:[%s18366_s8 + $0x780] sm:$0xff] }
 0xa41   :  { %10459 = vmatprep.subr.bf16.mxu0 %v10458_v9  ;;  %10587 = vmatprep.subr.bf16.mxu1 %v10586_v56  ;;  %v15489_v9 = vmul.f32 %v11151_v14, %v15089_v30  ;;  %v15495_v56 = vmul.f32 %v11153_v18, %v15094_v48  ;;  %v4450_v30 = vld [vmem:[%s18366_s8 + $0x778] sm:$0xff]  ;;  %v5009_v48 = vmul.f32 %v11155_v62, %v15024_v17  ;;  %v4455_v34 = vld [vmem:[%s18366_s8 + $0x7a0] sm:$0xff] }
 0xa42   :  { %v5011_v14 = vmul.f32 %v15465_v7, %v15032_v43  ;;  %v10596_v51 = vpack.c.bf16 %v4441_v26, %v4437_v54  ;;  %v15523_v17 = vmul.f32 %v11155_v62, %v15045_v5  ;;  %v10598_v18 = vpack.c.bf16 %v4450_v30, %v4446_v16  ;;  %v4445_v43 = vld [vmem:[%s18366_s8 + $0x750] sm:$0xff]  ;;  %v4456_v5 = vld [vmem:[%s18366_s8 + $0x7a8] sm:$0xff]  ;;  %v4462_v26 = vld [vmem:[%s18366_s8 + $0x7d8] sm:$0xff] }
 0xa43   :  { %v5075_v61 = vmul.f32 %v18909_v53, %v5005_v21  ;;  %v5079_v6 = vmul.f32 %v18910_v24, %v5009_v48  ;;  %v5077_v62 = vmul.f32 %v18909_v53, %v5007_v23  ;;  %v4460_v54 = vld [vmem:[%s18366_s8 + $0x7c8] sm:$0xff] }
 0xa44   :  { %10461 = vmatpush1.bf16.msra.mxu0 %v10460_v37  ;;  %10589 = vmatpush1.bf16.msra.mxu1 %v10588_v20  ;;  %v4449_v37 = vld [vmem:[%s18366_s8 + $0x770] sm:$0xff]  ;;  %v4452_v20 = vld [vmem:[%s18366_s8 + $0x788] sm:$0xff] }
 0xa45   :  { %10463 = vmatprep.subr.bf16.mxu0 %v10462_v31  ;;  %10591 = vmatprep.subr.bf16.mxu1 %v10590_v25  ;;  %v4458_v31 = vld [vmem:[%s18366_s8 + $0x7b8] sm:$0xff]  ;;  %v5015_v25 = vmul.f32 %v15465_v7, %v15053_v57  ;;  %v10472_v57 = vpack.c.bf16 %v4447_v46, %v4443_v40  ;;  %v10600_v41 = vpack.c.bf16 %v4449_v37, %v4445_v43  ;;  %v18912_v30 = vld [vmem:[#allocation82_spill] sm:$0xff]  ;;  %v4459_v43 = vld [vmem:[%s18366_s8 + $0x7c0] sm:$0xff] }
 0xa46   :  { %v10602_v15 = vpack.c.bf16 %v4458_v31, %v4454_v36  ;;  %v5145_v16 = vadd.f32 %v18911_v58, %v5075_v61  ;;  %v5149_v21 = vadd.f32 %v18912_v30, %v5079_v6  ;;  %v5147_v48 = vadd.f32 %v18911_v58, %v5077_v62 }
 0xa47   :  { %v5027_v40 = vmul.f32 %v15465_v7, %v15122_v47  ;;  %v5148_v46 = vadd.f32 %v18912_v30, %v5078_v55  ;;  %v10606_v37 = vpack.c.bf16 %v4466_v49, %v4462_v26  ;;  %v4463_v47 = vld [vmem:[%s18366_s8 + $0x7e0] sm:$0xff]  ;;  %v18918_v49 = vld [vmem:[#allocation88_spill] sm:$0xff] }
 0xa48   :  { %10465 = vmatpush1.bf16.msra.mxu0 %v10464_v33  ;;  %10593 = vmatpush1.bf16.msra.mxu1 %v10592_v35  ;;  %v5081_v33 = vmul.f32 %v18910_v24, %v5011_v14  ;;  %v15559_v35 = vmul.f32 %v15465_v7, %v15103_v10  ;;  %v10474_v10 = vpack.c.bf16 %v4456_v5, %v4452_v20  ;;  %v4465_v7 = vld [vmem:[%s18366_s8 + $0x7f0] sm:$0xff] }
 0xa49   :  { %10467 = vmatprep.subr.bf16.mxu0 %v10466_v3  ;;  %10595 = vmatprep.subr.bf16.mxu1 %v10594_v59  ;;  %v4453_v3 = vld [vmem:[%s18366_s8 + $0x790] sm:$0xff]  ;;  %v5080_v14 = vmul.f32 %v18910_v24, %v15433_v2  ;;  %v10610_v36 = vpack.c.bf16 %v5149_v21, %v5145_v16  ;;  %v18914_v24 = vld [vmem:[#allocation85_spill] sm:$0xff]  ;;  %v5094_v21 = vmul.f32 %v18918_v49, %v15460_v32 }
 0xa4a   :  { %v4457_v59 = vld [vmem:[%s18366_s8 + $0x7b0] sm:$0xff]  ;;  %v5151_v23 = vadd.f32 %v18912_v30, %v5081_v33  ;;  %v5083_v6 = vmul.f32 %v18914_v24, %v15523_v17  ;;  %v5082_v55 = vmul.f32 %v18914_v24, %v15454_v29 }
 0xa4b   :  { %v5150_v2 = vadd.f32 %v18912_v30, %v5080_v14  ;;  %v18915_v17 = vld [vmem:[#allocation87_spill] sm:$0xff]  ;;  %v5097_v30 = vmul.f32 %v18918_v49, %v5027_v40 }
 0xa4c   :  { %10469 = vmatpush1.bf16.msra.mxu0 %v10468_v19  ;;  %10597 = vmatpush1.bf16.msra.mxu1 %v10596_v51  ;;  %v5074_v19 = vmul.f32 %v18909_v53, %v15421_v45  ;;  %v5076_v51 = vmul.f32 %v18909_v53, %v15436_v8  ;;  %v10478_v45 = vpack.c.bf16 %v4464_v60, %v4460_v54  ;;  %v4461_v8 = vld [vmem:[%s18366_s8 + $0x7d0] sm:$0xff]  ;;  %v18913_v53 = vld [vmem:[#allocation84_spill] sm:$0xff]  ;;  %v18917_v60 = vld [vmem:[#allocation89_spill] sm:$0xff] }
 0xa4d   :  { %10471 = vmatprep.subr.bf16.mxu0 %v10470_v42  ;;  %10599 = vmatprep.subr.bf16.mxu1 %v10598_v18  ;;  %v10476_v42 = vpack.c.bf16 %v4455_v34, %v4451_v11  ;;  %v10604_v18 = vpack.c.bf16 %v4457_v59, %v4453_v3  ;;  %v10622_v31 = vpack.c.bf16 %v5151_v23, %v5147_v48  ;;  %v18919_v14 = vld [vmem:[#allocation91_spill] sm:$0xff] }
 0xa4e   :  { %v5144_v20 = vadd.f32 %v18911_v58, %v5074_v19  ;;  %v5146_v5 = vadd.f32 %v18911_v58, %v5076_v51  ;;  %v5086_v61 = vmul.f32 %v18913_v53, %v15439_v1  ;;  %v5087_v33 = vmul.f32 %v18913_v53, %v5017_v27 }
 0xa4f   :  { %v10608_v11 = vpack.c.bf16 %v4465_v7, %v4461_v8  ;;  %v5085_v34 = vmul.f32 %v18914_v24, %v5015_v25  ;;  %v5088_v62 = vmul.f32 %v18913_v53, %v15442_v13  ;;  %v5084_v1 = vmul.f32 %v18914_v24, %v15457_v12  ;;  %v5175_v24 = vld [vmem:[%s18361_s3 + $0x18] sm:$0xff] }
 0xa50   :  { %10473 = vmatpush1.bf16.msra.mxu0 %v10472_v57  ;;  %10601 = vmatpush1.bf16.msra.mxu1 %v10600_v41  ;;  %v5089_v57 = vmul.f32 %v18913_v53, %v5019_v4  ;;  %v10480_v41 = vpack.c.bf16 %v4463_v47, %v4459_v43  ;;  %v5153_v27 = vadd.f32 %v18915_v17, %v5083_v6  ;;  %v18916_v4 = vld [vmem:[#allocation86_spill] sm:$0xff]  ;;  %v5176_v6 = vld [vmem:[%s18361_s3 + $0x20] sm:$0xff] }
 0xa51   :  { %10475 = vmatprep.subr.bf16.mxu0 %v10474_v10  ;;  %10603 = vmatprep.subr.bf16.mxu1 %v10602_v15  ;;  %v5157_v10 = vadd.f32 %v18916_v4, %v5087_v33  ;;  %v5155_v15 = vadd.f32 %v18915_v17, %v5085_v34  ;;  %v5156_v25 = vadd.f32 %v18916_v4, %v5086_v61  ;;  %v5174_v61 = vld [vmem:[%s18361_s3 + $0x10] sm:$0xff]  ;;  %v5177_v33 = vld [vmem:[%s18361_s3 + $0x28] sm:$0xff] }
 0xa52   :  { %v5159_v3 = vadd.f32 %v18916_v4, %v5089_v57  ;;  %v5158_v13 = vadd.f32 %v18916_v4, %v5088_v62  ;;  %v10612_v59 = vpack.c.bf16 %v5148_v46, %v5144_v20  ;;  %v10624_v54 = vpack.c.bf16 %v5150_v2, %v5146_v5  ;;  %v5178_v57 = vld [vmem:[%s18361_s3 + $0x30] sm:$0x1] }
 0xa53   :  { %v5152_v29 = vadd.f32 %v18915_v17, %v5082_v55  ;;  %v5154_v12 = vadd.f32 %v18915_v17, %v5084_v1  ;;  %v5091_v26 = vmul.f32 %v18917_v60, %v15549_v63  ;;  %v5095_v58 = vmul.f32 %v18918_v49, %v15552_v44  ;;  %v18920_v63 = vld [vmem:[#allocation90_spill] sm:$0xff] }
 0xa54   :  { %10477 = vmatpush1.bf16.msra.mxu0 %v10476_v42  ;;  %10605 = vmatpush1.bf16.msra.mxu1 %v10604_v18  ;;  %v5093_v16 = vmul.f32 %v18917_v60, %v15559_v35  ;;  %v10614_v48 = vpack.c.bf16 %v5157_v10, %v5153_v27  ;;  %v10626_v23 = vpack.c.bf16 %v5159_v3, %v5155_v15 }
 0xa55   :  { %10479 = vmatprep.subr.bf16.mxu0 %v10478_v45  ;;  %10607 = vmatprep.subr.bf16.mxu1 %v10606_v37  ;;  %v5161_v19 = vadd.f32 %v18919_v14, %v5091_v26  ;;  %v5165_v51 = vadd.f32 %v18920_v63, %v5095_v58  ;;  %v5167_v46 = vadd.f32 %v18920_v63, %v5097_v30 }
 0xa56   :  { %v5163_v44 = vadd.f32 %v18919_v14, %v5093_v16  ;;  %v5096_v35 = vmul.f32 %v18918_v49, %v15463_v28  ;;  %v5090_v32 = vmul.f32 %v18917_v60, %v15468_v22  ;;  %v5092_v40 = vmul.f32 %v18917_v60, %v15477_v0  ;;  %v18921_v22 = vld [vmem:[#allocation93_spill] sm:$0xff] }
 0xa57   :  { %v5164_v42 = vadd.f32 %v18920_v63, %v5094_v21  ;;  %v10628_v18 = vpack.c.bf16 %v5158_v13, %v5154_v12  ;;  %v5099_v0 = vmul.f32 %v18921_v22, %v15492_v52  ;;  %v5101_v45 = vmul.f32 %v18921_v22, %v15499_v39  ;;  %v4467_v21 = vld [vmem:[%s18367_s9] sm:$0xff] }
 0xa58   :  { %10481 = vmatpush1.bf16.msra.mxu0 %v10480_v41  ;;  %10609 = vmatpush1.bf16.msra.mxu1 %v10608_v11  ;;  %v5166_v43 = vadd.f32 %v18920_v63, %v5096_v35  ;;  %v5160_v2 = vadd.f32 %v18919_v14, %v5090_v32  ;;  %v5162_v28 = vadd.f32 %v18919_v14, %v5092_v40  ;;  %v5189_v41 = vpop.permute.xlu0 %5188 }
 0xa59   :  { %10611 = vmatprep.subr.bf16.mxu0 %v10610_v36  ;;  %10623 = vmatprep.subr.bf16.mxu1 %v10622_v31  ;;  %v10618_v37 = vpack.c.bf16 %v5165_v51, %v5161_v19  ;;  %v10630_v47 = vpack.c.bf16 %v5167_v46, %v5163_v44  ;;  %v5098_v8 = vmul.f32 %v18921_v22, %v15489_v9  ;;  %v18922_v36 = vld [vmem:[#allocation92_spill] sm:$0xff]  ;;  %v5172_v9 = vld [vmem:[%s18361_s3] sm:$0xff] }
 0xa5a   :  { %v5100_v7 = vmul.f32 %v18921_v22, %v15495_v56  ;;  %v10620_v20 = vpack.c.bf16 %v5164_v42, %v5160_v2  ;;  %v10632_v5 = vpack.c.bf16 %v5166_v43, %v5162_v28  ;;  %v5169_v31 = vadd.f32 %v18922_v36, %v5099_v0  ;;  %v5173_v56 = vld [vmem:[%s18361_s3 + $0x8] sm:$0xff] }
 0xa5b   :  { %4611 = vmatmul.mubr.f32.vlgmr.msra.gmra.mrb[114].mxu0 %v15280_v50  ;;  %4753 = vmatmul.mubr.f32.vlgmr.msra.gmra.mrb[114].mxu1 %v15280_v50  ;;  %v10616_v50 = vpack.c.bf16 %v5156_v25, %v5152_v29  ;;  %v5171_v52 = vadd.f32 %v18922_v36, %v5101_v45  ;;  %v5168_v39 = vadd.f32 %v18922_v36, %v5098_v8 }
 0xa5c   :  { %10613 = vmatpush1.bf16.msra.mxu0 %v10612_v59  ;;  %10625 = vmatpush1.bf16.msra.mxu1 %v10624_v54  ;;  %v5170_v53 = vadd.f32 %v18922_v36, %v5100_v7  ;;  %v15729_v11 = vpop.permute.xlu0 %5198 }
 0xa5d   :  { %10615 = vmatprep.subr.bf16.mxu0 %v10614_v48  ;;  %10627 = vmatprep.subr.bf16.mxu1 %v10626_v23  ;;  %v4468_v48 = vld [vmem:[%s18367_s9 + $0x8] sm:$0xff]  ;;  %v4471_v23 = vcombine.high %v4467_v21, %v4467_v21 }
 0xa5e   :  { %5318 = vmatprep.mubr.f32.mxu0 %v18740_v38  ;;  %5425 = vmatprep.mubr.f32.mxu1 %v18740_v38  ;;  %v4472_v14 = vcombine.high %v4468_v48, %v4468_v48 }
 0xa60   :  { %10617 = vmatpush1.bf16.msra.mxu0 %v10616_v50  ;;  %10629 = vmatpush1.bf16.msra.mxu1 %v10628_v18  ;;  %v15731_v34 = vpop.permute.xlu0 %5208 }
 0xa61   :  { %10619 = vmatprep.subr.bf16.mxu0 %v10618_v37  ;;  %10631 = vmatprep.subr.bf16.mxu1 %v10630_v47 }
 0xa64   :  { %10621 = vmatpush1.bf16.msra.mxu0 %v10620_v20  ;;  %10633 = vmatpush1.bf16.msra.mxu1 %v10632_v5  ;;  %v15733_v62 = vpop.permute.xlu0 %5218 }
 0xa65   :  { %9862 = vmatprep.subr.msk.mxu0 %vm69_vm0, %v5169_v31  ;;  %9871 = vmatprep.subr.msk.mxu1 %vm69_vm0, %v5171_v52 }
 0xa68   :  { %9863 = vmatpush1.msk.msra.mxu0 %vm69_vm0, %v5168_v39  ;;  %9872 = vmatpush1.msk.msra.mxu1 %vm69_vm0, %v5170_v53  ;;  %v15735_v55 = vpop.permute.xlu0 %5517  ;;  %v5194_v39 = vpop.permute.xlu1 %5193 }
 0xa69   :  { %9864 = vmatmul.mubr.msk.f32.vlgmr.msra.gmra.mrb[116].mxu0 %vm459_vm1, %v5172_v9  ;;  %9873 = vmatmul.mubr.msk.f32.vlgmr.msra.gmra.mrb[116].mxu1 %vm459_vm1, %v5172_v9 }
 0xa6a   :  { %5324 = vmatprep.mubr.f32.mxu0 %v18740_v38  ;;  %5431 = vmatprep.mubr.f32.mxu1 %v18740_v38 }
 0xa6c   :  { %v15737_v1 = vpop.permute.xlu0 %5527 }
 0xa6d   :  { %9865 = vmatmul.mubr.msk.f32.gmra.mrb[118].mxu0 %vm459_vm1, %v5173_v56  ;;  %9874 = vmatmul.mubr.msk.f32.gmra.mrb[118].mxu1 %vm459_vm1, %v5173_v56 }
 0xa6e   :  { %5330 = vmatprep.mubr.f32.mxu0 %v18740_v38  ;;  %5437 = vmatprep.mubr.f32.mxu1 %v18740_v38 }
 0xa70   :  { %v15739_v17 = vpop.permute.xlu0 %5537 }
 0xa71   :  { %9866 = vmatmul.mubr.msk.f32.gmra.mrb[120].mxu0 %vm459_vm1, %v5174_v61  ;;  %9875 = vmatmul.mubr.msk.f32.gmra.mrb[120].mxu1 %vm459_vm1, %v5174_v61 }
 0xa72   :  { %5336 = vmatprep.mubr.f32.mxu0 %v18740_v38  ;;  %5443 = vmatprep.mubr.f32.mxu1 %v18740_v38 }
 0xa74   :  { %v15741_v27 = vpop.permute.xlu0 %6033 }
 0xa75   :  { %9867 = vmatmul.mubr.msk.f32.gmra.mrb[122].mxu0 %vm459_vm1, %v5175_v24  ;;  %9876 = vmatmul.mubr.msk.f32.gmra.mrb[122].mxu1 %vm459_vm1, %v5175_v24 }
 0xa76   :  { %5342 = vmatprep.mubr.f32.mxu0 %v18740_v38  ;;  %5449 = vmatprep.mubr.f32.mxu1 %v18740_v38 }
 0xa78   :  { %v15743_v4 = vpop.permute.xlu0 %6103 }
 0xa79   :  { %9868 = vmatmul.mubr.msk.f32.gmra.mrb[124].mxu0 %vm459_vm1, %v5176_v6  ;;  %9877 = vmatmul.mubr.msk.f32.gmra.mrb[124].mxu1 %vm459_vm1, %v5176_v6 }
 0xa7a   :  { %5348 = vmatprep.mubr.f32.mxu0 %v18740_v38  ;;  %5455 = vmatprep.mubr.f32.mxu1 %v18740_v38 }
 0xa7c   :  { %v15745_v10 = vpop.permute.xlu0 %6043 }
 0xa7d   :  { %9869 = vmatmul.mubr.msk.f32.gmra.mrb[126].mxu0 %vm459_vm1, %v5177_v33  ;;  %9878 = vmatmul.mubr.msk.f32.gmra.mrb[126].mxu1 %vm459_vm1, %v5177_v33 }
 0xa7e   :  { %5354 = vmatprep.mubr.f32.mxu0 %v18740_v38  ;;  %5461 = vmatprep.mubr.f32.mxu1 %v18740_v38 }
 0xa80   :  { %v15747_v15 = vpop.permute.xlu0 %6113 }
 0xa81   :  { %9870 = vmatmul.mubr.msk.f32.gmra.mrb[128].mxu0 %vm459_vm1, %v5178_v57  ;;  %9879 = vmatmul.mubr.msk.f32.gmra.mrb[128].mxu1 %vm459_vm1, %v5178_v57 }
 0xa82   :  { %5642 = vmatprep.mubr.f32.mxu0 %v18740_v38  ;;  %5749 = vmatprep.mubr.f32.mxu1 %v18740_v38 }
 0xa84   :  { %v15749_v3 = vpop.permute.xlu0 %6053 }
 0xa88   :  { %v15751_v25 = vpop.permute.xlu0 %6123 }
 0xa8c   :  { %v15753_v13 = vpop.permute.xlu0 %6063 }
 0xa90   :  { %v15755_v59 = vpop.permute.xlu0 %6180 }
 0xa94   :  { %v15757_v54 = vpop.permute.xlu0 %6190 }
 0xa95   :  { %18923 = vst [vmem:[#allocation116_spill] sm:$0xff] %v15757_v54 }
 0xa98   :  { %v15759_v29 = vpop.permute.xlu0 %6200 }
 0xa99   :  { %18924 = vst [vmem:[#allocation107_spill] sm:$0xff] %v15759_v29 }
 0xa9c   :  { %v15761_v12 = vpop.permute.xlu0 %6210 }
 0xa9d   :  { %18925 = vst [vmem:[#allocation118_spill] sm:$0xff] %v15761_v12 }
 0xaa0   :  { %v15763_v60 = vpop.permute.xlu0 %6509 }
 0xaa1   :  { %18926 = vst [vmem:[#allocation109_spill] sm:$0xff] %v15763_v60 }
 0xaa4   :  { %v15765_v26 = vpop.permute.xlu0 %6519 }
 0xaa5   :  { %18927 = vst [vmem:[#allocation111_spill] sm:$0xff] %v15765_v26 }
 0xaa8   :  { %v15767_v49 = vpop.permute.xlu0 %6529 }
 0xaa9   :  { %18928 = vst [vmem:[#allocation113_spill] sm:$0xff] %v15767_v49 }
 0xaac   :  { %v15769_v58 = vpop.permute.xlu0 %7025 }
 0xaad   :  { %18929 = vst [vmem:[#allocation115_spill] sm:$0xff] %v15769_v58 }
 0xab0   :  { %v15771_v16 = vpop.permute.xlu0 %7095 }
 0xab1   :  { %18930 = vst [vmem:[#allocation117_spill] sm:$0xff] %v15771_v16 }
 0xab4   :  { %v15773_v30 = vpop.permute.xlu0 %7035 }
 0xab5   :  { %18931 = vst [vmem:[#allocation119_spill] sm:$0xff] %v15773_v30 }
 0xab8   :  { %v15781_v19 = vpop.permute.xlu0 %7105 }
 0xab9   :  { %18932 = vst [vmem:[#allocation25_spill] sm:$0xff] %v15781_v19 }
 0xabc   :  { %v15801_v0 = vpop.permute.xlu0 %7045 }
 0xabd   :  { %18933 = vst [vmem:[#allocation24_spill] sm:$0xff] %v15801_v0 }
 0xac0   :  { %v15805_v20 = vpop.permute.xlu0 %7115 }
 0xac1   :  { %18934 = vst [vmem:[#allocation29_spill] sm:$0xff] %v15805_v20 }
 0xb2e   :  { %v4612_v63 = vpop.f32.mrb[114].mxu0  ;;  %v4754_v51 = vpop.f32.mrb[114].mxu1 }
 0xb2f   :  { %v15783_v44 = vadd.f32 %v4612_v63, %v4467_v21  ;;  %v15785_v46 = vadd.f32 %v4754_v51, %v4468_v48  ;;  %v4614_v35 = vpop.f32.mrb[115].mxu0  ;;  %v4756_v32 = vpop.f32.mrb[115].mxu1 }
 0xb30   :  { %v15787_v40 = vadd.f32 %v4614_v35, %v4471_v23  ;;  %v15789_v42 = vadd.f32 %v4756_v32, %v4472_v14  ;;  %v15807_v63 = vpop.permute.xlu0 %7055 }
 0xb31   :  { %v4759_v50 = vmul.f32 %v15783_v44, %v15783_v44  ;;  %v4761_v18 = vmul.f32 %v15785_v46, %v15785_v46  ;;  %18935 = vst [vmem:[#allocation28_spill] sm:$0xff] %v15807_v63 }
 0xb32   :  { %v4760_v43 = vmul.f32 %v15787_v40, %v15787_v40  ;;  %v4762_v22 = vmul.f32 %v15789_v42, %v15789_v42 }
 0xb33   :  { %v4764_v2 = vsel %vm4763_vm2, %v4759_v50, 0.0  ;;  %v4767_v37 = vsel %vm4763_vm2, %v4761_v18, 0.0 }
 0xb34   :  { %v4765_v28 = vsel %vm4763_vm2, %v4760_v43, 0.0  ;;  %v4769_v8 = vsel %vm4763_vm2, %v4762_v22, 0.0 }
 0xb35   :  { %v4766_v45 = vadd.f32 %v4765_v28, %v4764_v2 }
 0xb37   :  { %v4768_v47 = vadd.f32 %v4767_v37, %v4766_v45 }
 0xb39   :  { %v4770_v7 = vadd.f32 %v4769_v8, %v4768_v47 }
 0xb3b   :  { %4771 = vadd.xlane.f32.xlu0 %v4770_v7 }
 0xb3c   :  { %v5320_v5 = vpop.f32.mrb[116].mxu0  ;;  %v5427_v36 = vpop.f32.mrb[116].mxu1 }
 0xb3d   :  { %v5322_v31 = vpop.f32.mrb[117].mxu0  ;;  %v5429_v52 = vpop.f32.mrb[117].mxu1  ;;  %v5321_v53 = vadd.f32 %v5320_v5, %v5189_v41  ;;  %v5428_v9 = vadd.f32 %v5427_v36, %v5189_v41 }
 0xb3e   :  { %v5323_v56 = vadd.f32 %v5322_v31, %v5189_v41  ;;  %v5430_v61 = vadd.f32 %v5429_v52, %v5189_v41 }
 0xb3f   :  { %v5468_v51 = vmax.f32 %v5321_v53, 0.0  ;;  %v5470_v35 = vmax.f32 %v5428_v9, 0.0  ;;  %v5204_v53 = vpop.permute.xlu1 %5203 }
 0xb40   :  { %v5326_v24 = vpop.f32.mrb[118].mxu0  ;;  %v5433_v6 = vpop.f32.mrb[118].mxu1  ;;  %v5469_v18 = vmax.f32 %v5323_v56, 0.0  ;;  %v5471_v43 = vmax.f32 %v5430_v61, 0.0 }
 0xb41   :  { %v5327_v33 = vadd.f32 %v5326_v24, %v5194_v39  ;;  %v5434_v57 = vadd.f32 %v5433_v6, %v5194_v39  ;;  %v5328_v21 = vpop.f32.mrb[119].mxu0  ;;  %v5435_v48 = vpop.f32.mrb[119].mxu1 }
 0xb42   :  { %v5329_v23 = vadd.f32 %v5328_v21, %v5194_v39  ;;  %v5436_v14 = vadd.f32 %v5435_v48, %v5194_v39  ;;  %v15813_v48 = vpop.permute.xlu0 %7172 }
 0xb43   :  { %v5472_v32 = vmax.f32 %v5327_v33, 0.0  ;;  %v5474_v50 = vmax.f32 %v5434_v57, 0.0  ;;  %18936 = vst [vmem:[#allocation33_spill] sm:$0xff] %v15813_v48 }
 0xb44   :  { %v5473_v2 = vmax.f32 %v5329_v23, 0.0  ;;  %v5475_v28 = vmax.f32 %v5436_v14, 0.0  ;;  %v5332_v22 = vpop.f32.mrb[120].mxu0  ;;  %v5439_v41 = vpop.f32.mrb[120].mxu1 }
 0xb45   :  { %v10636_v45 = vpack.c.bf16 %v5472_v32, %v5468_v51  ;;  %v10648_v37 = vpack.c.bf16 %v5474_v50, %v5470_v35  ;;  %v5333_v47 = vadd.f32 %v5332_v22, %v15729_v11  ;;  %v5440_v8 = vadd.f32 %v5439_v41, %v15729_v11  ;;  %v5334_v7 = vpop.f32.mrb[121].mxu0  ;;  %v5441_v5 = vpop.f32.mrb[121].mxu1 }
 0xb46   :  { %v10634_v36 = vpack.c.bf16 %v5473_v2, %v5469_v18  ;;  %v10646_v31 = vpack.c.bf16 %v5475_v28, %v5471_v43  ;;  %v5335_v52 = vadd.f32 %v5334_v7, %v15729_v11  ;;  %v5442_v39 = vadd.f32 %v5441_v5, %v15729_v11  ;;  %v5214_v5 = vpop.permute.xlu1 %5213 }
 0xb47   :  { %v5476_v23 = vmax.f32 %v5333_v47, 0.0  ;;  %v5478_v14 = vmax.f32 %v5440_v8, 0.0 }
 0xb48   :  { %v5338_v9 = vpop.f32.mrb[122].mxu0  ;;  %v5445_v56 = vpop.f32.mrb[122].mxu1  ;;  %10635 = vmatprep.subr.bf16.mxu0 %v10634_v36  ;;  %10647 = vmatprep.subr.bf16.mxu1 %v10646_v31  ;;  %v5477_v11 = vmax.f32 %v5335_v52, 0.0  ;;  %v5479_v32 = vmax.f32 %v5442_v39, 0.0 }
 0xb49   :  { %v5339_v61 = vadd.f32 %v5338_v9, %v5204_v53  ;;  %v5446_v24 = vadd.f32 %v5445_v56, %v5204_v53  ;;  %v5340_v6 = vpop.f32.mrb[123].mxu0  ;;  %v5447_v33 = vpop.f32.mrb[123].mxu1  ;;  %10637 = vmatpush1.bf16.msra.mxu0 %v10636_v45  ;;  %10649 = vmatpush1.bf16.msra.mxu1 %v10648_v37 }
 0xb4a   :  { %v5341_v57 = vadd.f32 %v5340_v6, %v5204_v53  ;;  %v5448_v21 = vadd.f32 %v5447_v33, %v5204_v53 }
 0xb4b   :  { %v5480_v51 = vmax.f32 %v5339_v61, 0.0  ;;  %v5482_v35 = vmax.f32 %v5446_v24, 0.0  ;;  %v15819_v24 = vpop.permute.xlu0 %7182 }
 0xb4c   :  { %v5481_v50 = vmax.f32 %v5341_v57, 0.0  ;;  %v5483_v18 = vmax.f32 %v5448_v21, 0.0  ;;  %v5344_v43 = vpop.f32.mrb[124].mxu0  ;;  %v5451_v2 = vpop.f32.mrb[124].mxu1  ;;  %18937 = vst [vmem:[#allocation32_spill] sm:$0xff] %v15819_v24 }
 0xb4d   :  { %v10640_v28 = vpack.c.bf16 %v5480_v51, %v5476_v23  ;;  %v10652_v22 = vpack.c.bf16 %v5482_v35, %v5478_v14  ;;  %v5346_v41 = vpop.f32.mrb[125].mxu0  ;;  %v5453_v7 = vpop.f32.mrb[125].mxu1  ;;  %v5345_v36 = vadd.f32 %v5344_v43, %v15731_v34  ;;  %v5452_v47 = vadd.f32 %v5451_v2, %v15731_v34 }
 0xb4e   :  { %v10638_v45 = vpack.c.bf16 %v5481_v50, %v5477_v11  ;;  %v10650_v37 = vpack.c.bf16 %v5483_v18, %v5479_v32  ;;  %v5347_v8 = vadd.f32 %v5346_v41, %v15731_v34  ;;  %v5454_v31 = vadd.f32 %v5453_v7, %v15731_v34 }
 0xb4f   :  { %v5484_v57 = vmax.f32 %v5345_v36, 0.0  ;;  %v5486_v21 = vmax.f32 %v5452_v47, 0.0  ;;  %v15825_v36 = vpop.permute.xlu0 %7192 }
 0xb50   :  { %v5350_v52 = vpop.f32.mrb[126].mxu0  ;;  %v5457_v39 = vpop.f32.mrb[126].mxu1  ;;  %10639 = vmatprep.subr.bf16.mxu0 %v10638_v45  ;;  %10651 = vmatprep.subr.bf16.mxu1 %v10650_v37  ;;  %v5485_v51 = vmax.f32 %v5347_v8, 0.0  ;;  %v5487_v34 = vmax.f32 %v5454_v31, 0.0  ;;  %18938 = vst [vmem:[#allocation27_spill] sm:$0xff] %v15825_v36 }
 0xb51   :  { %v5351_v53 = vadd.f32 %v5350_v52, %v5214_v5  ;;  %v5458_v9 = vadd.f32 %v5457_v39, %v5214_v5  ;;  %v5352_v56 = vpop.f32.mrb[127].mxu0  ;;  %v5459_v61 = vpop.f32.mrb[127].mxu1  ;;  %10641 = vmatpush1.bf16.msra.mxu0 %v10640_v28  ;;  %10653 = vmatpush1.bf16.msra.mxu1 %v10652_v22  ;;  %v5496_v39 = vld [vmem:[%s18363_s5] sm:$0xff] }
 0xb52   :  { %v5353_v6 = vadd.f32 %v5352_v56, %v5214_v5  ;;  %v5460_v33 = vadd.f32 %v5459_v61, %v5214_v5  ;;  %v5499_v61 = vld [vmem:[%s18363_s5 + $0x18] sm:$0xff] }
 0xb53   :  { %v5488_v23 = vmax.f32 %v5351_v53, 0.0  ;;  %v5490_v14 = vmax.f32 %v5458_v9, 0.0  ;;  %v5497_v53 = vld [vmem:[%s18363_s5 + $0x8] sm:$0xff]  ;;  %v5498_v9 = vld [vmem:[%s18363_s5 + $0x10] sm:$0xff] }
 0xb54   :  { %v5489_v35 = vmax.f32 %v5353_v6, 0.0  ;;  %v5491_v11 = vmax.f32 %v5460_v33, 0.0  ;;  %v5356_v32 = vpop.f32.mrb[128].mxu0  ;;  %v5463_v50 = vpop.f32.mrb[128].mxu1  ;;  %v5500_v33 = vld [vmem:[%s18363_s5 + $0x20] sm:$0xff] }
 0xb55   :  { %v10644_v18 = vpack.c.bf16 %v5488_v23, %v5484_v57  ;;  %v10656_v43 = vpack.c.bf16 %v5490_v14, %v5486_v21  ;;  %v5358_v2 = vpop.f32.mrb[129].mxu0  ;;  %v5465_v41 = vpop.f32.mrb[129].mxu1  ;;  %v5357_v37 = vadd.f32 %v5356_v32, %v15733_v62  ;;  %v5464_v5 = vadd.f32 %v5463_v50, %v15733_v62  ;;  %v5501_v57 = vld [vmem:[%s18363_s5 + $0x28] sm:$0xff]  ;;  %v5502_v23 = vld [vmem:[%s18363_s5 + $0x30] sm:$0x1] }
 0xb56   :  { %v10642_v28 = vpack.c.bf16 %v5489_v35, %v5485_v51  ;;  %v10654_v22 = vpack.c.bf16 %v5491_v11, %v5487_v34  ;;  %v5359_v7 = vadd.f32 %v5358_v2, %v15733_v62  ;;  %v5466_v45 = vadd.f32 %v5465_v41, %v15733_v62  ;;  %v15834_v62 = vpop.permute.xlu0 %7202 }
 0xb57   :  { %v5492_v31 = vmax.f32 %v5357_v37, 0.0  ;;  %v5494_v52 = vmax.f32 %v5464_v5, 0.0  ;;  %18939 = vst [vmem:[#allocation26_spill] sm:$0xff] %v15834_v62 }
 0xb58   :  { %v5493_v47 = vmax.f32 %v5359_v7, 0.0  ;;  %v5495_v8 = vmax.f32 %v5466_v45, 0.0  ;;  %10643 = vmatprep.subr.bf16.mxu0 %v10642_v28  ;;  %10655 = vmatprep.subr.bf16.mxu1 %v10654_v22 }
 0xb59   :  { %10645 = vmatpush1.bf16.msra.mxu0 %v10644_v18  ;;  %10657 = vmatpush1.bf16.msra.mxu1 %v10656_v43 }
 0xb5a   :  { %9880 = vmatprep.subr.msk.mxu0 %vm69_vm0, %v5493_v47  ;;  %9889 = vmatprep.subr.msk.mxu1 %vm69_vm0, %v5495_v8  ;;  %v15850_v56 = vpop.permute.xlu0 %7501 }
 0xb5b   :  { %18940 = vst [vmem:[#allocation31_spill] sm:$0xff] %v15850_v56 }
 0xb5d   :  { %9881 = vmatpush1.msk.msra.mxu0 %vm69_vm0, %v5492_v31  ;;  %9890 = vmatpush1.msk.msra.mxu1 %vm69_vm0, %v5494_v52 }
 0xb5e   :  { %9882 = vmatmul.mubr.msk.f32.vlgmr.msra.gmra.mrb[130].mxu0 %vm459_vm1, %v5496_v39  ;;  %9891 = vmatmul.mubr.msk.f32.vlgmr.msra.gmra.mrb[130].mxu1 %vm459_vm1, %v5496_v39  ;;  %v15859_v6 = vpop.permute.xlu0 %7511 }
 0xb5f   :  { %5648 = vmatprep.mubr.f32.mxu0 %v18740_v38  ;;  %5755 = vmatprep.mubr.f32.mxu1 %v18740_v38  ;;  %18941 = vst [vmem:[#allocation30_spill] sm:$0xff] %v15859_v6 }
 0xb62   :  { %9883 = vmatmul.mubr.msk.f32.gmra.mrb[132].mxu0 %vm459_vm1, %v5497_v53  ;;  %9892 = vmatmul.mubr.msk.f32.gmra.mrb[132].mxu1 %vm459_vm1, %v5497_v53  ;;  %v15875_v21 = vpop.permute.xlu0 %7521 }
 0xb63   :  { %5654 = vmatprep.mubr.f32.mxu0 %v18740_v38  ;;  %5761 = vmatprep.mubr.f32.mxu1 %v18740_v38  ;;  %18942 = vst [vmem:[#allocation35_spill] sm:$0xff] %v15875_v21 }
 0xb66   :  { %9884 = vmatmul.mubr.msk.f32.gmra.mrb[134].mxu0 %vm459_vm1, %v5498_v9  ;;  %9893 = vmatmul.mubr.msk.f32.gmra.mrb[134].mxu1 %vm459_vm1, %v5498_v9  ;;  %v15884_v14 = vpop.permute.xlu0 %8017  ;;  %v5513_v9 = vpop.permute.xlu1 %5512 }
 0xb67   :  { %5660 = vmatprep.mubr.f32.mxu0 %v18740_v38  ;;  %5767 = vmatprep.mubr.f32.mxu1 %v18740_v38  ;;  %18943 = vst [vmem:[#allocation34_spill] sm:$0xff] %v15884_v14 }
 0xb6a   :  { %9885 = vmatmul.mubr.msk.f32.gmra.mrb[136].mxu0 %vm459_vm1, %v5499_v61  ;;  %9894 = vmatmul.mubr.msk.f32.gmra.mrb[136].mxu1 %vm459_vm1, %v5499_v61  ;;  %v15890_v51 = vpop.permute.xlu0 %8087 }
 0xb6b   :  { %5666 = vmatprep.mubr.f32.mxu0 %v18740_v38  ;;  %5773 = vmatprep.mubr.f32.mxu1 %v18740_v38  ;;  %18944 = vst [vmem:[#allocation37_spill] sm:$0xff] %v15890_v51 }
 0xb6e   :  { %9886 = vmatmul.mubr.msk.f32.gmra.mrb[138].mxu0 %vm459_vm1, %v5500_v33  ;;  %9895 = vmatmul.mubr.msk.f32.gmra.mrb[138].mxu1 %vm459_vm1, %v5500_v33  ;;  %v15892_v34 = vpop.permute.xlu0 %8027 }
 0xb6f   :  { %5672 = vmatprep.mubr.f32.mxu0 %v18740_v38  ;;  %5779 = vmatprep.mubr.f32.mxu1 %v18740_v38  ;;  %18945 = vst [vmem:[#allocation36_spill] sm:$0xff] %v15892_v34 }
 0xb72   :  { %9887 = vmatmul.mubr.msk.f32.gmra.mrb[140].mxu0 %vm459_vm1, %v5501_v57  ;;  %9896 = vmatmul.mubr.msk.f32.gmra.mrb[140].mxu1 %vm459_vm1, %v5501_v57  ;;  %v15894_v35 = vpop.permute.xlu0 %8097 }
 0xb73   :  { %5678 = vmatprep.mubr.f32.mxu0 %v18740_v38  ;;  %5785 = vmatprep.mubr.f32.mxu1 %v18740_v38  ;;  %18946 = vst [vmem:[#allocation39_spill] sm:$0xff] %v15894_v35 }
 0xb76   :  { %9888 = vmatmul.mubr.msk.f32.gmra.mrb[142].mxu0 %vm459_vm1, %v5502_v23  ;;  %9897 = vmatmul.mubr.msk.f32.gmra.mrb[142].mxu1 %vm459_vm1, %v5502_v23  ;;  %v15896_v11 = vpop.permute.xlu0 %8037 }
 0xb77   :  { %6310 = vmatprep.mubr.f32.mxu0 %v18740_v38  ;;  %6417 = vmatprep.mubr.f32.mxu1 %v18740_v38  ;;  %18947 = vst [vmem:[#allocation38_spill] sm:$0xff] %v15896_v11 }
 0xb7a   :  { %v15898_v32 = vpop.permute.xlu0 %8107 }
 0xb7b   :  { %18948 = vst [vmem:[#allocation41_spill] sm:$0xff] %v15898_v32 }
 0xb7e   :  { %v15900_v50 = vpop.permute.xlu0 %8047 }
 0xb7f   :  { %18949 = vst [vmem:[#allocation40_spill] sm:$0xff] %v15900_v50 }
 0xb82   :  { %v15902_v18 = vpop.permute.xlu0 %8164 }
 0xb83   :  { %18950 = vst [vmem:[#allocation43_spill] sm:$0xff] %v15902_v18 }
 0xb86   :  { %v15904_v43 = vpop.permute.xlu0 %8174 }
 0xb87   :  { %18951 = vst [vmem:[#allocation42_spill] sm:$0xff] %v15904_v43 }
 0xb8a   :  { %v15906_v2 = vpop.permute.xlu0 %8184 }
 0xb8b   :  { %18952 = vst [vmem:[#allocation45_spill] sm:$0xff] %v15906_v2 }
 0xb8e   :  { %v15908_v41 = vpop.permute.xlu0 %8194 }
 0xb8f   :  { %18953 = vst [vmem:[#allocation47_spill] sm:$0xff] %v15908_v41 }
 0xb92   :  { %v15910_v28 = vpop.permute.xlu0 %8493 }
 0xb93   :  { %18954 = vst [vmem:[#allocation44_spill] sm:$0xff] %v15910_v28 }
 0xb96   :  { %v15912_v22 = vpop.permute.xlu0 %8503 }
 0xb97   :  { %18955 = vst [vmem:[#allocation46_spill] sm:$0xff] %v15912_v22 }
 0xb9a   :  { %v15914_v7 = vpop.permute.xlu0 %8513 }
 0xb9b   :  { %18956 = vst [vmem:[#allocation49_spill] sm:$0xff] %v15914_v7 }
 0xbc8   :  { %v4772_v45 = vpop.xlane.xlu0 %4771 }
 0xbc9   :  { %v4773_v37 = vrot.slane %v4772_v45, 4 }
 0xbcb   :  { %v4774_v5 = vadd.f32 %v4773_v37, %v4772_v45 }
 0xbcd   :  { %v4775_v47 = vrot.slane %v4774_v5, 2 }
 0xbcf   :  { %v4776_v8 = vadd.f32 %v4775_v47, %v4774_v5  ;;  %v5523_v47 = vpop.permute.xlu1 %5522 }
 0xbd1   :  { %v4777_v31 = vrot.slane %v4776_v8, 1 }
 0xbd3   :  { %v4778_v52 = vadd.f32 %v4777_v31, %v4776_v8 }
 0xbd5   :  { %11098 = vpush %v4778_v52 }
 0xc06   :  { %s11099_s18 = spop %11098 }
 0xc07   :  { %s4780_s6 = smax.f32 %s11268_s19, %s11099_s18 }
 0xc08   :  { %v4781_v39 = vstv %s4780_s6 }
 0xc09   :  { %11158 = vrsqrt.f32 %v4781_v39 }
 0xc13   :  { %v11159_v53 = vpop.eup %11158 }
 0xc14   :  { %11100 = vpush %v11159_v53 }
 0xc31   :  { %v5644_v61 = vpop.f32.mrb[130].mxu0  ;;  %v5751_v33 = vpop.f32.mrb[130].mxu1 }
 0xc32   :  { %v5646_v57 = vpop.f32.mrb[131].mxu0  ;;  %v5753_v23 = vpop.f32.mrb[131].mxu1  ;;  %v5645_v52 = vadd.f32 %v5644_v61, %v5513_v9  ;;  %v5752_v22 = vadd.f32 %v5751_v33, %v5513_v9  ;;  %v11215_v61 = vld [vmem:[%s18358_s0 + $0x110] sm:$0xff] }
 0xc33   :  { %v5647_v28 = vadd.f32 %v5646_v57, %v5513_v9  ;;  %v5754_v11 = vadd.f32 %v5753_v23, %v5513_v9  ;;  %v11218_v23 = vld [vmem:[%s18358_s0 + $0xe8] sm:$0xff] }
 0xc35   :  { %v5650_v7 = vpop.f32.mrb[132].mxu0  ;;  %v5757_v45 = vpop.f32.mrb[132].mxu1 }
 0xc36   :  { %v5652_v37 = vpop.f32.mrb[133].mxu0  ;;  %v5759_v5 = vpop.f32.mrb[133].mxu1  ;;  %v5651_v8 = vadd.f32 %v5650_v7, %v15735_v55  ;;  %v5758_v31 = vadd.f32 %v5757_v45, %v15735_v55  ;;  %v11214_v7 = vld [vmem:[%s18358_s0 + $0x100] sm:$0xff] }
 0xc37   :  { %v5653_v39 = vadd.f32 %v5652_v37, %v15735_v55  ;;  %v5760_v2 = vadd.f32 %v5759_v5, %v15735_v55  ;;  %v11216_v55 = vld [vmem:[%s18358_s0 + $0xe0] sm:$0xff]  ;;  %v15944_v37 = vadd.f32 %v11218_v23, %v5647_v28 }
 0xc38   :  { %v15924_v45 = vadd.f32 %v11214_v7, %v5651_v8  ;;  %v15929_v33 = vadd.f32 %v11215_v61, %v5758_v31  ;;  %v11220_v31 = vld [vmem:[%s18358_s0 + $0x118] sm:$0xff] }
 0xc39   :  { %v5656_v53 = vpop.f32.mrb[134].mxu0  ;;  %v5763_v41 = vpop.f32.mrb[134].mxu1  ;;  %18960 = vst [vmem:[#allocation10_spill] sm:$0xff] %v15944_v37 }
 0xc3a   :  { %v5657_v43 = vadd.f32 %v5656_v53, %v5523_v47  ;;  %v5658_v18 = vpop.f32.mrb[135].mxu0  ;;  %v5765_v50 = vpop.f32.mrb[135].mxu1  ;;  %v5764_v32 = vadd.f32 %v5763_v41, %v5523_v47  ;;  %18957 = vst [vmem:[#allocation48_spill] sm:$0xff] %v15929_v33  ;;  %v15934_v41 = vadd.f32 %v11216_v55, %v5645_v52  ;;  %v11221_v52 = vld [vmem:[%s18358_s0 + $0x120] sm:$0xff]  ;;  %v11222_v55 = vld [vmem:[%s18358_s0 + $0x130] sm:$0xff] }
 0xc3b   :  { %v5659_v35 = vadd.f32 %v5658_v18, %v5523_v47  ;;  %v5766_v57 = vadd.f32 %v5765_v50, %v5523_v47  ;;  %v11217_v18 = vld [vmem:[%s18358_s0 + $0xf0] sm:$0xff]  ;;  %v11219_v50 = vld [vmem:[%s18358_s0 + $0x108] sm:$0xff] }
 0xc3c   :  { %18958 = vst [vmem:[#allocation51_spill] sm:$0xff] %v15934_v41  ;;  %v15939_v9 = vadd.f32 %v11217_v18, %v5752_v22  ;;  %v15949_v5 = vadd.f32 %v11219_v50, %v5653_v39  ;;  %v15954_v22 = vadd.f32 %v11220_v31, %v5760_v2  ;;  %v15959_v28 = vadd.f32 %v11221_v52, %v5657_v43  ;;  %v11223_v2 = vld [vmem:[%s18358_s0 + $0x128] sm:$0xff] }
 0xc3d   :  { %v5662_v47 = vpop.f32.mrb[136].mxu0  ;;  %v5769_v8 = vpop.f32.mrb[136].mxu1  ;;  %v15966_v18 = vadd.f32 %v11222_v55, %v5764_v32  ;;  %v15971_v23 = vadd.f32 %v11223_v2, %v5659_v35  ;;  %v5820_v32 = vadd.f32 %v15924_v45, %v15934_v41  ;;  %v11225_v35 = vld [vmem:[%s18358_s0 + $0x138] sm:$0xff]  ;;  %v11227_v55 = vld [vmem:[%s18358_s0 + $0x150] sm:$0xff] }
 0xc3e   :  { %18959 = vst [vmem:[#allocation11_spill] sm:$0xff] %v15939_v9  ;;  %18961 = vst [vmem:[#allocation50_spill] sm:$0xff] %v15949_v5  ;;  %v5663_v53 = vadd.f32 %v5662_v47, %v15737_v1  ;;  %v5770_v7 = vadd.f32 %v5769_v8, %v15737_v1  ;;  %v5664_v39 = vpop.f32.mrb[137].mxu0  ;;  %v5771_v61 = vpop.f32.mrb[137].mxu1  ;;  %v11224_v8 = vld [vmem:[%s18358_s0 + $0xf8] sm:$0xff]  ;;  %v5846_v52 = vadd.f32 %v15929_v33, %v15939_v9 }
 0xc3f   :  { %18962 = vst [vmem:[#allocation15_spill] sm:$0xff] %v15954_v22  ;;  %18963 = vst [vmem:[#allocation5_spill] sm:$0xff] %v15959_v28  ;;  %v5665_v43 = vadd.f32 %v5664_v39, %v15737_v1  ;;  %v5772_v50 = vadd.f32 %v5771_v61, %v15737_v1  ;;  %v5533_v47 = vpop.permute.xlu1 %5532  ;;  %v15978_v31 = vadd.f32 %v11224_v8, %v5754_v11  ;;  %v11226_v11 = vld [vmem:[%s18358_s0 + $0x140] sm:$0xff] }
 0xc40   :  { %18964 = vst [vmem:[#allocation17_spill] sm:$0xff] %v15966_v18  ;;  %18965 = vst [vmem:[#allocation7_spill] sm:$0xff] %v15971_v23  ;;  %v15987_v39 = vadd.f32 %v11225_v35, %v5766_v57  ;;  %v5833_v1 = vadd.f32 %v15949_v5, %v15944_v37  ;;  %v15994_v61 = vadd.f32 %v11226_v11, %v5663_v53  ;;  %v11228_v57 = vld [vmem:[%s18358_s0 + $0x148] sm:$0xff]  ;;  %v11229_v11 = vld [vmem:[%s18358_s0 + $0x158] sm:$0xff] }
 0xc41   :  { %18966 = vst [vmem:[#allocation8_spill] sm:$0xff] %v15978_v31  ;;  %v15999_v2 = vadd.f32 %v11227_v55, %v5770_v7  ;;  %v16004_v8 = vadd.f32 %v11228_v57, %v5665_v43  ;;  %v5668_v35 = vpop.f32.mrb[138].mxu0  ;;  %v5775_v51 = vpop.f32.mrb[138].mxu1  ;;  %v5859_v34 = vadd.f32 %v15954_v22, %v15978_v31  ;;  %v5821_v53 = vadd.f32 %v5820_v32, %v15959_v28 }
 0xc42   :  { %18967 = vst [vmem:[#allocation6_spill] sm:$0xff] %v15987_v39  ;;  %18968 = vst [vmem:[#allocation12_spill] sm:$0xff] %v15994_v61  ;;  %v16012_v14 = vadd.f32 %v11229_v11, %v5772_v50  ;;  %v5669_v7 = vadd.f32 %v5668_v35, %v5533_v47  ;;  %v5670_v55 = vpop.f32.mrb[139].mxu0  ;;  %v5777_v21 = vpop.f32.mrb[139].mxu1  ;;  %v5847_v6 = vadd.f32 %v5846_v52, %v15966_v18  ;;  %v11230_v52 = vld [vmem:[%s18358_s0 + $0x160] sm:$0xff] }
 0xc43   :  { %18969 = vst [vmem:[#allocation9_spill] sm:$0xff] %v15999_v2  ;;  %18970 = vst [vmem:[#allocation19_spill] sm:$0xff] %v16004_v8  ;;  %v5834_v43 = vadd.f32 %v5833_v1, %v15971_v23  ;;  %v5776_v57 = vadd.f32 %v5775_v51, %v5533_v47  ;;  %v5671_v56 = vadd.f32 %v5670_v55, %v5533_v47 }
 0xc44   :  { %18971 = vst [vmem:[#allocation13_spill] sm:$0xff] %v16012_v14  ;;  %v5860_v62 = vadd.f32 %v5859_v34, %v15987_v39  ;;  %v5778_v36 = vadd.f32 %v5777_v21, %v5533_v47  ;;  %v5822_v32 = vadd.f32 %v5821_v53, %v15994_v61  ;;  %v5848_v24 = vadd.f32 %v5847_v6, %v15999_v2  ;;  %v11231_v6 = vld [vmem:[%s18358_s0 + $0x170] sm:$0xff] }
 0xc45   :  { %v5835_v48 = vadd.f32 %v5834_v43, %v16004_v8  ;;  %s11101_s29 = spop %11100  ;;  %v5674_v50 = vpop.f32.mrb[140].mxu0  ;;  %v5781_v35 = vpop.f32.mrb[140].mxu1  ;;  %v16024_v51 = vadd.f32 %v11230_v52, %v5669_v7  ;;  %v16030_v53 = vadd.f32 %v11231_v6, %v5776_v57 }
 0xc46   :  { %v5861_v11 = vadd.f32 %v5860_v62, %v16012_v14  ;;  %v4784_v1 = vstv %s11101_s29  ;;  %v5675_v21 = vadd.f32 %v5674_v50, %v15739_v17  ;;  %v5676_v34 = vpop.f32.mrb[141].mxu0  ;;  %v5783_v47 = vpop.f32.mrb[141].mxu1  ;;  %v11232_v62 = vld [vmem:[%s18358_s0 + $0x168] sm:$0xff]  ;;  %v11233_v50 = vld [vmem:[%s18358_s0 + $0x178] sm:$0xff]  ;;  %v5782_v20 = vadd.f32 %v5781_v35, %v15739_v17 }
 0xc47   :  { %18972 = vst [vmem:[#allocation18_spill] sm:$0xff] %v16024_v51  ;;  %18973 = vst [vmem:[#allocation14_spill] sm:$0xff] %v16030_v53  ;;  %v16035_v55 = vadd.f32 %v11232_v62, %v5671_v56  ;;  %v4785_v7 = vmul.f32 %v15783_v44, %v4784_v1  ;;  %v4786_v43 = vmul.f32 %v15787_v40, %v4784_v1  ;;  %v5543_v52 = vpop.permute.xlu1 %5542  ;;  %v11234_v44 = vld [vmem:[%s18358_s0 + $0x180] sm:$0xff] }
 0xc48   :  { %v16042_v63 = vadd.f32 %v11233_v50, %v5778_v36  ;;  %v4787_v57 = vmul.f32 %v15785_v46, %v4784_v1  ;;  %v4788_v6 = vmul.f32 %v15789_v42, %v4784_v1  ;;  %v16050_v56 = vadd.f32 %v11234_v44, %v5675_v21  ;;  %v11235_v42 = vld [vmem:[%s18358_s0 + $0x190] sm:$0xff]  ;;  %v11236_v21 = vld [vmem:[%s18358_s0 + $0x188] sm:$0xff] }
 0xc49   :  { %18974 = vst [vmem:[#allocation16_spill] sm:$0xff] %v16035_v55  ;;  %v4793_v19 = vcombine.low %v4785_v7, %v4786_v43  ;;  %v5677_v40 = vadd.f32 %v5676_v34, %v15739_v17  ;;  %v5784_v62 = vadd.f32 %v5783_v47, %v15739_v17  ;;  %v5680_v16 = vpop.f32.mrb[142].mxu0  ;;  %v5787_v36 = vpop.f32.mrb[142].mxu1  ;;  %v5823_v50 = vadd.f32 %v5822_v32, %v16024_v51  ;;  %v11237_v32 = vld [vmem:[%s18358_s0 + $0x198] sm:$0xff] }
 0xc4a   :  { %18975 = vst [vmem:[#allocation94_spill] sm:$0xff] %v16042_v63  ;;  %18976 = vst [vmem:[#allocation100_spill] sm:$0xff] %v16050_v56  ;;  %v4794_v46 = vcombine.low %v4787_v57, %v4788_v6  ;;  %v16058_v35 = vadd.f32 %v11235_v42, %v5782_v20  ;;  %v5681_v1 = vadd.f32 %v5680_v16, %v5543_v52  ;;  %v5682_v7 = vpop.f32.mrb[143].mxu0  ;;  %v5789_v43 = vpop.f32.mrb[143].mxu1 }
 0xc4b   :  { %4797 = vst [vmem:[#allocation2] sm:$0xff] %v4793_v19  ;;  %v16063_v17 = vadd.f32 %v11236_v21, %v5677_v40  ;;  %v16068_v34 = vadd.f32 %v11237_v32, %v5784_v62  ;;  %v5788_v47 = vadd.f32 %v5787_v36, %v5543_v52  ;;  %v5683_v57 = vadd.f32 %v5682_v7, %v5543_v52  ;;  %v11238_v19 = vld [vmem:[%s18358_s0 + $0x1a0] sm:$0x1]  ;;  %v11239_v62 = vld [vmem:[%s18358_s0 + $0x1b0] sm:$0x1] }
 0xc4c   :  { %18977 = vst [vmem:[#allocation21_spill] sm:$0xff] %v16058_v35  ;;  %v5849_v20 = vadd.f32 %v5848_v24, %v16030_v53  ;;  %v5836_v16 = vadd.f32 %v5835_v48, %v16035_v55  ;;  %4798 = vst [vmem:[#allocation2 + $0x8] sm:$0xff] %v4794_v46  ;;  %v16075_v6 = vadd.f32 %v11238_v19, %v5681_v1  ;;  %v11240_v48 = vld [vmem:[%s18358_s0 + $0x1a8] sm:$0x1] }
 0xc4d   :  { %18978 = vst [vmem:[#allocation53_spill] sm:$0xff] %v16063_v17  ;;  %18979 = vst [vmem:[#allocation52_spill] sm:$0xff] %v16068_v34  ;;  %v5790_v44 = vadd.f32 %v5789_v43, %v5543_v52  ;;  %v5862_v40 = vadd.f32 %v5861_v11, %v16042_v63  ;;  %v5824_v42 = vadd.f32 %v5823_v50, %v16050_v56  ;;  %v11241_v50 = vld [vmem:[%s18358_s0 + $0x1b8] sm:$0x1] }
 0xc4e   :  { %18980 = vst [vmem:[#allocation57_spill] sm:$0xff] %v16075_v6  ;;  %v16082_v36 = vadd.f32 %v11239_v62, %v5788_v47  ;;  %v16087_v24 = vadd.f32 %v11240_v48, %v5683_v57  ;;  %v5850_v46 = vadd.f32 %v5849_v20, %v16058_v35  ;;  %v5837_v52 = vadd.f32 %v5836_v16, %v16063_v17 }
 0xc4f   :  { %v5825_v11 = vsel %vm69_vm0, %v16075_v6, 0.0  ;;  %v16096_v1 = vadd.f32 %v11241_v50, %v5790_v44  ;;  %v5863_v7 = vadd.f32 %v5862_v40, %v16068_v34 }
 0xc50   :  { %18981 = vst [vmem:[#allocation56_spill] sm:$0xff] %v16082_v36  ;;  %18982 = vst [vmem:[#allocation55_spill] sm:$0xff] %v16087_v24  ;;  %v5826_v43 = vadd.f32 %v5825_v11, %v5824_v42  ;;  %v5851_v21 = vsel %vm69_vm0, %v16082_v36, 0.0  ;;  %v5838_v32 = vsel %vm69_vm0, %v16087_v24, 0.0 }
 0xc51   :  { %18983 = vst [vmem:[#allocation54_spill] sm:$0xff] %v16096_v1  ;;  %v5852_v47 = vadd.f32 %v5851_v21, %v5850_v46  ;;  %v5839_v57 = vadd.f32 %v5838_v32, %v5837_v52  ;;  %v5864_v20 = vsel %vm69_vm0, %v16096_v1, 0.0 }
 0xc52   :  { %v5827_v16 = vrot.slane %v5826_v43, 4  ;;  %v5865_v19 = vadd.f32 %v5864_v20, %v5863_v7 }
 0xc53   :  { %v5853_v62 = vrot.slane %v5852_v47, 4  ;;  %v5840_v48 = vrot.slane %v5839_v57, 4 }
 0xc54   :  { %v5828_v44 = vadd.f32 %v5827_v16, %v5826_v43  ;;  %v5866_v40 = vrot.slane %v5865_v19, 4 }
 0xc55   :  { %v5854_v50 = vadd.f32 %v5853_v62, %v5852_v47  ;;  %v5841_v0 = vadd.f32 %v5840_v48, %v5839_v57 }
 0xc56   :  { %v5829_v42 = vrot.slane %v5828_v44, 2  ;;  %v5867_v60 = vadd.f32 %v5866_v40, %v5865_v19 }
 0xc57   :  { %v5855_v11 = vrot.slane %v5854_v50, 2  ;;  %v5842_v30 = vrot.slane %v5841_v0, 2 }
 0xc58   :  { %v5830_v58 = vadd.f32 %v5829_v42, %v5828_v44  ;;  %v5868_v29 = vrot.slane %v5867_v60, 2 }
 0xc59   :  { %v5856_v49 = vadd.f32 %v5855_v11, %v5854_v50  ;;  %v5843_v26 = vadd.f32 %v5842_v30, %v5841_v0 }
 0xc5a   :  { %v5831_v46 = vrot.slane %v5830_v58, 1 }
 0xc5b   :  { %v5857_v52 = vrot.slane %v5856_v49, 1  ;;  %v5844_v21 = vrot.slane %v5843_v26, 1 }
 0xc5c   :  { %v5832_v32 = vadd.f32 %v5831_v46, %v5830_v58 }
 0xc5d   :  { %v5858_v12 = vadd.f32 %v5857_v52, %v5856_v49  ;;  %v5845_v54 = vadd.f32 %v5844_v21, %v5843_v26  ;;  %v5869_v49 = vadd.f32 %v5868_v29, %v5867_v60 }
 0xc5e   :  { %v5872_v7 = vmul.f32 0.020408163, %v5832_v32 }
 0xc5f   :  { %v5874_v20 = vmul.f32 0.020408163, %v5858_v12  ;;  %v5873_v62 = vmul.f32 0.020408163, %v5845_v54  ;;  %v5870_v42 = vrot.slane %v5869_v49, 1 }
 0xc60   :  { %v16106_v43 = vsub.f32 %v15934_v41, %v5872_v7  ;;  %v16109_v47 = vsub.f32 %v15924_v45, %v5872_v7  ;;  %v16112_v57 = vsub.f32 %v15959_v28, %v5872_v7  ;;  %v16115_v30 = vsub.f32 %v15994_v61, %v5872_v7 }
 0xc61   :  { %v16118_v0 = vsub.f32 %v15939_v9, %v5874_v20  ;;  %v16121_v58 = vsub.f32 %v16024_v51, %v5872_v7  ;;  %v16128_v16 = vsub.f32 %v16075_v6, %v5872_v7  ;;  %v16131_v19 = vsub.f32 %v15929_v33, %v5874_v20 }
 0xc62   :  { %v5904_v12 = vmul.f32 %v16106_v43, %v16106_v43  ;;  %v5908_v26 = vmul.f32 %v16109_v47, %v16109_v47  ;;  %v5912_v48 = vmul.f32 %v16112_v57, %v16112_v57  ;;  %v16136_v60 = vsub.f32 %v15966_v18, %v5874_v20 }
 0xc63   :  { %v16139_v44 = vsub.f32 %v16050_v56, %v5872_v7  ;;  %v5916_v50 = vmul.f32 %v16115_v30, %v16115_v30  ;;  %v5906_v40 = vmul.f32 %v16118_v0, %v16118_v0  ;;  %v5920_v54 = vmul.f32 %v16121_v58, %v16121_v58 }
 0xc64   :  { %v5932_v29 = vadd.f32 %v5908_v26, %v5904_v12  ;;  %v16148_v46 = vsub.f32 %v15999_v2, %v5874_v20  ;;  %v5910_v52 = vmul.f32 %v16131_v19, %v16131_v19  ;;  %v5928_v21 = vmul.f32 %v16128_v16, %v16128_v16 }
 0xc65   :  { %v16155_v32 = vsub.f32 %v16030_v53, %v5874_v20  ;;  %v16158_v7 = vsub.f32 %v16082_v36, %v5874_v20  ;;  %v16161_v12 = vsub.f32 %v15944_v37, %v5873_v62  ;;  %v16166_v6 = vsub.f32 %v15949_v5, %v5873_v62 }
 0xc66   :  { %v5933_v11 = vadd.f32 %v5932_v29, %v5912_v48  ;;  %v5914_v48 = vmul.f32 %v16136_v60, %v16136_v60  ;;  %v5958_v29 = vadd.f32 %v5910_v52, %v5906_v40  ;;  %v5924_v2 = vmul.f32 %v16139_v44, %v16139_v44 }
 0xc67   :  { %v16171_v53 = vsub.f32 %v16058_v35, %v5874_v20  ;;  %v16174_v36 = vsub.f32 %v15971_v23, %v5873_v62  ;;  %v5871_v56 = vadd.f32 %v5870_v42, %v5869_v49  ;;  %v5905_v40 = vmul.f32 %v16161_v12, %v16161_v12 }
 0xc68   :  { %v5934_v26 = vadd.f32 %v5933_v11, %v5916_v50  ;;  %v5918_v50 = vmul.f32 %v16148_v46, %v16148_v46  ;;  %v5959_v11 = vadd.f32 %v5958_v29, %v5914_v48  ;;  %v5937_v52 = vsel %vm69_vm0, %v5928_v21, 0.0 }
 0xc69   :  { %v5922_v18 = vmul.f32 %v16155_v32, %v16155_v32  ;;  %v16184_v20 = vsub.f32 %v16004_v8, %v5873_v62  ;;  %v5909_v35 = vmul.f32 %v16166_v6, %v16166_v6  ;;  %v5930_v42 = vmul.f32 %v16158_v7, %v16158_v7 }
 0xc6a   :  { %v5935_v51 = vadd.f32 %v5934_v26, %v5920_v54  ;;  %v5960_v54 = vadd.f32 %v5959_v11, %v5918_v50  ;;  %v16191_v26 = vsub.f32 %v16035_v55, %v5873_v62  ;;  %v16194_v48 = vsub.f32 %v16087_v24, %v5873_v62 }
 0xc6b   :  { %v5913_v21 = vmul.f32 %v16174_v36, %v16174_v36  ;;  %v5945_v29 = vadd.f32 %v5909_v35, %v5905_v40  ;;  %v5875_v8 = vmul.f32 0.020408163, %v5871_v56  ;;  %v5926_v9 = vmul.f32 %v16171_v53, %v16171_v53 }
 0xc6c   :  { %v5936_v49 = vadd.f32 %v5935_v51, %v5924_v2  ;;  %v5961_v2 = vadd.f32 %v5960_v54, %v5922_v18  ;;  %v16201_v51 = vsub.f32 %v16063_v17, %v5873_v62  ;;  %v5917_v50 = vmul.f32 %v16184_v20, %v16184_v20 }
 0xc6d   :  { %v5946_v11 = vadd.f32 %v5945_v29, %v5913_v21  ;;  %v16206_v24 = vsub.f32 %v15978_v31, %v5875_v8  ;;  %v16209_v55 = vsub.f32 %v15954_v22, %v5875_v8  ;;  %v5963_v40 = vsel %vm69_vm0, %v5930_v42, 0.0 }
 0xc6e   :  { %v5938_v61 = vadd.f32 %v5937_v52, %v5936_v49  ;;  %v5962_v56 = vadd.f32 %v5961_v2, %v5926_v9  ;;  %v16213_v52 = vsub.f32 %v15987_v39, %v5875_v8  ;;  %v5921_v18 = vmul.f32 %v16191_v26, %v16191_v26 }
 0xc6f   :  { %v5929_v62 = vmul.f32 %v16194_v48, %v16194_v48  ;;  %v5947_v49 = vadd.f32 %v5946_v11, %v5917_v50  ;;  %v5907_v54 = vmul.f32 %v16206_v24, %v16206_v24  ;;  %v16222_v17 = vsub.f32 %v16012_v14, %v5875_v8 }
 0xc70   :  { %v5939_v35 = vrot.slane %v5938_v61, 4  ;;  %v5964_v29 = vadd.f32 %v5963_v40, %v5962_v56  ;;  %v5911_v9 = vmul.f32 %v16209_v55, %v16209_v55  ;;  %v5925_v42 = vmul.f32 %v16201_v51, %v16201_v51 }
 0xc71   :  { %v5948_v2 = vadd.f32 %v5947_v49, %v5921_v18  ;;  %v16229_v39 = vsub.f32 %v16042_v63, %v5875_v8  ;;  %v5915_v11 = vmul.f32 %v16213_v52, %v16213_v52  ;;  %v5950_v56 = vsel %vm69_vm0, %v5929_v62, 0.0 }
 0xc72   :  { %v5940_v21 = vadd.f32 %v5939_v35, %v5938_v61  ;;  %v5965_v50 = vrot.slane %v5964_v29, 4  ;;  %v5971_v61 = vadd.f32 %v5911_v9, %v5907_v54  ;;  %v16235_v40 = vsub.f32 %v16068_v34, %v5875_v8 }
 0xc73   :  { %v5949_v35 = vadd.f32 %v5948_v2, %v5925_v42  ;;  %v16238_v14 = vsub.f32 %v16096_v1, %v5875_v8  ;;  %v5919_v49 = vmul.f32 %v16222_v17, %v16222_v17  ;;  %v5923_v54 = vmul.f32 %v16229_v39, %v16229_v39  ;;  %v16246_v2 = vpop.permute.xlu1 %6038 }
 0xc74   :  { %v5941_v31 = vrot.slane %v5940_v21, 2  ;;  %v5966_v18 = vadd.f32 %v5965_v50, %v5964_v29  ;;  %v5972_v63 = vadd.f32 %v5971_v61, %v5915_v11 }
 0xc75   :  { %v5951_v23 = vadd.f32 %v5950_v56, %v5949_v35  ;;  %v5931_v42 = vmul.f32 %v16238_v14, %v16238_v14 }
 0xc76   :  { %v5942_v22 = vadd.f32 %v5941_v31, %v5940_v21  ;;  %v5967_v37 = vrot.slane %v5966_v18, 2  ;;  %v5973_v9 = vadd.f32 %v5972_v63, %v5919_v49  ;;  %v5927_v21 = vmul.f32 %v16235_v40, %v16235_v40 }
 0xc77   :  { %v5952_v62 = vrot.slane %v5951_v23, 4  ;;  %v5976_v1 = vsel %vm69_vm0, %v5931_v42, 0.0  ;;  %v16251_v41 = vpop.permute.xlu1 %6108 }
 0xc78   :  { %v5943_v33 = vrot.slane %v5942_v22, 1  ;;  %v5968_v31 = vadd.f32 %v5967_v37, %v5966_v18  ;;  %v5974_v29 = vadd.f32 %v5973_v9, %v5923_v54 }
 0xc79   :  { %v5953_v50 = vadd.f32 %v5952_v62, %v5951_v23 }
 0xc7a   :  { %v5944_v8 = vadd.f32 %v5943_v33, %v5942_v22  ;;  %v5969_v61 = vrot.slane %v5968_v31, 1  ;;  %v5975_v35 = vadd.f32 %v5974_v29, %v5927_v21 }
 0xc7b   :  { %v5954_v56 = vrot.slane %v5953_v50, 2  ;;  %v16253_v62 = vpop.permute.xlu1 %6048 }
 0xc7c   :  { %v5984_v11 = vmul.f32 0.020408163, %v5944_v8  ;;  %v5970_v49 = vadd.f32 %v5969_v61, %v5968_v31  ;;  %v5977_v34 = vadd.f32 %v5976_v1, %v5975_v35 }
 0xc7d   :  { %v5955_v28 = vadd.f32 %v5954_v56, %v5953_v50 }
 0xc7e   :  { %v5988_v63 = vadd.f32 1e-05, %v5984_v11  ;;  %v5986_v33 = vmul.f32 0.020408163, %v5970_v49  ;;  %v5978_v37 = vrot.slane %v5977_v34, 4 }
 0xc7f   :  { %v5956_v22 = vrot.slane %v5955_v28, 1  ;;  %v16258_v61 = vpop.permute.xlu1 %6118 }
 0xc80   :  { %11160 = vrsqrt.f32 %v5988_v63  ;;  %v5990_v18 = vadd.f32 1e-05, %v5986_v33  ;;  %v5979_v5 = vadd.f32 %v5978_v37, %v5977_v34 }
 0xc81   :  { %v5957_v54 = vadd.f32 %v5956_v22, %v5955_v28 }
 0xc82   :  { %11162 = vrsqrt.f32 %v5990_v18  ;;  %v5980_v23 = vrot.slane %v5979_v5, 2 }
 0xc83   :  { %v5985_v9 = vmul.f32 0.020408163, %v5957_v54 }
 0xc84   :  { %v5981_v8 = vadd.f32 %v5980_v23, %v5979_v5  ;;  %v16281_v23 = vpop.permute.xlu1 %6058 }
 0xc85   :  { %v5989_v42 = vadd.f32 1e-05, %v5985_v9 }
 0xc86   :  { %v5982_v21 = vrot.slane %v5981_v8, 1 }
 0xc87   :  { %11164 = vrsqrt.f32 %v5989_v42 }
 0xc88   :  { %v5983_v31 = vadd.f32 %v5982_v21, %v5981_v8 }
 0xc8a   :  { %v11161_v1 = vpop.eup %11160  ;;  %v5987_v28 = vmul.f32 0.020408163, %v5983_v31 }
 0xc8b   :  { %v5996_v29 = vmul.f32 %v11161_v1, %v16106_v43  ;;  %v6000_v50 = vmul.f32 %v11161_v1, %v16109_v47  ;;  %v6004_v11 = vmul.f32 %v11161_v1, %v16112_v57  ;;  %v6008_v34 = vmul.f32 %v11161_v1, %v16115_v30 }
 0xc8c   :  { %v16264_v63 = vpop.eup %11162  ;;  %v5991_v49 = vadd.f32 1e-05, %v5987_v28  ;;  %v6012_v33 = vmul.f32 %v11161_v1, %v16121_v58  ;;  %v6016_v37 = vmul.f32 %v11161_v1, %v16139_v44  ;;  %v6020_v58 = vmul.f32 %v11161_v1, %v16128_v16 }
 0xc8d   :  { %v6066_v35 = vmul.f32 %v15741_v27, %v5996_v29  ;;  %v6070_v5 = vmul.f32 %v16246_v2, %v6000_v50  ;;  %v6074_v56 = vmul.f32 %v15745_v10, %v6004_v11  ;;  %v6078_v43 = vmul.f32 %v16253_v62, %v6008_v34 }
 0xc8e   :  { %11166 = vrsqrt.f32 %v5991_v49  ;;  %v5998_v30 = vmul.f32 %v16264_v63, %v16118_v0  ;;  %v6002_v22 = vmul.f32 %v16264_v63, %v16131_v19  ;;  %v6082_v44 = vmul.f32 %v15749_v3, %v6012_v33 }
 0xc8f   :  { %v6136_v47 = vadd.f32 %v15743_v4, %v6066_v35  ;;  %v6140_v57 = vadd.f32 %v16251_v41, %v6070_v5  ;;  %v16276_v18 = vadd.f32 %v15747_v15, %v6074_v56  ;;  %v16279_v54 = vadd.f32 %v16258_v61, %v6078_v43  ;;  %v6129_v43 = vpop.permute.xlu1 %6128 }
 0xc90   :  { %v6086_v42 = vmul.f32 %v16281_v23, %v6016_v37  ;;  %v6068_v21 = vmul.f32 %v15741_v27, %v5998_v30  ;;  %v6006_v31 = vmul.f32 %v16264_v63, %v16136_v60  ;;  %v6072_v29 = vmul.f32 %v16246_v2, %v6002_v22 }
 0xc91   :  { %v11165_v9 = vpop.eup %11164  ;;  %v10660_v8 = vpack.c.bf16 %v6140_v57, %v6136_v47  ;;  %v10664_v1 = vpack.c.bf16 %v16279_v54, %v16276_v18  ;;  %v6014_v22 = vmul.f32 %v16264_v63, %v16155_v32 }
 0xc92   :  { %v5997_v0 = vmul.f32 %v11165_v9, %v16161_v12  ;;  %v6001_v19 = vmul.f32 %v11165_v9, %v16166_v6  ;;  %v6005_v50 = vmul.f32 %v11165_v9, %v16174_v36  ;;  %v6009_v16 = vmul.f32 %v11165_v9, %v16184_v20 }
 0xc93   :  { %v6010_v6 = vmul.f32 %v16264_v63, %v16148_v46  ;;  %v6013_v28 = vmul.f32 %v11165_v9, %v16191_v26  ;;  %v6017_v36 = vmul.f32 %v11165_v9, %v16201_v51  ;;  %v6152_v20 = vadd.f32 %v15751_v25, %v6082_v44 }
 0xc94   :  { %v6067_v11 = vmul.f32 %v15741_v27, %v5997_v0  ;;  %v6071_v12 = vmul.f32 %v16246_v2, %v6001_v19  ;;  %v6075_v60 = vmul.f32 %v15745_v10, %v6005_v50  ;;  %v6079_v34 = vmul.f32 %v16253_v62, %v6009_v16 }
 0xc95   :  { %v6138_v56 = vadd.f32 %v15743_v4, %v6068_v21  ;;  %v6083_v49 = vmul.f32 %v15749_v3, %v6013_v28  ;;  %v6076_v47 = vmul.f32 %v15745_v10, %v6006_v31  ;;  %v6087_v57 = vmul.f32 %v16281_v23, %v6017_v36  ;;  %v6134_v28 = vpop.permute.xlu1 %6133 }
 0xc96   :  { %v6137_v35 = vadd.f32 %v15743_v4, %v6067_v11  ;;  %v6141_v5 = vadd.f32 %v16251_v41, %v6071_v12  ;;  %v6145_v46 = vadd.f32 %v15747_v15, %v6075_v60  ;;  %v6149_v26 = vadd.f32 %v16258_v61, %v6079_v34 }
 0xc97   :  { %v6021_v33 = vmul.f32 %v11165_v9, %v16194_v48  ;;  %v6156_v30 = vadd.f32 %v6129_v43, %v6086_v42  ;;  %v6153_v0 = vadd.f32 %v15751_v25, %v6083_v49  ;;  %v6157_v31 = vadd.f32 %v6129_v43, %v6087_v57  ;;  %v9913_v49 = vld [vmem:[%s18361_s3 + $0x40] sm:$0xff]  ;;  %v9918_v57 = vld [vmem:[%s18361_s3 + $0x68] sm:$0x1] }
 0xc98   :  { %v11167_v51 = vpop.eup %11166  ;;  %v10658_v37 = vpack.c.bf16 %v6141_v5, %v6137_v35  ;;  %v10662_v44 = vpack.c.bf16 %v6149_v26, %v6145_v46  ;;  %v9915_v46 = vld [vmem:[%s18361_s3 + $0x50] sm:$0xff]  ;;  %v9916_v26 = vld [vmem:[%s18361_s3 + $0x58] sm:$0xff] }
 0xc99   :  { %v5999_v18 = vmul.f32 %v11167_v51, %v16206_v24  ;;  %v6003_v54 = vmul.f32 %v11167_v51, %v16209_v55  ;;  %v6007_v19 = vmul.f32 %v11167_v51, %v16213_v52  ;;  %v6011_v21 = vmul.f32 %v11167_v51, %v16222_v17 }
 0xc9a   :  { %10659 = vmatprep.subr.bf16.mxu0 %v10658_v37  ;;  %v6015_v48 = vmul.f32 %v11167_v51, %v16229_v39  ;;  %v6142_v24 = vadd.f32 %v16251_v41, %v6072_v29  ;;  %v6019_v55 = vmul.f32 %v11167_v51, %v16235_v40  ;;  %v6080_v52 = vmul.f32 %v16253_v62, %v6010_v6 }
 0xc9b   :  { %v6069_v9 = vmul.f32 %v15741_v27, %v5999_v18  ;;  %v6073_v42 = vmul.f32 %v16246_v2, %v6003_v54  ;;  %10661 = vmatpush1.bf16.msra.mxu0 %v10660_v8  ;;  %v6077_v32 = vmul.f32 %v15745_v10, %v6007_v19  ;;  %v6081_v50 = vmul.f32 %v16253_v62, %v6011_v21 }
 0xc9c   :  { %10663 = vmatprep.subr.bf16.mxu0 %v10662_v44  ;;  %v6018_v17 = vmul.f32 %v16264_v63, %v16171_v53  ;;  %v6085_v2 = vmul.f32 %v15749_v3, %v6015_v48  ;;  %v6089_v8 = vmul.f32 %v16281_v23, %v6019_v55  ;;  %v6090_v40 = vmul.f32 %v15753_v13, %v6020_v58 }
 0xc9d   :  { %v6139_v39 = vadd.f32 %v15743_v4, %v6069_v9  ;;  %v6143_v27 = vadd.f32 %v16251_v41, %v6073_v42  ;;  %v6147_v29 = vadd.f32 %v15747_v15, %v6077_v32  ;;  %v6151_v10 = vadd.f32 %v16258_v61, %v6081_v50 }
 0xc9e   :  { %v10666_v16 = vpack.c.bf16 %v6157_v31, %v6153_v0  ;;  %v10672_v62 = vpack.c.bf16 %v6142_v24, %v6138_v56  ;;  %v6146_v53 = vadd.f32 %v15747_v15, %v6076_v47  ;;  %v6091_v4 = vmul.f32 %v15753_v13, %v6021_v33  ;;  %v9912_v56 = vld [vmem:[%s18361_s3 + $0x38] sm:$0xff]  ;;  %v9917_v47 = vld [vmem:[%s18361_s3 + $0x60] sm:$0xff] }
 0xc9f   :  { %v10670_v11 = vpack.c.bf16 %v6143_v27, %v6139_v39  ;;  %10665 = vmatpush1.bf16.msra.mxu0 %v10664_v1  ;;  %v6150_v41 = vadd.f32 %v16258_v61, %v6080_v52  ;;  %v10668_v12 = vpack.c.bf16 %v6156_v30, %v6152_v20  ;;  %v6084_v6 = vmul.f32 %v15749_v3, %v6014_v22  ;;  %v6186_v30 = vpop.permute.xlu1 %6185 }
 0xca0   :  { %10667 = vmatprep.subr.bf16.mxu0 %v10666_v16  ;;  %v6088_v58 = vmul.f32 %v16281_v23, %v6018_v17  ;;  %v6023_v60 = vmul.f32 %v11167_v51, %v16238_v14  ;;  %v10674_v34 = vpack.c.bf16 %v6151_v10, %v6147_v29  ;;  %v6155_v36 = vadd.f32 %v15751_v25, %v6085_v2  ;;  %v18984_v2 = vld [vmem:[#allocation116_spill] sm:$0xff] }
 0xca1   :  { %10671 = vmatprep.subr.bf16.mxu1 %v10670_v11  ;;  %v6159_v1 = vadd.f32 %v6129_v43, %v6089_v8  ;;  %v6161_v15 = vadd.f32 %v6134_v28, %v6091_v4  ;;  %v6022_v61 = vmul.f32 %v16264_v63, %v16158_v7  ;;  %v10676_v20 = vpack.c.bf16 %v6150_v41, %v6146_v53 }
 0xca2   :  { %10673 = vmatpush1.bf16.msra.mxu1 %v10672_v62  ;;  %v6154_v3 = vadd.f32 %v15751_v25, %v6084_v6  ;;  %v6158_v35 = vadd.f32 %v6129_v43, %v6088_v58  ;;  %v6093_v14 = vmul.f32 %v15753_v13, %v6023_v60  ;;  %v6160_v5 = vadd.f32 %v6134_v28, %v6090_v40 }
 0xca3   :  { %10675 = vmatprep.subr.bf16.mxu1 %v10674_v34  ;;  %10669 = vmatpush1.bf16.msra.mxu0 %v10668_v12  ;;  %v10678_v23 = vpack.c.bf16 %v6159_v1, %v6155_v36  ;;  %v6092_v7 = vmul.f32 %v15753_v13, %v6022_v61  ;;  %v9914_v13 = vld [vmem:[%s18361_s3 + $0x48] sm:$0xff]  ;;  %v6196_v17 = vpop.permute.xlu1 %6195 }
 0xca4   :  { %9926 = vmatprep.subr.msk.mxu0 %vm69_vm0, %v6161_v15  ;;  %v10680_v63 = vpack.c.bf16 %v6158_v35, %v6154_v3  ;;  %v6163_v25 = vadd.f32 %v6134_v28, %v6093_v14 }
 0xca5   :  { %v6162_v43 = vadd.f32 %v6134_v28, %v6092_v7 }
 0xca6   :  { %10677 = vmatpush1.bf16.msra.mxu1 %v10676_v20 }
 0xca7   :  { %10679 = vmatprep.subr.bf16.mxu1 %v10678_v23  ;;  %9927 = vmatpush1.msk.msra.mxu0 %vm69_vm0, %v6160_v5  ;;  %v6206_v5 = vpop.permute.xlu1 %6205 }
 0xca8   :  { %9928 = vmatmul.mubr.msk.f32.vlgmr.msra.gmra.mrb[144].mxu0 %vm459_vm1, %v9912_v56 }
 0xca9   :  { %6316 = vmatprep.mubr.f32.mxu0 %v18740_v38 }
 0xcaa   :  { %10681 = vmatpush1.bf16.msra.mxu1 %v10680_v63  ;;  %v18985_v63 = vld [vmem:[#allocation107_spill] sm:$0xff] }
 0xcab   :  { %9935 = vmatprep.subr.msk.mxu1 %vm69_vm0, %v6163_v25 }
 0xcac   :  { %9929 = vmatmul.mubr.msk.f32.gmra.mrb[146].mxu0 %vm459_vm1, %v9913_v49 }
 0xcad   :  { %6322 = vmatprep.mubr.f32.mxu0 %v18740_v38 }
 0xcae   :  { %9936 = vmatpush1.msk.msra.mxu1 %vm69_vm0, %v6162_v43 }
 0xcaf   :  { %9937 = vmatmul.mubr.msk.f32.vlgmr.msra.gmra.mrb[144].mxu1 %vm459_vm1, %v9912_v56 }
 0xcb0   :  { %6423 = vmatprep.mubr.f32.mxu1 %v18740_v38  ;;  %9930 = vmatmul.mubr.msk.f32.gmra.mrb[148].mxu0 %vm459_vm1, %v9914_v13 }
 0xcb1   :  { %6328 = vmatprep.mubr.f32.mxu0 %v18740_v38 }
 0xcb3   :  { %9938 = vmatmul.mubr.msk.f32.gmra.mrb[146].mxu1 %vm459_vm1, %v9913_v49 }
 0xcb4   :  { %6429 = vmatprep.mubr.f32.mxu1 %v18740_v38  ;;  %9931 = vmatmul.mubr.msk.f32.gmra.mrb[150].mxu0 %vm459_vm1, %v9915_v46 }
 0xcb5   :  { %6334 = vmatprep.mubr.f32.mxu0 %v18740_v38 }
 0xcb7   :  { %9939 = vmatmul.mubr.msk.f32.gmra.mrb[148].mxu1 %vm459_vm1, %v9914_v13 }
 0xcb8   :  { %6435 = vmatprep.mubr.f32.mxu1 %v18740_v38  ;;  %9932 = vmatmul.mubr.msk.f32.gmra.mrb[152].mxu0 %vm459_vm1, %v9916_v26 }
 0xcb9   :  { %6340 = vmatprep.mubr.f32.mxu0 %v18740_v38 }
 0xcbb   :  { %9940 = vmatmul.mubr.msk.f32.gmra.mrb[150].mxu1 %vm459_vm1, %v9915_v46 }
 0xcbc   :  { %6441 = vmatprep.mubr.f32.mxu1 %v18740_v38  ;;  %9933 = vmatmul.mubr.msk.f32.gmra.mrb[154].mxu0 %vm459_vm1, %v9917_v47 }
 0xcbd   :  { %6346 = vmatprep.mubr.f32.mxu0 %v18740_v38 }
 0xcbf   :  { %9941 = vmatmul.mubr.msk.f32.gmra.mrb[152].mxu1 %vm459_vm1, %v9916_v26 }
 0xcc0   :  { %6447 = vmatprep.mubr.f32.mxu1 %v18740_v38  ;;  %9934 = vmatmul.mubr.msk.f32.gmra.mrb[156].mxu0 %vm459_vm1, %v9918_v57 }
 0xcc1   :  { %6634 = vmatprep.mubr.f32.mxu0 %v18740_v38 }
 0xcc3   :  { %9942 = vmatmul.mubr.msk.f32.gmra.mrb[154].mxu1 %vm459_vm1, %v9917_v47 }
 0xcc4   :  { %6453 = vmatprep.mubr.f32.mxu1 %v18740_v38 }
 0xcc7   :  { %9943 = vmatmul.mubr.msk.f32.gmra.mrb[156].mxu1 %vm459_vm1, %v9918_v57 }
 0xcc8   :  { %6741 = vmatprep.mubr.f32.mxu1 %v18740_v38 }
 0xd7b   :  { %v6312_v51 = vpop.f32.mrb[144].mxu0 }
 0xd7c   :  { %v6314_v33 = vpop.f32.mrb[145].mxu0  ;;  %v6313_v37 = vadd.f32 %v6312_v51, %v15755_v59 }
 0xd7d   :  { %v6315_v22 = vadd.f32 %v6314_v33, %v15755_v59 }
 0xd7e   :  { %v6460_v19 = vmax.f32 %v6313_v37, 0.0 }
 0xd7f   :  { %v6318_v18 = vpop.f32.mrb[146].mxu0  ;;  %v6461_v48 = vmax.f32 %v6315_v22, 0.0 }
 0xd80   :  { %v6319_v54 = vadd.f32 %v6318_v18, %v6186_v30  ;;  %v6320_v44 = vpop.f32.mrb[147].mxu0 }
 0xd81   :  { %v6321_v0 = vadd.f32 %v6320_v44, %v6186_v30 }
 0xd82   :  { %v6419_v21 = vpop.f32.mrb[144].mxu1  ;;  %v6464_v31 = vmax.f32 %v6319_v54, 0.0 }
 0xd83   :  { %v6421_v9 = vpop.f32.mrb[145].mxu1  ;;  %v6465_v42 = vmax.f32 %v6321_v0, 0.0  ;;  %v6324_v24 = vpop.f32.mrb[148].mxu0  ;;  %v6420_v50 = vadd.f32 %v6419_v21, %v15755_v59 }
 0xd84   :  { %v10684_v55 = vpack.c.bf16 %v6464_v31, %v6460_v19  ;;  %v6326_v32 = vpop.f32.mrb[149].mxu0  ;;  %v6422_v39 = vadd.f32 %v6421_v9, %v15755_v59  ;;  %v6325_v8 = vadd.f32 %v6324_v24, %v18984_v2 }
 0xd85   :  { %v10682_v52 = vpack.c.bf16 %v6465_v42, %v6461_v48  ;;  %v6327_v10 = vadd.f32 %v6326_v32, %v18984_v2  ;;  %v6462_v4 = vmax.f32 %v6420_v50, 0.0  ;;  %v18986_v50 = vld [vmem:[#allocation118_spill] sm:$0xff] }
 0xd86   :  { %v6425_v27 = vpop.f32.mrb[146].mxu1  ;;  %v6463_v6 = vmax.f32 %v6422_v39, 0.0  ;;  %v6468_v28 = vmax.f32 %v6325_v8, 0.0 }
 0xd87   :  { %v6426_v40 = vadd.f32 %v6425_v27, %v6186_v30  ;;  %v6427_v29 = vpop.f32.mrb[147].mxu1  ;;  %v6330_v16 = vpop.f32.mrb[150].mxu0  ;;  %10683 = vmatprep.subr.bf16.mxu0 %v10682_v52  ;;  %v6469_v36 = vmax.f32 %v6327_v10, 0.0 }
 0xd88   :  { %v6428_v11 = vadd.f32 %v6427_v29, %v6186_v30  ;;  %v6331_v62 = vadd.f32 %v6330_v16, %v6196_v17  ;;  %v6332_v53 = vpop.f32.mrb[151].mxu0  ;;  %10685 = vmatpush1.bf16.msra.mxu0 %v10684_v55 }
 0xd89   :  { %v6466_v41 = vmax.f32 %v6426_v40, 0.0  ;;  %v6333_v12 = vadd.f32 %v6332_v53, %v6196_v17 }
 0xd8a   :  { %v6467_v58 = vmax.f32 %v6428_v11, 0.0  ;;  %v6431_v59 = vpop.f32.mrb[148].mxu1  ;;  %v6472_v60 = vmax.f32 %v6331_v62, 0.0 }
 0xd8b   :  { %v10696_v34 = vpack.c.bf16 %v6466_v41, %v6462_v4  ;;  %v6433_v1 = vpop.f32.mrb[149].mxu1  ;;  %v6473_v15 = vmax.f32 %v6333_v12, 0.0  ;;  %v6336_v61 = vpop.f32.mrb[152].mxu0  ;;  %v6432_v23 = vadd.f32 %v6431_v59, %v18984_v2  ;;  %v9944_v41 = vld [vmem:[%s18363_s5 + $0x38] sm:$0xff] }
 0xd8c   :  { %v10694_v20 = vpack.c.bf16 %v6467_v58, %v6463_v6  ;;  %v10688_v3 = vpack.c.bf16 %v6472_v60, %v6468_v28  ;;  %v6338_v35 = vpop.f32.mrb[153].mxu0  ;;  %v6434_v56 = vadd.f32 %v6433_v1, %v18984_v2  ;;  %v6337_v25 = vadd.f32 %v6336_v61, %v18985_v63  ;;  %v9946_v1 = vld [vmem:[%s18363_s5 + $0x48] sm:$0xff]  ;;  %v9948_v61 = vld [vmem:[%s18363_s5 + $0x58] sm:$0xff] }
 0xd8d   :  { %v10686_v14 = vpack.c.bf16 %v6473_v15, %v6469_v36  ;;  %v6339_v13 = vadd.f32 %v6338_v35, %v18985_v63  ;;  %v6470_v51 = vmax.f32 %v6432_v23, 0.0  ;;  %v9947_v15 = vld [vmem:[%s18363_s5 + $0x50] sm:$0xff] }
 0xd8e   :  { %v6437_v7 = vpop.f32.mrb[150].mxu1  ;;  %10695 = vmatprep.subr.bf16.mxu1 %v10694_v20  ;;  %v6471_v30 = vmax.f32 %v6434_v56, 0.0  ;;  %v6476_v18 = vmax.f32 %v6337_v25, 0.0  ;;  %v9949_v20 = vld [vmem:[%s18363_s5 + $0x60] sm:$0xff] }
 0xd8f   :  { %v6438_v49 = vadd.f32 %v6437_v7, %v6196_v17  ;;  %v6439_v43 = vpop.f32.mrb[151].mxu1  ;;  %10697 = vmatpush1.bf16.msra.mxu1 %v10696_v34  ;;  %v6342_v46 = vpop.f32.mrb[154].mxu0  ;;  %10687 = vmatprep.subr.bf16.mxu0 %v10686_v14  ;;  %v6477_v19 = vmax.f32 %v6339_v13, 0.0  ;;  %v9945_v34 = vld [vmem:[%s18363_s5 + $0x40] sm:$0xff] }
 0xd90   :  { %v6440_v26 = vadd.f32 %v6439_v43, %v6196_v17  ;;  %v6343_v47 = vadd.f32 %v6342_v46, %v6206_v5  ;;  %v6344_v57 = vpop.f32.mrb[155].mxu0  ;;  %10689 = vmatpush1.bf16.msra.mxu0 %v10688_v3  ;;  %v9950_v3 = vld [vmem:[%s18363_s5 + $0x68] sm:$0x1]  ;;  %v18987_v13 = vld [vmem:[#allocation109_spill] sm:$0xff] }
 0xd91   :  { %v6474_v33 = vmax.f32 %v6438_v49, 0.0  ;;  %v6345_v37 = vadd.f32 %v6344_v57, %v6206_v5 }
 0xd92   :  { %v6475_v22 = vmax.f32 %v6440_v26, 0.0  ;;  %v6443_v54 = vpop.f32.mrb[152].mxu1  ;;  %v6480_v44 = vmax.f32 %v6343_v47, 0.0 }
 0xd93   :  { %v10700_v0 = vpack.c.bf16 %v6474_v33, %v6470_v51  ;;  %v6445_v21 = vpop.f32.mrb[153].mxu1  ;;  %v6481_v31 = vmax.f32 %v6345_v37, 0.0  ;;  %v6348_v48 = vpop.f32.mrb[156].mxu0  ;;  %v6444_v55 = vadd.f32 %v6443_v54, %v18985_v63 }
 0xd94   :  { %v10698_v9 = vpack.c.bf16 %v6475_v22, %v6471_v30  ;;  %v10692_v42 = vpack.c.bf16 %v6480_v44, %v6476_v18  ;;  %v6350_v24 = vpop.f32.mrb[157].mxu0  ;;  %v6446_v17 = vadd.f32 %v6445_v21, %v18985_v63  ;;  %v6349_v27 = vadd.f32 %v6348_v48, %v18986_v50  ;;  %v18988_v21 = vld [vmem:[#allocation50_spill] sm:$0xff] }
 0xd95   :  { %v10690_v32 = vpack.c.bf16 %v6481_v31, %v6477_v19  ;;  %v6351_v52 = vadd.f32 %v6350_v24, %v18986_v50  ;;  %v6478_v10 = vmax.f32 %v6444_v55, 0.0 }
 0xd96   :  { %v6449_v39 = vpop.f32.mrb[154].mxu1  ;;  %10699 = vmatprep.subr.bf16.mxu1 %v10698_v9  ;;  %v6479_v11 = vmax.f32 %v6446_v17, 0.0  ;;  %v6484_v53 = vmax.f32 %v6349_v27, 0.0  ;;  %v18991_v17 = vld [vmem:[#allocation5_spill] sm:$0xff] }
 0xd97   :  { %v6450_v2 = vadd.f32 %v6449_v39, %v6206_v5  ;;  %v6451_v8 = vpop.f32.mrb[155].mxu1  ;;  %10701 = vmatpush1.bf16.msra.mxu1 %v10700_v0  ;;  %v6485_v40 = vmax.f32 %v6351_v52, 0.0  ;;  %10691 = vmatprep.subr.bf16.mxu0 %v10690_v32 }
 0xd98   :  { %v6452_v29 = vadd.f32 %v6451_v8, %v6206_v5  ;;  %10693 = vmatpush1.bf16.msra.mxu0 %v10692_v42  ;;  %v6505_v5 = vpop.permute.xlu1 %6504  ;;  %v18989_v42 = vld [vmem:[#allocation111_spill] sm:$0xff]  ;;  %v18992_v8 = vld [vmem:[#allocation10_spill] sm:$0xff] }
 0xd99   :  { %v6482_v16 = vmax.f32 %v6450_v2, 0.0  ;;  %9958 = vmatprep.subr.msk.mxu0 %vm69_vm0, %v6485_v40 }
 0xd9a   :  { %v6483_v62 = vmax.f32 %v6452_v29, 0.0  ;;  %v6455_v4 = vpop.f32.mrb[156].mxu1 }
 0xd9b   :  { %v10704_v12 = vpack.c.bf16 %v6482_v16, %v6478_v10  ;;  %v6457_v6 = vpop.f32.mrb[157].mxu1  ;;  %v6456_v59 = vadd.f32 %v6455_v4, %v18986_v50 }
 0xd9c   :  { %v10702_v58 = vpack.c.bf16 %v6483_v62, %v6479_v11  ;;  %v6458_v28 = vadd.f32 %v6457_v6, %v18986_v50  ;;  %9959 = vmatpush1.msk.msra.mxu0 %vm69_vm0, %v6484_v53  ;;  %v6515_v43 = vpop.permute.xlu1 %6514  ;;  %v18990_v50 = vld [vmem:[#allocation51_spill] sm:$0xff]  ;;  %v18993_v11 = vld [vmem:[#allocation48_spill] sm:$0xff] }
 0xd9d   :  { %9960 = vmatmul.mubr.msk.f32.vlgmr.msra.gmra.mrb[158].mxu0 %vm459_vm1, %v9944_v41  ;;  %v6486_v36 = vmax.f32 %v6456_v59, 0.0  ;;  %v18995_v53 = vld [vmem:[#allocation7_spill] sm:$0xff] }
 0xd9e   :  { %v6487_v60 = vmax.f32 %v6458_v28, 0.0  ;;  %10703 = vmatprep.subr.bf16.mxu1 %v10702_v58  ;;  %6640 = vmatprep.mubr.f32.mxu0 %v18740_v38  ;;  %v18996_v6 = vld [vmem:[#allocation11_spill] sm:$0xff] }
 0xd9f   :  { %10705 = vmatpush1.bf16.msra.mxu1 %v10704_v12  ;;  %v18998_v59 = vld [vmem:[#allocation15_spill] sm:$0xff] }
 0xda0   :  { %9967 = vmatprep.subr.msk.mxu1 %vm69_vm0, %v6487_v60  ;;  %v6525_v32 = vpop.permute.xlu1 %6524 }
 0xda1   :  { %9961 = vmatmul.mubr.msk.f32.gmra.mrb[160].mxu0 %vm459_vm1, %v9945_v34 }
 0xda2   :  { %6646 = vmatprep.mubr.f32.mxu0 %v18740_v38 }
 0xda3   :  { %9968 = vmatpush1.msk.msra.mxu1 %vm69_vm0, %v6486_v36 }
 0xda4   :  { %9969 = vmatmul.mubr.msk.f32.vlgmr.msra.gmra.mrb[158].mxu1 %vm459_vm1, %v9944_v41 }
 0xda5   :  { %6747 = vmatprep.mubr.f32.mxu1 %v18740_v38  ;;  %9962 = vmatmul.mubr.msk.f32.gmra.mrb[162].mxu0 %vm459_vm1, %v9946_v1 }
 0xda6   :  { %6652 = vmatprep.mubr.f32.mxu0 %v18740_v38 }
 0xda8   :  { %9970 = vmatmul.mubr.msk.f32.gmra.mrb[160].mxu1 %vm459_vm1, %v9945_v34  ;;  %v19000_v34 = vld [vmem:[#allocation12_spill] sm:$0xff] }
 0xda9   :  { %6753 = vmatprep.mubr.f32.mxu1 %v18740_v38  ;;  %9963 = vmatmul.mubr.msk.f32.gmra.mrb[164].mxu0 %vm459_vm1, %v9947_v15 }
 0xdaa   :  { %6658 = vmatprep.mubr.f32.mxu0 %v18740_v38 }
 0xdac   :  { %9971 = vmatmul.mubr.msk.f32.gmra.mrb[162].mxu1 %vm459_vm1, %v9946_v1 }
 0xdad   :  { %6759 = vmatprep.mubr.f32.mxu1 %v18740_v38  ;;  %9964 = vmatmul.mubr.msk.f32.gmra.mrb[166].mxu0 %vm459_vm1, %v9948_v61 }
 0xdae   :  { %6664 = vmatprep.mubr.f32.mxu0 %v18740_v38 }
 0xdb0   :  { %9972 = vmatmul.mubr.msk.f32.gmra.mrb[164].mxu1 %vm459_vm1, %v9947_v15 }
 0xdb1   :  { %6765 = vmatprep.mubr.f32.mxu1 %v18740_v38  ;;  %9965 = vmatmul.mubr.msk.f32.gmra.mrb[168].mxu0 %vm459_vm1, %v9949_v20 }
 0xdb2   :  { %6670 = vmatprep.mubr.f32.mxu0 %v18740_v38 }
 0xdb4   :  { %9973 = vmatmul.mubr.msk.f32.gmra.mrb[166].mxu1 %vm459_vm1, %v9948_v61  ;;  %v19001_v61 = vld [vmem:[#allocation8_spill] sm:$0xff] }
 0xdb5   :  { %6771 = vmatprep.mubr.f32.mxu1 %v18740_v38  ;;  %9966 = vmatmul.mubr.msk.f32.gmra.mrb[170].mxu0 %vm459_vm1, %v9950_v3 }
 0xdb6   :  { %7302 = vmatprep.mubr.f32.mxu0 %v18740_v38 }
 0xdb8   :  { %9974 = vmatmul.mubr.msk.f32.gmra.mrb[168].mxu1 %vm459_vm1, %v9949_v20 }
 0xdb9   :  { %6777 = vmatprep.mubr.f32.mxu1 %v18740_v38 }
 0xdbc   :  { %9975 = vmatmul.mubr.msk.f32.gmra.mrb[170].mxu1 %vm459_vm1, %v9950_v3 }
 0xdbd   :  { %7409 = vmatprep.mubr.f32.mxu1 %v18740_v38 }
 0xe70   :  { %v6636_v35 = vpop.f32.mrb[158].mxu0 }
 0xe71   :  { %v6638_v23 = vpop.f32.mrb[159].mxu0  ;;  %v6637_v33 = vadd.f32 %v6636_v35, %v6505_v5  ;;  %v19003_v35 = vld [vmem:[#allocation19_spill] sm:$0xff] }
 0xe72   :  { %v6639_v22 = vadd.f32 %v6638_v23, %v6505_v5 }
 0xe73   :  { %v16484_v52 = vadd.f32 %v6637_v33, %v18990_v50 }
 0xe74   :  { %v6642_v14 = vpop.f32.mrb[160].mxu0  ;;  %v16491_v40 = vadd.f32 %v6639_v22, %v18992_v8 }
 0xe75   :  { %v6644_v56 = vpop.f32.mrb[161].mxu0  ;;  %v6643_v46 = vadd.f32 %v6642_v14, %v18987_v13  ;;  %v19004_v14 = vld [vmem:[#allocation113_spill] sm:$0xff] }
 0xe76   :  { %v6645_v47 = vadd.f32 %v6644_v56, %v18987_v13 }
 0xe77   :  { %v6743_v7 = vpop.f32.mrb[158].mxu1  ;;  %v16475_v18 = vadd.f32 %v6643_v46, %v15924_v45 }
 0xe78   :  { %v6745_v63 = vpop.f32.mrb[159].mxu1  ;;  %v6648_v25 = vpop.f32.mrb[162].mxu0  ;;  %v6744_v19 = vadd.f32 %v6743_v7, %v6505_v5  ;;  %v16479_v31 = vadd.f32 %v6645_v47, %v18988_v21  ;;  %v19005_v7 = vld [vmem:[#allocation17_spill] sm:$0xff] }
 0xe79   :  { %v6650_v49 = vpop.f32.mrb[163].mxu0  ;;  %v6649_v37 = vadd.f32 %v6648_v25, %v6515_v43  ;;  %v6746_v45 = vadd.f32 %v6745_v63, %v6505_v5  ;;  %v6812_v16 = vadd.f32 %v16475_v18, %v16484_v52 }
 0xe7a   :  { %v6651_v0 = vadd.f32 %v6650_v49, %v6515_v43  ;;  %v16502_v58 = vadd.f32 %v6744_v19, %v18996_v6  ;;  %v6825_v28 = vadd.f32 %v16479_v31, %v16491_v40  ;;  %v19007_v49 = vld [vmem:[#allocation18_spill] sm:$0xff]  ;;  %v19019_v6 = vld [vmem:[#allocation13_spill] sm:$0xff] }
 0xe7b   :  { %v6749_v26 = vpop.f32.mrb[160].mxu1  ;;  %v16487_v39 = vadd.f32 %v6649_v37, %v18991_v17  ;;  %v16513_v20 = vadd.f32 %v6746_v45, %v19001_v61  ;;  %v19008_v37 = vld [vmem:[#allocation16_spill] sm:$0xff] }
 0xe7c   :  { %v6751_v57 = vpop.f32.mrb[161].mxu1  ;;  %v6654_v51 = vpop.f32.mrb[164].mxu0  ;;  %v6750_v54 = vadd.f32 %v6749_v26, %v18987_v13  ;;  %v16499_v4 = vadd.f32 %v6651_v0, %v18995_v53  ;;  %18997 = vst [vmem:[#allocation60_spill] sm:$0xff] %v16502_v58  ;;  %v19009_v0 = vld [vmem:[#allocation100_spill] sm:$0xff] }
 0xe7d   :  { %v6656_v30 = vpop.f32.mrb[165].mxu0  ;;  %v6752_v48 = vadd.f32 %v6751_v57, %v18987_v13  ;;  %v6655_v24 = vadd.f32 %v6654_v51, %v18989_v42  ;;  %19002 = vst [vmem:[#allocation58_spill] sm:$0xff] %v16513_v20  ;;  %v6813_v3 = vadd.f32 %v6812_v16, %v16487_v39  ;;  %v6535_v26 = vpop.permute.xlu1 %6534 }
 0xe7e   :  { %v6657_v27 = vadd.f32 %v6656_v30, %v18989_v42  ;;  %v16496_v62 = vadd.f32 %v6750_v54, %v18993_v11  ;;  %v6826_v57 = vadd.f32 %v6825_v28, %v16499_v4 }
 0xe7f   :  { %v6755_v44 = vpop.f32.mrb[162].mxu1  ;;  %v16507_v60 = vadd.f32 %v6752_v48, %v18998_v59  ;;  %v16510_v36 = vadd.f32 %v6655_v24, %v19000_v34  ;;  %v19011_v24 = vld [vmem:[#allocation53_spill] sm:$0xff] }
 0xe80   :  { %v6757_v9 = vpop.f32.mrb[163].mxu1  ;;  %v6660_v55 = vpop.f32.mrb[166].mxu0  ;;  %v6756_v29 = vadd.f32 %v6755_v44, %v6515_v43  ;;  %18994 = vst [vmem:[#allocation61_spill] sm:$0xff] %v16496_v62  ;;  %v16517_v23 = vadd.f32 %v6657_v27, %v19003_v35  ;;  %v6838_v47 = vadd.f32 %v16496_v62, %v16502_v58  ;;  %v19013_v27 = vld [vmem:[#allocation6_spill] sm:$0xff] }
 0xe81   :  { %v6662_v2 = vpop.f32.mrb[167].mxu0  ;;  %v6661_v10 = vadd.f32 %v6660_v55, %v6525_v32  ;;  %18999 = vst [vmem:[#allocation59_spill] sm:$0xff] %v16507_v60  ;;  %v6758_v25 = vadd.f32 %v6757_v9, %v6515_v43  ;;  %v6851_v43 = vadd.f32 %v16507_v60, %v16513_v20  ;;  %v6814_v22 = vadd.f32 %v6813_v3, %v16510_v36  ;;  %v19023_v3 = vld [vmem:[#allocation14_spill] sm:$0xff] }
 0xe82   :  { %v6663_v12 = vadd.f32 %v6662_v2, %v6525_v32  ;;  %v16521_v63 = vadd.f32 %v6756_v29, %v19005_v7  ;;  %v6827_v48 = vadd.f32 %v6826_v57, %v16517_v23  ;;  %v19015_v29 = vld [vmem:[#allocation9_spill] sm:$0xff] }
 0xe83   :  { %v6761_v41 = vpop.f32.mrb[164].mxu1  ;;  %v16524_v13 = vadd.f32 %v6661_v10, %v19007_v49  ;;  %v16547_v2 = vadd.f32 %v6758_v25, %v19013_v27 }
 0xe84   :  { %v6763_v1 = vpop.f32.mrb[165].mxu1  ;;  %v6666_v15 = vpop.f32.mrb[168].mxu0  ;;  %19006 = vst [vmem:[#allocation63_spill] sm:$0xff] %v16521_v63  ;;  %v6762_v51 = vadd.f32 %v6761_v41, %v18989_v42  ;;  %v16532_v30 = vadd.f32 %v6663_v12, %v19008_v37  ;;  %v6839_v17 = vadd.f32 %v6838_v47, %v16521_v63  ;;  %v19017_v41 = vld [vmem:[#allocation57_spill] sm:$0xff]  ;;  %v19025_v47 = vld [vmem:[#allocation94_spill] sm:$0xff] }
 0xe85   :  { %v6667_v5 = vadd.f32 %v6666_v15, %v19004_v14  ;;  %v6668_v56 = vpop.f32.mrb[169].mxu0  ;;  %v6764_v54 = vadd.f32 %v6763_v1, %v18989_v42  ;;  %19014 = vst [vmem:[#allocation64_spill] sm:$0xff] %v16547_v2  ;;  %v6815_v42 = vadd.f32 %v6814_v22, %v16524_v13  ;;  %v19021_v15 = vld [vmem:[#allocation55_spill] sm:$0xff]  ;;  %v6852_v7 = vadd.f32 %v6851_v43, %v16547_v2 }
 0xe86   :  { %v6669_v46 = vadd.f32 %v6668_v56, %v19004_v14  ;;  %v16551_v10 = vadd.f32 %v6762_v51, %v19015_v29  ;;  %v6828_v16 = vadd.f32 %v6827_v48, %v16532_v30  ;;  %v19027_v51 = vld [vmem:[#allocation21_spill] sm:$0xff]  ;;  %v19033_v29 = vld [vmem:[#allocation54_spill] sm:$0xff] }
 0xe87   :  { %v6767_v33 = vpop.f32.mrb[166].mxu1  ;;  %v16539_v19 = vadd.f32 %v6667_v5, %v19009_v0  ;;  %v16558_v28 = vadd.f32 %v6764_v54, %v19019_v6 }
 0xe88   :  { %v6769_v44 = vpop.f32.mrb[167].mxu1  ;;  %v6672_v21 = vpop.f32.mrb[170].mxu0  ;;  %v6768_v9 = vadd.f32 %v6767_v33, %v6525_v32  ;;  %v16543_v55 = vadd.f32 %v6669_v46, %v19011_v24  ;;  %19016 = vst [vmem:[#allocation67_spill] sm:$0xff] %v16551_v10  ;;  %v6840_v46 = vadd.f32 %v6839_v17, %v16551_v10 }
 0xe89   :  { %19010 = vst [vmem:[#allocation62_spill] sm:$0xff] %v16539_v19  ;;  %v6673_v50 = vadd.f32 %v6672_v21, %v6535_v26  ;;  %v6674_v45 = vpop.f32.mrb[171].mxu0  ;;  %v6770_v11 = vadd.f32 %v6769_v44, %v6525_v32  ;;  %19020 = vst [vmem:[#allocation69_spill] sm:$0xff] %v16558_v28  ;;  %v6816_v59 = vadd.f32 %v6815_v42, %v16539_v19  ;;  %v19029_v21 = vld [vmem:[#allocation52_spill] sm:$0xff] }
 0xe8a   :  { %19012 = vst [vmem:[#allocation65_spill] sm:$0xff] %v16543_v55  ;;  %v6675_v8 = vadd.f32 %v6674_v45, %v6535_v26  ;;  %v16566_v35 = vadd.f32 %v6768_v9, %v19023_v3  ;;  %v6829_v32 = vadd.f32 %v6828_v16, %v16543_v55  ;;  %v19031_v45 = vld [vmem:[#allocation56_spill] sm:$0xff] }
 0xe8b   :  { %v6773_v53 = vpop.f32.mrb[168].mxu1  ;;  %v16555_v12 = vadd.f32 %v6673_v50, %v19017_v41  ;;  %v16577_v57 = vadd.f32 %v6770_v11, %v19025_v47 }
 0xe8c   :  { %v6774_v34 = vadd.f32 %v6773_v53, %v19004_v14  ;;  %v6775_v1 = vpop.f32.mrb[169].mxu1  ;;  %v16563_v61 = vadd.f32 %v6675_v8, %v19021_v15  ;;  %19024 = vst [vmem:[#allocation71_spill] sm:$0xff] %v16566_v35  ;;  %v6841_v43 = vadd.f32 %v6840_v46, %v16566_v35 }
 0xe8d   :  { %19018 = vst [vmem:[#allocation66_spill] sm:$0xff] %v16555_v12  ;;  %v6776_v5 = vadd.f32 %v6775_v1, %v19004_v14  ;;  %v6817_v56 = vsel %vm69_vm0, %v16555_v12, 0.0  ;;  %19026 = vst [vmem:[#allocation70_spill] sm:$0xff] %v16577_v57  ;;  %v6853_v14 = vadd.f32 %v6852_v7, %v16558_v28 }
 0xe8e   :  { %19022 = vst [vmem:[#allocation68_spill] sm:$0xff] %v16563_v61  ;;  %v6818_v25 = vadd.f32 %v6817_v56, %v6816_v59  ;;  %v6830_v49 = vsel %vm69_vm0, %v16563_v61, 0.0  ;;  %v16580_v33 = vadd.f32 %v6774_v34, %v19027_v51 }
 0xe8f   :  { %v6779_v37 = vpop.f32.mrb[170].mxu1  ;;  %v6831_v22 = vadd.f32 %v6830_v49, %v6829_v32  ;;  %v16585_v48 = vadd.f32 %v6776_v5, %v19029_v21  ;;  %v6854_v27 = vadd.f32 %v6853_v14, %v16577_v57 }
 0xe90   :  { %19028 = vst [vmem:[#allocation73_spill] sm:$0xff] %v16580_v33  ;;  %v6819_v54 = vrot.slane %v6818_v25, 4  ;;  %v6780_v44 = vadd.f32 %v6779_v37, %v6535_v26  ;;  %v6781_v0 = vpop.f32.mrb[171].mxu1  ;;  %v6842_v42 = vadd.f32 %v6841_v43, %v16580_v33 }
 0xe91   :  { %19030 = vst [vmem:[#allocation72_spill] sm:$0xff] %v16585_v48  ;;  %v6832_v9 = vrot.slane %v6831_v22, 4  ;;  %v6782_v24 = vadd.f32 %v6781_v0, %v6535_v26  ;;  %v6855_v41 = vadd.f32 %v6854_v27, %v16585_v48 }
 0xe92   :  { %v6820_v50 = vadd.f32 %v6819_v54, %v6818_v25  ;;  %v16588_v17 = vadd.f32 %v6780_v44, %v19031_v45 }
 0xe93   :  { %v6833_v8 = vadd.f32 %v6832_v9, %v6831_v22  ;;  %v16593_v16 = vadd.f32 %v6782_v24, %v19033_v29 }
 0xe94   :  { %19032 = vst [vmem:[#allocation75_spill] sm:$0xff] %v16588_v17  ;;  %v6821_v11 = vrot.slane %v6820_v50, 2  ;;  %v6843_v53 = vsel %vm69_vm0, %v16588_v17, 0.0 }
 0xe95   :  { %19034 = vst [vmem:[#allocation74_spill] sm:$0xff] %v16593_v16  ;;  %v6844_v6 = vadd.f32 %v6843_v53, %v6842_v42  ;;  %v6834_v26 = vrot.slane %v6833_v8, 2  ;;  %v6856_v59 = vsel %vm69_vm0, %v16593_v16, 0.0 }
 0xe96   :  { %v6822_v34 = vadd.f32 %v6821_v11, %v6820_v50  ;;  %v6857_v3 = vadd.f32 %v6856_v59, %v6855_v41 }
 0xe97   :  { %v6845_v1 = vrot.slane %v6844_v6, 4  ;;  %v6835_v15 = vadd.f32 %v6834_v26, %v6833_v8 }
 0xe98   :  { %v6823_v32 = vrot.slane %v6822_v34, 1  ;;  %v6858_v46 = vrot.slane %v6857_v3, 4 }
 0xe99   :  { %v6846_v5 = vadd.f32 %v6845_v1, %v6844_v6  ;;  %v6836_v56 = vrot.slane %v6835_v15, 1 }
 0xe9a   :  { %v6824_v7 = vadd.f32 %v6823_v32, %v6822_v34  ;;  %v6859_v0 = vadd.f32 %v6858_v46, %v6857_v3 }
 0xe9b   :  { %v6847_v25 = vrot.slane %v6846_v5, 2  ;;  %v6837_v49 = vadd.f32 %v6836_v56, %v6835_v15 }
 0xe9c   :  { %v6864_v47 = vmul.f32 0.020408163, %v6824_v7  ;;  %v6860_v26 = vrot.slane %v6859_v0, 2 }
 0xe9d   :  { %v6848_v51 = vadd.f32 %v6847_v25, %v6846_v5  ;;  %v6865_v44 = vmul.f32 0.020408163, %v6837_v49 }
 0xe9e   :  { %v16601_v37 = vsub.f32 %v16484_v52, %v6864_v47  ;;  %v16604_v22 = vsub.f32 %v16475_v18, %v6864_v47  ;;  %v16607_v14 = vsub.f32 %v16487_v39, %v6864_v47  ;;  %v16610_v43 = vsub.f32 %v16510_v36, %v6864_v47 }
 0xe9f   :  { %v6849_v54 = vrot.slane %v6848_v51, 1  ;;  %v16613_v21 = vsub.f32 %v16555_v12, %v6864_v47  ;;  %v16620_v45 = vsub.f32 %v16524_v13, %v6864_v47  ;;  %v16623_v27 = vsub.f32 %v16539_v19, %v6864_v47 }
 0xea0   :  { %v6896_v9 = vmul.f32 %v16601_v37, %v16601_v37  ;;  %v6900_v24 = vmul.f32 %v16604_v22, %v16604_v22  ;;  %v6904_v42 = vmul.f32 %v16607_v14, %v16607_v14  ;;  %v16628_v11 = vsub.f32 %v16491_v40, %v6865_v44 }
 0xea1   :  { %v6850_v50 = vadd.f32 %v6849_v54, %v6848_v51  ;;  %v6908_v53 = vmul.f32 %v16610_v43, %v16610_v43  ;;  %v6920_v41 = vmul.f32 %v16613_v21, %v16613_v21  ;;  %v16644_v15 = vsub.f32 %v16479_v31, %v6865_v44 }
 0xea2   :  { %v6924_v8 = vadd.f32 %v6900_v24, %v6896_v9  ;;  %v6912_v3 = vmul.f32 %v16620_v45, %v16620_v45  ;;  %v6916_v32 = vmul.f32 %v16623_v27, %v16623_v27  ;;  %v16658_v49 = vsub.f32 %v16499_v4, %v6865_v44 }
 0xea3   :  { %v6866_v29 = vmul.f32 0.020408163, %v6850_v50  ;;  %v6897_v46 = vmul.f32 %v16628_v11, %v16628_v11  ;;  %v6929_v51 = vsel %vm69_vm0, %v6920_v41, 0.0  ;;  %v16667_v9 = vsub.f32 %v16517_v23, %v6865_v44 }
 0xea4   :  { %v6925_v6 = vadd.f32 %v6924_v8, %v6904_v42  ;;  %v16672_v42 = vsub.f32 %v16532_v30, %v6865_v44  ;;  %v6901_v8 = vmul.f32 %v16644_v15, %v16644_v15 }
 0xea5   :  { %v16635_v59 = vsub.f32 %v16502_v58, %v6866_v29  ;;  %v16638_v34 = vsub.f32 %v16496_v62, %v6866_v29  ;;  %v16641_v1 = vsub.f32 %v16521_v63, %v6866_v29  ;;  %v16651_v56 = vsub.f32 %v16551_v10, %v6866_v29 }
 0xea6   :  { %v6926_v5 = vadd.f32 %v6925_v6, %v6908_v53  ;;  %v16664_v54 = vsub.f32 %v16566_v35, %v6866_v29  ;;  %v16677_v6 = vsub.f32 %v16580_v33, %v6866_v29  ;;  %v16680_v41 = vsub.f32 %v16588_v17, %v6866_v29 }
 0xea7   :  { %v6898_v7 = vmul.f32 %v16635_v59, %v16635_v59  ;;  %v6902_v25 = vmul.f32 %v16638_v34, %v16638_v34  ;;  %v6906_v24 = vmul.f32 %v16641_v1, %v16641_v1  ;;  %v6861_v35 = vadd.f32 %v6860_v26, %v6859_v0 }
 0xea8   :  { %v6927_v47 = vadd.f32 %v6926_v5, %v6912_v3  ;;  %v6910_v3 = vmul.f32 %v16651_v56, %v16651_v56  ;;  %v6914_v63 = vmul.f32 %v16664_v54, %v16664_v54  ;;  %v6909_v17 = vmul.f32 %v16667_v9, %v16667_v9 }
 0xea9   :  { %v6950_v50 = vadd.f32 %v6902_v25, %v6898_v7  ;;  %v6905_v7 = vmul.f32 %v16658_v49, %v16658_v49  ;;  %v6937_v25 = vadd.f32 %v6901_v8, %v6897_v46  ;;  %v6918_v0 = vmul.f32 %v16677_v6, %v16677_v6 }
 0xeaa   :  { %v6928_v53 = vadd.f32 %v6927_v47, %v6916_v32  ;;  %v16689_v32 = vsub.f32 %v16543_v55, %v6865_v44  ;;  %v16692_v47 = vsub.f32 %v16563_v61, %v6865_v44  ;;  %v6922_v26 = vmul.f32 %v16680_v41, %v16680_v41 }
 0xeab   :  { %v6951_v5 = vadd.f32 %v6950_v50, %v6906_v24  ;;  %v6938_v24 = vadd.f32 %v6937_v25, %v6905_v7  ;;  %v6862_v50 = vrot.slane %v6861_v35, 1 }
 0xeac   :  { %v6930_v10 = vadd.f32 %v6929_v51, %v6928_v53  ;;  %v6913_v51 = vmul.f32 %v16672_v42, %v16672_v42  ;;  %v6917_v7 = vmul.f32 %v16689_v32, %v16689_v32  ;;  %v6955_v62 = vsel %vm69_vm0, %v6922_v26, 0.0 }
 0xead   :  { %v6952_v29 = vadd.f32 %v6951_v5, %v6910_v3  ;;  %v6939_v8 = vadd.f32 %v6938_v24, %v6909_v17  ;;  %v6863_v44 = vadd.f32 %v6862_v50, %v6861_v35  ;;  %v6921_v3 = vmul.f32 %v16692_v47, %v16692_v47 }
 0xeae   :  { %v6931_v33 = vrot.slane %v6930_v10, 4 }
 0xeaf   :  { %v6953_v46 = vadd.f32 %v6952_v29, %v6914_v63  ;;  %v6940_v25 = vadd.f32 %v6939_v8, %v6913_v51  ;;  %v6867_v58 = vmul.f32 0.020408163, %v6863_v44 }
 0xeb0   :  { %v6932_v53 = vadd.f32 %v6931_v33, %v6930_v10  ;;  %v6942_v33 = vsel %vm69_vm0, %v6921_v3, 0.0 }
 0xeb1   :  { %v6954_v5 = vadd.f32 %v6953_v46, %v6918_v0  ;;  %v6941_v63 = vadd.f32 %v6940_v25, %v6917_v7  ;;  %v16708_v29 = vsub.f32 %v16513_v20, %v6867_v58  ;;  %v16711_v35 = vsub.f32 %v16507_v60, %v6867_v58 }
 0xeb2   :  { %v6933_v61 = vrot.slane %v6932_v53, 2  ;;  %v16715_v17 = vsub.f32 %v16547_v2, %v6867_v58  ;;  %v16718_v46 = vsub.f32 %v16558_v28, %v6867_v58  ;;  %v16725_v44 = vsub.f32 %v16577_v57, %v6867_v58 }
 0xeb3   :  { %v6956_v12 = vadd.f32 %v6955_v62, %v6954_v5  ;;  %v6943_v50 = vadd.f32 %v6942_v33, %v6941_v63  ;;  %v6899_v62 = vmul.f32 %v16708_v29, %v16708_v29  ;;  %v6903_v26 = vmul.f32 %v16711_v35, %v16711_v35  ;;  %v16729_v5 = vpop.permute.xlu1 %7030 }
 0xeb4   :  { %v6934_v10 = vadd.f32 %v6933_v61, %v6932_v53  ;;  %v6907_v53 = vmul.f32 %v16715_v17, %v16715_v17  ;;  %v16732_v63 = vsub.f32 %v16593_v16, %v6867_v58  ;;  %v16735_v28 = vsub.f32 %v16585_v48, %v6867_v58 }
 0xeb5   :  { %v6957_v24 = vrot.slane %v6956_v12, 4  ;;  %v6944_v8 = vrot.slane %v6943_v50, 4  ;;  %v6963_v3 = vadd.f32 %v6903_v26, %v6899_v62  ;;  %v6915_v62 = vmul.f32 %v16725_v44, %v16725_v44 }
 0xeb6   :  { %v6935_v0 = vrot.slane %v6934_v10, 1  ;;  %v6919_v58 = vmul.f32 %v16735_v28, %v16735_v28 }
 0xeb7   :  { %v6958_v51 = vadd.f32 %v6957_v24, %v6956_v12  ;;  %v6945_v25 = vadd.f32 %v6944_v8, %v6943_v50  ;;  %v6911_v12 = vmul.f32 %v16718_v46, %v16718_v46  ;;  %v6923_v8 = vmul.f32 %v16732_v63, %v16732_v63  ;;  %v16745_v48 = vpop.permute.xlu1 %7100 }
 0xeb8   :  { %v6936_v61 = vadd.f32 %v6935_v0, %v6934_v10  ;;  %v6964_v10 = vadd.f32 %v6963_v3, %v6907_v53 }
 0xeb9   :  { %v6959_v7 = vrot.slane %v6958_v51, 2  ;;  %v6946_v0 = vrot.slane %v6945_v25, 2  ;;  %v6968_v16 = vsel %vm69_vm0, %v6923_v8, 0.0 }
 0xeba   :  { %v6976_v33 = vmul.f32 0.020408163, %v6936_v61  ;;  %v6965_v26 = vadd.f32 %v6964_v10, %v6911_v12 }
 0xebb   :  { %v6960_v24 = vadd.f32 %v6959_v7, %v6958_v51  ;;  %v6947_v50 = vadd.f32 %v6946_v0, %v6945_v25  ;;  %v16748_v0 = vpop.permute.xlu1 %7040 }
 0xebc   :  { %v6980_v57 = vadd.f32 1e-05, %v6976_v33  ;;  %v6966_v61 = vadd.f32 %v6965_v26, %v6915_v62 }
 0xebd   :  { %v6961_v2 = vrot.slane %v6960_v24, 1  ;;  %v6948_v51 = vrot.slane %v6947_v50, 1 }
 0xebe   :  { %11168 = vrsqrt.f32 %v6980_v57  ;;  %v6967_v3 = vadd.f32 %v6966_v61, %v6919_v58 }
 0xebf   :  { %v6962_v53 = vadd.f32 %v6961_v2, %v6960_v24  ;;  %v6949_v33 = vadd.f32 %v6948_v51, %v6947_v50  ;;  %v16750_v2 = vpop.permute.xlu1 %7110 }
 0xec0   :  { %v6969_v12 = vadd.f32 %v6968_v16, %v6967_v3  ;;  %v19035_v3 = vld [vmem:[#allocation115_spill] sm:$0xff] }
 0xec1   :  { %v6978_v7 = vmul.f32 0.020408163, %v6962_v53  ;;  %v6977_v10 = vmul.f32 0.020408163, %v6949_v33 }
 0xec2   :  { %v6970_v25 = vrot.slane %v6969_v12, 4 }
 0xec3   :  { %v6982_v20 = vadd.f32 1e-05, %v6978_v7  ;;  %v6981_v60 = vadd.f32 1e-05, %v6977_v10  ;;  %v16759_v7 = vpop.permute.xlu1 %7050 }
 0xec4   :  { %v6971_v55 = vadd.f32 %v6970_v25, %v6969_v12 }
 0xec5   :  { %11170 = vrsqrt.f32 %v6981_v60 }
 0xec6   :  { %v6972_v62 = vrot.slane %v6971_v55, 2  ;;  %11172 = vrsqrt.f32 %v6982_v20 }
 0xec8   :  { %v11169_v26 = vpop.eup %11168  ;;  %v6973_v57 = vadd.f32 %v6972_v62, %v6971_v55  ;;  %v19037_v62 = vld [vmem:[#allocation24_spill] sm:$0xff] }
 0xec9   :  { %v6988_v50 = vmul.f32 %v11169_v26, %v16601_v37  ;;  %v6992_v8 = vmul.f32 %v11169_v26, %v16604_v22  ;;  %v6996_v16 = vmul.f32 %v11169_v26, %v16607_v14  ;;  %v7000_v61 = vmul.f32 %v11169_v26, %v16610_v43  ;;  %v19036_v37 = vld [vmem:[#allocation119_spill] sm:$0xff] }
 0xeca   :  { %v6974_v24 = vrot.slane %v6973_v57, 1  ;;  %v7004_v53 = vmul.f32 %v11169_v26, %v16620_v45  ;;  %v7008_v60 = vmul.f32 %v11169_v26, %v16623_v27  ;;  %v7012_v22 = vmul.f32 %v11169_v26, %v16613_v21 }
 0xecb   :  { %v7058_v20 = vmul.f32 %v19035_v3, %v6988_v50  ;;  %v7062_v33 = vmul.f32 %v16729_v5, %v6992_v8  ;;  %v7066_v12 = vmul.f32 %v19036_v37, %v6996_v16  ;;  %v7070_v43 = vmul.f32 %v16748_v0, %v7000_v61  ;;  %v19038_v8 = vld [vmem:[#allocation117_spill] sm:$0xff] }
 0xecc   :  { %v6975_v58 = vadd.f32 %v6974_v24, %v6973_v57  ;;  %v7074_v57 = vmul.f32 %v19037_v62, %v7004_v53  ;;  %v7078_v24 = vmul.f32 %v16759_v7, %v7008_v60 }
 0xecd   :  { %v7128_v21 = vadd.f32 %v19038_v8, %v7058_v20  ;;  %v7132_v16 = vadd.f32 %v16745_v48, %v7062_v33  ;;  %v16785_v20 = vpop.permute.xlu1 %7120 }
 0xece   :  { %v6979_v51 = vmul.f32 0.020408163, %v6975_v58 }
 0xecf   :  { %v11171_v55 = vpop.eup %11170 }
 0xed0   :  { %v6983_v14 = vadd.f32 1e-05, %v6979_v51  ;;  %v6989_v10 = vmul.f32 %v11171_v55, %v16628_v11  ;;  %v16766_v45 = vpop.eup %11172  ;;  %v6993_v27 = vmul.f32 %v11171_v55, %v16644_v15  ;;  %v6997_v25 = vmul.f32 %v11171_v55, %v16658_v49  ;;  %v19039_v15 = vld [vmem:[#allocation25_spill] sm:$0xff] }
 0xed1   :  { %v7001_v26 = vmul.f32 %v11171_v55, %v16667_v9  ;;  %v7136_v61 = vadd.f32 %v19039_v15, %v7066_v12  ;;  %v6990_v53 = vmul.f32 %v16766_v45, %v16635_v59  ;;  %v6994_v60 = vmul.f32 %v16766_v45, %v16638_v34  ;;  %v19040_v59 = vld [vmem:[#allocation29_spill] sm:$0xff] }
 0xed2   :  { %11174 = vrsqrt.f32 %v6983_v14  ;;  %v7059_v50 = vmul.f32 %v19035_v3, %v6989_v10  ;;  %v7063_v11 = vmul.f32 %v16729_v5, %v6993_v27  ;;  %v7067_v58 = vmul.f32 %v19036_v37, %v6997_v25 }
 0xed3   :  { %v7071_v51 = vmul.f32 %v16748_v0, %v7001_v26  ;;  %v7140_v14 = vadd.f32 %v16750_v2, %v7070_v43  ;;  %v7005_v12 = vmul.f32 %v11171_v55, %v16672_v42  ;;  %v7009_v27 = vmul.f32 %v11171_v55, %v16689_v32 }
 0xed4   :  { %v7129_v49 = vadd.f32 %v19038_v8, %v7059_v50  ;;  %v7133_v9 = vadd.f32 %v16745_v48, %v7063_v11  ;;  %v7137_v33 = vadd.f32 %v19039_v15, %v7067_v58  ;;  %v7144_v25 = vadd.f32 %v19040_v59, %v7074_v57 }
 0xed5   :  { %v7141_v10 = vadd.f32 %v16750_v2, %v7071_v51  ;;  %v7148_v34 = vadd.f32 %v16785_v20, %v7078_v24  ;;  %v10708_v26 = vpack.c.bf16 %v7132_v16, %v7128_v21  ;;  %v6998_v19 = vmul.f32 %v16766_v45, %v16641_v1  ;;  %v19041_v21 = vld [vmem:[#allocation28_spill] sm:$0xff] }
 0xed6   :  { %v10706_v50 = vpack.c.bf16 %v7133_v9, %v7129_v49  ;;  %v7075_v11 = vmul.f32 %v19037_v62, %v7005_v12  ;;  %v7013_v58 = vmul.f32 %v11171_v55, %v16692_v47  ;;  %v7060_v43 = vmul.f32 %v19035_v3, %v6990_v53 }
 0xed7   :  { %v7064_v42 = vmul.f32 %v16729_v5, %v6994_v60  ;;  %v7079_v51 = vmul.f32 %v16759_v7, %v7009_v27  ;;  %v10710_v32 = vpack.c.bf16 %v7141_v10, %v7137_v33  ;;  %v7002_v24 = vmul.f32 %v16766_v45, %v16651_v56 }
 0xed8   :  { %10707 = vmatprep.subr.bf16.mxu0 %v10706_v50  ;;  %v7145_v57 = vadd.f32 %v19040_v59, %v7075_v11  ;;  %v7082_v16 = vmul.f32 %v19041_v21, %v7012_v22  ;;  %v10712_v47 = vpack.c.bf16 %v7140_v14, %v7136_v61  ;;  %v10716_v55 = vpack.c.bf16 %v7148_v34, %v7144_v25  ;;  %v7126_v34 = vpop.permute.xlu1 %7125 }
 0xed9   :  { %10709 = vmatpush1.bf16.msra.mxu0 %v10708_v26  ;;  %v7149_v1 = vadd.f32 %v16785_v20, %v7079_v51  ;;  %v7130_v53 = vadd.f32 %v19038_v8, %v7060_v43  ;;  %v7134_v60 = vadd.f32 %v16745_v48, %v7064_v42  ;;  %v7068_v9 = vmul.f32 %v19036_v37, %v6998_v19  ;;  %v9990_v42 = vld [vmem:[%s18361_s3 + $0x70] sm:$0xff] }
 0xeda   :  { %10711 = vmatprep.subr.bf16.mxu0 %v10710_v32  ;;  %v7083_v33 = vmul.f32 %v19041_v21, %v7013_v58  ;;  %v7072_v61 = vmul.f32 %v16748_v0, %v7002_v24  ;;  %v7152_v58 = vadd.f32 %v7126_v34, %v7082_v16  ;;  %v9991_v24 = vld [vmem:[%s18361_s3 + $0x78] sm:$0xff] }
 0xedb   :  { %v10714_v27 = vpack.c.bf16 %v7149_v1, %v7145_v57  ;;  %v10720_v43 = vpack.c.bf16 %v7134_v60, %v7130_v53  ;;  %v9996_v53 = vld [vmem:[%s18361_s3 + $0xa0] sm:$0x1] }
 0xedc   :  { %v11175_v49 = vpop.eup %11174  ;;  %v7153_v26 = vadd.f32 %v7126_v34, %v7083_v33  ;;  %v19042_v33 = vld [vmem:[#allocation33_spill] sm:$0xff] }
 0xedd   :  { %v6991_v12 = vmul.f32 %v11175_v49, %v16708_v29  ;;  %v6995_v56 = vmul.f32 %v11175_v49, %v16711_v35  ;;  %v6999_v10 = vmul.f32 %v11175_v49, %v16715_v17  ;;  %v7003_v22 = vmul.f32 %v11175_v49, %v16718_v46  ;;  %10713 = vmatpush1.bf16.msra.mxu0 %v10712_v47 }
 0xede   :  { %v7007_v14 = vmul.f32 %v11175_v49, %v16725_v44  ;;  %v7011_v25 = vmul.f32 %v11175_v49, %v16735_v28  ;;  %10715 = vmatprep.subr.bf16.mxu0 %v10714_v27  ;;  %v7006_v35 = vmul.f32 %v16766_v45, %v16664_v54  ;;  %v7010_v44 = vmul.f32 %v16766_v45, %v16677_v6 }
 0xedf   :  { %v7061_v19 = vmul.f32 %v19035_v3, %v6991_v12  ;;  %v7065_v50 = vmul.f32 %v16729_v5, %v6995_v56  ;;  %v7069_v29 = vmul.f32 %v19036_v37, %v6999_v10  ;;  %v7073_v17 = vmul.f32 %v16748_v0, %v7003_v22  ;;  %v7178_v56 = vpop.permute.xlu1 %7177 }
 0xee0   :  { %v7077_v46 = vmul.f32 %v19037_v62, %v7007_v14  ;;  %v7081_v37 = vmul.f32 %v16759_v7, %v7011_v25  ;;  %v7138_v0 = vadd.f32 %v19039_v15, %v7068_v9  ;;  %v7142_v6 = vadd.f32 %v16750_v2, %v7072_v61 }
 0xee1   :  { %v7131_v28 = vadd.f32 %v19038_v8, %v7061_v19  ;;  %v7135_v3 = vadd.f32 %v16745_v48, %v7065_v50  ;;  %v7139_v5 = vadd.f32 %v19039_v15, %v7069_v29  ;;  %v7143_v11 = vadd.f32 %v16750_v2, %v7073_v17  ;;  %10717 = vmatpush1.bf16.msra.mxu0 %v10716_v55  ;;  %v9994_v55 = vld [vmem:[%s18361_s3 + $0x90] sm:$0xff] }
 0xee2   :  { %10004 = vmatprep.subr.msk.mxu0 %vm69_vm0, %v7153_v26  ;;  %v7076_v8 = vmul.f32 %v19037_v62, %v7006_v35  ;;  %v7080_v48 = vmul.f32 %v16759_v7, %v7010_v44  ;;  %v7015_v51 = vmul.f32 %v11175_v49, %v16732_v63  ;;  %v7147_v15 = vadd.f32 %v19040_v59, %v7077_v46  ;;  %v9995_v49 = vld [vmem:[%s18361_s3 + $0x98] sm:$0xff] }
 0xee3   :  { %v10718_v54 = vpack.c.bf16 %v7135_v3, %v7131_v28  ;;  %v10722_v32 = vpack.c.bf16 %v7143_v11, %v7139_v5  ;;  %v7151_v57 = vadd.f32 %v16785_v20, %v7081_v37  ;;  %v7014_v2 = vmul.f32 %v16766_v45, %v16680_v41  ;;  %v7188_v44 = vpop.permute.xlu1 %7187  ;;  %v19043_v26 = vld [vmem:[#allocation32_spill] sm:$0xff] }
 0xee4   :  { %v10724_v7 = vpack.c.bf16 %v7142_v6, %v7138_v0  ;;  %v7146_v62 = vadd.f32 %v19040_v59, %v7076_v8  ;;  %v7150_v63 = vadd.f32 %v16785_v20, %v7080_v48  ;;  %v7085_v16 = vmul.f32 %v19041_v21, %v7015_v51  ;;  %v9992_v20 = vld [vmem:[%s18361_s3 + $0x80] sm:$0xff] }
 0xee5   :  { %10719 = vmatprep.subr.bf16.mxu1 %v10718_v54  ;;  %10005 = vmatpush1.msk.msra.mxu0 %vm69_vm0, %v7152_v58  ;;  %v10726_v1 = vpack.c.bf16 %v7151_v57, %v7147_v15  ;;  %v7084_v41 = vmul.f32 %v19041_v21, %v7014_v2  ;;  %v9993_v21 = vld [vmem:[%s18361_s3 + $0x88] sm:$0xff] }
 0xee6   :  { %10721 = vmatpush1.bf16.msra.mxu1 %v10720_v43  ;;  %10006 = vmatmul.mubr.msk.f32.vlgmr.msra.gmra.mrb[172].mxu0 %vm459_vm1, %v9990_v42  ;;  %v10728_v45 = vpack.c.bf16 %v7150_v63, %v7146_v62  ;;  %v7155_v59 = vadd.f32 %v7126_v34, %v7085_v16 }
 0xee7   :  { %10723 = vmatprep.subr.bf16.mxu1 %v10722_v32  ;;  %7308 = vmatprep.mubr.f32.mxu0 %v18740_v38  ;;  %v7154_v47 = vadd.f32 %v7126_v34, %v7084_v41 }
 0xeea   :  { %10725 = vmatpush1.bf16.msra.mxu1 %v10724_v7  ;;  %10007 = vmatmul.mubr.msk.f32.gmra.mrb[174].mxu0 %vm459_vm1, %v9991_v24 }
 0xeeb   :  { %10727 = vmatprep.subr.bf16.mxu1 %v10726_v1  ;;  %7314 = vmatprep.mubr.f32.mxu0 %v18740_v38  ;;  %v7198_v1 = vpop.permute.xlu1 %7197 }
 0xeee   :  { %10729 = vmatpush1.bf16.msra.mxu1 %v10728_v45  ;;  %10008 = vmatmul.mubr.msk.f32.gmra.mrb[176].mxu0 %vm459_vm1, %v9992_v20  ;;  %v19044_v45 = vld [vmem:[#allocation27_spill] sm:$0xff] }
 0xeef   :  { %10013 = vmatprep.subr.msk.mxu1 %vm69_vm0, %v7155_v59  ;;  %7320 = vmatprep.mubr.f32.mxu0 %v18740_v38 }
 0xef2   :  { %10014 = vmatpush1.msk.msra.mxu1 %vm69_vm0, %v7154_v47  ;;  %10009 = vmatmul.mubr.msk.f32.gmra.mrb[178].mxu0 %vm459_vm1, %v9993_v21 }
 0xef3   :  { %10015 = vmatmul.mubr.msk.f32.vlgmr.msra.gmra.mrb[172].mxu1 %vm459_vm1, %v9990_v42  ;;  %7326 = vmatprep.mubr.f32.mxu0 %v18740_v38 }
 0xef4   :  { %7415 = vmatprep.mubr.f32.mxu1 %v18740_v38 }
 0xef6   :  { %10010 = vmatmul.mubr.msk.f32.gmra.mrb[180].mxu0 %vm459_vm1, %v9994_v55 }
 0xef7   :  { %10016 = vmatmul.mubr.msk.f32.gmra.mrb[174].mxu1 %vm459_vm1, %v9991_v24  ;;  %7332 = vmatprep.mubr.f32.mxu0 %v18740_v38 }
 0xef8   :  { %7421 = vmatprep.mubr.f32.mxu1 %v18740_v38 }
 0xefa   :  { %10011 = vmatmul.mubr.msk.f32.gmra.mrb[182].mxu0 %vm459_vm1, %v9995_v49 }
 0xefb   :  { %10017 = vmatmul.mubr.msk.f32.gmra.mrb[176].mxu1 %vm459_vm1, %v9992_v20  ;;  %7338 = vmatprep.mubr.f32.mxu0 %v18740_v38 }
 0xefc   :  { %7427 = vmatprep.mubr.f32.mxu1 %v18740_v38 }
 0xefe   :  { %10012 = vmatmul.mubr.msk.f32.gmra.mrb[184].mxu0 %vm459_vm1, %v9996_v53 }
 0xeff   :  { %10018 = vmatmul.mubr.msk.f32.gmra.mrb[178].mxu1 %vm459_vm1, %v9993_v21  ;;  %7626 = vmatprep.mubr.f32.mxu0 %v18740_v38 }
 0xf00   :  { %7433 = vmatprep.mubr.f32.mxu1 %v18740_v38 }
 0xf03   :  { %10019 = vmatmul.mubr.msk.f32.gmra.mrb[180].mxu1 %vm459_vm1, %v9994_v55 }
 0xf04   :  { %7439 = vmatprep.mubr.f32.mxu1 %v18740_v38 }
 0xf07   :  { %10020 = vmatmul.mubr.msk.f32.gmra.mrb[182].mxu1 %vm459_vm1, %v9995_v49 }
 0xf08   :  { %7445 = vmatprep.mubr.f32.mxu1 %v18740_v38 }
 0xf0b   :  { %10021 = vmatmul.mubr.msk.f32.gmra.mrb[184].mxu1 %vm459_vm1, %v9996_v53 }
 0xf0c   :  { %7733 = vmatprep.mubr.f32.mxu1 %v18740_v38 }
 0xfb9   :  { %v7304_v60 = vpop.f32.mrb[172].mxu0 }
 0xfba   :  { %v7306_v9 = vpop.f32.mrb[173].mxu0  ;;  %v7305_v12 = vadd.f32 %v7304_v60, %v19042_v33 }
 0xfbb   :  { %v7307_v10 = vadd.f32 %v7306_v9, %v19042_v33 }
 0xfbc   :  { %v7452_v25 = vmax.f32 %v7305_v12, 0.0 }
 0xfbd   :  { %v7310_v27 = vpop.f32.mrb[174].mxu0  ;;  %v7453_v19 = vmax.f32 %v7307_v10, 0.0 }
 0xfbe   :  { %v7311_v22 = vadd.f32 %v7310_v27, %v7178_v56  ;;  %v7312_v61 = vpop.f32.mrb[175].mxu0 }
 0xfbf   :  { %v7313_v14 = vadd.f32 %v7312_v61, %v7178_v56 }
 0xfc0   :  { %v7456_v34 = vmax.f32 %v7311_v22, 0.0 }
 0xfc1   :  { %v7457_v50 = vmax.f32 %v7313_v14, 0.0  ;;  %v7316_v29 = vpop.f32.mrb[176].mxu0 }
 0xfc2   :  { %v10732_v35 = vpack.c.bf16 %v7456_v34, %v7452_v25  ;;  %v7318_v17 = vpop.f32.mrb[177].mxu0  ;;  %v7317_v28 = vadd.f32 %v7316_v29, %v19043_v26 }
 0xfc3   :  { %v10730_v46 = vpack.c.bf16 %v7457_v50, %v7453_v19  ;;  %v7319_v5 = vadd.f32 %v7318_v17, %v19043_v26 }
 0xfc4   :  { %v7460_v6 = vmax.f32 %v7317_v28, 0.0 }
 0xfc5   :  { %v7322_v37 = vpop.f32.mrb[178].mxu0  ;;  %10731 = vmatprep.subr.bf16.mxu0 %v10730_v46  ;;  %v7461_v51 = vmax.f32 %v7319_v5, 0.0 }
 0xfc6   :  { %v7411_v3 = vpop.f32.mrb[172].mxu1  ;;  %v7323_v54 = vadd.f32 %v7322_v37, %v7188_v44  ;;  %v7324_v0 = vpop.f32.mrb[179].mxu0  ;;  %10733 = vmatpush1.bf16.msra.mxu0 %v10732_v35 }
 0xfc7   :  { %v7413_v11 = vpop.f32.mrb[173].mxu1  ;;  %v7325_v58 = vadd.f32 %v7324_v0, %v7188_v44  ;;  %v7412_v43 = vadd.f32 %v7411_v3, %v19042_v33  ;;  %v19045_v3 = vld [vmem:[#allocation26_spill] sm:$0xff] }
 0xfc8   :  { %v7464_v8 = vmax.f32 %v7323_v54, 0.0  ;;  %v7414_v48 = vadd.f32 %v7413_v11, %v19042_v33 }
 0xfc9   :  { %v7465_v32 = vmax.f32 %v7325_v58, 0.0  ;;  %v7328_v15 = vpop.f32.mrb[180].mxu0  ;;  %v7454_v16 = vmax.f32 %v7412_v43, 0.0 }
 0xfca   :  { %v7417_v42 = vpop.f32.mrb[174].mxu1  ;;  %v10736_v7 = vpack.c.bf16 %v7464_v8, %v7460_v6  ;;  %v7330_v62 = vpop.f32.mrb[181].mxu0  ;;  %v7329_v20 = vadd.f32 %v7328_v15, %v19044_v45  ;;  %v7455_v59 = vmax.f32 %v7414_v48, 0.0 }
 0xfcb   :  { %v7418_v57 = vadd.f32 %v7417_v42, %v7178_v56  ;;  %v7419_v2 = vpop.f32.mrb[175].mxu1  ;;  %v10734_v24 = vpack.c.bf16 %v7465_v32, %v7461_v51  ;;  %v7331_v55 = vadd.f32 %v7330_v62, %v19044_v45  ;;  %v10022_v51 = vld [vmem:[%s18363_s5 + $0x70] sm:$0xff] }
 0xfcc   :  { %v7420_v63 = vadd.f32 %v7419_v2, %v7178_v56  ;;  %v7468_v27 = vmax.f32 %v7329_v20, 0.0 }
 0xfcd   :  { %v7458_v41 = vmax.f32 %v7418_v57, 0.0  ;;  %v7334_v49 = vpop.f32.mrb[182].mxu0  ;;  %10735 = vmatprep.subr.bf16.mxu0 %v10734_v24  ;;  %v7469_v25 = vmax.f32 %v7331_v55, 0.0  ;;  %v10023_v24 = vld [vmem:[%s18363_s5 + $0x78] sm:$0xff]  ;;  %v10024_v55 = vld [vmem:[%s18363_s5 + $0x80] sm:$0xff] }
 0xfce   :  { %v7459_v47 = vmax.f32 %v7420_v63, 0.0  ;;  %v7423_v21 = vpop.f32.mrb[176].mxu1  ;;  %v7335_v9 = vadd.f32 %v7334_v49, %v7198_v1  ;;  %v7336_v33 = vpop.f32.mrb[183].mxu0  ;;  %10737 = vmatpush1.bf16.msra.mxu0 %v10736_v7 }
 0xfcf   :  { %v10744_v53 = vpack.c.bf16 %v7458_v41, %v7454_v16  ;;  %v7425_v60 = vpop.f32.mrb[177].mxu1  ;;  %v7337_v56 = vadd.f32 %v7336_v33, %v7198_v1  ;;  %v7424_v10 = vadd.f32 %v7423_v21, %v19043_v26  ;;  %v10027_v33 = vld [vmem:[%s18363_s5 + $0x98] sm:$0xff] }
 0xfd0   :  { %v10742_v12 = vpack.c.bf16 %v7459_v47, %v7455_v59  ;;  %v7472_v22 = vmax.f32 %v7335_v9, 0.0  ;;  %v7426_v61 = vadd.f32 %v7425_v60, %v19043_v26  ;;  %v10025_v60 = vld [vmem:[%s18363_s5 + $0x88] sm:$0xff]  ;;  %v10026_v9 = vld [vmem:[%s18363_s5 + $0x90] sm:$0xff] }
 0xfd1   :  { %v7473_v34 = vmax.f32 %v7337_v56, 0.0  ;;  %v7340_v19 = vpop.f32.mrb[184].mxu0  ;;  %v7462_v37 = vmax.f32 %v7424_v10, 0.0 }
 0xfd2   :  { %v7429_v14 = vpop.f32.mrb[178].mxu1  ;;  %10743 = vmatprep.subr.bf16.mxu1 %v10742_v12  ;;  %v10740_v35 = vpack.c.bf16 %v7472_v22, %v7468_v27  ;;  %v7342_v17 = vpop.f32.mrb[185].mxu0  ;;  %v7341_v54 = vadd.f32 %v7340_v19, %v19045_v3  ;;  %v7463_v0 = vmax.f32 %v7426_v61, 0.0  ;;  %v10028_v12 = vld [vmem:[%s18363_s5 + $0xa0] sm:$0x1] }
 0xfd3   :  { %v7430_v50 = vadd.f32 %v7429_v14, %v7188_v44  ;;  %v7431_v29 = vpop.f32.mrb[179].mxu1  ;;  %10745 = vmatpush1.bf16.msra.mxu1 %v10744_v53  ;;  %v10738_v28 = vpack.c.bf16 %v7473_v34, %v7469_v25  ;;  %v7343_v5 = vadd.f32 %v7342_v17, %v19045_v3  ;;  %v16967_v27 = vpop.permute.xlu1 %7496 }
 0xfd4   :  { %v7432_v46 = vadd.f32 %v7431_v29, %v7188_v44  ;;  %v7476_v42 = vmax.f32 %v7341_v54, 0.0 }
 0xfd5   :  { %v7466_v11 = vmax.f32 %v7430_v50, 0.0  ;;  %v7477_v43 = vmax.f32 %v7343_v5, 0.0  ;;  %10739 = vmatprep.subr.bf16.mxu0 %v10738_v28  ;;  %v19046_v50 = vld [vmem:[#allocation31_spill] sm:$0xff] }
 0xfd6   :  { %v7467_v26 = vmax.f32 %v7432_v46, 0.0  ;;  %v7435_v58 = vpop.f32.mrb[180].mxu1  ;;  %10741 = vmatpush1.bf16.msra.mxu0 %v10740_v35 }
 0xfd7   :  { %v10748_v6 = vpack.c.bf16 %v7466_v11, %v7462_v37  ;;  %v7437_v8 = vpop.f32.mrb[181].mxu1  ;;  %10036 = vmatprep.subr.msk.mxu0 %vm69_vm0, %v7477_v43  ;;  %v7436_v44 = vadd.f32 %v7435_v58, %v19044_v45  ;;  %v16969_v25 = vpop.permute.xlu1 %7506  ;;  %v19047_v58 = vld [vmem:[#allocation30_spill] sm:$0xff] }
 0xfd8   :  { %v10746_v48 = vpack.c.bf16 %v7467_v26, %v7463_v0  ;;  %v7438_v32 = vadd.f32 %v7437_v8, %v19044_v45 }
 0xfd9   :  { %v7470_v62 = vmax.f32 %v7436_v44, 0.0 }
 0xfda   :  { %v7441_v15 = vpop.f32.mrb[182].mxu1  ;;  %10747 = vmatprep.subr.bf16.mxu1 %v10746_v48  ;;  %10037 = vmatpush1.msk.msra.mxu0 %vm69_vm0, %v7476_v42  ;;  %v7471_v16 = vmax.f32 %v7438_v32, 0.0 }
 0xfdb   :  { %v7442_v57 = vadd.f32 %v7441_v15, %v7198_v1  ;;  %v7443_v2 = vpop.f32.mrb[183].mxu1  ;;  %10749 = vmatpush1.bf16.msra.mxu1 %v10748_v6  ;;  %10038 = vmatmul.mubr.msk.f32.vlgmr.msra.gmra.mrb[186].mxu0 %vm459_vm1, %v10022_v51  ;;  %v16975_v37 = vpop.permute.xlu1 %7516 }
 0xfdc   :  { %v7444_v7 = vadd.f32 %v7443_v2, %v7198_v1  ;;  %7632 = vmatprep.mubr.f32.mxu0 %v18740_v38 }
 0xfdd   :  { %v7474_v63 = vmax.f32 %v7442_v57, 0.0 }
 0xfde   :  { %v7475_v41 = vmax.f32 %v7444_v7, 0.0  ;;  %v7447_v45 = vpop.f32.mrb[184].mxu1 }
 0xfdf   :  { %v10752_v20 = vpack.c.bf16 %v7474_v63, %v7470_v62  ;;  %v7449_v59 = vpop.f32.mrb[185].mxu1  ;;  %10039 = vmatmul.mubr.msk.f32.gmra.mrb[188].mxu0 %vm459_vm1, %v10023_v24  ;;  %v7448_v1 = vadd.f32 %v7447_v45, %v19045_v3 }
 0xfe0   :  { %v10750_v47 = vpack.c.bf16 %v7475_v41, %v7471_v16  ;;  %v7450_v21 = vadd.f32 %v7449_v59, %v19045_v3  ;;  %7638 = vmatprep.mubr.f32.mxu0 %v18740_v38 }
 0xfe1   :  { %v7478_v53 = vmax.f32 %v7448_v1, 0.0 }
 0xfe2   :  { %v7479_v49 = vmax.f32 %v7450_v21, 0.0  ;;  %10751 = vmatprep.subr.bf16.mxu1 %v10750_v47 }
 0xfe3   :  { %10753 = vmatpush1.bf16.msra.mxu1 %v10752_v20  ;;  %10040 = vmatmul.mubr.msk.f32.gmra.mrb[190].mxu0 %vm459_vm1, %v10024_v55 }
 0xfe4   :  { %10045 = vmatprep.subr.msk.mxu1 %vm69_vm0, %v7479_v49  ;;  %7644 = vmatprep.mubr.f32.mxu0 %v18740_v38 }
 0xfe7   :  { %10046 = vmatpush1.msk.msra.mxu1 %vm69_vm0, %v7478_v53  ;;  %10041 = vmatmul.mubr.msk.f32.gmra.mrb[192].mxu0 %vm459_vm1, %v10025_v60 }
 0xfe8   :  { %10047 = vmatmul.mubr.msk.f32.vlgmr.msra.gmra.mrb[186].mxu1 %vm459_vm1, %v10022_v51  ;;  %7650 = vmatprep.mubr.f32.mxu0 %v18740_v38 }
 0xfe9   :  { %7739 = vmatprep.mubr.f32.mxu1 %v18740_v38 }
 0xfeb   :  { %10042 = vmatmul.mubr.msk.f32.gmra.mrb[194].mxu0 %vm459_vm1, %v10026_v9 }
 0xfec   :  { %10048 = vmatmul.mubr.msk.f32.gmra.mrb[188].mxu1 %vm459_vm1, %v10023_v24  ;;  %7656 = vmatprep.mubr.f32.mxu0 %v18740_v38  ;;  %v19048_v24 = vld [vmem:[#allocation35_spill] sm:$0xff] }
 0xfed   :  { %7745 = vmatprep.mubr.f32.mxu1 %v18740_v38 }
 0xfef   :  { %10043 = vmatmul.mubr.msk.f32.gmra.mrb[196].mxu0 %vm459_vm1, %v10027_v33 }
 0xff0   :  { %10049 = vmatmul.mubr.msk.f32.gmra.mrb[190].mxu1 %vm459_vm1, %v10024_v55  ;;  %7662 = vmatprep.mubr.f32.mxu0 %v18740_v38  ;;  %v19050_v55 = vld [vmem:[#allocation62_spill] sm:$0xff] }
 0xff1   :  { %7751 = vmatprep.mubr.f32.mxu1 %v18740_v38 }
 0xff3   :  { %10044 = vmatmul.mubr.msk.f32.gmra.mrb[198].mxu0 %vm459_vm1, %v10028_v12 }
 0xff4   :  { %10050 = vmatmul.mubr.msk.f32.gmra.mrb[192].mxu1 %vm459_vm1, %v10025_v60  ;;  %8294 = vmatprep.mubr.f32.mxu0 %v18740_v38 }
 0xff5   :  { %7757 = vmatprep.mubr.f32.mxu1 %v18740_v38 }
 0xff8   :  { %10051 = vmatmul.mubr.msk.f32.gmra.mrb[194].mxu1 %vm459_vm1, %v10026_v9 }
 0xff9   :  { %7763 = vmatprep.mubr.f32.mxu1 %v18740_v38 }
 0xffc   :  { %10052 = vmatmul.mubr.msk.f32.gmra.mrb[196].mxu1 %vm459_vm1, %v10027_v33  ;;  %v19051_v33 = vld [vmem:[#allocation65_spill] sm:$0xff] }
 0xffd   :  { %7769 = vmatprep.mubr.f32.mxu1 %v18740_v38 }
0x1000   :  { %10053 = vmatmul.mubr.msk.f32.gmra.mrb[198].mxu1 %vm459_vm1, %v10028_v12 }
0x1001   :  { %8401 = vmatprep.mubr.f32.mxu1 %v18740_v38 }
0x10ae   :  { %v7628_v56 = vpop.f32.mrb[186].mxu0 }
0x10af   :  { %v7630_v10 = vpop.f32.mrb[187].mxu0  ;;  %v7629_v3 = vadd.f32 %v7628_v56, %v16967_v27 }
0x10b0   :  { %v7631_v11 = vadd.f32 %v7630_v10, %v16967_v27 }
0x10b1   :  { %v16988_v51 = vadd.f32 %v7629_v3, %v16484_v52 }
0x10b2   :  { %v7634_v22 = vpop.f32.mrb[188].mxu0  ;;  %v16995_v15 = vadd.f32 %v7631_v11, %v16491_v40  ;;  %v19057_v11 = vld [vmem:[#allocation68_spill] sm:$0xff] }
0x10b3   :  { %v7636_v61 = vpop.f32.mrb[189].mxu0  ;;  %v7635_v29 = vadd.f32 %v7634_v22, %v19046_v50 }
0x10b4   :  { %v7637_v46 = vadd.f32 %v7636_v61, %v19046_v50 }
0x10b5   :  { %v16980_v0 = vadd.f32 %v7635_v29, %v16475_v18 }
0x10b6   :  { %v7640_v14 = vpop.f32.mrb[190].mxu0  ;;  %v16984_v8 = vadd.f32 %v7637_v46, %v16479_v31 }
0x10b7   :  { %v7642_v34 = vpop.f32.mrb[191].mxu0  ;;  %v7641_v5 = vadd.f32 %v7640_v14, %v16969_v25  ;;  %v7804_v2 = vadd.f32 %v16980_v0, %v16988_v51 }
0x10b8   :  { %v7643_v54 = vadd.f32 %v7642_v34, %v16969_v25 }
0x10b9   :  { %v16991_v32 = vadd.f32 %v7641_v5, %v16487_v39  ;;  %v7817_v39 = vadd.f32 %v16984_v8, %v16995_v15 }
0x10ba   :  { %v7646_v35 = vpop.f32.mrb[192].mxu0  ;;  %v16998_v57 = vadd.f32 %v7643_v54, %v16499_v4 }
0x10bb   :  { %v7735_v19 = vpop.f32.mrb[186].mxu1  ;;  %v7648_v28 = vpop.f32.mrb[193].mxu0  ;;  %v7647_v43 = vadd.f32 %v7646_v35, %v19047_v58  ;;  %v7805_v41 = vadd.f32 %v7804_v2, %v16991_v32  ;;  %v19055_v35 = vld [vmem:[#allocation61_spill] sm:$0xff] }
0x10bc   :  { %v7737_v17 = vpop.f32.mrb[187].mxu1  ;;  %v7649_v44 = vadd.f32 %v7648_v28, %v19047_v58  ;;  %v7818_v59 = vadd.f32 %v7817_v39, %v16998_v57 }
0x10bd   :  { %v17004_v52 = vadd.f32 %v7647_v43, %v16510_v36  ;;  %v17017_v36 = vpop.permute.xlu1 %7526 }
0x10be   :  { %v7652_v6 = vpop.f32.mrb[194].mxu0  ;;  %v17009_v40 = vadd.f32 %v7649_v44, %v16517_v23 }
0x10bf   :  { %v7741_v26 = vpop.f32.mrb[188].mxu1  ;;  %v7654_v42 = vpop.f32.mrb[195].mxu0  ;;  %v7653_v18 = vadd.f32 %v7652_v6, %v16975_v37  ;;  %v7806_v21 = vadd.f32 %v7805_v41, %v17004_v52 }
0x10c0   :  { %v7743_v48 = vpop.f32.mrb[189].mxu1  ;;  %v7655_v31 = vadd.f32 %v7654_v42, %v16975_v37  ;;  %v7742_v23 = vadd.f32 %v7741_v26, %v19046_v50  ;;  %v7819_v60 = vadd.f32 %v7818_v59, %v17009_v40  ;;  %v19059_v26 = vld [vmem:[#allocation60_spill] sm:$0xff]  ;;  %v19060_v42 = vld [vmem:[#allocation63_spill] sm:$0xff] }
0x10c1   :  { %v17014_v45 = vadd.f32 %v7653_v18, %v16524_v13  ;;  %v7736_v13 = vadd.f32 %v7735_v19, %v16967_v27  ;;  %v7744_v14 = vadd.f32 %v7743_v48, %v19046_v50  ;;  %v19053_v19 = vld [vmem:[#allocation66_spill] sm:$0xff]  ;;  %v7738_v50 = vadd.f32 %v7737_v17, %v16967_v27  ;;  %v19062_v17 = vld [vmem:[#allocation59_spill] sm:$0xff] }
0x10c2   :  { %v7658_v62 = vpop.f32.mrb[196].mxu0  ;;  %v17021_v47 = vadd.f32 %v7655_v31, %v16532_v30  ;;  %v17043_v46 = vadd.f32 %v7742_v23, %v19055_v35  ;;  %v19074_v35 = vld [vmem:[#allocation69_spill] sm:$0xff] }
0x10c3   :  { %v7747_v7 = vpop.f32.mrb[190].mxu1  ;;  %v7659_v4 = vadd.f32 %v7658_v62, %v19048_v24  ;;  %v7660_v16 = vpop.f32.mrb[197].mxu0  ;;  %v7807_v22 = vadd.f32 %v7806_v21, %v17014_v45  ;;  %v17051_v43 = vadd.f32 %v7736_v13, %v19059_v26  ;;  %v19068_v13 = vld [vmem:[#allocation71_spill] sm:$0xff] }
0x10c4   :  { %v7749_v63 = vpop.f32.mrb[191].mxu1  ;;  %v7661_v20 = vadd.f32 %v7660_v16, %v19048_v24  ;;  %19049 = vst [vmem:[#allocation77_spill] sm:$0xff] %v17021_v47  ;;  %v7748_v10 = vadd.f32 %v7747_v7, %v16969_v25  ;;  %v7820_v34 = vadd.f32 %v7819_v60, %v17021_v47  ;;  %19056 = vst [vmem:[#allocation98_spill] sm:$0xff] %v17043_v46  ;;  %v19064_v16 = vld [vmem:[#allocation67_spill] sm:$0xff] }
0x10c5   :  { %v17026_v49 = vadd.f32 %v7659_v4, %v19050_v55  ;;  %v7750_v62 = vadd.f32 %v7749_v63, %v16969_v25  ;;  %v7830_v27 = vadd.f32 %v17043_v46, %v17051_v43  ;;  %v17067_v4 = vadd.f32 %v7744_v14, %v19062_v17 }
0x10c6   :  { %v7664_v53 = vpop.f32.mrb[198].mxu0  ;;  %v17031_v12 = vadd.f32 %v7661_v20, %v19051_v33  ;;  %v17058_v18 = vadd.f32 %v7748_v10, %v19060_v42 }
0x10c7   :  { %v7753_v1 = vpop.f32.mrb[192].mxu1  ;;  %v7665_v30 = vadd.f32 %v7664_v53, %v17017_v36  ;;  %v7666_v56 = vpop.f32.mrb[199].mxu0  ;;  %v7808_v5 = vadd.f32 %v7807_v22, %v17026_v49  ;;  %19063 = vst [vmem:[#allocation20_spill] sm:$0xff] %v17067_v4  ;;  %v19066_v53 = vld [vmem:[#allocation58_spill] sm:$0xff] }
0x10c8   :  { %v7755_v9 = vpop.f32.mrb[193].mxu1  ;;  %19052 = vst [vmem:[#allocation76_spill] sm:$0xff] %v17031_v12  ;;  %v7667_v61 = vadd.f32 %v7666_v56, %v17017_v36  ;;  %v7754_v28 = vadd.f32 %v7753_v1, %v19047_v58  ;;  %v7821_v48 = vadd.f32 %v7820_v34, %v17031_v12  ;;  %19061 = vst [vmem:[#allocation97_spill] sm:$0xff] %v17058_v18 }
0x10c9   :  { %v17040_v29 = vadd.f32 %v7665_v30, %v19053_v19  ;;  %v7756_v23 = vadd.f32 %v7755_v9, %v19047_v58  ;;  %v17075_v25 = vadd.f32 %v7738_v50, %v19066_v53  ;;  %v7831_v63 = vadd.f32 %v7830_v27, %v17058_v18  ;;  %v19070_v30 = vld [vmem:[#allocation64_spill] sm:$0xff] }
0x10ca   :  { %v17048_v54 = vadd.f32 %v7667_v61, %v19057_v11  ;;  %v17070_v41 = vadd.f32 %v7754_v28, %v19064_v16  ;;  %v17082_v56 = vadd.f32 %v7750_v62, %v19070_v30  ;;  %v19072_v61 = vld [vmem:[#allocation73_spill] sm:$0xff]  ;;  %v19082_v16 = vld [vmem:[#allocation72_spill] sm:$0xff] }
0x10cb   :  { %19054 = vst [vmem:[#allocation79_spill] sm:$0xff] %v17040_v29  ;;  %v7759_v3 = vpop.f32.mrb[194].mxu1  ;;  %v7809_v44 = vsel %vm69_vm0, %v17040_v29, 0.0  ;;  %19067 = vst [vmem:[#allocation99_spill] sm:$0xff] %v17075_v25  ;;  %v7843_v58 = vadd.f32 %v17067_v4, %v17075_v25  ;;  %v17092_v28 = vadd.f32 %v7756_v23, %v19074_v35 }
0x10cc   :  { %19058 = vst [vmem:[#allocation102_spill] sm:$0xff] %v17048_v54  ;;  %v7761_v6 = vpop.f32.mrb[195].mxu1  ;;  %v7760_v31 = vadd.f32 %v7759_v3, %v16975_v37  ;;  %v7810_v2 = vadd.f32 %v7809_v44, %v7808_v5  ;;  %v7822_v7 = vsel %vm69_vm0, %v17048_v54, 0.0  ;;  %19065 = vst [vmem:[#allocation23_spill] sm:$0xff] %v17070_v41  ;;  %v7832_v9 = vadd.f32 %v7831_v63, %v17070_v41  ;;  %v19076_v44 = vld [vmem:[#allocation70_spill] sm:$0xff] }
0x10cd   :  { %v7823_v39 = vadd.f32 %v7822_v7, %v7821_v48  ;;  %19071 = vst [vmem:[#allocation96_spill] sm:$0xff] %v17082_v56  ;;  %v7762_v10 = vadd.f32 %v7761_v6, %v16975_v37  ;;  %19075 = vst [vmem:[#allocation104_spill] sm:$0xff] %v17092_v28  ;;  %v7844_v48 = vadd.f32 %v7843_v58, %v17082_v56 }
0x10ce   :  { %v7811_v59 = vrot.slane %v7810_v2, 4  ;;  %v17079_v60 = vadd.f32 %v7760_v31, %v19068_v13  ;;  %v19078_v31 = vld [vmem:[#allocation75_spill] sm:$0xff] }
0x10cf   :  { %v7765_v20 = vpop.f32.mrb[196].mxu1  ;;  %v7824_v55 = vrot.slane %v7823_v39, 4  ;;  %v17100_v42 = vadd.f32 %v7762_v10, %v19076_v44  ;;  %v7845_v17 = vadd.f32 %v7844_v48, %v17092_v28 }
0x10d0   :  { %v7766_v21 = vadd.f32 %v7765_v20, %v19048_v24  ;;  %v7767_v1 = vpop.f32.mrb[197].mxu1  ;;  %19069 = vst [vmem:[#allocation78_spill] sm:$0xff] %v17079_v60  ;;  %v7812_v33 = vadd.f32 %v7811_v59, %v7810_v2  ;;  %v7833_v26 = vadd.f32 %v7832_v9, %v17079_v60 }
0x10d1   :  { %v7825_v22 = vadd.f32 %v7824_v55, %v7823_v39  ;;  %v7768_v3 = vadd.f32 %v7767_v1, %v19048_v24  ;;  %19077 = vst [vmem:[#allocation106_spill] sm:$0xff] %v17100_v42  ;;  %v19080_v39 = vld [vmem:[#allocation74_spill] sm:$0xff]  ;;  %v7846_v1 = vadd.f32 %v7845_v17, %v17100_v42 }
0x10d2   :  { %v17089_v14 = vadd.f32 %v7766_v21, %v19072_v61  ;;  %v7813_v34 = vrot.slane %v7812_v33, 2 }
0x10d3   :  { %v7771_v19 = vpop.f32.mrb[198].mxu1  ;;  %v7826_v11 = vrot.slane %v7825_v22, 2  ;;  %v17111_v20 = vadd.f32 %v7768_v3, %v19082_v16 }
0x10d4   :  { %19073 = vst [vmem:[#allocation95_spill] sm:$0xff] %v17089_v14  ;;  %v7772_v5 = vadd.f32 %v7771_v19, %v17017_v36  ;;  %v7773_v37 = vpop.f32.mrb[199].mxu1  ;;  %v7814_v50 = vadd.f32 %v7813_v34, %v7812_v33  ;;  %v7834_v24 = vadd.f32 %v7833_v26, %v17089_v14 }
0x10d5   :  { %v7774_v6 = vadd.f32 %v7773_v37, %v17017_v36  ;;  %v7827_v7 = vadd.f32 %v7826_v11, %v7825_v22  ;;  %19083 = vst [vmem:[#allocation101_spill] sm:$0xff] %v17111_v20  ;;  %v7847_v33 = vadd.f32 %v7846_v1, %v17111_v20 }
0x10d6   :  { %v17103_v2 = vadd.f32 %v7772_v5, %v19078_v31  ;;  %v7815_v62 = vrot.slane %v7814_v50, 1 }
0x10d7   :  { %v17107_v27 = vadd.f32 %v7774_v6, %v19080_v39  ;;  %v7828_v59 = vrot.slane %v7827_v7, 1 }
0x10d8   :  { %19079 = vst [vmem:[#allocation108_spill] sm:$0xff] %v17103_v2  ;;  %v7835_v36 = vsel %vm69_vm0, %v17103_v2, 0.0  ;;  %v7816_v23 = vadd.f32 %v7815_v62, %v7814_v50 }
0x10d9   :  { %19081 = vst [vmem:[#allocation112_spill] sm:$0xff] %v17107_v27  ;;  %v7836_v21 = vadd.f32 %v7835_v36, %v7834_v24  ;;  %v7829_v55 = vadd.f32 %v7828_v59, %v7827_v7  ;;  %v7848_v13 = vsel %vm69_vm0, %v17107_v27, 0.0 }
0x10da   :  { %v7856_v53 = vmul.f32 0.020408163, %v7816_v23  ;;  %v7849_v61 = vadd.f32 %v7848_v13, %v7847_v33 }
0x10db   :  { %v7837_v63 = vrot.slane %v7836_v21, 4  ;;  %v7857_v58 = vmul.f32 0.020408163, %v7829_v55 }
0x10dc   :  { %v17120_v30 = vsub.f32 %v16988_v51, %v7856_v53  ;;  %v17123_v10 = vsub.f32 %v16980_v0, %v7856_v53  ;;  %v17126_v22 = vsub.f32 %v16991_v32, %v7856_v53  ;;  %v17129_v34 = vsub.f32 %v17004_v52, %v7856_v53 }
0x10dd   :  { %v7838_v9 = vadd.f32 %v7837_v63, %v7836_v21  ;;  %v17136_v3 = vsub.f32 %v17014_v45, %v7856_v53  ;;  %v17139_v5 = vsub.f32 %v17040_v29, %v7856_v53  ;;  %v17144_v50 = vsub.f32 %v16995_v15, %v7857_v58 }
0x10de   :  { %v7888_v19 = vmul.f32 %v17120_v30, %v17120_v30  ;;  %v7892_v35 = vmul.f32 %v17123_v10, %v17123_v10  ;;  %v7896_v37 = vmul.f32 %v17126_v22, %v17126_v22  ;;  %v17147_v6 = vsub.f32 %v16984_v8, %v7857_v58 }
0x10df   :  { %v7839_v11 = vrot.slane %v7838_v9, 2  ;;  %v17150_v48 = vsub.f32 %v17026_v49, %v7856_v53  ;;  %v7850_v31 = vrot.slane %v7849_v61, 4  ;;  %v7900_v7 = vmul.f32 %v17129_v34, %v17129_v34 }
0x10e0   :  { %v7916_v26 = vadd.f32 %v7892_v35, %v7888_v19  ;;  %v17155_v62 = vsub.f32 %v16998_v57, %v7857_v58  ;;  %v7889_v39 = vmul.f32 %v17144_v50, %v17144_v50  ;;  %v7912_v17 = vmul.f32 %v17139_v5, %v17139_v5 }
0x10e1   :  { %v7840_v44 = vadd.f32 %v7839_v11, %v7838_v9  ;;  %v7893_v36 = vmul.f32 %v17147_v6, %v17147_v6  ;;  %v7904_v59 = vmul.f32 %v17136_v3, %v17136_v3  ;;  %v7851_v55 = vadd.f32 %v7850_v31, %v7849_v61 }
0x10e2   :  { %v7917_v24 = vadd.f32 %v7916_v26, %v7896_v37  ;;  %v7908_v53 = vmul.f32 %v17150_v48, %v17150_v48  ;;  %v7897_v13 = vmul.f32 %v17155_v62, %v17155_v62  ;;  %v7921_v33 = vsel %vm69_vm0, %v7912_v17, 0.0 }
0x10e3   :  { %v7841_v16 = vrot.slane %v7840_v44, 1  ;;  %v7929_v1 = vadd.f32 %v7893_v36, %v7889_v39  ;;  %v17171_v19 = vsub.f32 %v17009_v40, %v7857_v58  ;;  %v17174_v11 = vsub.f32 %v17021_v47, %v7857_v58 }
0x10e4   :  { %v7918_v23 = vadd.f32 %v7917_v24, %v7900_v7  ;;  %v17177_v37 = vsub.f32 %v17031_v12, %v7857_v58  ;;  %v7852_v7 = vrot.slane %v7851_v55, 2  ;;  %v17189_v39 = vsub.f32 %v17048_v54, %v7857_v58 }
0x10e5   :  { %v7842_v21 = vadd.f32 %v7841_v16, %v7840_v44  ;;  %v7930_v61 = vadd.f32 %v7929_v1, %v7897_v13  ;;  %v7905_v58 = vmul.f32 %v17174_v11, %v17174_v11 }
0x10e6   :  { %v7919_v63 = vadd.f32 %v7918_v23, %v7904_v59  ;;  %v7901_v59 = vmul.f32 %v17171_v19, %v17171_v19  ;;  %v7909_v1 = vmul.f32 %v17177_v37, %v17177_v37 }
0x10e7   :  { %v7858_v9 = vmul.f32 0.020408163, %v7842_v21 }
0x10e8   :  { %v7920_v35 = vadd.f32 %v7919_v63, %v7908_v53  ;;  %v7931_v13 = vadd.f32 %v7930_v61, %v7901_v59 }
0x10e9   :  { %v17180_v26 = vsub.f32 %v17051_v43, %v7858_v9  ;;  %v17183_v44 = vsub.f32 %v17043_v46, %v7858_v9  ;;  %v17186_v31 = vsub.f32 %v17058_v18, %v7858_v9  ;;  %v17192_v17 = vsub.f32 %v17070_v41, %v7858_v9 }
0x10ea   :  { %v7922_v24 = vadd.f32 %v7921_v33, %v7920_v35  ;;  %v17201_v21 = vsub.f32 %v17079_v60, %v7858_v9  ;;  %v7853_v33 = vadd.f32 %v7852_v7, %v7851_v55  ;;  %v17210_v41 = vsub.f32 %v17089_v14, %v7858_v9 }
0x10eb   :  { %v7890_v16 = vmul.f32 %v17180_v26, %v17180_v26  ;;  %v7894_v36 = vmul.f32 %v17183_v44, %v17183_v44  ;;  %v7898_v53 = vmul.f32 %v17186_v31, %v17186_v31  ;;  %v17213_v18 = vsub.f32 %v17103_v2, %v7858_v9 }
0x10ec   :  { %v7923_v23 = vrot.slane %v7922_v24, 4  ;;  %v7913_v60 = vmul.f32 %v17189_v39, %v17189_v39  ;;  %v7902_v29 = vmul.f32 %v17192_v17, %v17192_v17  ;;  %v7932_v12 = vadd.f32 %v7931_v13, %v7905_v58 }
0x10ed   :  { %v7942_v63 = vadd.f32 %v7894_v36, %v7890_v16  ;;  %v7854_v47 = vrot.slane %v7853_v33, 1  ;;  %v7906_v55 = vmul.f32 %v17201_v21, %v17201_v21  ;;  %v7914_v9 = vmul.f32 %v17213_v18, %v17213_v18 }
0x10ee   :  { %v7924_v35 = vadd.f32 %v7923_v23, %v7922_v24  ;;  %v7933_v7 = vadd.f32 %v7932_v12, %v7909_v1  ;;  %v7934_v36 = vsel %vm69_vm0, %v7913_v60, 0.0  ;;  %v7910_v59 = vmul.f32 %v17210_v41, %v17210_v41 }
0x10ef   :  { %v7943_v54 = vadd.f32 %v7942_v63, %v7898_v53  ;;  %v7855_v24 = vadd.f32 %v7854_v47, %v7853_v33 }
0x10f0   :  { %v7925_v46 = vrot.slane %v7924_v35, 2  ;;  %v7935_v53 = vadd.f32 %v7934_v36, %v7933_v7 }
0x10f1   :  { %v7944_v61 = vadd.f32 %v7943_v54, %v7902_v29  ;;  %v7859_v58 = vmul.f32 0.020408163, %v7855_v24  ;;  %v7947_v29 = vsel %vm69_vm0, %v7914_v9, 0.0 }
0x10f2   :  { %v7926_v16 = vadd.f32 %v7925_v46, %v7924_v35  ;;  %v7936_v2 = vrot.slane %v7935_v53, 4 }
0x10f3   :  { %v7945_v23 = vadd.f32 %v7944_v61, %v7906_v55  ;;  %v17227_v14 = vsub.f32 %v17075_v25, %v7859_v58  ;;  %v17230_v47 = vsub.f32 %v17067_v4, %v7859_v58  ;;  %v17234_v46 = vsub.f32 %v17082_v56, %v7859_v58  ;;  %v17243_v61 = vpop.permute.xlu1 %8022 }
0x10f4   :  { %v7927_v63 = vrot.slane %v7926_v16, 1  ;;  %v7937_v60 = vadd.f32 %v7936_v2, %v7935_v53  ;;  %v17237_v33 = vsub.f32 %v17092_v28, %v7859_v58  ;;  %v17246_v9 = vsub.f32 %v17100_v42, %v7859_v58 }
0x10f5   :  { %v7946_v13 = vadd.f32 %v7945_v23, %v7910_v59  ;;  %v7891_v35 = vmul.f32 %v17227_v14, %v17227_v14  ;;  %v7895_v55 = vmul.f32 %v17230_v47, %v17230_v47  ;;  %v7899_v2 = vmul.f32 %v17234_v46, %v17234_v46 }
0x10f6   :  { %v7928_v12 = vadd.f32 %v7927_v63, %v7926_v16  ;;  %v7938_v24 = vrot.slane %v7937_v60, 2  ;;  %v17251_v53 = vsub.f32 %v17107_v27, %v7859_v58  ;;  %v17254_v63 = vsub.f32 %v17111_v20, %v7859_v58 }
0x10f7   :  { %v7948_v54 = vadd.f32 %v7947_v29, %v7946_v13  ;;  %v7955_v36 = vadd.f32 %v7895_v55, %v7891_v35  ;;  %v7903_v13 = vmul.f32 %v17237_v33, %v17237_v33  ;;  %v7907_v42 = vmul.f32 %v17246_v9, %v17246_v9  ;;  %v17260_v35 = vpop.permute.xlu1 %8092 }
0x10f8   :  { %v7968_v1 = vmul.f32 0.020408163, %v7928_v12  ;;  %v7939_v23 = vadd.f32 %v7938_v24, %v7937_v60  ;;  %v7915_v55 = vmul.f32 %v17251_v53, %v17251_v53  ;;  %v7911_v58 = vmul.f32 %v17254_v63, %v17254_v63 }
0x10f9   :  { %v7949_v7 = vrot.slane %v7948_v54, 4  ;;  %v7956_v12 = vadd.f32 %v7955_v36, %v7899_v2 }
0x10fa   :  { %v7972_v16 = vadd.f32 1e-05, %v7968_v1  ;;  %v7940_v1 = vrot.slane %v7939_v23, 1  ;;  %v7960_v20 = vsel %vm69_vm0, %v7915_v55, 0.0 }
0x10fb   :  { %v7950_v59 = vadd.f32 %v7949_v7, %v7948_v54  ;;  %v7957_v28 = vadd.f32 %v7956_v12, %v7903_v13  ;;  %v17267_v13 = vpop.permute.xlu1 %8032 }
0x10fc   :  { %11176 = vrsqrt.f32 %v7972_v16  ;;  %v7941_v60 = vadd.f32 %v7940_v1, %v7939_v23 }
0x10fd   :  { %v7951_v29 = vrot.slane %v7950_v59, 2  ;;  %v7958_v7 = vadd.f32 %v7957_v28, %v7907_v42 }
0x10fe   :  { %v7969_v2 = vmul.f32 0.020408163, %v7941_v60 }
0x10ff   :  { %v7952_v54 = vadd.f32 %v7951_v29, %v7950_v59  ;;  %v7959_v16 = vadd.f32 %v7958_v7, %v7911_v58  ;;  %v17270_v28 = vpop.permute.xlu1 %8102  ;;  %v19084_v58 = vld [vmem:[#allocation34_spill] sm:$0xff] }
0x1100   :  { %v7973_v27 = vadd.f32 1e-05, %v7969_v2 }
0x1101   :  { %v7953_v24 = vrot.slane %v7952_v54, 1  ;;  %v7961_v56 = vadd.f32 %v7960_v20, %v7959_v16 }
0x1102   :  { %11178 = vrsqrt.f32 %v7973_v27 }
0x1103   :  { %v7954_v36 = vadd.f32 %v7953_v24, %v7952_v54  ;;  %v7962_v59 = vrot.slane %v7961_v56, 4  ;;  %v19085_v24 = vld [vmem:[#allocation36_spill] sm:$0xff] }
0x1105   :  { %v7970_v12 = vmul.f32 0.020408163, %v7954_v36  ;;  %v7963_v29 = vadd.f32 %v7962_v59, %v7961_v56 }
0x1106   :  { %v11177_v23 = vpop.eup %11176 }
0x1107   :  { %v7974_v1 = vadd.f32 1e-05, %v7970_v12  ;;  %v7964_v4 = vrot.slane %v7963_v29, 2  ;;  %v7980_v25 = vmul.f32 %v11177_v23, %v17120_v30  ;;  %v7984_v42 = vmul.f32 %v11177_v23, %v17123_v10 }
0x1108   :  { %v7988_v54 = vmul.f32 %v11177_v23, %v17126_v22  ;;  %v7992_v60 = vmul.f32 %v11177_v23, %v17129_v34  ;;  %v7996_v16 = vmul.f32 %v11177_v23, %v17136_v3  ;;  %v17283_v34 = vpop.permute.xlu1 %8042 }
0x1109   :  { %v7965_v20 = vadd.f32 %v7964_v4, %v7963_v29  ;;  %11180 = vrsqrt.f32 %v7974_v1  ;;  %v8050_v27 = vmul.f32 %v19084_v58, %v7980_v25  ;;  %v8054_v56 = vmul.f32 %v17243_v61, %v7984_v42 }
0x110a   :  { %v8058_v2 = vmul.f32 %v19085_v24, %v7988_v54  ;;  %v8062_v30 = vmul.f32 %v17267_v13, %v7992_v60  ;;  %v8000_v4 = vmul.f32 %v11177_v23, %v17150_v48 }
0x110b   :  { %v7966_v55 = vrot.slane %v7965_v20, 1 }
0x110c   :  { %v11179_v7 = vpop.eup %11178 }
0x110d   :  { %v7967_v36 = vadd.f32 %v7966_v55, %v7965_v20  ;;  %v7981_v10 = vmul.f32 %v11179_v7, %v17144_v50  ;;  %v7985_v22 = vmul.f32 %v11179_v7, %v17147_v6  ;;  %v7989_v25 = vmul.f32 %v11179_v7, %v17155_v62  ;;  %v19086_v50 = vld [vmem:[#allocation37_spill] sm:$0xff]  ;;  %v19087_v62 = vld [vmem:[#allocation38_spill] sm:$0xff] }
0x110e   :  { %v7993_v12 = vmul.f32 %v11179_v7, %v17171_v19  ;;  %v7997_v59 = vmul.f32 %v11179_v7, %v17174_v11  ;;  %v8001_v29 = vmul.f32 %v11179_v7, %v17177_v37  ;;  %v8120_v54 = vadd.f32 %v19086_v50, %v8050_v27 }
0x110f   :  { %v7971_v1 = vmul.f32 0.020408163, %v7967_v36  ;;  %v8051_v3 = vmul.f32 %v19084_v58, %v7981_v10  ;;  %v8055_v42 = vmul.f32 %v17243_v61, %v7985_v22  ;;  %v8124_v6 = vadd.f32 %v17260_v35, %v8054_v56  ;;  %v19088_v36 = vld [vmem:[#allocation39_spill] sm:$0xff] }
0x1110   :  { %v8059_v48 = vmul.f32 %v19085_v24, %v7989_v25  ;;  %v8063_v60 = vmul.f32 %v17267_v13, %v7993_v12  ;;  %v8067_v20 = vmul.f32 %v19087_v62, %v7997_v59  ;;  %v8071_v55 = vmul.f32 %v17283_v34, %v8001_v29  ;;  %v17305_v59 = vpop.permute.xlu1 %8112 }
0x1111   :  { %v7975_v19 = vadd.f32 1e-05, %v7971_v1  ;;  %v8121_v11 = vadd.f32 %v19086_v50, %v8051_v3  ;;  %v8125_v37 = vadd.f32 %v17260_v35, %v8055_v42  ;;  %v8004_v27 = vmul.f32 %v11177_v23, %v17139_v5  ;;  %v19089_v5 = vld [vmem:[#allocation41_spill] sm:$0xff] }
0x1112   :  { %v8129_v10 = vadd.f32 %v19088_v36, %v8059_v48  ;;  %v8133_v22 = vadd.f32 %v17270_v28, %v8063_v60  ;;  %v8066_v25 = vmul.f32 %v19087_v62, %v7996_v16  ;;  %v10756_v1 = vpack.c.bf16 %v8124_v6, %v8120_v54 }
0x1113   :  { %11182 = vrsqrt.f32 %v7975_v19  ;;  %v10754_v56 = vpack.c.bf16 %v8125_v37, %v8121_v11  ;;  %v17303_v12 = vpop.eup %11180  ;;  %v8128_v3 = vadd.f32 %v19088_v36, %v8058_v2  ;;  %v8132_v42 = vadd.f32 %v17270_v28, %v8062_v30 }
0x1114   :  { %v8070_v29 = vmul.f32 %v17283_v34, %v8000_v4  ;;  %v8005_v48 = vmul.f32 %v11179_v7, %v17189_v39  ;;  %v10758_v60 = vpack.c.bf16 %v8133_v22, %v8129_v10  ;;  %v8137_v23 = vadd.f32 %v19089_v5, %v8067_v20  ;;  %v19090_v39 = vld [vmem:[#allocation40_spill] sm:$0xff]  ;;  %v17324_v37 = vpop.permute.xlu1 %8117 }
0x1115   :  { %10755 = vmatprep.subr.bf16.mxu0 %v10754_v56  ;;  %v8141_v19 = vadd.f32 %v17305_v59, %v8071_v55  ;;  %v7982_v16 = vmul.f32 %v17303_v12, %v17180_v26  ;;  %v7986_v2 = vmul.f32 %v17303_v12, %v17183_v44  ;;  %v10760_v54 = vpack.c.bf16 %v8132_v42, %v8128_v3 }
0x1116   :  { %10757 = vmatpush1.bf16.msra.mxu0 %v10756_v1  ;;  %v8136_v30 = vadd.f32 %v19089_v5, %v8066_v25  ;;  %v8140_v4 = vadd.f32 %v17305_v59, %v8070_v29  ;;  %v8074_v7 = vmul.f32 %v19090_v39, %v8004_v27  ;;  %v7990_v6 = vmul.f32 %v17303_v12, %v17186_v31 }
0x1117   :  { %10759 = vmatprep.subr.bf16.mxu0 %v10758_v60  ;;  %v10762_v20 = vpack.c.bf16 %v8141_v19, %v8137_v23  ;;  %v8075_v11 = vmul.f32 %v19090_v39, %v8005_v48  ;;  %v8052_v26 = vmul.f32 %v19084_v58, %v7982_v16  ;;  %v8056_v44 = vmul.f32 %v17243_v61, %v7986_v2 }
0x1118   :  { %v10764_v55 = vpack.c.bf16 %v8140_v4, %v8136_v30  ;;  %v7994_v22 = vmul.f32 %v17303_v12, %v17192_v17  ;;  %v8060_v27 = vmul.f32 %v19085_v24, %v7990_v6  ;;  %v8144_v56 = vadd.f32 %v17324_v37, %v8074_v7 }
0x1119   :  { %v8145_v31 = vadd.f32 %v17324_v37, %v8075_v11  ;;  %v7998_v42 = vmul.f32 %v17303_v12, %v17201_v21  ;;  %v8122_v29 = vadd.f32 %v19086_v50, %v8052_v26  ;;  %v10068_v21 = vld [vmem:[%s18361_s3 + $0xa8] sm:$0xff]  ;;  %v8002_v19 = vmul.f32 %v17303_v12, %v17210_v41  ;;  %v10069_v41 = vld [vmem:[%s18361_s3 + $0xb0] sm:$0xff] }
0x111a   :  { %10761 = vmatpush1.bf16.msra.mxu0 %v10760_v54  ;;  %v8130_v54 = vadd.f32 %v19088_v36, %v8060_v27 }
0x111b   :  { %10763 = vmatprep.subr.bf16.mxu0 %v10762_v20  ;;  %v8068_v30 = vmul.f32 %v19087_v62, %v7998_v42  ;;  %v8072_v4 = vmul.f32 %v17283_v34, %v8002_v19 }
0x111d   :  { %v11183_v10 = vpop.eup %11182  ;;  %v8142_v11 = vadd.f32 %v17305_v59, %v8072_v4 }
0x111e   :  { %v7983_v25 = vmul.f32 %v11183_v10, %v17227_v14  ;;  %v7987_v1 = vmul.f32 %v11183_v10, %v17230_v47  ;;  %v7991_v3 = vmul.f32 %v11183_v10, %v17234_v46  ;;  %10765 = vmatpush1.bf16.msra.mxu0 %v10764_v55  ;;  %v7995_v17 = vmul.f32 %v11183_v10, %v17237_v33  ;;  %v10071_v55 = vld [vmem:[%s18361_s3 + $0xc0] sm:$0xff] }
0x111f   :  { %v7999_v48 = vmul.f32 %v11183_v10, %v17246_v9  ;;  %v8003_v60 = vmul.f32 %v11183_v10, %v17254_v63  ;;  %10082 = vmatprep.subr.msk.mxu0 %vm69_vm0, %v8145_v31  ;;  %v8126_v46 = vadd.f32 %v17260_v35, %v8056_v44  ;;  %v8064_v9 = vmul.f32 %v17267_v13, %v7994_v22  ;;  %v19091_v31 = vld [vmem:[#allocation43_spill] sm:$0xff] }
0x1120   :  { %v8053_v14 = vmul.f32 %v19084_v58, %v7983_v25  ;;  %v8057_v47 = vmul.f32 %v17243_v61, %v7987_v1  ;;  %v8061_v23 = vmul.f32 %v19085_v24, %v7991_v3  ;;  %v8065_v33 = vmul.f32 %v17267_v13, %v7995_v17  ;;  %v8170_v25 = vpop.permute.xlu1 %8169 }
0x1121   :  { %v8069_v63 = vmul.f32 %v19087_v62, %v7999_v48  ;;  %v8073_v24 = vmul.f32 %v17283_v34, %v8003_v60  ;;  %v8007_v7 = vmul.f32 %v11183_v10, %v17251_v53  ;;  %v8006_v34 = vmul.f32 %v17303_v12, %v17213_v18 }
0x1122   :  { %v8123_v58 = vadd.f32 %v19086_v50, %v8053_v14  ;;  %v8127_v61 = vadd.f32 %v17260_v35, %v8057_v47  ;;  %v8131_v16 = vadd.f32 %v19088_v36, %v8061_v23  ;;  %10083 = vmatpush1.msk.msra.mxu0 %vm69_vm0, %v8144_v56  ;;  %v8135_v2 = vadd.f32 %v17270_v28, %v8065_v33 }
0x1123   :  { %10084 = vmatmul.mubr.msk.f32.vlgmr.msra.gmra.mrb[200].mxu0 %vm459_vm1, %v10068_v21  ;;  %v10768_v35 = vpack.c.bf16 %v8126_v46, %v8122_v29  ;;  %v8134_v50 = vadd.f32 %v17270_v28, %v8064_v9  ;;  %v8139_v20 = vadd.f32 %v19089_v5, %v8069_v63  ;;  %v8143_v36 = vadd.f32 %v17305_v59, %v8073_v24  ;;  %v10070_v28 = vld [vmem:[%s18361_s3 + $0xb8] sm:$0xff]  ;;  %v10072_v59 = vld [vmem:[%s18361_s3 + $0xc8] sm:$0xff] }
0x1124   :  { %v10766_v13 = vpack.c.bf16 %v8127_v61, %v8123_v58  ;;  %8300 = vmatprep.mubr.f32.mxu0 %v18740_v38  ;;  %v10770_v6 = vpack.c.bf16 %v8135_v2, %v8131_v16  ;;  %v8138_v62 = vadd.f32 %v19089_v5, %v8068_v30  ;;  %v8077_v44 = vmul.f32 %v19090_v39, %v8007_v7  ;;  %v19092_v9 = vld [vmem:[#allocation42_spill] sm:$0xff]  ;;  %v8180_v19 = vpop.permute.xlu1 %8179 }
0x1125   :  { %v10772_v53 = vpack.c.bf16 %v8134_v50, %v8130_v54  ;;  %v10774_v26 = vpack.c.bf16 %v8143_v36, %v8139_v20  ;;  %v8076_v18 = vmul.f32 %v19090_v39, %v8006_v34  ;;  %v10073_v39 = vld [vmem:[%s18361_s3 + $0xd0] sm:$0xff]  ;;  %v19093_v36 = vld [vmem:[#allocation45_spill] sm:$0xff] }
0x1126   :  { %10767 = vmatprep.subr.bf16.mxu1 %v10766_v13  ;;  %v10776_v12 = vpack.c.bf16 %v8142_v11, %v8138_v62  ;;  %v8147_v5 = vadd.f32 %v17324_v37, %v8077_v44 }
0x1127   :  { %10769 = vmatpush1.bf16.msra.mxu1 %v10768_v35  ;;  %10085 = vmatmul.mubr.msk.f32.gmra.mrb[202].mxu0 %vm459_vm1, %v10069_v41  ;;  %v8146_v10 = vadd.f32 %v17324_v37, %v8076_v18  ;;  %v10074_v37 = vld [vmem:[%s18361_s3 + $0xd8] sm:$0x1] }
0x1128   :  { %10771 = vmatprep.subr.bf16.mxu1 %v10770_v6  ;;  %8306 = vmatprep.mubr.f32.mxu0 %v18740_v38  ;;  %v17428_v34 = vpop.permute.xlu1 %8189 }
0x112b   :  { %10773 = vmatpush1.bf16.msra.mxu1 %v10772_v53  ;;  %10086 = vmatmul.mubr.msk.f32.gmra.mrb[204].mxu0 %vm459_vm1, %v10070_v28 }
0x112c   :  { %10775 = vmatprep.subr.bf16.mxu1 %v10774_v26  ;;  %8312 = vmatprep.mubr.f32.mxu0 %v18740_v38 }
0x112f   :  { %10777 = vmatpush1.bf16.msra.mxu1 %v10776_v12  ;;  %10087 = vmatmul.mubr.msk.f32.gmra.mrb[206].mxu0 %vm459_vm1, %v10071_v55 }
0x1130   :  { %10091 = vmatprep.subr.msk.mxu1 %vm69_vm0, %v8147_v5  ;;  %8318 = vmatprep.mubr.f32.mxu0 %v18740_v38 }
0x1133   :  { %10092 = vmatpush1.msk.msra.mxu1 %vm69_vm0, %v8146_v10  ;;  %10088 = vmatmul.mubr.msk.f32.gmra.mrb[208].mxu0 %vm459_vm1, %v10072_v59 }
0x1134   :  { %10093 = vmatmul.mubr.msk.f32.vlgmr.msra.gmra.mrb[200].mxu1 %vm459_vm1, %v10068_v21  ;;  %8324 = vmatprep.mubr.f32.mxu0 %v18740_v38 }
0x1135   :  { %8407 = vmatprep.mubr.f32.mxu1 %v18740_v38 }
0x1137   :  { %10089 = vmatmul.mubr.msk.f32.gmra.mrb[210].mxu0 %vm459_vm1, %v10073_v39 }
0x1138   :  { %10094 = vmatmul.mubr.msk.f32.gmra.mrb[202].mxu1 %vm459_vm1, %v10069_v41  ;;  %8330 = vmatprep.mubr.f32.mxu0 %v18740_v38 }
0x1139   :  { %8413 = vmatprep.mubr.f32.mxu1 %v18740_v38 }
0x113b   :  { %10090 = vmatmul.mubr.msk.f32.gmra.mrb[212].mxu0 %vm459_vm1, %v10074_v37 }
0x113c   :  { %10095 = vmatmul.mubr.msk.f32.gmra.mrb[204].mxu1 %vm459_vm1, %v10070_v28  ;;  %8618 = vmatprep.mubr.f32.mxu0 %v18740_v38 }
0x113d   :  { %8419 = vmatprep.mubr.f32.mxu1 %v18740_v38 }
0x1140   :  { %10096 = vmatmul.mubr.msk.f32.gmra.mrb[206].mxu1 %vm459_vm1, %v10071_v55 }
0x1141   :  { %8425 = vmatprep.mubr.f32.mxu1 %v18740_v38 }
0x1144   :  { %10097 = vmatmul.mubr.msk.f32.gmra.mrb[208].mxu1 %vm459_vm1, %v10072_v59 }
0x1145   :  { %8431 = vmatprep.mubr.f32.mxu1 %v18740_v38 }
0x1148   :  { %10098 = vmatmul.mubr.msk.f32.gmra.mrb[210].mxu1 %vm459_vm1, %v10073_v39 }
0x1149   :  { %8437 = vmatprep.mubr.f32.mxu1 %v18740_v38 }
0x114c   :  { %10099 = vmatmul.mubr.msk.f32.gmra.mrb[212].mxu1 %vm459_vm1, %v10074_v37 }
0x114d   :  { %8725 = vmatprep.mubr.f32.mxu1 %v18740_v38 }
0x11f6   :  { %v8296_v22 = vpop.f32.mrb[200].mxu0 }
0x11f7   :  { %v8298_v27 = vpop.f32.mrb[201].mxu0  ;;  %v8297_v56 = vadd.f32 %v8296_v22, %v19091_v31 }
0x11f8   :  { %v8299_v1 = vadd.f32 %v8298_v27, %v19091_v31 }
0x11f9   :  { %v8444_v48 = vmax.f32 %v8297_v56, 0.0 }
0x11fa   :  { %v8302_v3 = vpop.f32.mrb[202].mxu0  ;;  %v8445_v14 = vmax.f32 %v8299_v1, 0.0 }
0x11fb   :  { %v8303_v42 = vadd.f32 %v8302_v3, %v8170_v25  ;;  %v8304_v29 = vpop.f32.mrb[203].mxu0 }
0x11fc   :  { %v8305_v17 = vadd.f32 %v8304_v29, %v8170_v25 }
0x11fd   :  { %v8448_v60 = vmax.f32 %v8303_v42, 0.0 }
0x11fe   :  { %v8449_v47 = vmax.f32 %v8305_v17, 0.0  ;;  %v8308_v46 = vpop.f32.mrb[204].mxu0 }
0x11ff   :  { %v10780_v23 = vpack.c.bf16 %v8448_v60, %v8444_v48  ;;  %v8310_v21 = vpop.f32.mrb[205].mxu0  ;;  %v8309_v63 = vadd.f32 %v8308_v46, %v19092_v9  ;;  %v19094_v46 = vld [vmem:[#allocation47_spill] sm:$0xff] }
0x1200   :  { %v10778_v33 = vpack.c.bf16 %v8449_v47, %v8445_v14  ;;  %v8311_v58 = vadd.f32 %v8310_v21, %v19092_v9 }
0x1201   :  { %v8452_v13 = vmax.f32 %v8309_v63, 0.0 }
0x1202   :  { %v8314_v61 = vpop.f32.mrb[206].mxu0  ;;  %10779 = vmatprep.subr.bf16.mxu0 %v10778_v33  ;;  %v8453_v41 = vmax.f32 %v8311_v58, 0.0 }
0x1203   :  { %v8315_v16 = vadd.f32 %v8314_v61, %v8180_v19  ;;  %v8316_v24 = vpop.f32.mrb[207].mxu0  ;;  %10781 = vmatpush1.bf16.msra.mxu0 %v10780_v23 }
0x1204   :  { %v8317_v2 = vadd.f32 %v8316_v24, %v8180_v19 }
0x1205   :  { %v8456_v54 = vmax.f32 %v8315_v16, 0.0 }
0x1206   :  { %v8457_v35 = vmax.f32 %v8317_v2, 0.0  ;;  %v8320_v50 = vpop.f32.mrb[208].mxu0 }
0x1207   :  { %v8403_v30 = vpop.f32.mrb[200].mxu1  ;;  %v10784_v4 = vpack.c.bf16 %v8456_v54, %v8452_v13  ;;  %v8322_v7 = vpop.f32.mrb[209].mxu0  ;;  %v8321_v28 = vadd.f32 %v8320_v50, %v19093_v36  ;;  %v10100_v54 = vld [vmem:[%s18363_s5 + $0xa8] sm:$0xff] }
0x1208   :  { %v8405_v6 = vpop.f32.mrb[201].mxu1  ;;  %v10782_v20 = vpack.c.bf16 %v8457_v35, %v8453_v41  ;;  %v8404_v53 = vadd.f32 %v8403_v30, %v19091_v31  ;;  %v8323_v62 = vadd.f32 %v8322_v7, %v19093_v36 }
0x1209   :  { %v8406_v26 = vadd.f32 %v8405_v6, %v19091_v31  ;;  %v8460_v39 = vmax.f32 %v8321_v28, 0.0 }
0x120a   :  { %v8326_v11 = vpop.f32.mrb[210].mxu0  ;;  %10783 = vmatprep.subr.bf16.mxu0 %v10782_v20  ;;  %v8446_v22 = vmax.f32 %v8404_v53, 0.0  ;;  %v8461_v56 = vmax.f32 %v8323_v62, 0.0 }
0x120b   :  { %v8409_v44 = vpop.f32.mrb[202].mxu1  ;;  %v8327_v55 = vadd.f32 %v8326_v11, %v17428_v34  ;;  %v8328_v18 = vpop.f32.mrb[211].mxu0  ;;  %10785 = vmatpush1.bf16.msra.mxu0 %v10784_v4  ;;  %v8447_v42 = vmax.f32 %v8406_v26, 0.0 }
0x120c   :  { %v8410_v12 = vadd.f32 %v8409_v44, %v8170_v25  ;;  %v8411_v5 = vpop.f32.mrb[203].mxu1  ;;  %v8329_v59 = vadd.f32 %v8328_v18, %v17428_v34  ;;  %v10102_v44 = vld [vmem:[%s18363_s5 + $0xb8] sm:$0xff] }
0x120d   :  { %v8412_v10 = vadd.f32 %v8411_v5, %v8170_v25  ;;  %v8464_v37 = vmax.f32 %v8327_v55, 0.0 }
0x120e   :  { %v8450_v27 = vmax.f32 %v8410_v12, 0.0  ;;  %v8465_v1 = vmax.f32 %v8329_v59, 0.0  ;;  %v8332_v3 = vpop.f32.mrb[212].mxu0 }
0x120f   :  { %v8451_v29 = vmax.f32 %v8412_v10, 0.0  ;;  %v8415_v31 = vpop.f32.mrb[204].mxu1  ;;  %v10788_v17 = vpack.c.bf16 %v8464_v37, %v8460_v39  ;;  %v8334_v48 = vpop.f32.mrb[213].mxu0  ;;  %v8333_v25 = vadd.f32 %v8332_v3, %v19094_v46  ;;  %v10105_v3 = vld [vmem:[%s18363_s5 + $0xd0] sm:$0xff] }
0x1210   :  { %v10792_v60 = vpack.c.bf16 %v8450_v27, %v8446_v22  ;;  %v8417_v14 = vpop.f32.mrb[205].mxu1  ;;  %v10786_v47 = vpack.c.bf16 %v8465_v1, %v8461_v56  ;;  %v8335_v23 = vadd.f32 %v8334_v48, %v19094_v46  ;;  %v8416_v33 = vadd.f32 %v8415_v31, %v19092_v9  ;;  %v10104_v56 = vld [vmem:[%s18363_s5 + $0xc8] sm:$0xff] }
0x1211   :  { %v10790_v21 = vpack.c.bf16 %v8451_v29, %v8447_v42  ;;  %v8418_v58 = vadd.f32 %v8417_v14, %v19092_v9  ;;  %v8468_v13 = vmax.f32 %v8333_v25, 0.0  ;;  %v10106_v42 = vld [vmem:[%s18363_s5 + $0xd8] sm:$0x1] }
0x1212   :  { %v8469_v63 = vmax.f32 %v8335_v23, 0.0  ;;  %10787 = vmatprep.subr.bf16.mxu0 %v10786_v47  ;;  %v8454_v41 = vmax.f32 %v8416_v33, 0.0  ;;  %v19095_v47 = vld [vmem:[#allocation44_spill] sm:$0xff] }
0x1213   :  { %v8421_v61 = vpop.f32.mrb[206].mxu1  ;;  %10791 = vmatprep.subr.bf16.mxu1 %v10790_v21  ;;  %10789 = vmatpush1.bf16.msra.mxu0 %v10788_v17  ;;  %v8455_v50 = vmax.f32 %v8418_v58, 0.0  ;;  %v8489_v17 = vpop.permute.xlu1 %8488 }
0x1214   :  { %v8422_v16 = vadd.f32 %v8421_v61, %v8180_v19  ;;  %v8423_v24 = vpop.f32.mrb[207].mxu1  ;;  %10793 = vmatpush1.bf16.msra.mxu1 %v10792_v60  ;;  %10114 = vmatprep.subr.msk.mxu0 %vm69_vm0, %v8469_v63 }
0x1215   :  { %v8424_v2 = vadd.f32 %v8423_v24, %v8180_v19  ;;  %v10101_v19 = vld [vmem:[%s18363_s5 + $0xb0] sm:$0xff] }
0x1216   :  { %v8458_v35 = vmax.f32 %v8422_v16, 0.0 }
0x1217   :  { %v8459_v30 = vmax.f32 %v8424_v2, 0.0  ;;  %v8427_v4 = vpop.f32.mrb[208].mxu1  ;;  %10115 = vmatpush1.msk.msra.mxu0 %vm69_vm0, %v8468_v13  ;;  %v8499_v24 = vpop.permute.xlu1 %8498 }
0x1218   :  { %v10796_v9 = vpack.c.bf16 %v8458_v35, %v8454_v41  ;;  %v8429_v7 = vpop.f32.mrb[209].mxu1  ;;  %10116 = vmatmul.mubr.msk.f32.vlgmr.msra.gmra.mrb[214].mxu0 %vm459_vm1, %v10100_v54  ;;  %v8428_v20 = vadd.f32 %v8427_v4, %v19093_v36  ;;  %v19096_v35 = vld [vmem:[#allocation46_spill] sm:$0xff] }
0x1219   :  { %v10794_v6 = vpack.c.bf16 %v8459_v30, %v8455_v50  ;;  %8624 = vmatprep.mubr.f32.mxu0 %v18740_v38  ;;  %v8430_v28 = vadd.f32 %v8429_v7, %v19093_v36 }
0x121a   :  { %v8462_v55 = vmax.f32 %v8428_v20, 0.0 }
0x121b   :  { %v8433_v53 = vpop.f32.mrb[210].mxu1  ;;  %10795 = vmatprep.subr.bf16.mxu1 %v10794_v6  ;;  %v8463_v12 = vmax.f32 %v8430_v28, 0.0  ;;  %v17510_v20 = vpop.permute.xlu1 %8508 }
0x121c   :  { %v8434_v62 = vadd.f32 %v8433_v53, %v17428_v34  ;;  %v8435_v11 = vpop.f32.mrb[211].mxu1  ;;  %10797 = vmatpush1.bf16.msra.mxu1 %v10796_v9  ;;  %10117 = vmatmul.mubr.msk.f32.gmra.mrb[216].mxu0 %vm459_vm1, %v10101_v19 }
0x121d   :  { %v8436_v26 = vadd.f32 %v8435_v11, %v17428_v34  ;;  %8630 = vmatprep.mubr.f32.mxu0 %v18740_v38  ;;  %v10103_v34 = vld [vmem:[%s18363_s5 + $0xc0] sm:$0xff] }
0x121e   :  { %v8466_v18 = vmax.f32 %v8434_v62, 0.0 }
0x121f   :  { %v8467_v36 = vmax.f32 %v8436_v26, 0.0  ;;  %v8439_v5 = vpop.f32.mrb[212].mxu1 }
0x1220   :  { %v10800_v59 = vpack.c.bf16 %v8466_v18, %v8462_v55  ;;  %v8441_v10 = vpop.f32.mrb[213].mxu1  ;;  %10118 = vmatmul.mubr.msk.f32.gmra.mrb[218].mxu0 %vm459_vm1, %v10102_v44  ;;  %v8440_v22 = vadd.f32 %v8439_v5, %v19094_v46 }
0x1221   :  { %v10798_v39 = vpack.c.bf16 %v8467_v36, %v8463_v12  ;;  %v8442_v37 = vadd.f32 %v8441_v10, %v19094_v46  ;;  %8636 = vmatprep.mubr.f32.mxu0 %v18740_v38 }
0x1222   :  { %v8470_v1 = vmax.f32 %v8440_v22, 0.0 }
0x1223   :  { %v8471_v27 = vmax.f32 %v8442_v37, 0.0  ;;  %10799 = vmatprep.subr.bf16.mxu1 %v10798_v39  ;;  %v17520_v39 = vpop.permute.xlu1 %8518 }
0x1224   :  { %10801 = vmatpush1.bf16.msra.mxu1 %v10800_v59  ;;  %10119 = vmatmul.mubr.msk.f32.gmra.mrb[220].mxu0 %vm459_vm1, %v10103_v34 }
0x1225   :  { %10123 = vmatprep.subr.msk.mxu1 %vm69_vm0, %v8471_v27  ;;  %8642 = vmatprep.mubr.f32.mxu0 %v18740_v38  ;;  %v19099_v27 = vld [vmem:[#allocation77_spill] sm:$0xff] }
0x1228   :  { %10124 = vmatpush1.msk.msra.mxu1 %vm69_vm0, %v8470_v1  ;;  %10120 = vmatmul.mubr.msk.f32.gmra.mrb[222].mxu0 %vm459_vm1, %v10104_v56  ;;  %v19100_v1 = vld [vmem:[#allocation76_spill] sm:$0xff] }
0x1229   :  { %10125 = vmatmul.mubr.msk.f32.vlgmr.msra.gmra.mrb[214].mxu1 %vm459_vm1, %v10100_v54  ;;  %8648 = vmatprep.mubr.f32.mxu0 %v18740_v38 }
0x122a   :  { %8731 = vmatprep.mubr.f32.mxu1 %v18740_v38 }
0x122c   :  { %10121 = vmatmul.mubr.msk.f32.gmra.mrb[224].mxu0 %vm459_vm1, %v10105_v3 }
0x122d   :  { %10126 = vmatmul.mubr.msk.f32.gmra.mrb[216].mxu1 %vm459_vm1, %v10101_v19  ;;  %8654 = vmatprep.mubr.f32.mxu0 %v18740_v38 }
0x122e   :  { %8737 = vmatprep.mubr.f32.mxu1 %v18740_v38 }
0x1230   :  { %10122 = vmatmul.mubr.msk.f32.gmra.mrb[226].mxu0 %vm459_vm1, %v10106_v42 }
0x1231   :  { %10127 = vmatmul.mubr.msk.f32.gmra.mrb[218].mxu1 %vm459_vm1, %v10102_v44  ;;  %8876 = vmatprep.mubr.f32.mxu0 %v18740_v38 }
0x1232   :  { %8743 = vmatprep.mubr.f32.mxu1 %v18740_v38 }
0x1235   :  { %10128 = vmatmul.mubr.msk.f32.gmra.mrb[220].mxu1 %vm459_vm1, %v10103_v34  ;;  %v19098_v34 = vld [vmem:[#allocation98_spill] sm:$0xff] }
0x1236   :  { %8749 = vmatprep.mubr.f32.mxu1 %v18740_v38 }
0x1239   :  { %10129 = vmatmul.mubr.msk.f32.gmra.mrb[222].mxu1 %vm459_vm1, %v10104_v56 }
0x123a   :  { %8755 = vmatprep.mubr.f32.mxu1 %v18740_v38 }
0x123d   :  { %10130 = vmatmul.mubr.msk.f32.gmra.mrb[224].mxu1 %vm459_vm1, %v10105_v3 }
0x123e   :  { %8761 = vmatprep.mubr.f32.mxu1 %v18740_v38 }
0x1241   :  { %10131 = vmatmul.mubr.msk.f32.gmra.mrb[226].mxu1 %vm459_vm1, %v10106_v42 }
0x1242   :  { %8947 = vmatprep.mubr.f32.mxu1 %v18740_v38 }
0x12eb   :  { %v8620_v29 = vpop.f32.mrb[214].mxu0 }
0x12ec   :  { %v8622_v31 = vpop.f32.mrb[215].mxu0  ;;  %v8621_v48 = vadd.f32 %v8620_v29, %v8489_v17  ;;  %v19101_v29 = vld [vmem:[#allocation99_spill] sm:$0xff] }
0x12ed   :  { %v8623_v60 = vadd.f32 %v8622_v31, %v8489_v17 }
0x12ee   :  { %v8768_v25 = vadd.f32 %v8621_v48, %v16988_v51 }
0x12ef   :  { %v8626_v14 = vpop.f32.mrb[216].mxu0  ;;  %v8769_v63 = vadd.f32 %v8623_v60, %v16995_v15 }
0x12f0   :  { %v8627_v46 = vadd.f32 %v8626_v14, %v19095_v47  ;;  %v8628_v23 = vpop.f32.mrb[217].mxu0 }
0x12f1   :  { %v8629_v21 = vadd.f32 %v8628_v23, %v19095_v47 }
0x12f2   :  { %v8772_v33 = vadd.f32 %v8627_v46, %v16980_v0 }
0x12f3   :  { %v8773_v58 = vadd.f32 %v8629_v21, %v16984_v8  ;;  %v8632_v38 = vpop.f32.mrb[218].mxu0 }
0x12f4   :  { %v10804_v61 = vpack.c.bf16 %v8772_v33, %v8768_v25  ;;  %v8634_v16 = vpop.f32.mrb[219].mxu0  ;;  %v8633_v13 = vadd.f32 %v8632_v38, %v8499_v24  ;;  %v8955_v25 = vld [vmem:[%s18366_s8 + $0x8] sm:$0xff] }
0x12f5   :  { %v10802_v2 = vpack.c.bf16 %v8773_v58, %v8769_v63  ;;  %v8635_v54 = vadd.f32 %v8634_v16, %v8499_v24  ;;  %v8959_v33 = vld [vmem:[%s18366_s8 + $0x28] sm:$0xff]  ;;  %v8958_v16 = vld [vmem:[%s18366_s8 + $0x20] sm:$0xff] }
0x12f6   :  { %v8776_v0 = vadd.f32 %v8633_v13, %v16991_v32  ;;  %v19103_v58 = vld [vmem:[#allocation102_spill] sm:$0xff] }
0x12f7   :  { %v8638_v41 = vpop.f32.mrb[220].mxu0  ;;  %10803 = vmatprep.subr.bf16.mxu0 %v10802_v2  ;;  %v8777_v8 = vadd.f32 %v8635_v54, %v16998_v57  ;;  %v19097_v57 = vld [vmem:[#allocation49_spill] sm:$0xff]  ;;  %v8963_v54 = vld [vmem:[%s18366_s8 + $0x48] sm:$0xff] }
0x12f8   :  { %v8639_v50 = vadd.f32 %v8638_v41, %v19096_v35  ;;  %v8640_v30 = vpop.f32.mrb[221].mxu0  ;;  %10805 = vmatpush1.bf16.msra.mxu0 %v10804_v61  ;;  %v8954_v61 = vld [vmem:[%s18366_s8] sm:$0xff]  ;;  %v8967_v41 = vld [vmem:[%s18366_s8 + $0x68] sm:$0xff] }
0x12f9   :  { %v8641_v51 = vadd.f32 %v8640_v30, %v19096_v35 }
0x12fa   :  { %v8780_v15 = vadd.f32 %v8639_v50, %v17004_v52 }
0x12fb   :  { %v8781_v4 = vadd.f32 %v8641_v51, %v17009_v40  ;;  %v8644_v9 = vpop.f32.mrb[222].mxu0  ;;  %v10826_v51 = vpack.c.bf16 %v8959_v33, %v8955_v25 }
0x12fc   :  { %v8727_v7 = vpop.f32.mrb[214].mxu1  ;;  %v10808_v6 = vpack.c.bf16 %v8780_v15, %v8776_v0  ;;  %v8646_v19 = vpop.f32.mrb[223].mxu0  ;;  %v8645_v62 = vadd.f32 %v8644_v9, %v17510_v20  ;;  %v19104_v0 = vld [vmem:[#allocation79_spill] sm:$0xff]  ;;  %v19105_v9 = vld [vmem:[#allocation97_spill] sm:$0xff] }
0x12fd   :  { %v8729_v28 = vpop.f32.mrb[215].mxu1  ;;  %v10806_v53 = vpack.c.bf16 %v8781_v4, %v8777_v8  ;;  %v8728_v11 = vadd.f32 %v8727_v7, %v8489_v17  ;;  %v8647_v26 = vadd.f32 %v8646_v19, %v17510_v20  ;;  %v17556_v8 = vld [vmem:[%s18365_s7] sm:$0xf]  ;;  %v10828_v4 = vpack.c.bf16 %v8958_v16, %v8954_v61 }
0x12fe   :  { %v8730_v52 = vadd.f32 %v8729_v28, %v8489_v17  ;;  %v8784_v59 = vadd.f32 %v8645_v62, %v17014_v45  ;;  %v19102_v17 = vld [vmem:[#allocation20_spill] sm:$0xff]  ;;  %v10830_v28 = vpack.c.bf16 %v8967_v41, %v8963_v54  ;;  %v8960_v54 = vld [vmem:[%s18366_s8 + $0x30] sm:$0xff] }
0x12ff   :  { %v8650_v32 = vpop.f32.mrb[224].mxu0  ;;  %10807 = vmatprep.subr.bf16.mxu0 %v10806_v53  ;;  %v8770_v37 = vadd.f32 %v8728_v11, %v17051_v43  ;;  %v8785_v56 = vadd.f32 %v8647_v26, %v19099_v27  ;;  %v8962_v53 = vld [vmem:[%s18366_s8 + $0x40] sm:$0xff]  ;;  %v19107_v62 = vld [vmem:[#allocation96_spill] sm:$0xff]  ;;  %v8979_v27 = vld [vmem:[%s18366_s8 + $0xc8] sm:$0xff] }
0x1300   :  { %v8733_v44 = vpop.f32.mrb[216].mxu1  ;;  %v8651_v55 = vadd.f32 %v8650_v32, %v19097_v57  ;;  %v8652_v40 = vpop.f32.mrb[225].mxu0  ;;  %10809 = vmatpush1.bf16.msra.mxu0 %v10808_v6  ;;  %v8771_v31 = vadd.f32 %v8730_v52, %v19101_v29  ;;  %v19106_v6 = vld [vmem:[#allocation23_spill] sm:$0xff]  ;;  %v19108_v26 = vld [vmem:[#allocation104_spill] sm:$0xff] }
0x1301   :  { %v8734_v18 = vadd.f32 %v8733_v44, %v19095_v47  ;;  %v8735_v12 = vpop.f32.mrb[217].mxu1  ;;  %v8653_v36 = vadd.f32 %v8652_v40, %v19097_v57  ;;  %v8971_v44 = vld [vmem:[%s18366_s8 + $0x88] sm:$0xff] }
0x1302   :  { %v8736_v5 = vadd.f32 %v8735_v12, %v19095_v47  ;;  %v8788_v10 = vadd.f32 %v8651_v55, %v17026_v49  ;;  %v8975_v55 = vld [vmem:[%s18366_s8 + $0xa8] sm:$0xff] }
0x1303   :  { %v8774_v22 = vadd.f32 %v8734_v18, %v19098_v34  ;;  %v8789_v3 = vadd.f32 %v8653_v36, %v19100_v1  ;;  %v8656_v42 = vpop.f32.mrb[226].mxu0 }
0x1304   :  { %v8775_v48 = vadd.f32 %v8736_v5, %v19102_v17  ;;  %v8739_v60 = vpop.f32.mrb[218].mxu1  ;;  %v10812_v14 = vpack.c.bf16 %v8788_v10, %v8784_v59  ;;  %v8658_v45 = vpop.f32.mrb[227].mxu0  ;;  %v8657_v21 = vadd.f32 %v8656_v42, %v17520_v39  ;;  %v10834_v59 = vpack.c.bf16 %v8975_v55, %v8971_v44  ;;  %v8970_v10 = vld [vmem:[%s18366_s8 + $0x80] sm:$0xff]  ;;  %v19110_v17 = vld [vmem:[#allocation95_spill] sm:$0xff]  ;;  %v8977_v44 = vld [vmem:[%s18366_s8 + $0xb8] sm:$0xff] }
0x1305   :  { %v10816_v47 = vpack.c.bf16 %v8774_v22, %v8770_v37  ;;  %v8741_v49 = vpop.f32.mrb[219].mxu1  ;;  %v8659_v46 = vadd.f32 %v8658_v45, %v17520_v39  ;;  %v10810_v23 = vpack.c.bf16 %v8789_v3, %v8785_v56  ;;  %v8740_v63 = vadd.f32 %v8739_v60, %v8499_v24  ;;  %v8974_v37 = vld [vmem:[%s18366_s8 + $0xa0] sm:$0xff]  ;;  %v8983_v56 = vld [vmem:[%s18366_s8 + $0xe8] sm:$0xff] }
0x1306   :  { %v10814_v43 = vpack.c.bf16 %v8775_v48, %v8771_v31  ;;  %v8742_v2 = vadd.f32 %v8741_v49, %v8499_v24  ;;  %v8792_v15 = vadd.f32 %v8657_v21, %v19104_v0  ;;  %v10836_v29 = vpack.c.bf16 %v8974_v37, %v8970_v10  ;;  %v19109_v31 = vld [vmem:[#allocation78_spill] sm:$0xff]  ;;  %v8982_v45 = vld [vmem:[%s18366_s8 + $0xe0] sm:$0xff]  ;;  %v8969_v0 = vld [vmem:[%s18366_s8 + $0x78] sm:$0xff] }
0x1307   :  { %v8793_v38 = vadd.f32 %v8659_v46, %v19103_v58  ;;  %10811 = vmatprep.subr.bf16.mxu0 %v10810_v23  ;;  %v8778_v7 = vadd.f32 %v8740_v63, %v19105_v9  ;;  %v10838_v60 = vpack.c.bf16 %v8983_v56, %v8979_v27  ;;  %v19112_v46 = vld [vmem:[#allocation101_spill] sm:$0xff]  ;;  %v8991_v21 = vld [vmem:[%s18366_s8 + $0x128] sm:$0xff]  ;;  %v8981_v10 = vld [vmem:[%s18366_s8 + $0xd8] sm:$0xff] }
0x1308   :  { %v8745_v13 = vpop.f32.mrb[220].mxu1  ;;  %10815 = vmatprep.subr.bf16.mxu1 %v10814_v43  ;;  %10813 = vmatpush1.bf16.msra.mxu0 %v10812_v14  ;;  %v8779_v11 = vadd.f32 %v8742_v2, %v19107_v62  ;;  %v8978_v14 = vld [vmem:[%s18366_s8 + $0xc0] sm:$0xff]  ;;  %v8987_v43 = vld [vmem:[%s18366_s8 + $0x108] sm:$0xff]  ;;  %v8961_v2 = vld [vmem:[%s18366_s8 + $0x38] sm:$0xff] }
0x1309   :  { %v8746_v50 = vadd.f32 %v8745_v13, %v19096_v35  ;;  %v8747_v30 = vpop.f32.mrb[221].mxu1  ;;  %10817 = vmatpush1.bf16.msra.mxu1 %v10816_v47  ;;  %10132 = vmatprep.subr.msk.mxu0 %vm69_vm0, %v8793_v38  ;;  %v19111_v47 = vld [vmem:[#allocation106_spill] sm:$0xff]  ;;  %v8957_v38 = vld [vmem:[%s18366_s8 + $0x18] sm:$0xff]  ;;  %v10840_v61 = vpack.c.bf16 %v8982_v45, %v8978_v14  ;;  %v8956_v13 = vld [vmem:[%s18366_s8 + $0x10] sm:$0xff]  ;;  %v10842_v41 = vpack.c.bf16 %v8991_v21, %v8987_v43 }
0x130a   :  { %v8748_v24 = vadd.f32 %v8747_v30, %v19096_v35  ;;  %v8966_v35 = vld [vmem:[%s18366_s8 + $0x60] sm:$0xff]  ;;  %v10954_v9 = vpack.c.bf16 %v8961_v2, %v8957_v38  ;;  %v9003_v55 = vld [vmem:[%s18366_s8 + $0x188] sm:$0xff]  ;;  %v8993_v14 = vld [vmem:[%s18366_s8 + $0x138] sm:$0xff] }
0x130b   :  { %v8782_v19 = vadd.f32 %v8746_v50, %v19106_v6  ;;  %v10832_v36 = vpack.c.bf16 %v8966_v35, %v8962_v53  ;;  %v19113_v50 = vld [vmem:[#allocation112_spill] sm:$0xff]  ;;  %v8968_v53 = vld [vmem:[%s18366_s8 + $0x70] sm:$0xff]  ;;  %v9002_v37 = vld [vmem:[%s18366_s8 + $0x180] sm:$0xff] }
0x130c   :  { %v8783_v32 = vadd.f32 %v8748_v24, %v19108_v26  ;;  %v8751_v52 = vpop.f32.mrb[222].mxu1  ;;  %10133 = vmatpush1.msk.msra.mxu0 %vm69_vm0, %v8792_v15  ;;  %v8990_v24 = vld [vmem:[%s18366_s8 + $0x120] sm:$0xff]  ;;  %v8995_v15 = vld [vmem:[%s18366_s8 + $0x148] sm:$0xff]  ;;  %v8997_v21 = vld [vmem:[%s18366_s8 + $0x158] sm:$0xff] }
0x130d   :  { %v10820_v40 = vpack.c.bf16 %v8782_v19, %v8778_v7  ;;  %v8753_v18 = vpop.f32.mrb[223].mxu1  ;;  %10134 = vmatmul.mubr.msk.f32.vlgmr.msra.gmra.mrb[228].mxu0 %vm459_vm1, %v17556_v8  ;;  %10827 = vmatprep.subr.bf16.mxu0 %v10826_v51  ;;  %v8752_v5 = vadd.f32 %v8751_v52, %v17510_v20  ;;  %v8986_v51 = vld [vmem:[%s18366_s8 + $0x100] sm:$0xff]  ;;  %v19114_v7 = vld [vmem:[#allocation108_spill] sm:$0xff]  ;;  %v10956_v19 = vpack.c.bf16 %v8960_v54, %v8956_v13  ;;  %v9011_v27 = vld [vmem:[%s18366_s8 + $0x1c8] sm:$0xff] }
0x130e   :  { %v10818_v12 = vpack.c.bf16 %v8783_v32, %v8779_v11  ;;  %10829 = vmatpush1.bf16.msra.mxu0 %v10828_v4  ;;  %v8754_v34 = vadd.f32 %v8753_v18, %v17510_v20  ;;  %v8999_v4 = vld [vmem:[%s18366_s8 + $0x168] sm:$0xff]  ;;  %v10844_v35 = vpack.c.bf16 %v8990_v24, %v8986_v51  ;;  %v8973_v11 = vld [vmem:[%s18366_s8 + $0x98] sm:$0xff]  ;;  %v8994_v32 = vld [vmem:[%s18366_s8 + $0x140] sm:$0xff] }
0x130f   :  { %10831 = vmatprep.subr.bf16.mxu0 %v10830_v28  ;;  %v8786_v20 = vadd.f32 %v8752_v5, %v19109_v31  ;;  %v8964_v28 = vld [vmem:[%s18366_s8 + $0x50] sm:$0xff]  ;;  %v10846_v26 = vpack.c.bf16 %v8999_v4, %v8995_v15  ;;  %v8998_v52 = vld [vmem:[%s18366_s8 + $0x160] sm:$0xff]  ;;  %v9015_v56 = vld [vmem:[%s18366_s8 + $0x1e8] sm:$0xff] }
0x1310   :  { %v8757_v22 = vpop.f32.mrb[224].mxu1  ;;  %10819 = vmatprep.subr.bf16.mxu1 %v10818_v12  ;;  %v8787_v49 = vadd.f32 %v8754_v34, %v19111_v47  ;;  %v10960_v18 = vpack.c.bf16 %v8968_v53, %v8964_v28  ;;  %v8972_v12 = vld [vmem:[%s18366_s8 + $0x90] sm:$0xff]  ;;  %v10848_v5 = vpack.c.bf16 %v8998_v52, %v8994_v32  ;;  %v9006_v34 = vld [vmem:[%s18366_s8 + $0x1a0] sm:$0xff]  ;;  %v9019_v45 = vld [vmem:[%s18366_s8 + $0x208] sm:$0xff] }
0x1311   :  { %v8758_v1 = vadd.f32 %v8757_v22, %v19097_v57  ;;  %v8759_v3 = vpop.f32.mrb[225].mxu1  ;;  %10821 = vmatpush1.bf16.msra.mxu1 %v10820_v40  ;;  %v9007_v40 = vld [vmem:[%s18366_s8 + $0x1a8] sm:$0xff]  ;;  %v8985_v22 = vld [vmem:[%s18366_s8 + $0xf8] sm:$0xff]  ;;  %v8996_v2 = vld [vmem:[%s18366_s8 + $0x150] sm:$0xff] }
0x1312   :  { %v8760_v42 = vadd.f32 %v8759_v3, %v19097_v57  ;;  %10833 = vmatpush1.bf16.msra.mxu0 %v10832_v36  ;;  %v8976_v36 = vld [vmem:[%s18366_s8 + $0xb0] sm:$0xff]  ;;  %v10966_v31 = vpack.c.bf16 %v8985_v22, %v8981_v10  ;;  %v9023_v47 = vld [vmem:[%s18366_s8 + $0x228] sm:$0xff]  ;;  %v9030_v51 = vld [vmem:[%s18366_s8 + $0x260] sm:$0xff] }
0x1313   :  { %v8790_v48 = vadd.f32 %v8758_v1, %v19110_v17  ;;  %10835 = vmatprep.subr.bf16.mxu0 %v10834_v59  ;;  %v10962_v59 = vpack.c.bf16 %v8977_v44, %v8973_v11  ;;  %v10964_v1 = vpack.c.bf16 %v8976_v36, %v8972_v12  ;;  %v8980_v3 = vld [vmem:[%s18366_s8 + $0xd0] sm:$0xff]  ;;  %v10854_v17 = vpack.c.bf16 %v9015_v56, %v9011_v27  ;;  %v9027_v38 = vld [vmem:[%s18366_s8 + $0x248] sm:$0xff]  ;;  %v9009_v24 = vld [vmem:[%s18366_s8 + $0x1b8] sm:$0xff] }
0x1314   :  { %v8791_v57 = vadd.f32 %v8760_v42, %v19112_v46  ;;  %v8763_v23 = vpop.f32.mrb[226].mxu1  ;;  %v8984_v42 = vld [vmem:[%s18366_s8 + $0xf0] sm:$0xff]  ;;  %v9039_v15 = vld [vmem:[%s18366_s8 + $0x2a8] sm:$0xff]  ;;  %v9013_v28 = vld [vmem:[%s18366_s8 + $0x1d8] sm:$0xff] }
0x1315   :  { %v10824_v25 = vpack.c.bf16 %v8790_v48, %v8786_v20  ;;  %v8765_v33 = vpop.f32.mrb[227].mxu1  ;;  %v8764_v16 = vadd.f32 %v8763_v23, %v17520_v39  ;;  %v8989_v20 = vld [vmem:[%s18366_s8 + $0x118] sm:$0xff]  ;;  %v9010_v48 = vld [vmem:[%s18366_s8 + $0x1c0] sm:$0xff]  ;;  %v8988_v46 = vld [vmem:[%s18366_s8 + $0x110] sm:$0xff] }
0x1316   :  { %v8766_v63 = vadd.f32 %v8765_v33, %v17520_v39  ;;  %v10822_v58 = vpack.c.bf16 %v8791_v57, %v8787_v49  ;;  %10837 = vmatpush1.bf16.msra.mxu0 %v10836_v29  ;;  %v8965_v39 = vld [vmem:[%s18366_s8 + $0x58] sm:$0xff]  ;;  %v10852_v29 = vpack.c.bf16 %v9006_v34, %v9002_v37  ;;  %v10968_v49 = vpack.c.bf16 %v8984_v42, %v8980_v3  ;;  %v8992_v57 = vld [vmem:[%s18366_s8 + $0x130] sm:$0xff]  ;;  %v9018_v33 = vld [vmem:[%s18366_s8 + $0x200] sm:$0xff] }
0x1317   :  { %10839 = vmatprep.subr.bf16.mxu0 %v10838_v60  ;;  %v8794_v6 = vadd.f32 %v8764_v16, %v19114_v7  ;;  %v10958_v62 = vpack.c.bf16 %v8969_v0, %v8965_v39  ;;  %v9014_v60 = vld [vmem:[%s18366_s8 + $0x1e0] sm:$0xff]  ;;  %v10970_v43 = vpack.c.bf16 %v8993_v14, %v8989_v20  ;;  %v10972_v16 = vpack.c.bf16 %v8992_v57, %v8988_v46  ;;  %v9000_v13 = vld [vmem:[%s18366_s8 + $0x170] sm:$0xff]  ;;  %v9035_v0 = vld [vmem:[%s18366_s8 + $0x288] sm:$0xff] }
0x1318   :  { %v8795_v30 = vadd.f32 %v8766_v63, %v19113_v50  ;;  %10823 = vmatprep.subr.bf16.mxu1 %v10822_v58  ;;  %v10856_v23 = vpack.c.bf16 %v9014_v60, %v9010_v48  ;;  %v9022_v63 = vld [vmem:[%s18366_s8 + $0x220] sm:$0xff]  ;;  %v9001_v58 = vld [vmem:[%s18366_s8 + $0x178] sm:$0xff]  ;;  %v10976_v4 = vpack.c.bf16 %v9000_v13, %v8996_v2  ;;  %v9008_v7 = vld [vmem:[%s18366_s8 + $0x1b0] sm:$0xff]  ;;  %v10866_v53 = vpack.c.bf16 %v9039_v15, %v9035_v0 }
0x1319   :  { %10825 = vmatpush1.bf16.msra.mxu1 %v10824_v25  ;;  %v10858_v25 = vpack.c.bf16 %v9023_v47, %v9019_v45  ;;  %v10860_v54 = vpack.c.bf16 %v9022_v63, %v9018_v33  ;;  %v9005_v50 = vld [vmem:[%s18366_s8 + $0x198] sm:$0xff]  ;;  %v9026_v39 = vld [vmem:[%s18366_s8 + $0x240] sm:$0xff]  ;;  %v9047_v32 = vld [vmem:[%s18366_s8 + $0x2e8] sm:$0xff] }
0x131a   :  { %10135 = vmatprep.subr.msk.mxu1 %vm69_vm0, %v8795_v30  ;;  %10841 = vmatpush1.bf16.msra.mxu0 %v10840_v61  ;;  %v9031_v61 = vld [vmem:[%s18366_s8 + $0x268] sm:$0xff]  ;;  %v9017_v11 = vld [vmem:[%s18366_s8 + $0x1f8] sm:$0xff]  ;;  %v9012_v44 = vld [vmem:[%s18366_s8 + $0x1d0] sm:$0xff] }
0x131b   :  { %10843 = vmatprep.subr.bf16.mxu0 %v10842_v41  ;;  %v10974_v41 = vpack.c.bf16 %v9001_v58, %v8997_v21  ;;  %v10862_v30 = vpack.c.bf16 %v9031_v61, %v9027_v38  ;;  %v9021_v12 = vld [vmem:[%s18366_s8 + $0x218] sm:$0xff]  ;;  %v9055_v37 = vld [vmem:[%s18366_s8 + $0x328] sm:$0xff]  ;;  %v9020_v22 = vld [vmem:[%s18366_s8 + $0x210] sm:$0xff] }
0x131c   :  { %v9025_v10 = vld [vmem:[%s18366_s8 + $0x238] sm:$0xff]  ;;  %v9024_v27 = vld [vmem:[%s18366_s8 + $0x230] sm:$0xff]  ;;  %v9063_v48 = vld [vmem:[%s18366_s8 + $0x368] sm:$0xff] }
0x131d   :  { %10136 = vmatpush1.msk.msra.mxu1 %vm69_vm0, %v8794_v6  ;;  %v10864_v6 = vpack.c.bf16 %v9030_v51, %v9026_v39  ;;  %v9029_v3 = vld [vmem:[%s18366_s8 + $0x258] sm:$0xff]  ;;  %v10988_v60 = vpack.c.bf16 %v9024_v27, %v9020_v22  ;;  %v9028_v14 = vld [vmem:[%s18366_s8 + $0x250] sm:$0xff]  ;;  %v9071_v33 = vld [vmem:[%s18366_s8 + $0x3a8] sm:$0xff] }
0x131e   :  { %10137 = vmatmul.mubr.msk.f32.vlgmr.msra.gmra.mrb[228].mxu1 %vm459_vm1, %v17556_v8  ;;  %10955 = vmatprep.subr.bf16.mxu1 %v10954_v9  ;;  %v10850_v8 = vpack.c.bf16 %v9007_v40, %v9003_v55  ;;  %v9004_v9 = vld [vmem:[%s18366_s8 + $0x190] sm:$0xff]  ;;  %v9033_v20 = vld [vmem:[%s18366_s8 + $0x278] sm:$0xff]  ;;  %v9079_v39 = vld [vmem:[%s18366_s8 + $0x3e8] sm:$0xff] }
0x131f   :  { %10957 = vmatpush1.bf16.msra.mxu1 %v10956_v19  ;;  %10845 = vmatpush1.bf16.msra.mxu0 %v10844_v35  ;;  %v10978_v19 = vpack.c.bf16 %v9009_v24, %v9005_v50  ;;  %v9034_v35 = vld [vmem:[%s18366_s8 + $0x280] sm:$0xff]  ;;  %v10980_v52 = vpack.c.bf16 %v9008_v7, %v9004_v9  ;;  %v9016_v55 = vld [vmem:[%s18366_s8 + $0x1f0] sm:$0xff]  ;;  %v9037_v46 = vld [vmem:[%s18366_s8 + $0x298] sm:$0xff] }
0x1320   :  { %10959 = vmatprep.subr.bf16.mxu1 %v10958_v62  ;;  %10847 = vmatprep.subr.bf16.mxu0 %v10846_v26  ;;  %v9038_v62 = vld [vmem:[%s18366_s8 + $0x2a0] sm:$0xff]  ;;  %v9043_v26 = vld [vmem:[%s18366_s8 + $0x2c8] sm:$0xff]  ;;  %v10984_v34 = vpack.c.bf16 %v9016_v55, %v9012_v44  ;;  %v9032_v45 = vld [vmem:[%s18366_s8 + $0x270] sm:$0xff] }
0x1321   :  { %v10868_v40 = vpack.c.bf16 %v9038_v62, %v9034_v35  ;;  %v10870_v36 = vpack.c.bf16 %v9047_v32, %v9043_v26  ;;  %v9041_v21 = vld [vmem:[%s18366_s8 + $0x2b8] sm:$0xff]  ;;  %v10992_v63 = vpack.c.bf16 %v9032_v45, %v9028_v14  ;;  %v9036_v58 = vld [vmem:[%s18366_s8 + $0x290] sm:$0xff]  ;;  %v9074_v7 = vld [vmem:[%s18366_s8 + $0x3c0] sm:$0xff] }
0x1322   :  { %v9040_v38 = vld [vmem:[%s18366_s8 + $0x2b0] sm:$0xff]  ;;  %v9045_v2 = vld [vmem:[%s18366_s8 + $0x2d8] sm:$0xff]  ;;  %v9086_v14 = vld [vmem:[%s18366_s8 + $0x420] sm:$0xff] }
0x1323   :  { %10961 = vmatpush1.bf16.msra.mxu1 %v10960_v18  ;;  %10849 = vmatpush1.bf16.msra.mxu0 %v10848_v5  ;;  %v10982_v18 = vpack.c.bf16 %v9017_v11, %v9013_v28  ;;  %v9042_v5 = vld [vmem:[%s18366_s8 + $0x2c0] sm:$0xff]  ;;  %v9049_v50 = vld [vmem:[%s18366_s8 + $0x2f8] sm:$0xff]  ;;  %v10996_v51 = vpack.c.bf16 %v9040_v38, %v9036_v58  ;;  %v9044_v24 = vld [vmem:[%s18366_s8 + $0x2d0] sm:$0xff] }
0x1324   :  { %10963 = vmatprep.subr.bf16.mxu1 %v10962_v59  ;;  %10851 = vmatprep.subr.bf16.mxu0 %v10850_v8  ;;  %v9046_v59 = vld [vmem:[%s18366_s8 + $0x2e0] sm:$0xff]  ;;  %v9051_v8 = vld [vmem:[%s18366_s8 + $0x308] sm:$0xff]  ;;  %v10998_v15 = vpack.c.bf16 %v9049_v50, %v9045_v2  ;;  %v9057_v28 = vld [vmem:[%s18366_s8 + $0x338] sm:$0xff] }
0x1325   :  { %v10872_v56 = vpack.c.bf16 %v9046_v59, %v9042_v5  ;;  %v10874_v42 = vpack.c.bf16 %v9055_v37, %v9051_v8  ;;  %v9052_v11 = vld [vmem:[%s18366_s8 + $0x310] sm:$0xff]  ;;  %v9061_v32 = vld [vmem:[%s18366_s8 + $0x358] sm:$0xff] }
0x1326   :  { %v9056_v26 = vld [vmem:[%s18366_s8 + $0x330] sm:$0xff]  ;;  %v9077_v37 = vld [vmem:[%s18366_s8 + $0x3d8] sm:$0xff] }
0x1327   :  { %10965 = vmatpush1.bf16.msra.mxu1 %v10964_v1  ;;  %10853 = vmatpush1.bf16.msra.mxu0 %v10852_v29  ;;  %v10986_v1 = vpack.c.bf16 %v9025_v10, %v9021_v12  ;;  %v9050_v29 = vld [vmem:[%s18366_s8 + $0x300] sm:$0xff]  ;;  %v11004_v44 = vpack.c.bf16 %v9056_v26, %v9052_v11  ;;  %v9069_v12 = vld [vmem:[%s18366_s8 + $0x398] sm:$0xff]  ;;  %v9068_v10 = vld [vmem:[%s18366_s8 + $0x390] sm:$0xff] }
0x1328   :  { %10967 = vmatprep.subr.bf16.mxu1 %v10966_v31  ;;  %10855 = vmatprep.subr.bf16.mxu0 %v10854_v17  ;;  %v9054_v31 = vld [vmem:[%s18366_s8 + $0x320] sm:$0xff]  ;;  %v9059_v17 = vld [vmem:[%s18366_s8 + $0x348] sm:$0xff]  ;;  %v9072_v8 = vld [vmem:[%s18366_s8 + $0x3b0] sm:$0xff] }
0x1329   :  { %v10876_v47 = vpack.c.bf16 %v9054_v31, %v9050_v29  ;;  %v10878_v57 = vpack.c.bf16 %v9063_v48, %v9059_v17  ;;  %v11012_v22 = vpack.c.bf16 %v9072_v8, %v9068_v10  ;;  %v9087_v29 = vld [vmem:[%s18366_s8 + $0x428] sm:$0xff]  ;;  %v9085_v31 = vld [vmem:[%s18366_s8 + $0x418] sm:$0xff]  ;;  %v9084_v45 = vld [vmem:[%s18366_s8 + $0x410] sm:$0xff] }
0x132a   :  { %v9089_v17 = vld [vmem:[%s18366_s8 + $0x438] sm:$0xff]  ;;  %v9096_v2 = vld [vmem:[%s18366_s8 + $0x470] sm:$0xff]  ;;  %v9110_v11 = vld [vmem:[%s18366_s8 + $0x4e0] sm:$0xff] }
0x132b   :  { %10969 = vmatpush1.bf16.msra.mxu1 %v10968_v49  ;;  %10857 = vmatpush1.bf16.msra.mxu0 %v10856_v23  ;;  %v10990_v49 = vpack.c.bf16 %v9033_v20, %v9029_v3  ;;  %v9058_v23 = vld [vmem:[%s18366_s8 + $0x340] sm:$0xff]  ;;  %v11018_v48 = vpack.c.bf16 %v9089_v17, %v9085_v31  ;;  %v9105_v50 = vld [vmem:[%s18366_s8 + $0x4b8] sm:$0xff] }
0x132c   :  { %10971 = vmatprep.subr.bf16.mxu1 %v10970_v43  ;;  %10859 = vmatprep.subr.bf16.mxu0 %v10858_v25  ;;  %v9062_v43 = vld [vmem:[%s18366_s8 + $0x360] sm:$0xff]  ;;  %v9067_v25 = vld [vmem:[%s18366_s8 + $0x388] sm:$0xff] }
0x132d   :  { %v10880_v61 = vpack.c.bf16 %v9062_v43, %v9058_v23  ;;  %v10882_v13 = vpack.c.bf16 %v9071_v33, %v9067_v25  ;;  %v9097_v23 = vld [vmem:[%s18366_s8 + $0x478] sm:$0xff]  ;;  %v9090_v33 = vld [vmem:[%s18366_s8 + $0x440] sm:$0xff] }
0x132e   :  { %v9118_v10 = vld [vmem:[%s18366_s8 + $0x520] sm:$0xff] }
0x132f   :  { %10973 = vmatpush1.bf16.msra.mxu1 %v10972_v16  ;;  %10861 = vmatpush1.bf16.msra.mxu0 %v10860_v54  ;;  %v10994_v16 = vpack.c.bf16 %v9041_v21, %v9037_v46  ;;  %v9066_v54 = vld [vmem:[%s18366_s8 + $0x380] sm:$0xff]  ;;  %v9095_v46 = vld [vmem:[%s18366_s8 + $0x468] sm:$0xff] }
0x1330   :  { %10975 = vmatprep.subr.bf16.mxu1 %v10974_v41  ;;  %10863 = vmatprep.subr.bf16.mxu0 %v10862_v30  ;;  %v9070_v41 = vld [vmem:[%s18366_s8 + $0x3a0] sm:$0xff]  ;;  %v9075_v30 = vld [vmem:[%s18366_s8 + $0x3c8] sm:$0xff] }
0x1331   :  { %v10884_v0 = vpack.c.bf16 %v9070_v41, %v9066_v54  ;;  %v10886_v9 = vpack.c.bf16 %v9079_v39, %v9075_v30  ;;  %v9103_v54 = vld [vmem:[%s18366_s8 + $0x4a8] sm:$0xff]  ;;  %v9101_v41 = vld [vmem:[%s18366_s8 + $0x498] sm:$0xff]  ;;  %v9122_v31 = vld [vmem:[%s18366_s8 + $0x540] sm:$0xff] }
0x1333   :  { %10977 = vmatpush1.bf16.msra.mxu1 %v10976_v4  ;;  %10865 = vmatpush1.bf16.msra.mxu0 %v10864_v6  ;;  %v9048_v4 = vld [vmem:[%s18366_s8 + $0x2f0] sm:$0xff]  ;;  %v9078_v6 = vld [vmem:[%s18366_s8 + $0x3e0] sm:$0xff] }
0x1334   :  { %10979 = vmatprep.subr.bf16.mxu1 %v10978_v19  ;;  %10867 = vmatprep.subr.bf16.mxu0 %v10866_v53  ;;  %v9053_v19 = vld [vmem:[%s18366_s8 + $0x318] sm:$0xff]  ;;  %v11000_v53 = vpack.c.bf16 %v9048_v4, %v9044_v24  ;;  %v10888_v35 = vpack.c.bf16 %v9078_v6, %v9074_v7  ;;  %v9102_v24 = vld [vmem:[%s18366_s8 + $0x4a0] sm:$0xff]  ;;  %v9100_v4 = vld [vmem:[%s18366_s8 + $0x490] sm:$0xff] }
0x1335   :  { %v11002_v62 = vpack.c.bf16 %v9057_v28, %v9053_v19  ;;  %v9107_v7 = vld [vmem:[%s18366_s8 + $0x4c8] sm:$0xff]  ;;  %v9109_v19 = vld [vmem:[%s18366_s8 + $0x4d8] sm:$0xff] }
0x1336   :  { %v9111_v6 = vld [vmem:[%s18366_s8 + $0x4e8] sm:$0xff]  ;;  %v9113_v28 = vld [vmem:[%s18366_s8 + $0x4f8] sm:$0xff] }
0x1337   :  { %10981 = vmatpush1.bf16.msra.mxu1 %v10980_v52  ;;  %10869 = vmatpush1.bf16.msra.mxu0 %v10868_v40  ;;  %v9065_v52 = vld [vmem:[%s18366_s8 + $0x378] sm:$0xff]  ;;  %v9060_v40 = vld [vmem:[%s18366_s8 + $0x350] sm:$0xff]  ;;  %v10902_v26 = vpack.c.bf16 %v9111_v6, %v9107_v7 }
0x1338   :  { %10983 = vmatprep.subr.bf16.mxu1 %v10982_v18  ;;  %10871 = vmatprep.subr.bf16.mxu0 %v10870_v36  ;;  %v11006_v55 = vpack.c.bf16 %v9065_v52, %v9061_v32  ;;  %v9064_v18 = vld [vmem:[%s18366_s8 + $0x370] sm:$0xff]  ;;  %v9073_v36 = vld [vmem:[%s18366_s8 + $0x3b8] sm:$0xff]  ;;  %v11030_v32 = vpack.c.bf16 %v9113_v28, %v9109_v19 }
0x1339   :  { %v11008_v5 = vpack.c.bf16 %v9064_v18, %v9060_v40  ;;  %v11010_v59 = vpack.c.bf16 %v9073_v36, %v9069_v12  ;;  %v9108_v52 = vld [vmem:[%s18366_s8 + $0x4d0] sm:$0xff]  ;;  %v9119_v40 = vld [vmem:[%s18366_s8 + $0x528] sm:$0xff]  ;;  %v9117_v18 = vld [vmem:[%s18366_s8 + $0x518] sm:$0xff] }
0x133a   :  { %v9121_v12 = vld [vmem:[%s18366_s8 + $0x538] sm:$0xff] }
0x133b   :  { %10985 = vmatpush1.bf16.msra.mxu1 %v10984_v34  ;;  %10873 = vmatpush1.bf16.msra.mxu0 %v10872_v56  ;;  %v9081_v34 = vld [vmem:[%s18366_s8 + $0x3f8] sm:$0xff]  ;;  %v9076_v56 = vld [vmem:[%s18366_s8 + $0x3d0] sm:$0xff] }
0x133c   :  { %10987 = vmatprep.subr.bf16.mxu1 %v10986_v1  ;;  %10875 = vmatprep.subr.bf16.mxu0 %v10874_v42  ;;  %v11014_v27 = vpack.c.bf16 %v9081_v34, %v9077_v37  ;;  %v9080_v1 = vld [vmem:[%s18366_s8 + $0x3f0] sm:$0xff]  ;;  %v9083_v42 = vld [vmem:[%s18366_s8 + $0x408] sm:$0xff]  ;;  %v11034_v37 = vpack.c.bf16 %v9121_v12, %v9117_v18  ;;  %v9149_v7 = vld [vmem:[%s18366_s8 + $0x618] sm:$0xff] }
0x133d   :  { %v11016_v3 = vpack.c.bf16 %v9080_v1, %v9076_v56  ;;  %v10890_v20 = vpack.c.bf16 %v9087_v29, %v9083_v42  ;;  %v9116_v34 = vld [vmem:[%s18366_s8 + $0x510] sm:$0xff]  ;;  %v9127_v56 = vld [vmem:[%s18366_s8 + $0x568] sm:$0xff]  ;;  %v9125_v1 = vld [vmem:[%s18366_s8 + $0x558] sm:$0xff] }
0x133e   :  { %v9153_v6 = vld [vmem:[%s18366_s8 + $0x638] sm:$0xff] }
0x133f   :  { %10989 = vmatpush1.bf16.msra.mxu1 %v10988_v60  ;;  %10877 = vmatpush1.bf16.msra.mxu0 %v10876_v47  ;;  %v9082_v60 = vld [vmem:[%s18366_s8 + $0x400] sm:$0xff]  ;;  %v9088_v47 = vld [vmem:[%s18366_s8 + $0x430] sm:$0xff] }
0x1340   :  { %10991 = vmatprep.subr.bf16.mxu1 %v10990_v49  ;;  %10879 = vmatprep.subr.bf16.mxu0 %v10878_v57  ;;  %v9091_v49 = vld [vmem:[%s18366_s8 + $0x448] sm:$0xff]  ;;  %v9093_v57 = vld [vmem:[%s18366_s8 + $0x458] sm:$0xff]  ;;  %v10892_v21 = vpack.c.bf16 %v9086_v14, %v9082_v60  ;;  %v11020_v25 = vpack.c.bf16 %v9088_v47, %v9084_v45  ;;  %v9124_v60 = vld [vmem:[%s18366_s8 + $0x550] sm:$0xff] }
0x1341   :  { %v10894_v38 = vpack.c.bf16 %v9095_v46, %v9091_v49  ;;  %v9128_v14 = vld [vmem:[%s18366_s8 + $0x570] sm:$0xff]  ;;  %v9131_v45 = vld [vmem:[%s18366_s8 + $0x588] sm:$0xff]  ;;  %v9133_v46 = vld [vmem:[%s18366_s8 + $0x598] sm:$0xff] }
0x1342   :  { %v9135_v49 = vld [vmem:[%s18366_s8 + $0x5a8] sm:$0xff] }
0x1343   :  { %10993 = vmatpush1.bf16.msra.mxu1 %v10992_v63  ;;  %10881 = vmatpush1.bf16.msra.mxu0 %v10880_v61  ;;  %v9094_v63 = vld [vmem:[%s18366_s8 + $0x460] sm:$0xff]  ;;  %v11022_v61 = vpack.c.bf16 %v9097_v23, %v9093_v57  ;;  %v9137_v57 = vld [vmem:[%s18366_s8 + $0x5b8] sm:$0xff] }
0x1344   :  { %10995 = vmatprep.subr.bf16.mxu1 %v10994_v16  ;;  %10883 = vmatprep.subr.bf16.mxu0 %v10882_v13  ;;  %v9092_v16 = vld [vmem:[%s18366_s8 + $0x450] sm:$0xff]  ;;  %v9099_v13 = vld [vmem:[%s18366_s8 + $0x488] sm:$0xff]  ;;  %v10896_v30 = vpack.c.bf16 %v9094_v63, %v9090_v33  ;;  %v9134_v33 = vld [vmem:[%s18366_s8 + $0x5a0] sm:$0xff]  ;;  %v10914_v63 = vpack.c.bf16 %v9135_v49, %v9131_v45 }
0x1345   :  { %v11024_v39 = vpack.c.bf16 %v9096_v2, %v9092_v16  ;;  %v9139_v16 = vld [vmem:[%s18366_s8 + $0x5c8] sm:$0xff]  ;;  %v9173_v45 = vld [vmem:[%s18366_s8 + $0x6d8] sm:$0xff] }
0x1346   :  { %v9143_v2 = vld [vmem:[%s18366_s8 + $0x5e8] sm:$0xff]  ;;  %v9177_v49 = vld [vmem:[%s18366_s8 + $0x6f8] sm:$0xff] }
0x1347   :  { %10997 = vmatpush1.bf16.msra.mxu1 %v10996_v51  ;;  %10885 = vmatpush1.bf16.msra.mxu0 %v10884_v0  ;;  %v9098_v51 = vld [vmem:[%s18366_s8 + $0x480] sm:$0xff]  ;;  %v10898_v0 = vpack.c.bf16 %v9103_v54, %v9099_v13  ;;  %v9141_v13 = vld [vmem:[%s18366_s8 + $0x5d8] sm:$0xff] }
0x1348   :  { %10999 = vmatprep.subr.bf16.mxu1 %v10998_v15  ;;  %10887 = vmatprep.subr.bf16.mxu0 %v10886_v9  ;;  %v11026_v15 = vpack.c.bf16 %v9105_v50, %v9101_v41  ;;  %v9104_v9 = vld [vmem:[%s18366_s8 + $0x4b0] sm:$0xff]  ;;  %v9145_v54 = vld [vmem:[%s18366_s8 + $0x5f8] sm:$0xff] }
0x134b   :  { %11001 = vmatpush1.bf16.msra.mxu1 %v11000_v53  ;;  %10889 = vmatpush1.bf16.msra.mxu0 %v10888_v35  ;;  %v10900_v53 = vpack.c.bf16 %v9102_v24, %v9098_v51  ;;  %v11028_v35 = vpack.c.bf16 %v9104_v9, %v9100_v4  ;;  %v10918_v51 = vpack.c.bf16 %v9143_v2, %v9139_v16  ;;  %v9147_v4 = vld [vmem:[%s18366_s8 + $0x608] sm:$0xff]  ;;  %v9185_v16 = vld [vmem:[%s18366_s8 + $0x738] sm:$0xff] }
0x134c   :  { %11003 = vmatprep.subr.bf16.mxu1 %v11002_v62  ;;  %10891 = vmatprep.subr.bf16.mxu0 %v10890_v20  ;;  %v9106_v62 = vld [vmem:[%s18366_s8 + $0x4c0] sm:$0xff]  ;;  %v11046_v24 = vpack.c.bf16 %v9145_v54, %v9141_v13  ;;  %v9151_v9 = vld [vmem:[%s18366_s8 + $0x628] sm:$0xff] }
0x134d   :  { %v10904_v36 = vpack.c.bf16 %v9110_v11, %v9106_v62  ;;  %v9126_v20 = vld [vmem:[%s18366_s8 + $0x560] sm:$0xff]  ;;  %v10922_v62 = vpack.c.bf16 %v9151_v9, %v9147_v4  ;;  %v11050_v11 = vpack.c.bf16 %v9153_v6, %v9149_v7  ;;  %v9193_v4 = vld [vmem:[%s18366_s8 + $0x778] sm:$0xff] }
0x134e   :  { %v9178_v54 = vld [vmem:[%s18366_s8 + $0x700] sm:$0xff] }
0x134f   :  { %11005 = vmatpush1.bf16.msra.mxu1 %v11004_v44  ;;  %v9112_v44 = vld [vmem:[%s18366_s8 + $0x4f0] sm:$0xff]  ;;  %v9186_v6 = vld [vmem:[%s18366_s8 + $0x740] sm:$0xff] }
0x1350   :  { %11007 = vmatprep.subr.bf16.mxu1 %v11006_v55  ;;  %v9115_v55 = vld [vmem:[%s18366_s8 + $0x508] sm:$0xff] }
0x1351   :  { %v10906_v8 = vpack.c.bf16 %v9119_v40, %v9115_v55  ;;  %v9157_v55 = vld [vmem:[%s18366_s8 + $0x658] sm:$0xff] }
0x1352   :  { %v9161_v40 = vld [vmem:[%s18366_s8 + $0x678] sm:$0xff] }
0x1353   :  { %11009 = vmatpush1.bf16.msra.mxu1 %v11008_v5  ;;  %v11032_v5 = vpack.c.bf16 %v9112_v44, %v9108_v52  ;;  %v9155_v52 = vld [vmem:[%s18366_s8 + $0x648] sm:$0xff] }
0x1354   :  { %11011 = vmatprep.subr.bf16.mxu1 %v11010_v59  ;;  %v9114_v59 = vld [vmem:[%s18366_s8 + $0x500] sm:$0xff]  ;;  %v9159_v44 = vld [vmem:[%s18366_s8 + $0x668] sm:$0xff] }
0x1355   :  { %v10908_v42 = vpack.c.bf16 %v9118_v10, %v9114_v59  ;;  %v10926_v59 = vpack.c.bf16 %v9159_v44, %v9155_v52  ;;  %v11054_v10 = vpack.c.bf16 %v9161_v40, %v9157_v55  ;;  %v9201_v52 = vld [vmem:[%s18366_s8 + $0x7b8] sm:$0xff]  ;;  %v9194_v40 = vld [vmem:[%s18366_s8 + $0x780] sm:$0xff] }
0x1357   :  { %11013 = vmatpush1.bf16.msra.mxu1 %v11012_v22  ;;  %v9120_v22 = vld [vmem:[%s18366_s8 + $0x530] sm:$0xff] }
0x1358   :  { %11015 = vmatprep.subr.bf16.mxu1 %v11014_v27  ;;  %v9123_v27 = vld [vmem:[%s18366_s8 + $0x548] sm:$0xff]  ;;  %v11036_v29 = vpack.c.bf16 %v9120_v22, %v9116_v34 }
0x1359   :  { %v10910_v17 = vpack.c.bf16 %v9127_v56, %v9123_v27  ;;  %v9163_v34 = vld [vmem:[%s18366_s8 + $0x688] sm:$0xff]  ;;  %v9165_v27 = vld [vmem:[%s18366_s8 + $0x698] sm:$0xff] }
0x135a   :  { %v9167_v22 = vld [vmem:[%s18366_s8 + $0x6a8] sm:$0xff]  ;;  %v9169_v56 = vld [vmem:[%s18366_s8 + $0x6b8] sm:$0xff] }
0x135b   :  { %11017 = vmatpush1.bf16.msra.mxu1 %v11016_v3  ;;  %v9129_v3 = vld [vmem:[%s18366_s8 + $0x578] sm:$0xff] }
0x135c   :  { %11019 = vmatprep.subr.bf16.mxu1 %v11018_v48  ;;  %v11038_v48 = vpack.c.bf16 %v9129_v3, %v9125_v1 }
0x13e0   :  { %v8878_v43 = vpop.f32.mrb[228].mxu0 }
0x13e1   :  { %v8880_v58 = vpop.f32.mrb[229].mxu0 }
0x13e2   :  { %9282 = vmatprep.mubr.f32.mxu0 %v8880_v58  ;;  %9424 = vmatprep.mubr.f32.mxu1 %v8880_v58  ;;  %v11042_v58 = vpack.c.bf16 %v9137_v57, %v9133_v46 }
0x13e3   :  { %9283 = vmatmul.mubr.f32.vlgmr.msra.gmra.mrb[230].mxu0 %v8878_v43  ;;  %9425 = vmatmul.mubr.f32.vlgmr.msra.gmra.mrb[230].mxu1 %v8878_v43  ;;  %v10912_v43 = vpack.c.bf16 %v9126_v20, %v9122_v31  ;;  %v10930_v31 = vpack.c.bf16 %v9167_v22, %v9163_v34  ;;  %v11058_v20 = vpack.c.bf16 %v9169_v56, %v9165_v27  ;;  %v9209_v34 = vld [vmem:[%s18366_s8 + $0x7f8] sm:$0xff]  ;;  %v9202_v56 = vld [vmem:[%s18366_s8 + $0x7c0] sm:$0xff] }
0x13e4   :  { %10893 = vmatpush1.bf16.msra.mxu0 %v10892_v21  ;;  %11021 = vmatpush1.bf16.msra.mxu1 %v11020_v25  ;;  %v11040_v21 = vpack.c.bf16 %v9128_v14, %v9124_v60  ;;  %v9130_v25 = vld [vmem:[%s18366_s8 + $0x580] sm:$0xff]  ;;  %v9171_v60 = vld [vmem:[%s18366_s8 + $0x6c8] sm:$0xff] }
0x13e5   :  { %10895 = vmatprep.subr.bf16.mxu0 %v10894_v38  ;;  %11023 = vmatprep.subr.bf16.mxu1 %v11022_v61  ;;  %v9132_v38 = vld [vmem:[%s18366_s8 + $0x590] sm:$0xff]  ;;  %v10916_v41 = vpack.c.bf16 %v9134_v33, %v9130_v25  ;;  %v9175_v14 = vld [vmem:[%s18366_s8 + $0x6e8] sm:$0xff]  ;;  %v11062_v25 = vpack.c.bf16 %v9177_v49, %v9173_v45 }
0x13e6   :  { %v9136_v61 = vld [vmem:[%s18366_s8 + $0x5b0] sm:$0xff] }
0x13e7   :  { %v11044_v50 = vpack.c.bf16 %v9136_v61, %v9132_v38  ;;  %v9172_v33 = vld [vmem:[%s18366_s8 + $0x6d0] sm:$0xff]  ;;  %v9183_v38 = vld [vmem:[%s18366_s8 + $0x728] sm:$0xff]  ;;  %v9181_v61 = vld [vmem:[%s18366_s8 + $0x718] sm:$0xff] }
0x13e8   :  { %10897 = vmatpush1.bf16.msra.mxu0 %v10896_v30  ;;  %11025 = vmatpush1.bf16.msra.mxu1 %v11024_v39  ;;  %v9138_v30 = vld [vmem:[%s18366_s8 + $0x5c0] sm:$0xff] }
0x13e9   :  { %10899 = vmatprep.subr.bf16.mxu0 %v10898_v0  ;;  %11027 = vmatprep.subr.bf16.mxu1 %v11026_v15  ;;  %v9142_v39 = vld [vmem:[%s18366_s8 + $0x5e0] sm:$0xff]  ;;  %v9140_v0 = vld [vmem:[%s18366_s8 + $0x5d0] sm:$0xff] }
0x13ea   :  { %v9144_v15 = vld [vmem:[%s18366_s8 + $0x5f0] sm:$0xff]  ;;  %v10920_v19 = vpack.c.bf16 %v9142_v39, %v9138_v30  ;;  %v11066_v30 = vpack.c.bf16 %v9185_v16, %v9181_v61 }
0x13eb   :  { %v11048_v28 = vpack.c.bf16 %v9144_v15, %v9140_v0  ;;  %v9180_v39 = vld [vmem:[%s18366_s8 + $0x710] sm:$0xff]  ;;  %v9191_v0 = vld [vmem:[%s18366_s8 + $0x768] sm:$0xff]  ;;  %v9189_v15 = vld [vmem:[%s18366_s8 + $0x758] sm:$0xff] }
0x13ec   :  { %10901 = vmatpush1.bf16.msra.mxu0 %v10900_v53  ;;  %11029 = vmatpush1.bf16.msra.mxu1 %v11028_v35  ;;  %v9146_v53 = vld [vmem:[%s18366_s8 + $0x600] sm:$0xff] }
0x13ed   :  { %10903 = vmatprep.subr.bf16.mxu0 %v10902_v26  ;;  %11031 = vmatprep.subr.bf16.mxu1 %v11030_v32  ;;  %v9150_v35 = vld [vmem:[%s18366_s8 + $0x620] sm:$0xff]  ;;  %v9148_v26 = vld [vmem:[%s18366_s8 + $0x610] sm:$0xff] }
0x13ee   :  { %v9152_v32 = vld [vmem:[%s18366_s8 + $0x630] sm:$0xff]  ;;  %v10924_v18 = vpack.c.bf16 %v9150_v35, %v9146_v53  ;;  %v11070_v53 = vpack.c.bf16 %v9193_v4, %v9189_v15 }
0x13ef   :  { %v11052_v12 = vpack.c.bf16 %v9152_v32, %v9148_v26  ;;  %v9188_v35 = vld [vmem:[%s18366_s8 + $0x750] sm:$0xff]  ;;  %v9199_v26 = vld [vmem:[%s18366_s8 + $0x7a8] sm:$0xff]  ;;  %v9197_v32 = vld [vmem:[%s18366_s8 + $0x798] sm:$0xff] }
0x13f0   :  { %10905 = vmatpush1.bf16.msra.mxu0 %v10904_v36  ;;  %11033 = vmatpush1.bf16.msra.mxu1 %v11032_v5  ;;  %v9154_v36 = vld [vmem:[%s18366_s8 + $0x640] sm:$0xff] }
0x13f1   :  { %10907 = vmatprep.subr.bf16.mxu0 %v10906_v8  ;;  %11035 = vmatprep.subr.bf16.mxu1 %v11034_v37  ;;  %v18094_v47 = vpop.f32.mrb[228].mxu1  ;;  %v9158_v5 = vld [vmem:[%s18366_s8 + $0x660] sm:$0xff]  ;;  %v9156_v8 = vld [vmem:[%s18366_s8 + $0x650] sm:$0xff] }
0x13f2   :  { %v8951_v23 = vpop.f32.mrb[229].mxu1  ;;  %v9160_v37 = vld [vmem:[%s18366_s8 + $0x670] sm:$0xff]  ;;  %v10928_v1 = vpack.c.bf16 %v9158_v5, %v9154_v36  ;;  %v11074_v36 = vpack.c.bf16 %v9201_v52, %v9197_v32 }
0x13f3   :  { %9353 = vmatprep.mubr.f32.mxu0 %v8951_v23  ;;  %9495 = vmatprep.mubr.f32.mxu1 %v8951_v23  ;;  %v11056_v3 = vpack.c.bf16 %v9160_v37, %v9156_v8  ;;  %v9170_v23 = vld [vmem:[%s18366_s8 + $0x6c0] sm:$0xff]  ;;  %v9196_v5 = vld [vmem:[%s18366_s8 + $0x790] sm:$0xff]  ;;  %v9207_v8 = vld [vmem:[%s18366_s8 + $0x7e8] sm:$0xff] }
0x13f4   :  { %10909 = vmatpush1.bf16.msra.mxu0 %v10908_v42  ;;  %11037 = vmatpush1.bf16.msra.mxu1 %v11036_v29  ;;  %v9162_v42 = vld [vmem:[%s18366_s8 + $0x680] sm:$0xff]  ;;  %v9205_v37 = vld [vmem:[%s18366_s8 + $0x7d8] sm:$0xff] }
0x13f5   :  { %10911 = vmatprep.subr.bf16.mxu0 %v10910_v17  ;;  %11039 = vmatprep.subr.bf16.mxu1 %v11038_v48  ;;  %v9166_v29 = vld [vmem:[%s18366_s8 + $0x6a0] sm:$0xff]  ;;  %v9164_v17 = vld [vmem:[%s18366_s8 + $0x690] sm:$0xff] }
0x13f6   :  { %v9168_v48 = vld [vmem:[%s18366_s8 + $0x6b0] sm:$0xff]  ;;  %v10932_v46 = vpack.c.bf16 %v9166_v29, %v9162_v42  ;;  %v9206_v42 = vld [vmem:[%s18366_s8 + $0x7e0] sm:$0xff] }
0x13f7   :  { %v11060_v57 = vpack.c.bf16 %v9168_v48, %v9164_v17  ;;  %v9204_v29 = vld [vmem:[%s18366_s8 + $0x7d0] sm:$0xff]  ;;  %v9210_v48 = vld [vmem:[%s18367_s9] sm:$0xff] }
0x13f8   :  { %10913 = vmatpush1.bf16.msra.mxu0 %v10912_v43  ;;  %11041 = vmatpush1.bf16.msra.mxu1 %v11040_v21  ;;  %v9174_v43 = vld [vmem:[%s18366_s8 + $0x6e0] sm:$0xff]  ;;  %v10934_v21 = vpack.c.bf16 %v9175_v14, %v9171_v60  ;;  %v9211_v60 = vld [vmem:[%s18367_s9 + $0x8] sm:$0xff]  ;;  %v9214_v14 = vcombine.high %v9210_v48, %v9210_v48 }
0x13f9   :  { %10915 = vmatprep.subr.bf16.mxu0 %v10914_v63  ;;  %11043 = vmatprep.subr.bf16.mxu1 %v11042_v58  ;;  %v9176_v63 = vld [vmem:[%s18366_s8 + $0x6f0] sm:$0xff]  ;;  %v9179_v58 = vld [vmem:[%s18366_s8 + $0x708] sm:$0xff]  ;;  %v10936_v2 = vpack.c.bf16 %v9174_v43, %v9170_v23  ;;  %v9215_v45 = vcombine.high %v9211_v60, %v9211_v60 }
0x13fa   :  { %v11064_v13 = vpack.c.bf16 %v9176_v63, %v9172_v33 }
0x13fc   :  { %10917 = vmatpush1.bf16.msra.mxu0 %v10916_v41  ;;  %11045 = vmatpush1.bf16.msra.mxu1 %v11044_v50  ;;  %v9182_v41 = vld [vmem:[%s18366_s8 + $0x720] sm:$0xff]  ;;  %v10938_v50 = vpack.c.bf16 %v9183_v38, %v9179_v58 }
0x13fd   :  { %10919 = vmatprep.subr.bf16.mxu0 %v10918_v51  ;;  %11047 = vmatprep.subr.bf16.mxu1 %v11046_v24  ;;  %v9184_v51 = vld [vmem:[%s18366_s8 + $0x730] sm:$0xff]  ;;  %v9187_v24 = vld [vmem:[%s18366_s8 + $0x748] sm:$0xff]  ;;  %v10940_v9 = vpack.c.bf16 %v9182_v41, %v9178_v54 }
0x13fe   :  { %v11068_v7 = vpack.c.bf16 %v9184_v51, %v9180_v39 }
0x1400   :  { %10921 = vmatpush1.bf16.msra.mxu0 %v10920_v19  ;;  %11049 = vmatpush1.bf16.msra.mxu1 %v11048_v28  ;;  %v9190_v19 = vld [vmem:[%s18366_s8 + $0x760] sm:$0xff]  ;;  %v10942_v28 = vpack.c.bf16 %v9191_v0, %v9187_v24 }
0x1401   :  { %10923 = vmatprep.subr.bf16.mxu0 %v10922_v62  ;;  %11051 = vmatprep.subr.bf16.mxu1 %v11050_v11  ;;  %v9192_v62 = vld [vmem:[%s18366_s8 + $0x770] sm:$0xff]  ;;  %v9195_v11 = vld [vmem:[%s18366_s8 + $0x788] sm:$0xff]  ;;  %v10944_v44 = vpack.c.bf16 %v9190_v19, %v9186_v6 }
0x1402   :  { %v11072_v55 = vpack.c.bf16 %v9192_v62, %v9188_v35 }
0x1404   :  { %10925 = vmatpush1.bf16.msra.mxu0 %v10924_v18  ;;  %11053 = vmatpush1.bf16.msra.mxu1 %v11052_v12  ;;  %v9198_v18 = vld [vmem:[%s18366_s8 + $0x7a0] sm:$0xff]  ;;  %v10946_v12 = vpack.c.bf16 %v9199_v26, %v9195_v11 }
0x1405   :  { %10927 = vmatprep.subr.bf16.mxu0 %v10926_v59  ;;  %11055 = vmatprep.subr.bf16.mxu1 %v11054_v10  ;;  %v9200_v59 = vld [vmem:[%s18366_s8 + $0x7b0] sm:$0xff]  ;;  %v9203_v10 = vld [vmem:[%s18366_s8 + $0x7c8] sm:$0xff]  ;;  %v10948_v22 = vpack.c.bf16 %v9198_v18, %v9194_v40 }
0x1406   :  { %v11076_v27 = vpack.c.bf16 %v9200_v59, %v9196_v5 }
0x1408   :  { %10929 = vmatpush1.bf16.msra.mxu0 %v10928_v1  ;;  %11057 = vmatpush1.bf16.msra.mxu1 %v11056_v3  ;;  %v10950_v1 = vpack.c.bf16 %v9207_v8, %v9203_v10  ;;  %v11078_v3 = vpack.c.bf16 %v9209_v34, %v9205_v37 }
0x1409   :  { %10931 = vmatprep.subr.bf16.mxu0 %v10930_v31  ;;  %11059 = vmatprep.subr.bf16.mxu1 %v11058_v20  ;;  %v9208_v31 = vld [vmem:[%s18366_s8 + $0x7f0] sm:$0xff]  ;;  %v10952_v20 = vpack.c.bf16 %v9206_v42, %v9202_v56 }
0x140a   :  { %v11080_v17 = vpack.c.bf16 %v9208_v31, %v9204_v29 }
0x140c   :  { %10933 = vmatpush1.bf16.msra.mxu0 %v10932_v46  ;;  %11061 = vmatpush1.bf16.msra.mxu1 %v11060_v57 }
0x140d   :  { %10935 = vmatprep.subr.bf16.mxu0 %v10934_v21  ;;  %11063 = vmatprep.subr.bf16.mxu1 %v11062_v25 }
0x1410   :  { %10937 = vmatpush1.bf16.msra.mxu0 %v10936_v2  ;;  %11065 = vmatpush1.bf16.msra.mxu1 %v11064_v13 }
0x1411   :  { %10939 = vmatprep.subr.bf16.mxu0 %v10938_v50  ;;  %11067 = vmatprep.subr.bf16.mxu1 %v11066_v30 }
0x1414   :  { %10941 = vmatpush1.bf16.msra.mxu0 %v10940_v9  ;;  %11069 = vmatpush1.bf16.msra.mxu1 %v11068_v7 }
0x1415   :  { %10943 = vmatprep.subr.bf16.mxu0 %v10942_v28  ;;  %11071 = vmatprep.subr.bf16.mxu1 %v11070_v53 }
0x1418   :  { %10945 = vmatpush1.bf16.msra.mxu0 %v10944_v44  ;;  %11073 = vmatpush1.bf16.msra.mxu1 %v11072_v55 }
0x1419   :  { %10947 = vmatprep.subr.bf16.mxu0 %v10946_v12  ;;  %11075 = vmatprep.subr.bf16.mxu1 %v11074_v36 }
0x141c   :  { %10949 = vmatpush1.bf16.msra.mxu0 %v10948_v22  ;;  %11077 = vmatpush1.bf16.msra.mxu1 %v11076_v27 }
0x141d   :  { %10951 = vmatprep.subr.bf16.mxu0 %v10950_v1  ;;  %11079 = vmatprep.subr.bf16.mxu1 %v11078_v3 }
0x1420   :  { %10953 = vmatpush1.bf16.msra.mxu0 %v10952_v20  ;;  %11081 = vmatpush1.bf16.msra.mxu1 %v11080_v17 }
0x1423   :  { %9354 = vmatmul.mubr.f32.vlgmr.msra.gmra.mrb[230].mxu0 %v18094_v47  ;;  %9496 = vmatmul.mubr.f32.vlgmr.msra.gmra.mrb[230].mxu1 %v18094_v47 }
0x14f6   :  { %v9355_v49 = vpop.f32.mrb[230].mxu0  ;;  %v9497_v46 = vpop.f32.mrb[230].mxu1 }
0x14f7   :  { %v11086_v57 = vadd.f32 %v9355_v49, %v9210_v48  ;;  %v11088_v23 = vadd.f32 %v9497_v46, %v9211_v60  ;;  %v9357_v43 = vpop.f32.mrb[231].mxu0  ;;  %v9499_v21 = vpop.f32.mrb[231].mxu1 }
0x14f8   :  { %v11087_v25 = vadd.f32 %v9357_v43, %v9214_v14  ;;  %v11089_v33 = vadd.f32 %v9499_v21, %v9215_v45 }
0x14f9   :  { %v9502_v63 = vmul.f32 %v11086_v57, %v11086_v57  ;;  %v9504_v47 = vmul.f32 %v11088_v23, %v11088_v23 }
0x14fa   :  { %v9503_v58 = vmul.f32 %v11087_v25, %v11087_v25  ;;  %v9505_v16 = vmul.f32 %v11089_v33, %v11089_v33 }
0x14fb   :  { %v9506_v38 = vsel %vm4763_vm2, %v9502_v63, 0.0  ;;  %v9509_v13 = vsel %vm4763_vm2, %v9504_v47, 0.0 }
0x14fc   :  { %v9507_v61 = vsel %vm4763_vm2, %v9503_v58, 0.0  ;;  %v9511_v41 = vsel %vm4763_vm2, %v9505_v16, 0.0 }
0x14fd   :  { %v9508_v2 = vadd.f32 %v9507_v61, %v9506_v38 }
0x14ff   :  { %v9510_v54 = vadd.f32 %v9509_v13, %v9508_v2 }
0x1501   :  { %v9512_v50 = vadd.f32 %v9511_v41, %v9510_v54 }
0x1503   :  { %9513 = vadd.xlane.f32.xlu1 %v9512_v50 }
0x1590   :  { %v9514_v30 = vpop.xlane.xlu1 %9513 }
0x1591   :  { %v9515_v39 = vrot.slane %v9514_v30, 4 }
0x1593   :  { %v9516_v51 = vadd.f32 %v9515_v39, %v9514_v30 }
0x1595   :  { %v9517_v24 = vrot.slane %v9516_v51, 2 }
0x1597   :  { %v9518_v0 = vadd.f32 %v9517_v24, %v9516_v51 }
0x1599   :  { %v9519_v15 = vrot.slane %v9518_v0, 1 }
0x159b   :  { %v9520_v4 = vadd.f32 %v9519_v15, %v9518_v0 }
0x159d   :  { %11102 = vpush %v9520_v4 }
0x15ce   :  { %s11103_s8 = spop %11102 }
0x15cf   :  { %s9522_s9 = smax.f32 %s11268_s19, %s11103_s8 }
0x15d0   :  { %v9523_v9 = vstv %s9522_s9 }
0x15d1   :  { %11184 = vrsqrt.f32 %v9523_v9 }
0x15db   :  { %v11185_v7 = vpop.eup %11184 }
0x15dc   :  { %11104 = vpush %v11185_v7 }
0x160d   :  { %s11105_s22 = spop %11104 }
0x160e   :  { %v9526_v6 = vstv %s11105_s22 }
0x160f   :  { %v9527_v19 = vmul.f32 %v11086_v57, %v9526_v6  ;;  %v9528_v28 = vmul.f32 %v11087_v25, %v9526_v6  ;;  %v9529_v53 = vmul.f32 %v11088_v23, %v9526_v6  ;;  %v9530_v35 = vmul.f32 %v11089_v33, %v9526_v6 }
0x1611   :  { %v9535_v62 = vcombine.low %v9527_v19, %v9528_v28  ;;  %v9536_v11 = vcombine.low %v9529_v53, %v9530_v35 }
0x1613   :  { %9540 = vst [vmem:[#allocation2 + $0x10] sm:$0xff] %v9535_v62  ;;  %9541 = vst [vmem:[#allocation2 + $0x18] sm:$0xff] %v9536_v11 }
0x1614   :  { %11253 = shalt.err (!%p11250_p4)
}
0x1615   :  { %s11254_s27 = scalar_lea.hbm %s18368_s10, 512 }
0x1616   :  { %p11255_p5 = scmp.ne.s32.totalorder %s18368_s10, %s11254_s27  ;;  %p11258_p6 = scmp.lt.u32.totalorder %s11254_s27, %s18368_s10 }
0x1618   :  { %p11260_p7 = pnand %p11258_p6, %p11255_p5 }
0x161a   :  { %11263 = shalt.err (!%p11260_p7)
}
0x161b   :  { %s11270_s0 = smov 256   ;;  %s11271_s11 = smov 16  }
0x161c   :  { %9553 = dma.vmem_to_hbm [thread:$0]  %s9548_s24, 512, %s18368_s10, [#allocation3], %s11270_s0, %s11270_s0, %s11271_s11  }
0x161d   :  { %11264 = dma.done.wait [#allocation3], 512  }
0x161e   :  { %11265 = vsyncadd [#allocation3], 4294966784 }
0x161f   :  { %9557 = vsyncpa [#allocation3], 1 }

</bundles_post_ra>
